<compile_context>
chip_gen: v6e
topology: v6e:2x2x1
jax: 0.10.0
libtpu: 0.0.40
codegen_flags: <defaults>
</compile_context>

<pallas_src>
import functools
from typing import NamedTuple

import jax
import jax.numpy as jnp
from jax.experimental import pallas as pl
from jax.experimental.pallas import tpu as pltpu


class FusedMoEWeights(NamedTuple):
    w_in: jax.Array       # bf16 [D, GP + E*H]   : [gate_w_pad | W1_all]
    b_in: jax.Array       # f32  [1, GP + E*H]   : [gate_b_pad(-1e30) | b1_all]
    expand: jax.Array     # bf16 [GP, E*H]       : one-hot gate -> hidden expansion
    w2_aug: jax.Array     # bf16 [E*H + GP, Cpad]: [[W2_all], [B2 rows]]
    num_classes: int      # original (unpadded) output width


def prepare_moe_weights(gate_w, gate_b, w1, b1, w2, b2):
    """Fuse / relayout MoE weights once (call at init time, reuse per forward)."""
    D, E = gate_w.shape
    _, _, H = w1.shape
    C = w2.shape[-1]
    EH = E * H
    GP = pl.cdiv(E, 128) * 128            # gate columns padded to lane width
    c_pad = pl.cdiv(C, 128) * 128         # lane-dense output width

    # Gate weights padded to GP lanes; padded bias columns are -1e30 so the
    # in-kernel softmax over the full GP-wide slab ignores them (exp -> 0).
    gw_pad = jnp.zeros((D, GP), jnp.bfloat16).at[:, :E].set(
        gate_w.astype(jnp.bfloat16))
    gb_pad = jnp.full((1, GP), -1e30, jnp.float32).at[:, :E].set(
        jnp.reshape(gate_b, (1, E)).astype(jnp.float32))

    # Layer-1 weights for all experts, lane-dense: column index = e*H + h.
    w1_all = jnp.transpose(w1, (1, 0, 2)).reshape(D, EH).astype(jnp.bfloat16)
    b1_all = jnp.reshape(b1, (1, EH)).astype(jnp.float32)

    w_in = jnp.concatenate([gw_pad, w1_all], axis=1)        # [D, GP+EH]
    b_in = jnp.concatenate([gb_pad, b1_all], axis=1)        # [1, GP+EH]

    # One-hot expansion: gate[:, :GP] @ expand broadcasts gate[:, e] across
    # that expert's H hidden columns.  Rows >= E are zero (padded gate cols
    # are exactly zero after softmax, so they contribute nothing).
    row = jax.lax.broadcasted_iota(jnp.int32, (GP, EH), 0)
    col = jax.lax.broadcasted_iota(jnp.int32, (GP, EH), 1)
    expand = (col // H == row).astype(jnp.bfloat16)

    # Layer-2 weights with the gated output bias folded in as extra K rows:
    #   [h*gatefull | gate] @ [[W2_all], [B2_rows]] = y + sum_e gate_e * b2_e
    w2_all = jnp.zeros((EH, c_pad), jnp.bfloat16).at[:, :C].set(
        w2.reshape(EH, C).astype(jnp.bfloat16))
    b2_rows = jnp.zeros((GP, c_pad), jnp.bfloat16).at[:E, :C].set(
        jnp.reshape(b2, (E, C)).astype(jnp.bfloat16))
    w2_aug = jnp.concatenate([w2_all, b2_rows], axis=0)      # [EH+GP, c_pad]

    return FusedMoEWeights(w_in, b_in, expand, w2_aug, C)


def moe_kernel(x_ref, w_in_ref, b_in_ref, expand_ref, w2_ref, out_ref, *,
               gate_pad):
    GP = gate_pad
    x = x_ref[...].astype(jnp.bfloat16)                      # bf16 [TB, D]

    # Fused layer-1 + gate logits: one MXU pass, f32 accumulation; all biases
    # (gate_b and b1) are already folded into b_in.
    res = jnp.dot(x, w_in_ref[...],
                  preferred_element_type=jnp.float32) + b_in_ref[...]

    # Gate softmax over the GP-wide slab (padded columns carry -1e30 bias ->
    # exp underflows to exactly 0).  Exact reciprocal keeps row sums == 1.
    logits = res[:, :GP]
    m = jnp.max(logits, axis=-1, keepdims=True)
    p = jnp.exp(logits - m)
    gate = p * pl.reciprocal(jnp.sum(p, axis=-1, keepdims=True),
                             approx=False)                   # f32 [TB, GP]
    gate_bf = gate.astype(jnp.bfloat16)

    # Hidden activations (layer-1 bias already added via b_in).
    h = jnp.maximum(res[:, GP:], 0.0)                        # f32 [TB, E*H]

    # Per-expert gate scaling via the hoisted one-hot expansion matmul (MXU).
    gate_full = jnp.dot(gate_bf, expand_ref[...],
                        preferred_element_type=jnp.float32)  # f32 [TB, E*H]
    # NOTE: on v6e/v7x this elementwise chain could run in packed bf16; kept
    # f32 so the same kernel is correct-and-fast on v5e as well.
    hs = (h * gate_full).astype(jnp.bfloat16)                # bf16 [TB, E*H]

    # Fused layer-2 + gated output bias: [hs | gate] @ [[W2], [B2]].
    hs_aug = jnp.concatenate([hs, gate_bf], axis=-1)         # bf16 [TB, E*H+GP]
    y = jnp.dot(hs_aug, w2_ref[...],
                preferred_element_type=jnp.float32)          # f32 [TB, c_pad]
    out_ref[...] = y.astype(out_ref.dtype)                   # lane-dense store


def moe_forward(weights: FusedMoEWeights, x, *, tb=256, out_dtype=jnp.float32):
    B, D = x.shape
    GP, EH = weights.expand.shape
    c_pad = weights.w2_aug.shape[1]
    C = weights.num_classes

    tb = min(tb, B)
    if B % tb == 0:
        b_pad, xin = B, x
    else:
        # Fallback only: pad the ragged tail (one extra HBM pass over x).
        # TODO(synk): handle a ragged final batch tile with a masked store.
        b_pad = pl.cdiv(B, tb) * tb
        xin = jnp.pad(x, ((0, b_pad - B), (0, 0)))

    kernel = functools.partial(moe_kernel, gate_pad=GP)

    def build(weight_mode):
        grid_spec = pltpu.PrefetchScalarGridSpec(
            num_scalar_prefetch=0,
            grid=(b_pad // tb,),
            in_specs=[
                pl.BlockSpec((tb, D), lambda i: (i, 0)),             # x tile
                pl.BlockSpec((D, GP + EH), lambda i: (0, 0),
                             pipeline_mode=weight_mode),             # fused W_in
                pl.BlockSpec((1, GP + EH), lambda i: (0, 0),
                             pipeline_mode=weight_mode),             # fused b_in
                pl.BlockSpec((GP, EH), lambda i: (0, 0),
                             pipeline_mode=weight_mode),             # expand
                pl.BlockSpec((EH + GP, c_pad), lambda i: (0, 0),
                             pipeline_mode=weight_mode),             # fused W2|B2
            ],
            out_specs=pl.BlockSpec((tb, c_pad), lambda i: (i, 0)),
        )
        return pl.pallas_call(
            kernel,
            out_shape=jax.ShapeDtypeStruct((b_pad, c_pad), out_dtype),
            grid_spec=grid_spec,
            compiler_params=pltpu.CompilerParams(
                # Batch tiles are independent; on v7x this also lets the two
                # TensorCores split the grid (try CORE_PARALLEL there).
                dimension_semantics=("parallel",)),
        )

    args = (xin, weights.w_in, weights.b_in, weights.expand, weights.w2_aug)
    try:
        # Constant-index weight blocks: single-buffer them to halve their VMEM.
        out = build(pl.Buffered(1))(*args)
    except Exception:
        # Fallback if this JAX build rejects single-buffered input specs.
        out = build(None)(*args)

    return out[:B, :C]


def moe_reference(x, gate_w, gate_b, w1, b1, w2, b2):
    gate = jax.nn.softmax(x @ gate_w + jnp.reshape(gate_b, (1, -1)), axis=1)
    h = jnp.maximum(jnp.einsum('bd,edh->ebh', x, w1) + b1[:, None, :], 0.0)
    y = jnp.einsum('ebh,ehc->ebc', h, w2) + b2[:, None, :]
    return jnp.einsum('be,ebc->bc', gate, y)


if __name__ == "__main__":
    # Small shapes consistent with the module (defaults scaled down, but kept
    # lane/row friendly): two 256-row batch tiles, H a multiple of 128, C=101
    # padded to 128 lanes inside the wrapper.
    B, input_dim, num_classes, num_experts, hidden = 512, 128, 101, 4, 128

    key = jax.random.PRNGKey(0)
    ks = jax.random.split(key, 7)
    x = jax.random.normal(ks[0], (B, input_dim), jnp.float32)
    gate_w = 0.05 * jax.random.normal(ks[1], (input_dim, num_experts), jnp.float32)
    gate_b = 0.05 * jax.random.normal(ks[2], (num_experts,), jnp.float32)
    w1 = 0.05 * jax.random.normal(ks[3], (num_experts, input_dim, hidden), jnp.float32)
    b1 = 0.05 * jax.random.normal(ks[4], (num_experts, hidden), jnp.float32)
    w2 = 0.05 * jax.random.normal(ks[5], (num_experts, hidden, num_classes), jnp.float32)
    b2 = 0.05 * jax.random.normal(ks[6], (num_experts, num_classes), jnp.float32)

    # Fuse / relayout weights once (static); reuse for every forward call.
    fused = prepare_moe_weights(gate_w, gate_b, w1, b1, w2, b2)

    out = moe_forward(fused, x, tb=256)
    out = jax.block_until_ready(out)

    ref = moe_reference(x, gate_w, gate_b, w1, b1, w2, b2)
    assert out.shape == (B, num_classes)
    max_err = float(jnp.max(jnp.abs(out - ref)))
    # bf16 MXU operands vs f32 reference -> loosened tolerance.
    assert jnp.allclose(out, ref, atol=2e-2, rtol=2e-2), (
        f"mismatch vs reference (max abs err {max_err})")

    print("KERNEL_OK")
</pallas_src>

<mosaic_0001>
module attributes {stable_mosaic.version = 11 : i64} {
  func.func @moe_kernel(%arg0: i32, %arg1: memref<256x128xf32, #tpu.memory_space<vmem>>, %arg2: memref<128x640xbf16, #tpu.memory_space<vmem>>, %arg3: memref<1x640xf32, #tpu.memory_space<vmem>>, %arg4: memref<128x512xbf16, #tpu.memory_space<vmem>>, %arg5: memref<640x128xbf16, #tpu.memory_space<vmem>>, %arg6: memref<256x128xf32, #tpu.memory_space<vmem>>) attributes {dimension_semantics = [#tpu.dimension_semantics<parallel>], iteration_bounds = array<i64: 2>, scalar_prefetch = 0 : i64, scratch_operands = 0 : i64, tpu.core_type = #tpu.core_type<tc>, window_params = [{transform_indices = @transform_0, window_bounds = array<i64: 256, 128>}, {pipeline_mode = #tpu.pipeline_mode<synchronous>, transform_indices = @transform_1, window_bounds = array<i64: 128, 640>}, {pipeline_mode = #tpu.pipeline_mode<synchronous>, transform_indices = @transform_2, window_bounds = array<i64: 1, 640>}, {pipeline_mode = #tpu.pipeline_mode<synchronous>, transform_indices = @transform_3, window_bounds = array<i64: 128, 512>}, {pipeline_mode = #tpu.pipeline_mode<synchronous>, transform_indices = @transform_4, window_bounds = array<i64: 640, 128>}, {transform_indices = @transform_5, window_bounds = array<i64: 256, 128>}]} {
    %c0 = arith.constant 0 : index
    %c0_0 = arith.constant 0 : index
    %0 = vector.load %arg1[%c0, %c0_0] : memref<256x128xf32, #tpu.memory_space<vmem>>, vector<256x128xf32>
    %1 = arith.truncf %0 : vector<256x128xf32> to vector<256x128xbf16>
    %c0_1 = arith.constant 0 : index
    %c0_2 = arith.constant 0 : index
    %2 = vector.load %arg2[%c0_1, %c0_2] : memref<128x640xbf16, #tpu.memory_space<vmem>>, vector<128x640xbf16>
    %cst = arith.constant dense<0.000000e+00> : vector<256x640xf32>
    %3 = tpu.matmul %1, %2, %cst {dimension_numbers = #tpu.dot_dimension_numbers<[1], [0], [0], [1], [0, 0, 1, 1], [], []>} : vector<256x128xbf16>, vector<128x640xbf16>, vector<256x640xf32> -> vector<256x640xf32>
    %c0_3 = arith.constant 0 : index
    %c0_4 = arith.constant 0 : index
    %4 = vector.load %arg3[%c0_3, %c0_4] : memref<1x640xf32, #tpu.memory_space<vmem>>, vector<1x640xf32>
    %5 = vector.broadcast %4 : vector<1x640xf32> to vector<256x640xf32>
    %6 = arith.addf %3, %5 : vector<256x640xf32>
    %7 = vector.extract_strided_slice %6 {offsets = [0, 0], sizes = [256, 128], strides = [1, 1]} : vector<256x640xf32> to vector<256x128xf32>
    %cst_5 = arith.constant dense<0xFF800000> : vector<256xf32>
    %8 = vector.multi_reduction <maximumf>, %7, %cst_5 [1] : vector<256x128xf32> to vector<256xf32>
    %9 = vector.shape_cast %8 : vector<256xf32> to vector<256x1xf32>
    %10 = vector.broadcast %9 : vector<256x1xf32> to vector<256x128xf32>
    %11 = arith.subf %7, %10 : vector<256x128xf32>
    %12 = math.exp %11 : vector<256x128xf32>
    %cst_6 = arith.constant dense<0.000000e+00> : vector<256xf32>
    %13 = vector.multi_reduction <add>, %12, %cst_6 [1] : vector<256x128xf32> to vector<256xf32>
    %14 = vector.shape_cast %13 : vector<256xf32> to vector<256x1xf32>
    %15 = tpu.reciprocal %14 : vector<256x1xf32> -> vector<256x1xf32>
    %16 = vector.broadcast %15 : vector<256x1xf32> to vector<256x128xf32>
    %17 = arith.mulf %12, %16 : vector<256x128xf32>
    %18 = arith.truncf %17 : vector<256x128xf32> to vector<256x128xbf16>
    %19 = vector.extract_strided_slice %6 {offsets = [0, 128], sizes = [256, 512], strides = [1, 1]} : vector<256x640xf32> to vector<256x512xf32>
    %cst_7 = arith.constant 0.000000e+00 : f32
    %20 = vector.broadcast %cst_7 : f32 to vector<256x512xf32>
    %21 = arith.maximumf %19, %20 : vector<256x512xf32>
    %c0_8 = arith.constant 0 : index
    %c0_9 = arith.constant 0 : index
    %22 = vector.load %arg4[%c0_8, %c0_9] : memref<128x512xbf16, #tpu.memory_space<vmem>>, vector<128x512xbf16>
    %cst_10 = arith.constant dense<0.000000e+00> : vector<256x512xf32>
    %23 = tpu.matmul %18, %22, %cst_10 {dimension_numbers = #tpu.dot_dimension_numbers<[1], [0], [0], [1], [0, 0, 1, 1], [], []>} : vector<256x128xbf16>, vector<128x512xbf16>, vector<256x512xf32> -> vector<256x512xf32>
    %24 = arith.mulf %21, %23 : vector<256x512xf32>
    %25 = arith.truncf %24 : vector<256x512xf32> to vector<256x512xbf16>
    %26 = tpu.concatenate %25, %18 in 1 : vector<256x512xbf16>, vector<256x128xbf16> -> vector<256x640xbf16>
    %c0_11 = arith.constant 0 : index
    %c0_12 = arith.constant 0 : index
    %27 = vector.load %arg5[%c0_11, %c0_12] : memref<640x128xbf16, #tpu.memory_space<vmem>>, vector<640x128xbf16>
    %cst_13 = arith.constant dense<0.000000e+00> : vector<256x128xf32>
    %28 = tpu.matmul %26, %27, %cst_13 {dimension_numbers = #tpu.dot_dimension_numbers<[1], [0], [0], [1], [0, 0, 1, 1], [], []>} : vector<256x640xbf16>, vector<640x128xbf16>, vector<256x128xf32> -> vector<256x128xf32>
    %c0_14 = arith.constant 0 : index
    %c0_15 = arith.constant 0 : index
    %29 = vector.load %arg6[%c0_14, %c0_15] : memref<256x128xf32, #tpu.memory_space<vmem>>, vector<256x128xf32>
    tpu.vector_store %arg6[%c0_14, %c0_15], %28 {strides = array<i32>} : memref<256x128xf32, #tpu.memory_space<vmem>>, vector<256x128xf32>,
    return
  }
  func.func @transform_0(%arg0: i32) -> (i32, i32) {
    %c0_i32 = arith.constant 0 : i32
    %c0_i32_0 = arith.constant 0 : i32
    return %arg0, %c0_i32 : i32, i32
  }
  func.func @transform_1(%arg0: i32) -> (i32, i32) {
    %c0_i32 = arith.constant 0 : i32
    %c0_i32_0 = arith.constant 0 : i32
    %c0_i32_1 = arith.constant 0 : i32
    return %c0_i32, %c0_i32_0 : i32, i32
  }
  func.func @transform_2(%arg0: i32) -> (i32, i32) {
    %c0_i32 = arith.constant 0 : i32
    %c0_i32_0 = arith.constant 0 : i32
    %c0_i32_1 = arith.constant 0 : i32
    return %c0_i32, %c0_i32_0 : i32, i32
  }
  func.func @transform_3(%arg0: i32) -> (i32, i32) {
    %c0_i32 = arith.constant 0 : i32
    %c0_i32_0 = arith.constant 0 : i32
    %c0_i32_1 = arith.constant 0 : i32
    return %c0_i32, %c0_i32_0 : i32, i32
  }
  func.func @transform_4(%arg0: i32) -> (i32, i32) {
    %c0_i32 = arith.constant 0 : i32
    %c0_i32_0 = arith.constant 0 : i32
    %c0_i32_1 = arith.constant 0 : i32
    return %c0_i32, %c0_i32_0 : i32, i32
  }
  func.func @transform_5(%arg0: i32) -> (i32, i32) {
    %c0_i32 = arith.constant 0 : i32
    %c0_i32_0 = arith.constant 0 : i32
    return %arg0, %c0_i32 : i32, i32
  }
}

module attributes {stable_mosaic.version = 11 : i64} {
  func.func @moe_kernel(%arg0: i32, %arg1: memref<256x128xf32, #tpu.memory_space<vmem>>, %arg2: memref<128x640xbf16, #tpu.memory_space<vmem>>, %arg3: memref<1x640xf32, #tpu.memory_space<vmem>>, %arg4: memref<128x512xbf16, #tpu.memory_space<vmem>>, %arg5: memref<640x128xbf16, #tpu.memory_space<vmem>>, %arg6: memref<256x128xf32, #tpu.memory_space<vmem>>) attributes {dimension_semantics = [#tpu.dimension_semantics<parallel>], iteration_bounds = array<i64: 2>, scalar_prefetch = 0 : i64, scratch_operands = 0 : i64, tpu.core_type = #tpu.core_type<tc>, window_params = [{transform_indices = @transform_0, window_bounds = array<i64: 256, 128>}, {pipeline_mode = #tpu.pipeline_mode<synchronous>, transform_indices = @transform_1, window_bounds = array<i64: 128, 640>}, {pipeline_mode = #tpu.pipeline_mode<synchronous>, transform_indices = @transform_2, window_bounds = array<i64: 1, 640>}, {pipeline_mode = #tpu.pipeline_mode<synchronous>, transform_indices = @transform_3, window_bounds = array<i64: 128, 512>}, {pipeline_mode = #tpu.pipeline_mode<synchronous>, transform_indices = @transform_4, window_bounds = array<i64: 640, 128>}, {transform_indices = @transform_5, window_bounds = array<i64: 256, 128>}]} {
    %c0 = arith.constant 0 : index
    %c0_0 = arith.constant 0 : index
    %0 = vector.load %arg1[%c0, %c0_0] : memref<256x128xf32, #tpu.memory_space<vmem>>, vector<256x128xf32>
    %1 = arith.truncf %0 : vector<256x128xf32> to vector<256x128xbf16>
    %c0_1 = arith.constant 0 : index
    %c0_2 = arith.constant 0 : index
    %2 = vector.load %arg2[%c0_1, %c0_2] : memref<128x640xbf16, #tpu.memory_space<vmem>>, vector<128x640xbf16>
    %cst = arith.constant dense<0.000000e+00> : vector<256x640xf32>
    %3 = tpu.matmul %1, %2, %cst {dimension_numbers = #tpu.dot_dimension_numbers<[1], [0], [0], [1], [0, 0, 1, 1], [], []>} : vector<256x128xbf16>, vector<128x640xbf16>, vector<256x640xf32> -> vector<256x640xf32>
    %c0_3 = arith.constant 0 : index
    %c0_4 = arith.constant 0 : index
    %4 = vector.load %arg3[%c0_3, %c0_4] : memref<1x640xf32, #tpu.memory_space<vmem>>, vector<1x640xf32>
    %5 = vector.broadcast %4 : vector<1x640xf32> to vector<256x640xf32>
    %6 = arith.addf %3, %5 : vector<256x640xf32>
    %7 = vector.extract_strided_slice %6 {offsets = [0, 0], sizes = [256, 128], strides = [1, 1]} : vector<256x640xf32> to vector<256x128xf32>
    %cst_5 = arith.constant dense<0xFF800000> : vector<256xf32>
    %8 = vector.multi_reduction <maximumf>, %7, %cst_5 [1] : vector<256x128xf32> to vector<256xf32>
    %9 = vector.shape_cast %8 : vector<256xf32> to vector<256x1xf32>
    %10 = vector.broadcast %9 : vector<256x1xf32> to vector<256x128xf32>
    %11 = arith.subf %7, %10 : vector<256x128xf32>
    %12 = math.exp %11 : vector<256x128xf32>
    %cst_6 = arith.constant dense<0.000000e+00> : vector<256xf32>
    %13 = vector.multi_reduction <add>, %12, %cst_6 [1] : vector<256x128xf32> to vector<256xf32>
    %14 = vector.shape_cast %13 : vector<256xf32> to vector<256x1xf32>
    %15 = tpu.reciprocal %14 : vector<256x1xf32> -> vector<256x1xf32>
    %16 = vector.broadcast %15 : vector<256x1xf32> to vector<256x128xf32>
    %17 = arith.mulf %12, %16 : vector<256x128xf32>
    %18 = arith.truncf %17 : vector<256x128xf32> to vector<256x128xbf16>
    %19 = vector.extract_strided_slice %6 {offsets = [0, 128], sizes = [256, 512], strides = [1, 1]} : vector<256x640xf32> to vector<256x512xf32>
    %cst_7 = arith.constant 0.000000e+00 : f32
    %20 = vector.broadcast %cst_7 : f32 to vector<256x512xf32>
    %21 = arith.maximumf %19, %20 : vector<256x512xf32>
    %c0_8 = arith.constant 0 : index
    %c0_9 = arith.constant 0 : index
    %22 = vector.load %arg4[%c0_8, %c0_9] : memref<128x512xbf16, #tpu.memory_space<vmem>>, vector<128x512xbf16>
    %cst_10 = arith.constant dense<0.000000e+00> : vector<256x512xf32>
    %23 = tpu.matmul %18, %22, %cst_10 {dimension_numbers = #tpu.dot_dimension_numbers<[1], [0], [0], [1], [0, 0, 1, 1], [], []>} : vector<256x128xbf16>, vector<128x512xbf16>, vector<256x512xf32> -> vector<256x512xf32>
    %24 = arith.mulf %21, %23 : vector<256x512xf32>
    %25 = arith.truncf %24 : vector<256x512xf32> to vector<256x512xbf16>
    %26 = tpu.concatenate %25, %18 in 1 : vector<256x512xbf16>, vector<256x128xbf16> -> vector<256x640xbf16>
    %c0_11 = arith.constant 0 : index
    %c0_12 = arith.constant 0 : index
    %27 = vector.load %arg5[%c0_11, %c0_12] : memref<640x128xbf16, #tpu.memory_space<vmem>>, vector<640x128xbf16>
    %cst_13 = arith.constant dense<0.000000e+00> : vector<256x128xf32>
    %28 = tpu.matmul %26, %27, %cst_13 {dimension_numbers = #tpu.dot_dimension_numbers<[1], [0], [0], [1], [0, 0, 1, 1], [], []>} : vector<256x640xbf16>, vector<640x128xbf16>, vector<256x128xf32> -> vector<256x128xf32>
    %c0_14 = arith.constant 0 : index
    %c0_15 = arith.constant 0 : index
    %29 = vector.load %arg6[%c0_14, %c0_15] : memref<256x128xf32, #tpu.memory_space<vmem>>, vector<256x128xf32>
    tpu.vector_store %arg6[%c0_14, %c0_15], %28 {strides = array<i32>} : memref<256x128xf32, #tpu.memory_space<vmem>>, vector<256x128xf32>,
    return
  }
  func.func @transform_0(%arg0: i32) -> (i32, i32) {
    %c0_i32 = arith.constant 0 : i32
    %c0_i32_0 = arith.constant 0 : i32
    return %arg0, %c0_i32 : i32, i32
  }
  func.func @transform_1(%arg0: i32) -> (i32, i32) {
    %c0_i32 = arith.constant 0 : i32
    %c0_i32_0 = arith.constant 0 : i32
    %c0_i32_1 = arith.constant 0 : i32
    return %c0_i32, %c0_i32_0 : i32, i32
  }
  func.func @transform_2(%arg0: i32) -> (i32, i32) {
    %c0_i32 = arith.constant 0 : i32
    %c0_i32_0 = arith.constant 0 : i32
    %c0_i32_1 = arith.constant 0 : i32
    return %c0_i32, %c0_i32_0 : i32, i32
  }
  func.func @transform_3(%arg0: i32) -> (i32, i32) {
    %c0_i32 = arith.constant 0 : i32
    %c0_i32_0 = arith.constant 0 : i32
    %c0_i32_1 = arith.constant 0 : i32
    return %c0_i32, %c0_i32_0 : i32, i32
  }
  func.func @transform_4(%arg0: i32) -> (i32, i32) {
    %c0_i32 = arith.constant 0 : i32
    %c0_i32_0 = arith.constant 0 : i32
    %c0_i32_1 = arith.constant 0 : i32
    return %c0_i32, %c0_i32_0 : i32, i32
  }
  func.func @transform_5(%arg0: i32) -> (i32, i32) {
    %c0_i32 = arith.constant 0 : i32
    %c0_i32_0 = arith.constant 0 : i32
    return %arg0, %c0_i32 : i32, i32
  }
}

</mosaic_0001>

<bundles_post_ra>
// kernel: tpu_custom_call.1
= control target key start
LH: loop header
LB: loop body
LE: loop exit
PB: predicated region body
PF: predicated region fallthrough
CT: control target
= control target key end

     0   :  { %10 = vsyncpa [#allocation3], 0  ;;  %s6084_s0 = inlined_call_operand.hbm [shape: f32[512,128], index: 0, kind: input, shape index: {}]   ;;  %s6085_s1 = inlined_call_operand.hbm [shape: bf16[128,640], index: 1, kind: input, shape index: {}]   ;;  %s6086_s2 = inlined_call_operand.hbm [shape: f32[1,640], index: 2, kind: input, shape index: {}]   ;;  %s6087_s3 = inlined_call_operand.hbm [shape: bf16[128,512], index: 3, kind: input, shape index: {}]   ;;  %s6088_s4 = inlined_call_operand.hbm [shape: bf16[640,128], index: 4, kind: input, shape index: {}]   ;;  %s6089_s5 = inlined_call_operand.hbm [shape: f32[512,128], index: 5, kind: output, shape index: {}]  }
   0x1   :  { %12 = vsyncpa [#allocation3 + $0x1], 0 }
   0x2   :  { %13 = vsyncpa [#allocation6], 0 }
   0x3   :  { %14 = vsyncpa [#allocation9], 0 }
   0x4   :  { %15 = vsyncpa [#allocation4], 0 }
   0x5   :  { %17 = vsyncpa [#allocation4 + $0x1], 0  ;;  %s4470_s18 = smov 0   ;;  %s4472_s19 = smov 0  }
   0x6   :  { %s4474_s20 = smov 0   ;;  %s4476_s21 = smov 0  }
   0x7 LB: > { %s4491_s22 = sadd.s32 4294967295, %s4421_s21   ;;  %s3342_s23 = sadd.s32 4294967294, %s4421_s21   ;;  %s4421_s21 = sphi %s4476_s21, %s6390_s21   ;;  %s4417_s20 = sphi %s4474_s20, %s6389_s20   ;;  %s4413_s19 = sphi %s4472_s19, %s6388_s19   ;;  %s4409_s18 = sphi %s4470_s18, %s6387_s18  }
   0x8   : > { %p43_p0 = scmp.ne.s32.totalorder %s4413_s19, %s4409_s18  ;;  %p6090_p1 = scmp.eq.s32.totalorder %s4491_s22, 0 }
   0x9   : > { %p157_p3 = scmp.eq.s32.totalorder %s3342_s23, 1  ;;  %p3343_p5 = scmp.ge.s32.totalorder %s4421_s21, 1 }
   0xa   : > { %p4500_p4 = por %p6090_p1, %p43_p0  ;;  %p164_p7 = scmp.lt.s32.totalorder %s4421_s21, 3 }
   0xb   : > { %p4505_p6 = por %p157_p3, %p43_p0  ;;  %s4423_s27 = smov [#allocation5]  }
   0xc   : > { %s6112_s24 = scalar_select %p4500_p4, 1, 0 }
   0xd   : > { %s6113_s25 = scalar_select %p4505_p6, 1, 0 }
   0xe   : > { %p4510_p8 = pnand %p3343_p5, %p164_p7  ;;  %s176_s28 = sshll.u32 %s4423_s27, 4  ;;  %s177_s28 = int_to_ptr.vmem [resolvable:$true] %s176_s28 }
   0xf   : > { %s4424_s30 = smov [#allocation8]   ;;  %s4228_s7 = scalar_lea.vmem %s177_s28, 5120 }
  0x10   : > { %s6114_s26 = scalar_select %p4510_p8, 1, 0 }
  0x11   : > { %p3866_p9 = pneg %p4510_p8  ;;  %s200_s6 = sshll.u32 %s4424_s30, 4  ;;  %s201_s6 = int_to_ptr.vmem [resolvable:$true] %s200_s6 }
  0x12   : > { %p4229_p13 = scmp.ne.s32.totalorder %s177_s28, %s4228_s7  ;;  %p4236_p5 = scmp.lt.s32.totalorder %s177_s28, %s177_s28 }
  0x13   : > { %p4519_p11 = pnand %p3866_p9, %p6090_p1  ;;  %p4237_p7 = scmp.lt.s32.totalorder %s4228_s7, %s4228_s7 }
  0x15   : > { %p4219_p12 = pneg %p4519_p11  ;;  %p4238_p10 = por %p4237_p7, %p4236_p5 }
  0x17   : > { %p4231_p0 = pnand %p4229_p13, %p4219_p12 }
  0x19   : > { %p4232_p3 = pneg %p4231_p0 }
  0x1b   : > { %p4239_p9 = pnand %p4238_p10, %p4232_p3 }
  0x1d   : > { %4242 = shalt.err (!%p4239_p9)
}
  0x1e   : > { %s4425_s8 = smov 320   ;;  %s4426_s9 = smov 20  }
  0x1f   : > { %3869 = dma.hbm_to_vmem [thread:$0]  (!%p4519_p11), %s6085_s1, 5120, %s177_s28, [#allocation6], %s4425_s8, %s4425_s8, %s4426_s9  }
  0x20   : > { %s4254_s12 = scalar_lea.vmem %s201_s6, 4096  ;;  %p4262_p2 = scmp.lt.s32.totalorder %s201_s6, %s201_s6 }
  0x21   : > { %p4255_p1 = scmp.ne.s32.totalorder %s201_s6, %s4254_s12  ;;  %p4263_p6 = scmp.lt.s32.totalorder %s4254_s12, %s4254_s12 }
  0x23   : > { %p4257_p13 = pnand %p4255_p1, %p4219_p12  ;;  %p4264_p5 = por %p4263_p6, %p4262_p2 }
  0x25   : > { %p4258_p0 = pneg %p4257_p13 }
  0x27   : > { %p4265_p10 = pnand %p4264_p5, %p4258_p0 }
  0x29   : > { %4268 = shalt.err (!%p4265_p10)
}
  0x2a   : > { %s4427_s13 = smov 256   ;;  %s4428_s14 = smov 16  }
  0x2b   : > { %3875 = dma.hbm_to_vmem [thread:$0]  (!%p4519_p11), %s6087_s3, 4096, %s201_s6, [#allocation9], %s4427_s13, %s4427_s13, %s4428_s14  }
  0x2c   : > { %s4429_s17 = smov [#allocation7]   ;;  %s4430_s27 = smov [#allocation10]  }
  0x2d   : > { %s190_s23 = sshll.u32 %s4429_s17, 4  ;;  %s213_s28 = sshll.u32 %s4430_s27, 4  ;;  %s191_s23 = int_to_ptr.vmem [resolvable:$true] %s190_s23  ;;  %s214_s28 = int_to_ptr.vmem [resolvable:$true] %s213_s28 }
  0x2e   : > { %s4280_s30 = scalar_lea.vmem %s191_s23, 80  ;;  %s4287_s7 = scalar_lea.vmem %s191_s23, 96 }
  0x2f   : > { %p4281_p1 = scmp.ne.s32.totalorder %s191_s23, %s4280_s30  ;;  %p4288_p3 = scmp.lt.s32.totalorder %s191_s23, %s191_s23 }
  0x30   : > { %p4289_p7 = scmp.lt.s32.totalorder %s4287_s7, %s4280_s30 }
  0x31   : > { %p4283_p2 = pnand %p4281_p1, %p4219_p12 }
  0x32   : > { %p4290_p9 = por %p4289_p7, %p4288_p3 }
  0x33   : > { %p4284_p6 = pneg %p4283_p2 }
  0x35   : > { %p4291_p13 = pnand %p4290_p9, %p4284_p6 }
  0x37   : > { %4294 = shalt.err (!%p4291_p13)
}
  0x38   : > { %3872 = dma.hbm_to_vmem [thread:$0]  (!%p4519_p11), %s6086_s2, 80, %s191_s23, [#allocation6]  }
  0x39   : > { %s4306_s9 = scalar_lea.vmem %s214_s28, 5120  ;;  %p4314_p1 = scmp.lt.s32.totalorder %s214_s28, %s214_s28 }
  0x3a   : > { %p4307_p0 = scmp.ne.s32.totalorder %s214_s28, %s4306_s9  ;;  %p4315_p2 = scmp.lt.s32.totalorder %s4306_s9, %s4306_s9 }
  0x3c   : > { %p4309_p5 = pnand %p4307_p0, %p4219_p12  ;;  %p4316_p4 = por %p4315_p2, %p4314_p1 }
  0x3e   : > { %p4310_p10 = pneg %p4309_p5 }
  0x40   : > { %p4317_p8 = pnand %p4316_p4, %p4310_p10 }
  0x42   : > { %4320 = shalt.err (!%p4317_p8)
}
  0x43   : > { %s4431_s10 = smov 64   ;;  %s4432_s11 = smov 4  }
  0x44   : > { %3878 = dma.hbm_to_vmem [thread:$0]  (!%p4519_p11), %s6088_s4, 5120, %s214_s28, [#allocation9], %s4431_s10, %s4431_s10, %s4432_s11  }
  0x45   : > { %s4558_s14 = sadd.s32 1, %s4421_s21   ;;  %s30_s16 = sadd.s32 1, %s4417_s20 }
  0x46   : > { %s27_s15 = ssub.s32 %s4421_s21, %s4558_s14  ;;  %p37_p8 = scmp.ne.s32.totalorder %s4417_s20, %s4413_s19 }
  0x47   : > { %p28_p4 = scmp.eq.s32.totalorder %s27_s15, 0  ;;  %p38_p12 = scmp.eq.s32.totalorder %s4421_s21, 0 }
  0x48   : > { %p6116_p3 = scmp.eq.s32.totalorder %s4491_s22, 1  ;;  %p3891_p9 = scmp.lt.s32.totalorder %s4421_s21, 2 }
  0x49   : > { %s4567_s17 = scalar_select %p28_p4, %s4417_s20, %s30_s16  }
  0x4a   : > { %p39_p6 = por %p38_p12, %p37_p8  ;;  %p4571_p7 = por %p6116_p3, %p37_p8 }
  0x4b   : > { %s227_s29 = sand.u32 1, %s4417_s20   ;;  %s3476_s28 = sshll.u32 %s4421_s21, 12 }
  0x4c   : > { %s6117_s23 = scalar_select %p4571_p7, 1, 0 }
  0x4d   : > { %s3349_s27 = sshll.u32 %s227_s29, 8  ;;  %s4581_s6 = scalar_lea.hbm %s6084_s0, %s3476_s28 }
  0x4e   : > { %s231_s8 = scalar_lea.vmem [#allocation2], %s3349_s27  ;;  %p4585_p11 = pnand %p3891_p9, %p39_p6 }
  0x4f   : > { %s238_s9 = sshll.u32 %s231_s8, 4  ;;  %s4589_s11 = scalar_lea.sflag [#allocation3], %s227_s29  ;;  %s4583_s9 = int_to_ptr.vmem [resolvable:$true] %s238_s9 }
  0x50   : > { %s4321_s12 = scalar_lea.hbm %s4581_s6, 4096  ;;  %p4323_p0 = pneg %p4585_p11 }
  0x51   : > { %p4322_p13 = scmp.ne.s32.totalorder %s4581_s6, %s4321_s12  ;;  %s4326_s16 = scalar_lea.hbm %s6084_s0, 8192 }
  0x52   : > { %p4327_p1 = scmp.lt.s32.totalorder %s4581_s6, %s6084_s0  ;;  %p4328_p2 = scmp.lt.s32.totalorder %s4326_s16, %s4321_s12 }
  0x53   : > { %p4324_p5 = pnand %p4323_p0, %p4322_p13 }
  0x54   : > { %p4329_p4 = por %p4328_p2, %p4327_p1 }
  0x55   : > { %p4325_p10 = pneg %p4324_p5 }
  0x57   : > { %p4330_p8 = pnand %p4329_p4, %p4325_p10 }
  0x59   : > { %4333 = shalt.err (!%p4330_p8)
}
  0x5a   : > { %s4334_s29 = scalar_lea.vmem %s4583_s9, 4096  ;;  %s4433_s30 = smov [#allocation2]  }
  0x5b   : > { %p4335_p12 = scmp.ne.s32.totalorder %s4583_s9, %s4334_s29  ;;  %s4339_s7 = sshll.u32 %s4433_s30, 4  ;;  %s4340_s7 = int_to_ptr.vmem [resolvable:$false] %s4339_s7 }
  0x5c   : > { %s4341_s8 = scalar_lea.vmem %s4340_s7, 8192  ;;  %p4342_p9 = scmp.lt.s32.totalorder %s4583_s9, %s4340_s7 }
  0x5d   : > { %p4337_p6 = pnand %p4335_p12, %p4323_p0  ;;  %p4343_p13 = scmp.lt.s32.totalorder %s4341_s8, %s4334_s29 }
  0x5f   : > { %p4338_p3 = pneg %p4337_p6  ;;  %p4344_p5 = por %p4343_p13, %p4342_p9 }
  0x61   : > { %p4345_p7 = pnand %p4344_p5, %p4338_p3 }
  0x63   : > { %4348 = shalt.err (!%p4345_p7)
}
  0x64   : > { %s4434_s12 = smov 128   ;;  %s4435_s13 = smov 8  }
  0x65   : > { %3882 = dma.hbm_to_vmem [thread:$0]  (!%p4585_p11), %s4581_s6, 4096, %s4583_s9, %s4589_s11, %s4434_s12, %s4434_s12, %s4435_s13  }
  0x66   : > { %p6119_p0 = scmp.ne.s32.totalorder %s6114_s26, 0 }
  0x68   : > { %250 = sbr.rel (%p6119_p0) target bundleno = 1332 (0x534), region = 40 }
  0x6d   : > { %s4613_s15 = sand.u32 1, %s4413_s19   ;;  %p6120_p7 = scmp.ne.s32.totalorder %s6112_s24, 0 }
  0x6e   : > { %s3353_s16 = sshll.u32 %s4613_s15, 8  ;;  %s253_s27 = scalar_lea.sflag [#allocation3], %s4613_s15 }
  0x6f   : > { %s4619_s28 = scalar_lea.vmem [#allocation2], %s3353_s16 }
  0x70   : > { %4392 = dma.done.wait (%p6120_p7), %s253_s27, 4096  }
  0x71   : > { %4394 = vsyncadd (%p6120_p7), %s253_s27, 4294963200  ;;  %p6121_p11 = scmp.eq.s32.totalorder %s4491_s22, 0 }
  0x73   : > { %4396 = dma.done.wait (%p6121_p11), [#allocation6], 5200   ;;  %p6122_p10 = pmov %p6121_p11 }
  0x75   : > { %4398 = vsyncadd (%p6122_p10), [#allocation6], 4294962096  ;;  %p6123_p1 = pmov %p6122_p10 }
  0x77   : > { %4400 = dma.done.wait (%p6123_p1), [#allocation9], 9216   ;;  %p6124_p2 = pmov %p6123_p1 }
  0x78   : > { %v6094_v0 = vmov 0   ;;  %v3944_v1 = vld [vmem:[#allocation5 + $0x11c] ss:$20 sps:$4 sm:$0xff]   ;;  %v3946_v2 = vld [vmem:[#allocation5 + $0x118] ss:$20 sps:$4 sm:$0xff]   ;;  %v302_v17 = vld [vmem:[%s4619_s28] sm:$0xff] }
  0x79   : > { %4402 = vsyncadd (%p6124_p2), [#allocation9], 4294958080  ;;  %665 = vmatprep.mubr.bf16.mxu0 %v6094_v0  ;;  %858 = vmatprep.mubr.bf16.mxu1 %v6094_v0  ;;  %v3947_v3 = vld [vmem:[#allocation5 + $0xf4] ss:$20 sps:$4 sm:$0xff]   ;;  %v3949_v4 = vld [vmem:[#allocation5 + $0xf0] ss:$20 sps:$4 sm:$0xff]  }
  0x7a   : > { %633 = vmatprep.subr.bf16.mxu0 %v3944_v1  ;;  %v3950_v5 = vld [vmem:[#allocation5 + $0xcc] ss:$20 sps:$4 sm:$0xff]   ;;  %v3952_v6 = vld [vmem:[#allocation5 + $0xc8] ss:$20 sps:$4 sm:$0xff]   ;;  %v3953_v7 = vld [vmem:[#allocation5 + $0xa4] ss:$20 sps:$4 sm:$0xff]  }
  0x7b   : > { %634 = vmatpush1.bf16.msra.mxu0 %v3946_v2  ;;  %v3955_v8 = vld [vmem:[#allocation5 + $0xa0] ss:$20 sps:$4 sm:$0xff]   ;;  %v3956_v9 = vld [vmem:[#allocation5 + $0x7c] ss:$20 sps:$4 sm:$0xff]   ;;  %v3958_v10 = vld [vmem:[#allocation5 + $0x78] ss:$20 sps:$4 sm:$0xff]   ;;  %v400_v2 = vlaneseq }
  0x7c   : > { %635 = vmatprep.subr.bf16.mxu0 %v3947_v3  ;;  %v3959_v11 = vld [vmem:[#allocation5 + $0x54] ss:$20 sps:$4 sm:$0xff]   ;;  %v3961_v12 = vld [vmem:[#allocation5 + $0x50] ss:$20 sps:$4 sm:$0xff]   ;;  %v3962_v13 = vld [vmem:[#allocation5 + $0x2c] ss:$20 sps:$4 sm:$0xff]  }
  0x7d   : > { %v3964_v14 = vld [vmem:[#allocation5 + $0x28] ss:$20 sps:$4 sm:$0xff]   ;;  %v3965_v15 = vld [vmem:[#allocation5 + $0x4] ss:$20 sps:$4 sm:$0xff]   ;;  %v3967_v16 = vld [vmem:[#allocation5] ss:$20 sps:$4 sm:$0xff]  }
  0x7e   : > { %v303_v18 = vld [vmem:[%s4619_s28 + $0x8] sm:$0xff]  ;;  %v304_v20 = vld [vmem:[%s4619_s28 + $0x10] sm:$0xff]  ;;  %v305_v21 = vld [vmem:[%s4619_s28 + $0x18] sm:$0xff]  ;;  %v4731_v3 = vshrl.u32 %v400_v2, 7  ;;  %s5902_s24 = scalar_lea.vmem [#allocation11], %s3353_s16  ;;  %s3477_s26 = sshll.u32 %s4491_s22, 12 }
  0x7f   : > { %636 = vmatpush1.bf16.msra.mxu0 %v3949_v4  ;;  %v4637_v19 = vpack.c.bf16 %v303_v18, %v302_v17  ;;  %v4643_v22 = vpack.c.bf16 %v305_v21, %v304_v20  ;;  %v306_v23 = vld [vmem:[%s4619_s28 + $0x20] sm:$0xff]  ;;  %v307_v24 = vld [vmem:[%s4619_s28 + $0x28] sm:$0xff]  ;;  %v308_v26 = vld [vmem:[%s4619_s28 + $0x30] sm:$0xff]  ;;  %s3231_s6 = sshll.u32 %s5902_s24, 4  ;;  %s6037_s11 = scalar_lea.hbm %s6089_s5, %s3477_s26  ;;  %s6039_s6 = int_to_ptr.vmem [resolvable:$true] %s3231_s6 }
  0x80   : > { %637 = vmatprep.subr.bf16.mxu0 %v3950_v5  ;;  %v4649_v25 = vpack.c.bf16 %v307_v24, %v306_v23  ;;  %v309_v27 = vld [vmem:[%s4619_s28 + $0x38] sm:$0xff]  ;;  %v310_v29 = vld [vmem:[%s4619_s28 + $0x40] sm:$0xff]  ;;  %v311_v30 = vld [vmem:[%s4619_s28 + $0x48] sm:$0xff]  ;;  %v402_v4 = vsub.s32 0, %v4731_v3  ;;  %s3218_s22 = scalar_lea.sflag [#allocation4], %s4613_s15  ;;  %s4349_s29 = scalar_lea.vmem %s6039_s6, 4096 }
  0x81   : > { %v4655_v28 = vpack.c.bf16 %v309_v27, %v308_v26  ;;  %v4661_v31 = vpack.c.bf16 %v311_v30, %v310_v29  ;;  %v312_v32 = vld [vmem:[%s4619_s28 + $0x50] sm:$0xff]  ;;  %v313_v33 = vld [vmem:[%s4619_s28 + $0x58] sm:$0xff]  ;;  %v314_v35 = vld [vmem:[%s4619_s28 + $0x60] sm:$0xff]  ;;  %p4350_p4 = scmp.ne.s32.totalorder %s6039_s6, %s4349_s29  ;;  %p6384_p8 = scmp.ne.s32.totalorder %s6117_s23, 0 }
  0x82   : > { %v4667_v34 = vpack.c.bf16 %v313_v33, %v312_v32  ;;  %v315_v36 = vld [vmem:[%s4619_s28 + $0x68] sm:$0xff]  ;;  %v316_v38 = vld [vmem:[%s4619_s28 + $0x70] sm:$0xff]  ;;  %v317_v39 = vld [vmem:[%s4619_s28 + $0x78] sm:$0xff]  ;;  %s4437_s30 = smov [#allocation11]  }
  0x83   : > { %638 = vmatpush1.bf16.msra.mxu0 %v3952_v6  ;;  %v4673_v37 = vpack.c.bf16 %v315_v36, %v314_v35  ;;  %v4679_v40 = vpack.c.bf16 %v317_v39, %v316_v38  ;;  %v318_v41 = vld [vmem:[%s4619_s28 + $0x80] sm:$0xff]  ;;  %v319_v42 = vld [vmem:[%s4619_s28 + $0x88] sm:$0xff]  ;;  %v320_v44 = vld [vmem:[%s4619_s28 + $0x90] sm:$0xff]  ;;  %p4351_p12 = pnand %p4350_p4, %p6384_p8  ;;  %s4353_s7 = sshll.u32 %s4437_s30, 4  ;;  %s4354_s7 = int_to_ptr.vmem [resolvable:$false] %s4353_s7 }
  0x84   : > { %639 = vmatprep.subr.bf16.mxu0 %v3953_v7  ;;  %v4685_v43 = vpack.c.bf16 %v319_v42, %v318_v41  ;;  %v321_v45 = vld [vmem:[%s4619_s28 + $0x98] sm:$0xff]  ;;  %v322_v47 = vld [vmem:[%s4619_s28 + $0xa0] sm:$0xff]  ;;  %v323_v48 = vld [vmem:[%s4619_s28 + $0xa8] sm:$0xff]  ;;  %s4355_s8 = scalar_lea.vmem %s4354_s7, 8192  ;;  %p4356_p3 = scmp.lt.s32.totalorder %s6039_s6, %s4354_s7 }
  0x85   : > { %v4691_v46 = vpack.c.bf16 %v321_v45, %v320_v44  ;;  %v4697_v49 = vpack.c.bf16 %v323_v48, %v322_v47  ;;  %v324_v50 = vld [vmem:[%s4619_s28 + $0xb0] sm:$0xff]  ;;  %v325_v51 = vld [vmem:[%s4619_s28 + $0xb8] sm:$0xff]  ;;  %v326_v53 = vld [vmem:[%s4619_s28 + $0xc0] sm:$0xff]  ;;  %p4352_p6 = pneg %p4351_p12  ;;  %p4357_p9 = scmp.lt.s32.totalorder %s4355_s8, %s4349_s29 }
  0x86   : > { %v4703_v52 = vpack.c.bf16 %v325_v51, %v324_v50  ;;  %v327_v54 = vld [vmem:[%s4619_s28 + $0xc8] sm:$0xff]  ;;  %v328_v56 = vld [vmem:[%s4619_s28 + $0xd0] sm:$0xff]  ;;  %v329_v57 = vld [vmem:[%s4619_s28 + $0xd8] sm:$0xff] }
  0x87   : > { %640 = vmatpush1.bf16.msra.mxu0 %v3955_v8  ;;  %v4709_v55 = vpack.c.bf16 %v327_v54, %v326_v53  ;;  %v4715_v58 = vpack.c.bf16 %v329_v57, %v328_v56  ;;  %v330_v59 = vld [vmem:[%s4619_s28 + $0xe0] sm:$0xff]  ;;  %v331_v60 = vld [vmem:[%s4619_s28 + $0xe8] sm:$0xff]  ;;  %v332_v62 = vld [vmem:[%s4619_s28 + $0xf0] sm:$0xff]  ;;  %p4358_p13 = por %p4357_p9, %p4356_p3 }
  0x88   : > { %641 = vmatprep.subr.bf16.mxu0 %v3956_v9  ;;  %v4721_v61 = vpack.c.bf16 %v331_v60, %v330_v59  ;;  %v333_v63 = vld [vmem:[%s4619_s28 + $0xf8] sm:$0xff]  ;;  %v398_v5 = vld [vmem:[#allocation7] sm:$0x1f]  ;;  %v3974_v51 = vld [vmem:[#allocation5 + $0xd4] ss:$20 sps:$4 sm:$0xff]  }
  0x89   : > { %v4727_v1 = vpack.c.bf16 %v333_v63, %v332_v62  ;;  %v4734_v6 = vrot.slane %v398_v5, %v402_v4  ;;  %v3968_v36 = vld [vmem:[#allocation5 + $0x124] ss:$20 sps:$4 sm:$0xff]   ;;  %v3970_v39 = vld [vmem:[#allocation5 + $0x120] ss:$20 sps:$4 sm:$0xff]   ;;  %v3971_v44 = vld [vmem:[#allocation5 + $0xfc] ss:$20 sps:$4 sm:$0xff]   ;;  %p4359_p5 = pnand %p4358_p13, %p4352_p6 }
  0x8a   : > { %826 = vmatprep.subr.bf16.mxu1 %v3968_v36  ;;  %v3973_v47 = vld [vmem:[#allocation5 + $0xf8] ss:$20 sps:$4 sm:$0xff]   ;;  %v3976_v54 = vld [vmem:[#allocation5 + $0xd0] ss:$20 sps:$4 sm:$0xff]   ;;  %v3979_v62 = vld [vmem:[#allocation5 + $0xa8] ss:$20 sps:$4 sm:$0xff]  }
  0x8b   : > { %642 = vmatpush1.bf16.msra.mxu0 %v3958_v10  ;;  %827 = vmatpush1.bf16.msra.mxu1 %v3970_v39  ;;  %v3977_v59 = vld [vmem:[#allocation5 + $0xac] ss:$20 sps:$4 sm:$0xff]   ;;  %v3980_v4 = vld [vmem:[#allocation5 + $0x84] ss:$20 sps:$4 sm:$0xff]   ;;  %v3986_v36 = vld [vmem:[#allocation5 + $0x34] ss:$20 sps:$4 sm:$0xff]  }
  0x8c   : > { %643 = vmatprep.subr.bf16.mxu0 %v3959_v11  ;;  %828 = vmatprep.subr.bf16.mxu1 %v3971_v44 }
  0x8f   : > { %644 = vmatpush1.bf16.msra.mxu0 %v3961_v12  ;;  %829 = vmatpush1.bf16.msra.mxu1 %v3973_v47 }
  0x90   : > { %645 = vmatprep.subr.bf16.mxu0 %v3962_v13  ;;  %830 = vmatprep.subr.bf16.mxu1 %v3974_v51 }
  0x93   : > { %646 = vmatpush1.bf16.msra.mxu0 %v3964_v14  ;;  %831 = vmatpush1.bf16.msra.mxu1 %v3976_v54  ;;  %v3991_v54 = vld [vmem:[#allocation5 + $0x8] ss:$20 sps:$4 sm:$0xff]  }
  0x94   : > { %647 = vmatprep.subr.bf16.mxu0 %v3965_v15  ;;  %832 = vmatprep.subr.bf16.mxu1 %v3977_v59 }
  0x97   : > { %648 = vmatpush1.bf16.msra.mxu0 %v3967_v16  ;;  %833 = vmatpush1.bf16.msra.mxu1 %v3979_v62 }
  0x98   : > { %834 = vmatprep.subr.bf16.mxu1 %v3980_v4 }
  0x9a   : > { %666 = vmatmul.mubr.bf16.vlgmr.msra.gmra.mxu0 %v4637_v19 }
  0x9b   : > { %675 = vmatprep.mubr.bf16.mxu0 %v6094_v0 }
  0xa2   : > { %676 = vmatmul.mubr.bf16.gmra.mxu0 %v4643_v22 }
  0xa3   : > { %685 = vmatprep.mubr.bf16.mxu0 %v6094_v0 }
  0xaa   : > { %686 = vmatmul.mubr.bf16.gmra.mxu0 %v4649_v25 }
  0xab   : > { %695 = vmatprep.mubr.bf16.mxu0 %v6094_v0 }
  0xb2   : > { %696 = vmatmul.mubr.bf16.gmra.mxu0 %v4655_v28 }
  0xb3   : > { %705 = vmatprep.mubr.bf16.mxu0 %v6094_v0 }
  0xba   : > { %706 = vmatmul.mubr.bf16.gmra.mxu0 %v4661_v31 }
  0xbb   : > { %715 = vmatprep.mubr.bf16.mxu0 %v6094_v0 }
  0xc2   : > { %716 = vmatmul.mubr.bf16.gmra.mxu0 %v4667_v34 }
  0xc3   : > { %725 = vmatprep.mubr.bf16.mxu0 %v6094_v0 }
  0xca   : > { %726 = vmatmul.mubr.bf16.gmra.mxu0 %v4673_v37 }
  0xcb   : > { %735 = vmatprep.mubr.bf16.mxu0 %v6094_v0 }
  0xd2   : > { %736 = vmatmul.mubr.bf16.gmra.mxu0 %v4679_v40 }
  0xd3   : > { %745 = vmatprep.mubr.bf16.mxu0 %v6094_v0 }
  0xda   : > { %746 = vmatmul.mubr.bf16.gmra.mxu0 %v4685_v43 }
  0xdb   : > { %755 = vmatprep.mubr.bf16.mxu0 %v6094_v0 }
  0xe2   : > { %756 = vmatmul.mubr.bf16.gmra.mxu0 %v4691_v46 }
  0xe3   : > { %765 = vmatprep.mubr.bf16.mxu0 %v6094_v0 }
  0xea   : > { %766 = vmatmul.mubr.bf16.gmra.mxu0 %v4697_v49 }
  0xeb   : > { %775 = vmatprep.mubr.bf16.mxu0 %v6094_v0 }
  0xf2   : > { %776 = vmatmul.mubr.bf16.gmra.mxu0 %v4703_v52 }
  0xf3   : > { %785 = vmatprep.mubr.bf16.mxu0 %v6094_v0 }
  0xfa   : > { %786 = vmatmul.mubr.bf16.gmra.mxu0 %v4709_v55 }
  0xfb   : > { %795 = vmatprep.mubr.bf16.mxu0 %v6094_v0 }
 0x102   : > { %796 = vmatmul.mubr.bf16.gmra.mxu0 %v4715_v58 }
 0x103   : > { %805 = vmatprep.mubr.bf16.mxu0 %v6094_v0 }
 0x10a   : > { %806 = vmatmul.mubr.bf16.gmra.mxu0 %v4721_v61 }
 0x10b   : > { %815 = vmatprep.mubr.bf16.mxu0 %v6094_v0 }
 0x112   : > { %816 = vmatmul.mubr.bf16.gmra.mxu0 %v4727_v1 }
 0x113   : > { %3766 = vmatprep.mubr.bf16.mxu0 %v4637_v19 }
 0x15a   : > { %v667_v7 = vpop.f32.mrf.mxu0 }
 0x15b   : > { %v4737_v8 = vadd.f32 %v667_v7, %v4734_v6  ;;  %v3982_v7 = vld [vmem:[#allocation5 + $0x80] ss:$20 sps:$4 sm:$0xff]  }
 0x15c   : > { %v4739_v9 = vpop.f32.mrf.mxu0  ;;  %835 = vmatpush1.bf16.msra.mxu1 %v3982_v7 }
 0x15d   : > { %1180 = vmax.xlane.f32.xlu0 %v4737_v8 }
 0x15e   : > { %v671_v10 = vpop.f32.mrf.mxu0 }
 0x15f   : > { %v4743_v11 = vadd.f32 %v671_v10, %v4734_v6 }
 0x160   : > { %v4745_v12 = vpop.f32.mrf.mxu0 }
 0x161   : > { %1182 = vmax.xlane.f32.xlu0 %v4743_v11 }
 0x162   : > { %v677_v13 = vpop.f32.mrf.mxu0 }
 0x163   : > { %v4749_v14 = vadd.f32 %v677_v13, %v4734_v6 }
 0x164   : > { %v4751_v15 = vpop.f32.mrf.mxu0 }
 0x165   : > { %1184 = vmax.xlane.f32.xlu1 %v4749_v14 }
 0x166   : > { %v681_v16 = vpop.f32.mrf.mxu0 }
 0x167   : > { %v4755_v17 = vadd.f32 %v681_v16, %v4734_v6  ;;  %v3983_v16 = vld [vmem:[#allocation5 + $0x5c] ss:$20 sps:$4 sm:$0xff]  }
 0x168   : > { %v4757_v18 = vpop.f32.mrf.mxu0  ;;  %836 = vmatprep.subr.bf16.mxu1 %v3983_v16 }
 0x169   : > { %1186 = vmax.xlane.f32.xlu1 %v4755_v17 }
 0x16a   : > { %v687_v20 = vpop.f32.mrf.mxu0 }
 0x16b   : > { %v4761_v21 = vadd.f32 %v687_v20, %v4734_v6 }
 0x16c   : > { %v4763_v23 = vpop.f32.mrf.mxu0 }
 0x16d   : > { %1188 = vmax.xlane.f32.xlu0 %v4761_v21 }
 0x16e   : > { %v691_v24 = vpop.f32.mrf.mxu0 }
 0x16f   : > { %v4767_v26 = vadd.f32 %v691_v24, %v4734_v6  ;;  %v3985_v24 = vld [vmem:[#allocation5 + $0x58] ss:$20 sps:$4 sm:$0xff]  }
 0x170   : > { %v4769_v27 = vpop.f32.mrf.mxu0  ;;  %837 = vmatpush1.bf16.msra.mxu1 %v3985_v24 }
 0x171   : > { %1190 = vmax.xlane.f32.xlu1 %v4767_v26  ;;  %838 = vmatprep.subr.bf16.mxu1 %v3986_v36 }
 0x172   : > { %v697_v29 = vpop.f32.mrf.mxu0 }
 0x173   : > { %v4773_v30 = vadd.f32 %v697_v29, %v4734_v6 }
 0x174   : > { %v4775_v32 = vpop.f32.mrf.mxu0 }
 0x175   : > { %6125 = vst [vmem:[#allocation16_spill] sm:$0xff] %v4775_v32  ;;  %1192 = vmax.xlane.f32.xlu0 %v4773_v30 }
 0x176   : > { %v701_v33 = vpop.f32.mrf.mxu0 }
 0x177   : > { %v4779_v35 = vadd.f32 %v701_v33, %v4734_v6 }
 0x178   : > { %v4781_v38 = vpop.f32.mrf.mxu0 }
 0x179   : > { %6126 = vst [vmem:[#allocation17_spill] sm:$0xff] %v4781_v38  ;;  %1194 = vmax.xlane.f32.xlu1 %v4779_v35 }
 0x17a   : > { %v707_v41 = vpop.f32.mrf.mxu0 }
 0x17b   : > { %v4785_v42 = vadd.f32 %v707_v41, %v4734_v6  ;;  %v3988_v41 = vld [vmem:[#allocation5 + $0x30] ss:$20 sps:$4 sm:$0xff]  }
 0x17c   : > { %v4787_v45 = vpop.f32.mrf.mxu0  ;;  %839 = vmatpush1.bf16.msra.mxu1 %v3988_v41 }
 0x17d   : > { %6127 = vst [vmem:[#allocation18_spill] sm:$0xff] %v4787_v45  ;;  %1196 = vmax.xlane.f32.xlu0 %v4785_v42 }
 0x17e   : > { %v711_v48 = vpop.f32.mrf.mxu0 }
 0x17f   : > { %v4791_v50 = vadd.f32 %v711_v48, %v4734_v6  ;;  %v3989_v48 = vld [vmem:[#allocation5 + $0xc] ss:$20 sps:$4 sm:$0xff]  }
 0x180   : > { %v4793_v53 = vpop.f32.mrf.mxu0  ;;  %840 = vmatprep.subr.bf16.mxu1 %v3989_v48 }
 0x181   : > { %6128 = vst [vmem:[#allocation19_spill] sm:$0xff] %v4793_v53  ;;  %1198 = vmax.xlane.f32.xlu1 %v4791_v50  ;;  %841 = vmatpush1.bf16.msra.mxu1 %v3991_v54 }
 0x182   : > { %v717_v56 = vpop.f32.mrf.mxu0 }
 0x183   : > { %v4797_v57 = vadd.f32 %v717_v56, %v4734_v6 }
 0x184   : > { %v4799_v60 = vpop.f32.mrf.mxu0  ;;  %859 = vmatmul.mubr.bf16.vlgmr.msra.gmra.mxu1 %v4637_v19 }
 0x185   : > { %6129 = vst [vmem:[#allocation20_spill] sm:$0xff] %v4799_v60  ;;  %1200 = vmax.xlane.f32.xlu0 %v4797_v57  ;;  %868 = vmatprep.mubr.bf16.mxu1 %v6094_v0 }
 0x186   : > { %v721_v63 = vpop.f32.mrf.mxu0 }
 0x187   : > { %v4803_v2 = vadd.f32 %v721_v63, %v4734_v6 }
 0x188   : > { %v4805_v5 = vpop.f32.mrf.mxu0 }
 0x189   : > { %6130 = vst [vmem:[#allocation21_spill] sm:$0xff] %v4805_v5  ;;  %1202 = vmax.xlane.f32.xlu1 %v4803_v2 }
 0x18a   : > { %v727_v10 = vpop.f32.mrf.mxu0 }
 0x18b   : > { %v4809_v13 = vadd.f32 %v727_v10, %v4734_v6 }
 0x18c   : > { %v4811_v20 = vpop.f32.mrf.mxu0  ;;  %869 = vmatmul.mubr.bf16.gmra.mxu1 %v4643_v22 }
 0x18d   : > { %6131 = vst [vmem:[#allocation22_spill] sm:$0xff] %v4811_v20  ;;  %1204 = vmax.xlane.f32.xlu0 %v4809_v13  ;;  %878 = vmatprep.mubr.bf16.mxu1 %v6094_v0  ;;  %v4014_v20 = vld [vmem:[#allocation8 + $0xcc] ss:$16 sps:$4 sm:$0xff]  }
 0x18e   : > { %v731_v29 = vpop.f32.mrf.mxu0 }
 0x18f   : > { %v4815_v33 = vadd.f32 %v731_v29, %v4734_v6 }
 0x190   : > { %v4817_v39 = vpop.f32.mrf.mxu0 }
 0x191   : > { %6132 = vst [vmem:[#allocation23_spill] sm:$0xff] %v4817_v39  ;;  %1206 = vmax.xlane.f32.xlu1 %v4815_v33  ;;  %v4003_v39 = vld [vmem:[#allocation8 + $0xc0] ss:$16 sps:$4 sm:$0xff]  }
 0x192   : > { %v737_v44 = vpop.f32.mrf.mxu0 }
 0x193   : > { %v4821_v47 = vadd.f32 %v737_v44, %v4734_v6 }
 0x194   : > { %v4823_v51 = vpop.f32.mrf.mxu0  ;;  %879 = vmatmul.mubr.bf16.gmra.mxu1 %v4649_v25 }
 0x195   : > { %6133 = vst [vmem:[#allocation24_spill] sm:$0xff] %v4823_v51  ;;  %1208 = vmax.xlane.f32.xlu0 %v4821_v47  ;;  %888 = vmatprep.mubr.bf16.mxu1 %v6094_v0  ;;  %v4011_v51 = vld [vmem:[#allocation8 + $0xec] ss:$16 sps:$4 sm:$0xff]  }
 0x196   : > { %v741_v56 = vpop.f32.mrf.mxu0 }
 0x197   : > { %v4827_v59 = vadd.f32 %v741_v56, %v4734_v6 }
 0x198   : > { %v4829_v62 = vpop.f32.mrf.mxu0 }
 0x199   : > { %6134 = vst [vmem:[#allocation25_spill] sm:$0xff] %v4829_v62  ;;  %1210 = vmax.xlane.f32.xlu1 %v4827_v59  ;;  %v4005_v62 = vld [vmem:[#allocation8 + $0xc4] ss:$16 sps:$4 sm:$0xff]  }
 0x19a   : > { %v747_v63 = vpop.f32.mrf.mxu0 }
 0x19b   : > { %v4835_v4 = vadd.f32 %v747_v63, %v4734_v6 }
 0x19c   : > { %v4837_v7 = vpop.f32.mrf.mxu0  ;;  %889 = vmatmul.mubr.bf16.gmra.mxu1 %v4655_v28 }
 0x19d   : > { %6135 = vst [vmem:[#allocation26_spill] sm:$0xff] %v4837_v7  ;;  %1212 = vmax.xlane.f32.xlu0 %v4835_v4  ;;  %898 = vmatprep.mubr.bf16.mxu1 %v6094_v0  ;;  %v3997_v7 = vld [vmem:[#allocation5 + $0x60] ss:$20 sps:$4 sm:$0xff]  }
 0x19e   : > { %v751_v10 = vpop.f32.mrf.mxu0 }
 0x19f   : > { %v4841_v16 = vadd.f32 %v751_v10, %v4734_v6 }
 0x1a0   : > { %v4843_v24 = vpop.f32.mrf.mxu0 }
 0x1a1   : > { %6136 = vst [vmem:[#allocation27_spill] sm:$0xff] %v4843_v24  ;;  %1214 = vmax.xlane.f32.xlu1 %v4841_v16  ;;  %v3992_v24 = vld [vmem:[#allocation5 + $0x128] ss:$20 sps:$4 sm:$0xff]  }
 0x1a2   : > { %v757_v19 = vpop.f32.mrf.mxu0  ;;  %3750 = vmatprep.subr.bf16.mxu0 %v3992_v24 }
 0x1a3   : > { %v4849_v29 = vadd.f32 %v757_v19, %v4734_v6  ;;  %3751 = vmatpush3.bf16.msra.mxu0 %v3992_v24  ;;  %v3998_v24 = vld [vmem:[#allocation5 + $0x38] ss:$20 sps:$4 sm:$0xff]  }
 0x1a4   : > { %v4851_v36 = vpop.f32.mrf.mxu0  ;;  %899 = vmatmul.mubr.bf16.gmra.mxu1 %v4661_v31 }
 0x1a5   : > { %6137 = vst [vmem:[#allocation28_spill] sm:$0xff] %v4851_v36  ;;  %1216 = vmax.xlane.f32.xlu0 %v4849_v29  ;;  %908 = vmatprep.mubr.bf16.mxu1 %v6094_v0 }
 0x1a6   : > { %v761_v41 = vpop.f32.mrf.mxu0 }
 0x1a7   : > { %v4855_v44 = vadd.f32 %v761_v41, %v4734_v6 }
 0x1a8   : > { %v4857_v48 = vpop.f32.mrf.mxu0 }
 0x1a9   : > { %6138 = vst [vmem:[#allocation29_spill] sm:$0xff] %v4857_v48  ;;  %1218 = vmax.xlane.f32.xlu1 %v4855_v44 }
 0x1aa   : > { %v767_v54 = vpop.f32.mrf.mxu0 }
 0x1ab   : > { %v4863_v56 = vadd.f32 %v767_v54, %v4734_v6 }
 0x1ac   : > { %v4865_v63 = vpop.f32.mrf.mxu0  ;;  %909 = vmatmul.mubr.bf16.gmra.mxu1 %v4667_v34 }
 0x1ad   : > { %6139 = vst [vmem:[#allocation30_spill] sm:$0xff] %v4865_v63  ;;  %1220 = vmax.xlane.f32.xlu0 %v4863_v56  ;;  %918 = vmatprep.mubr.bf16.mxu1 %v6094_v0 }
 0x1ae   : > { %v771_v10 = vpop.f32.mrf.mxu0 }
 0x1af   : > { %v4869_v19 = vadd.f32 %v771_v10, %v4734_v6 }
 0x1b0   : > { %v4871_v41 = vpop.f32.mrf.mxu0 }
 0x1b1   : > { %6140 = vst [vmem:[#allocation31_spill] sm:$0xff] %v4871_v41  ;;  %1222 = vmax.xlane.f32.xlu1 %v4869_v19  ;;  %v3993_v41 = vld [vmem:[#allocation5 + $0x100] ss:$20 sps:$4 sm:$0xff]  }
 0x1b2   : > { %v777_v48 = vpop.f32.mrf.mxu0  ;;  %3752 = vmatprep.subr.bf16.mxu0 %v3993_v41 }
 0x1b3   : > { %v4877_v54 = vadd.f32 %v777_v48, %v4734_v6  ;;  %3753 = vmatpush3.bf16.msra.mxu0 %v3993_v41  ;;  %v3994_v48 = vld [vmem:[#allocation5 + $0xd8] ss:$20 sps:$4 sm:$0xff]   ;;  %v3999_v41 = vld [vmem:[#allocation5 + $0x10] ss:$20 sps:$4 sm:$0xff]  }
 0x1b4   : > { %v4879_v36 = vpop.f32.mrf.mxu0  ;;  %3754 = vmatprep.subr.bf16.mxu0 %v3994_v48  ;;  %919 = vmatmul.mubr.bf16.gmra.mxu1 %v4673_v37 }
 0x1b5   : > { %6141 = vst [vmem:[#allocation32_spill] sm:$0xff] %v4879_v36  ;;  %1224 = vmax.xlane.f32.xlu0 %v4877_v54  ;;  %v3996_v36 = vld [vmem:[#allocation5 + $0x88] ss:$20 sps:$4 sm:$0xff]   ;;  %928 = vmatprep.mubr.bf16.mxu1 %v6094_v0 }
 0x1b6   : > { %v781_v63 = vpop.f32.mrf.mxu0 }
 0x1b7   : > { %v4883_v10 = vadd.f32 %v781_v63, %v4734_v6  ;;  %3755 = vmatpush3.bf16.msra.mxu0 %v3994_v48  ;;  %v3995_v63 = vld [vmem:[#allocation5 + $0xb0] ss:$20 sps:$4 sm:$0xff]  }
 0x1b8   : > { %3756 = vmatprep.subr.bf16.mxu0 %v3995_v63  ;;  %v4000_v48 = vld [vmem:[#allocation8 + $0xe0] ss:$16 sps:$4 sm:$0xff]   ;;  %v4895_v5 = vpop.f32.mrf.mxu0 }
 0x1b9   : > { %1226 = vmax.xlane.f32.xlu1 %v4883_v10  ;;  %6142 = vst [vmem:[#allocation33_spill] sm:$0xff] %v4895_v5 }
 0x1bb   : > { %3757 = vmatpush3.bf16.msra.mxu0 %v3995_v63  ;;  %v4002_v63 = vld [vmem:[#allocation8 + $0xe4] ss:$16 sps:$4 sm:$0xff]  }
 0x1bc   : > { %3758 = vmatprep.subr.bf16.mxu0 %v3996_v36  ;;  %929 = vmatmul.mubr.bf16.gmra.mxu1 %v4679_v40 }
 0x1bd   : > { %938 = vmatprep.mubr.bf16.mxu1 %v6094_v0  ;;  %1804 = vmatprep.subr.bf16.mxu1 %v4002_v63  ;;  %v787_v63 = vpop.f32.mrf.mxu0 }
 0x1be   : > { %1805 = vmatpush1.bf16.msra.mxu1 %v4000_v48  ;;  %v4017_v48 = vld [vmem:[#allocation8 + $0xac] ss:$16 sps:$4 sm:$0xff]  }
 0x1bf   : > { %3759 = vmatpush3.bf16.msra.mxu0 %v3996_v36  ;;  %v4009_v36 = vld [vmem:[#allocation8 + $0xe8] ss:$16 sps:$4 sm:$0xff]   ;;  %1806 = vmatprep.subr.bf16.mxu1 %v4005_v62 }
 0x1c0   : > { %3760 = vmatprep.subr.bf16.mxu0 %v3997_v7  ;;  %v4015_v62 = vld [vmem:[#allocation8 + $0xa8] ss:$16 sps:$4 sm:$0xff]  }
 0x1c2   : > { %1807 = vmatpush1.bf16.msra.mxu1 %v4003_v39 }
 0x1c3   : > { %3761 = vmatpush3.bf16.msra.mxu0 %v3997_v7  ;;  %v4008_v7 = vld [vmem:[#allocation8 + $0xa4] ss:$16 sps:$4 sm:$0xff]  }
 0x1c4   : > { %3762 = vmatprep.subr.bf16.mxu0 %v3998_v24  ;;  %939 = vmatmul.mubr.bf16.gmra.mxu1 %v4685_v43 }
 0x1c5   : > { %948 = vmatprep.mubr.bf16.mxu1 %v6094_v0  ;;  %1808 = vmatprep.subr.bf16.mxu1 %v4008_v7 }
 0x1c7   : > { %3763 = vmatpush3.bf16.msra.mxu0 %v3998_v24  ;;  %v4006_v24 = vld [vmem:[#allocation8 + $0xa0] ss:$16 sps:$4 sm:$0xff]  }
 0x1c8   : > { %3764 = vmatprep.subr.bf16.mxu0 %v3999_v41  ;;  %1809 = vmatpush1.bf16.msra.mxu1 %v4006_v24 }
 0x1cb   : > { %3765 = vmatpush3.bf16.msra.mxu0 %v3999_v41  ;;  %v4012_v41 = vld [vmem:[#allocation8 + $0xc8] ss:$16 sps:$4 sm:$0xff]  }
 0x1cc   : > { %1997 = vmatprep.subr.bf16.mxu0 %v4011_v51  ;;  %949 = vmatmul.mubr.bf16.gmra.mxu1 %v4691_v46 }
 0x1cd   : > { %958 = vmatprep.mubr.bf16.mxu1 %v6094_v0 }
 0x1ce   : > { %3767 = vmatmul.mubr.bf16.vlgmr.msra.gmra.mxu0 %v4643_v22  ;;  %v4901_v22 = vpop.f32.mrf.mxu0 }
 0x1cf   : > { %3770 = vmatprep.mubr.bf16.mxu0 %v4649_v25  ;;  %1998 = vmatpush1.bf16.msra.mxu0 %v4009_v36  ;;  %6143 = vst [vmem:[#allocation34_spill] sm:$0xff] %v4901_v22 }
 0x1d0   : > { %1999 = vmatprep.subr.bf16.mxu0 %v4014_v20  ;;  %v791_v39 = vpop.f32.mrf.mxu0 }
 0x1d2   : > { %v4908_v7 = vpop.f32.mrf.mxu0 }
 0x1d3   : > { %2000 = vmatpush1.bf16.msra.mxu0 %v4012_v41  ;;  %6144 = vst [vmem:[#allocation35_spill] sm:$0xff] %v4908_v7 }
 0x1d4   : > { %2001 = vmatprep.subr.bf16.mxu0 %v4017_v48  ;;  %959 = vmatmul.mubr.bf16.gmra.mxu1 %v4697_v49  ;;  %v797_v41 = vpop.f32.mrf.mxu0 }
 0x1d5   : > { %968 = vmatprep.mubr.bf16.mxu1 %v6094_v0 }
 0x1d6   : > { %3771 = vmatmul.mubr.bf16.gmra.mxu0 %v4655_v28 }
 0x1d7   : > { %3774 = vmatprep.mubr.bf16.mxu0 %v4661_v31  ;;  %2002 = vmatpush1.bf16.msra.mxu0 %v4015_v62 }
 0x1dc   : > { %969 = vmatmul.mubr.bf16.gmra.mxu1 %v4703_v52 }
 0x1dd   : > { %978 = vmatprep.mubr.bf16.mxu1 %v6094_v0 }
 0x1de   : > { %3775 = vmatmul.mubr.bf16.gmra.mxu0 %v4667_v34 }
 0x1df   : > { %3778 = vmatprep.mubr.bf16.mxu0 %v4673_v37 }
 0x1e4   : > { %979 = vmatmul.mubr.bf16.gmra.mxu1 %v4709_v55 }
 0x1e5   : > { %988 = vmatprep.mubr.bf16.mxu1 %v6094_v0 }
 0x1e6   : > { %v1181_v25 = vpop.xlane.xlu0 %1180  ;;  %3779 = vmatmul.mubr.bf16.gmra.mxu0 %v4679_v40 }
 0x1e7   : > { %v1244_v20 = vsub.f32 %v4737_v8, %v1181_v25  ;;  %v4916_v25 = vpop.f32.mrf.mxu0  ;;  %3782 = vmatprep.mubr.bf16.mxu0 %v4685_v43 }
 0x1e8   : > { %6145 = vst [vmem:[#allocation36_spill] sm:$0xff] %v4916_v25 }
 0x1e9   : > { %v1276_v51 = vmul.f32 1.442695, %v1244_v20  ;;  %v801_v20 = vpop.f32.mrf.mxu0 }
 0x1ea   : > { %v1183_v36 = vpop.xlane.xlu0 %1182 }
 0x1eb   : > { %4088 = vpow2.f32 %v1276_v51  ;;  %v1245_v28 = vsub.f32 %v4743_v11, %v1183_v36  ;;  %v4926_v36 = vadd.f32 %v787_v63, %v4734_v6 }
 0x1ec   : > { %989 = vmatmul.mubr.bf16.gmra.mxu1 %v4715_v58 }
 0x1ed   : > { %v1278_v31 = vmul.f32 1.442695, %v1245_v28  ;;  %998 = vmatprep.mubr.bf16.mxu1 %v6094_v0 }
 0x1ee   : > { %v1185_v24 = vpop.xlane.xlu1 %1184  ;;  %3783 = vmatmul.mubr.bf16.gmra.mxu0 %v4691_v46 }
 0x1ef   : > { %4090 = vpow2.f32 %v1278_v31  ;;  %v1246_v8 = vsub.f32 %v4749_v14, %v1185_v24  ;;  %3786 = vmatprep.mubr.bf16.mxu0 %v4697_v49 }
 0x1f1   : > { %v1280_v48 = vmul.f32 1.442695, %v1246_v8  ;;  %v4941_v8 = vadd.f32 %v791_v39, %v4734_v6  ;;  %v4018_v39 = vld [vmem:[#allocation8 + $0x80] ss:$16 sps:$4 sm:$0xff]  }
 0x1f2   : > { %v1187_v62 = vpop.xlane.xlu1 %1186 }
 0x1f3   : > { %4092 = vpow2.f32 %v1280_v48  ;;  %v1247_v34 = vsub.f32 %v4755_v17, %v1187_v62  ;;  %v4930_v17 = vpop.f32.mrf.mxu0 }
 0x1f4   : > { %6146 = vst [vmem:[#allocation37_spill] sm:$0xff] %v4930_v17  ;;  %999 = vmatmul.mubr.bf16.gmra.mxu1 %v4721_v61 }
 0x1f5   : > { %v1282_v37 = vmul.f32 1.442695, %v1247_v34  ;;  %v807_v24 = vpop.f32.mrf.mxu0  ;;  %1008 = vmatprep.mubr.bf16.mxu1 %v6094_v0 }
 0x1f6   : > { %v1189_v11 = vpop.xlane.xlu0 %1188  ;;  %3787 = vmatmul.mubr.bf16.gmra.mxu0 %v4703_v52 }
 0x1f7   : > { %4094 = vpow2.f32 %v1282_v37  ;;  %v1248_v14 = vsub.f32 %v4761_v21, %v1189_v11  ;;  %v4951_v34 = vpop.f32.mrf.mxu0  ;;  %v4020_v37 = vld [vmem:[#allocation8 + $0x84] ss:$16 sps:$4 sm:$0xff]   ;;  %v4021_v11 = vld [vmem:[#allocation8 + $0x88] ss:$16 sps:$4 sm:$0xff]   ;;  %3790 = vmatprep.mubr.bf16.mxu0 %v4709_v55 }
 0x1f8   : > { %v4923_v51 = vpop.eup %4088  ;;  %6147 = vst [vmem:[#allocation38_spill] sm:$0xff] %v4951_v34  ;;  %1810 = vmatprep.subr.bf16.mxu1 %v4020_v37  ;;  %v4026_v55 = vld [vmem:[#allocation8 + $0x64] ss:$16 sps:$4 sm:$0xff]  }
 0x1f9   : > { %v1284_v28 = vmul.f32 1.442695, %v1248_v14  ;;  %1340 = vadd.xlane.f32.xlu0 %v4923_v51  ;;  %v4023_v14 = vld [vmem:[#allocation8 + $0x8c] ss:$16 sps:$4 sm:$0xff]   ;;  %v811_v52 = vpop.f32.mrf.mxu0  ;;  %1811 = vmatpush1.bf16.msra.mxu1 %v4018_v39 }
 0x1fa   : > { %v1191_v40 = vpop.xlane.xlu1 %1190  ;;  %2003 = vmatprep.subr.bf16.mxu0 %v4023_v14  ;;  %1812 = vmatprep.subr.bf16.mxu1 %v4026_v55 }
 0x1fb   : > { %4096 = vpow2.f32 %v1284_v28  ;;  %v1249_v43 = vsub.f32 %v4767_v26, %v1191_v40  ;;  %v4947_v26 = vadd.f32 %v797_v41, %v4734_v6  ;;  %2004 = vmatpush1.bf16.msra.mxu0 %v4021_v11  ;;  %v4035_v11 = vld [vmem:[#allocation8 + $0x4c] ss:$16 sps:$4 sm:$0xff]  }
 0x1fc   : > { %v4936_v21 = vpop.eup %4090  ;;  %1009 = vmatmul.mubr.bf16.gmra.mxu1 %v4727_v1 }
 0x1fd   : > { %v1286_v63 = vmul.f32 1.442695, %v1249_v43  ;;  %1228 = vmax.xlane.f32.xlu0 %v4926_v36  ;;  %1342 = vadd.xlane.f32.xlu1 %v4936_v21 }
 0x1fe   : > { %v1193_v31 = vpop.xlane.xlu0 %1192  ;;  %3791 = vmatmul.mubr.bf16.gmra.mxu0 %v4715_v58  ;;  %1836 = vmatprep.mubr.bf16.mxu1 %v6094_v0 }
 0x1ff   : > { %4098 = vpow2.f32 %v1286_v63  ;;  %v1250_v46 = vsub.f32 %v4773_v30, %v1193_v31  ;;  %v4029_v63 = vld [vmem:[#allocation8 + $0x6c] ss:$16 sps:$4 sm:$0xff]   ;;  %3794 = vmatprep.mubr.bf16.mxu0 %v4721_v61 }
 0x200   : > { %v4944_v48 = vpop.eup %4092  ;;  %2005 = vmatprep.subr.bf16.mxu0 %v4029_v63 }
 0x201   : > { %v1288_v49 = vmul.f32 1.442695, %v1250_v46  ;;  %1344 = vadd.xlane.f32.xlu0 %v4944_v48  ;;  %1230 = vmax.xlane.f32.xlu1 %v4941_v8  ;;  %v4024_v46 = vld [vmem:[#allocation8 + $0x60] ss:$16 sps:$4 sm:$0xff]  }
 0x202   : > { %v1195_v62 = vpop.xlane.xlu1 %1194  ;;  %1813 = vmatpush1.bf16.msra.mxu1 %v4024_v46  ;;  %v4038_v46 = vld [vmem:[#allocation8 + $0x24] ss:$16 sps:$4 sm:$0xff]  }
 0x203   : > { %4100 = vpow2.f32 %v1288_v49  ;;  %v1251_v30 = vsub.f32 %v4779_v35, %v1195_v62  ;;  %v4963_v35 = vadd.f32 %v801_v20, %v4734_v6  ;;  %v4027_v49 = vld [vmem:[#allocation8 + $0x68] ss:$16 sps:$4 sm:$0xff]   ;;  %v4969_v62 = vadd.f32 %v807_v24, %v4734_v6  ;;  %v4973_v20 = vpop.f32.mrf.mxu0  ;;  %v4032_v24 = vld [vmem:[#allocation8 + $0x44] ss:$16 sps:$4 sm:$0xff]  }
 0x204   : > { %v4958_v41 = vpop.eup %4094  ;;  %6148 = vst [vmem:[#allocation39_spill] sm:$0xff] %v4973_v20  ;;  %2006 = vmatpush1.bf16.msra.mxu0 %v4027_v49  ;;  %1814 = vmatprep.subr.bf16.mxu1 %v4032_v24  ;;  %v4041_v49 = vld [vmem:[#allocation8 + $0x2c] ss:$16 sps:$4 sm:$0xff]  }
 0x205   : > { %v1290_v28 = vmul.f32 1.442695, %v1251_v30  ;;  %1232 = vmax.xlane.f32.xlu0 %v4947_v26  ;;  %1346 = vadd.xlane.f32.xlu1 %v4958_v41 }
 0x206   : > { %v1197_v40 = vpop.xlane.xlu0 %1196  ;;  %2007 = vmatprep.subr.bf16.mxu0 %v4035_v11  ;;  %3795 = vmatmul.mubr.bf16.gmra.mxu0 %v4727_v1 }
 0x207   : > { %4102 = vpow2.f32 %v1290_v28  ;;  %v1252_v43 = vsub.f32 %v4785_v42, %v1197_v40  ;;  %v4030_v28 = vld [vmem:[#allocation8 + $0x40] ss:$16 sps:$4 sm:$0xff]   ;;  %v4033_v40 = vld [vmem:[#allocation8 + $0x48] ss:$16 sps:$4 sm:$0xff]   ;;  %2029 = vmatprep.mubr.bf16.mxu0 %v6094_v0 }
 0x208   : > { %v4966_v31 = vpop.eup %4096  ;;  %1815 = vmatpush1.bf16.msra.mxu1 %v4030_v28  ;;  %2008 = vmatpush1.bf16.msra.mxu0 %v4033_v40  ;;  %v4047_v28 = vld [vmem:[#allocation8 + $0xc] ss:$16 sps:$4 sm:$0xff]  }
 0x209   : > { %v1292_v30 = vmul.f32 1.442695, %v1252_v43  ;;  %1234 = vmax.xlane.f32.xlu1 %v4963_v35  ;;  %1348 = vadd.xlane.f32.xlu0 %v4966_v31  ;;  %v817_v43 = vpop.f32.mrf.mxu0 }
 0x20a   : > { %v1199_v37 = vpop.xlane.xlu1 %1198  ;;  %1816 = vmatprep.subr.bf16.mxu1 %v4038_v46  ;;  %2009 = vmatprep.subr.bf16.mxu0 %v4041_v49 }
 0x20b   : > { %4104 = vpow2.f32 %v1292_v30  ;;  %v1253_v42 = vsub.f32 %v4791_v50, %v1199_v37  ;;  %v4983_v50 = vadd.f32 %v811_v52, %v4734_v6  ;;  %v4991_v30 = vadd.f32 %v817_v43, %v4734_v6  ;;  %v4036_v52 = vld [vmem:[#allocation8 + $0x20] ss:$16 sps:$4 sm:$0xff]  }
 0x20c   : > { %v4978_v39 = vpop.eup %4098  ;;  %1817 = vmatpush1.bf16.msra.mxu1 %v4036_v52  ;;  %v4042_v43 = vld [vmem:[#allocation8] ss:$16 sps:$4 sm:$0xff]  }
 0x20d   : > { %v1294_v14 = vmul.f32 1.442695, %v1253_v42  ;;  %1350 = vadd.xlane.f32.xlu1 %v4978_v39  ;;  %1236 = vmax.xlane.f32.xlu0 %v4969_v62  ;;  %v4995_v42 = vpop.f32.mrf.mxu0 }
 0x20e   : > { %v1201_v58 = vpop.xlane.xlu0 %1200  ;;  %6149 = vst [vmem:[#allocation40_spill] sm:$0xff] %v4995_v42 }
 0x20f   : > { %4106 = vpow2.f32 %v1294_v14  ;;  %v1254_v55 = vsub.f32 %v4797_v57, %v1201_v58  ;;  %v4039_v57 = vld [vmem:[#allocation8 + $0x28] ss:$16 sps:$4 sm:$0xff]   ;;  %v4044_v14 = vld [vmem:[#allocation8 + $0x4] ss:$16 sps:$4 sm:$0xff]  }
 0x210   : > { %v4988_v63 = vpop.eup %4100  ;;  %2010 = vmatpush1.bf16.msra.mxu0 %v4039_v57  ;;  %v4045_v58 = vld [vmem:[#allocation8 + $0x8] ss:$16 sps:$4 sm:$0xff]   ;;  %1818 = vmatprep.subr.bf16.mxu1 %v4044_v14 }
 0x211   : > { %v1296_v37 = vmul.f32 1.442695, %v1254_v55  ;;  %1238 = vmax.xlane.f32.xlu1 %v4983_v50  ;;  %1352 = vadd.xlane.f32.xlu0 %v4988_v63  ;;  %v821_v55 = vpop.f32.mrf.mxu0 }
 0x212   : > { %v1203_v24 = vpop.xlane.xlu1 %1202  ;;  %2011 = vmatprep.subr.bf16.mxu0 %v4047_v28  ;;  %1819 = vmatpush1.bf16.msra.mxu1 %v4042_v43 }
 0x213   : > { %4108 = vpow2.f32 %v1296_v37  ;;  %v1255_v61 = vsub.f32 %v4803_v2, %v1203_v24  ;;  %v5005_v2 = vadd.f32 %v821_v55, %v4734_v6 }
 0x214   : > { %v5000_v11 = vpop.eup %4102  ;;  %2012 = vmatpush1.bf16.msra.mxu0 %v4045_v58 }
 0x215   : > { %v1298_v40 = vmul.f32 1.442695, %v1255_v61  ;;  %1354 = vadd.xlane.f32.xlu1 %v5000_v11  ;;  %1240 = vmax.xlane.f32.xlu0 %v4991_v30 }
 0x216   : > { %v1205_v1 = vpop.xlane.xlu0 %1204 }
 0x217   : > { %4110 = vpow2.f32 %v1298_v40  ;;  %v1256_v46 = vsub.f32 %v4809_v13, %v1205_v1 }
 0x218   : > { %v5010_v49 = vpop.eup %4104 }
 0x219   : > { %v1300_v37 = vmul.f32 1.442695, %v1256_v46  ;;  %1242 = vmax.xlane.f32.xlu1 %v5005_v2  ;;  %1356 = vadd.xlane.f32.xlu0 %v5010_v49 }
 0x21a   : > { %v1207_v52 = vpop.xlane.xlu1 %1206 }
 0x21b   : > { %4112 = vpow2.f32 %v1300_v37  ;;  %v1257_v6 = vsub.f32 %v4815_v33, %v1207_v52 }
 0x21c   : > { %v5015_v57 = vpop.eup %4106 }
 0x21d   : > { %v1302_v13 = vmul.f32 1.442695, %v1257_v6  ;;  %1358 = vadd.xlane.f32.xlu1 %v5015_v57 }
 0x21e   : > { %v1209_v24 = vpop.xlane.xlu0 %1208 }
 0x21f   : > { %4114 = vpow2.f32 %v1302_v13  ;;  %v1258_v61 = vsub.f32 %v4821_v47, %v1209_v24 }
 0x220   : > { %v5019_v14 = vpop.eup %4108 }
 0x221   : > { %v1304_v28 = vmul.f32 1.442695, %v1258_v61  ;;  %1360 = vadd.xlane.f32.xlu0 %v5019_v14 }
 0x222   : > { %v1211_v40 = vpop.xlane.xlu1 %1210 }
 0x223   : > { %4116 = vpow2.f32 %v1304_v28  ;;  %v1259_v43 = vsub.f32 %v4827_v59, %v1211_v40 }
 0x224   : > { %v5023_v58 = vpop.eup %4110 }
 0x225   : > { %v1306_v33 = vmul.f32 1.442695, %v1259_v43  ;;  %1362 = vadd.xlane.f32.xlu1 %v5023_v58 }
 0x226   : > { %v1213_v55 = vpop.xlane.xlu0 %1212 }
 0x227   : > { %4118 = vpow2.f32 %v1306_v33  ;;  %v1260_v1 = vsub.f32 %v4835_v4, %v1213_v55 }
 0x228   : > { %v5027_v46 = vpop.eup %4112 }
 0x229   : > { %v1308_v47 = vmul.f32 1.442695, %v1260_v1  ;;  %1364 = vadd.xlane.f32.xlu0 %v5027_v46 }
 0x22a   : > { %v1215_v37 = vpop.xlane.xlu1 %1214 }
 0x22b   : > { %4120 = vpow2.f32 %v1308_v47  ;;  %v1261_v52 = vsub.f32 %v4841_v16, %v1215_v37 }
 0x22c   : > { %v5031_v6 = vpop.eup %4114 }
 0x22d   : > { %v1310_v59 = vmul.f32 1.442695, %v1261_v52  ;;  %1366 = vadd.xlane.f32.xlu1 %v5031_v6 }
 0x22e   : > { %v1217_v13 = vpop.xlane.xlu0 %1216 }
 0x22f   : > { %4122 = vpow2.f32 %v1310_v59  ;;  %v1262_v24 = vsub.f32 %v4849_v29, %v1217_v13 }
 0x230   : > { %v5035_v61 = vpop.eup %4116 }
 0x231   : > { %v1312_v4 = vmul.f32 1.442695, %v1262_v24  ;;  %1368 = vadd.xlane.f32.xlu0 %v5035_v61 }
 0x232   : > { %v1219_v28 = vpop.xlane.xlu1 %1218 }
 0x233   : > { %4124 = vpow2.f32 %v1312_v4  ;;  %v1263_v40 = vsub.f32 %v4855_v44, %v1219_v28 }
 0x234   : > { %v5039_v43 = vpop.eup %4118 }
 0x235   : > { %v1314_v16 = vmul.f32 1.442695, %v1263_v40  ;;  %1370 = vadd.xlane.f32.xlu1 %v5039_v43 }
 0x236   : > { %v1221_v33 = vpop.xlane.xlu0 %1220 }
 0x237   : > { %4126 = vpow2.f32 %v1314_v16  ;;  %v1264_v55 = vsub.f32 %v4863_v56, %v1221_v33 }
 0x238   : > { %v5043_v1 = vpop.eup %4120 }
 0x239   : > { %v1316_v29 = vmul.f32 1.442695, %v1264_v55  ;;  %1372 = vadd.xlane.f32.xlu0 %v5043_v1 }
 0x23a   : > { %v1223_v47 = vpop.xlane.xlu1 %1222 }
 0x23b   : > { %4128 = vpow2.f32 %v1316_v29  ;;  %v1265_v37 = vsub.f32 %v4869_v19, %v1223_v47 }
 0x23c   : > { %v5047_v52 = vpop.eup %4122 }
 0x23d   : > { %v1318_v44 = vmul.f32 1.442695, %v1265_v37  ;;  %1374 = vadd.xlane.f32.xlu1 %v5047_v52 }
 0x23e   : > { %v1225_v59 = vpop.xlane.xlu0 %1224 }
 0x23f   : > { %4130 = vpow2.f32 %v1318_v44  ;;  %v1266_v13 = vsub.f32 %v4877_v54, %v1225_v59 }
 0x240   : > { %v5051_v24 = vpop.eup %4124 }
 0x241   : > { %v1320_v56 = vmul.f32 1.442695, %v1266_v13  ;;  %1376 = vadd.xlane.f32.xlu0 %v5051_v24 }
 0x242   : > { %v1227_v4 = vpop.xlane.xlu1 %1226 }
 0x243   : > { %4132 = vpow2.f32 %v1320_v56  ;;  %v1267_v28 = vsub.f32 %v4883_v10, %v1227_v4 }
 0x244   : > { %v5055_v40 = vpop.eup %4126  ;;  %v5070_v10 = vpop.f32.mrf.mxu1 }
 0x245   : > { %v1322_v19 = vmul.f32 1.442695, %v1267_v28  ;;  %1378 = vadd.xlane.f32.xlu1 %v5055_v40 }
 0x246   : > { %v5072_v29 = vpop.f32.mrf.mxu1 }
 0x247   : > { %4134 = vpow2.f32 %v1322_v19 }
 0x248   : > { %v5058_v16 = vpop.eup %4128  ;;  %v5074_v47 = vpop.f32.mrf.mxu1 }
 0x249   : > { %1380 = vadd.xlane.f32.xlu0 %v5058_v16 }
 0x24a   : > { %v5076_v37 = vpop.f32.mrf.mxu1 }
 0x24c   : > { %v5061_v54 = vpop.eup %4130  ;;  %v5078_v44 = vpop.f32.mrf.mxu1 }
 0x24d   : > { %1382 = vadd.xlane.f32.xlu1 %v5061_v54 }
 0x24e   : > { %v5080_v59 = vpop.f32.mrf.mxu1 }
 0x250   : > { %v5064_v33 = vpop.eup %4132  ;;  %v5082_v13 = vpop.f32.mrf.mxu1 }
 0x251   : > { %1384 = vadd.xlane.f32.xlu0 %v5064_v33 }
 0x252   : > { %v5084_v56 = vpop.f32.mrf.mxu1 }
 0x254   : > { %v5067_v55 = vpop.eup %4134  ;;  %v5086_v4 = vpop.f32.mrf.mxu1 }
 0x255   : > { %1386 = vadd.xlane.f32.xlu1 %v5067_v55 }
 0x256   : > { %v5088_v28 = vpop.f32.mrf.mxu1 }
 0x258   : > { %v5090_v19 = vpop.f32.mrf.mxu1 }
 0x25a   : > { %v5092_v42 = vpop.f32.mrf.mxu1 }
 0x25c   : > { %v5095_v7 = vpop.f32.mrf.mxu1 }
 0x25d   : > { %6150 = vst [vmem:[#allocation41_spill] sm:$0xff] %v5095_v7 }
 0x25e   : > { %v5098_v45 = vpop.f32.mrf.mxu1 }
 0x25f   : > { %6151 = vst [vmem:[#allocation42_spill] sm:$0xff] %v5098_v45 }
 0x282   : > { %v1341_v0 = vpop.xlane.xlu0 %1340 }
 0x283   : > { %4136 = vrcp.f32 %v1341_v0 }
 0x286   : > { %v1343_v34 = vpop.xlane.xlu1 %1342  ;;  %v1229_v20 = vpop.xlane.xlu0 %1228 }
 0x287   : > { %4138 = vrcp.f32 %v1343_v34  ;;  %v1268_v17 = vsub.f32 %v4926_v36, %v1229_v20  ;;  %v5101_v36 = vpop.f32.mrf.mxu1 }
 0x288   : > { %6152 = vst [vmem:[#allocation43_spill] sm:$0xff] %v5101_v36 }
 0x289   : > { %v1324_v25 = vmul.f32 1.442695, %v1268_v17  ;;  %v5106_v45 = vpop.f32.mrf.mxu1 }
 0x28a   : > { %v1231_v22 = vpop.xlane.xlu1 %1230  ;;  %v1345_v5 = vpop.xlane.xlu0 %1344  ;;  %6153 = vst [vmem:[#allocation44_spill] sm:$0xff] %v5106_v45 }
 0x28b   : > { %4140 = vpow2.f32 %v1324_v25  ;;  %v1269_v60 = vsub.f32 %v4941_v8, %v1231_v22 }
 0x28c   : > { %4142 = vrcp.f32 %v1345_v5 }
 0x28d   : > { %v1326_v53 = vmul.f32 1.442695, %v1269_v60 }
 0x28e   : > { %v1347_v0 = vpop.xlane.xlu1 %1346  ;;  %v1233_v38 = vpop.xlane.xlu0 %1232 }
 0x28f   : > { %4144 = vpow2.f32 %v1326_v53  ;;  %v1270_v32 = vsub.f32 %v4947_v26, %v1233_v38 }
 0x290   : > { %4146 = vrcp.f32 %v1347_v0  ;;  %v4137_v17 = vpop.eup %4136 }
 0x291   : > { %v1328_v34 = vmul.f32 1.442695, %v1270_v32  ;;  %v1436_v8 = vmul.f32 %v4137_v17, %v4923_v51  ;;  %v5117_v51 = vpop.f32.mrf.mxu1  ;;  %v6157_v17 = vmov 0  }
 0x292   : > { %v1235_v20 = vpop.xlane.xlu1 %1234  ;;  %v1349_v7 = vpop.xlane.xlu0 %1348  ;;  %6156 = vst [vmem:[#allocation47_spill] sm:$0xff] %v5117_v51 }
 0x293   : > { %4148 = vpow2.f32 %v1328_v34  ;;  %v1271_v25 = vsub.f32 %v4963_v35, %v1235_v20  ;;  %v5113_v35 = vpop.f32.mrf.mxu0 }
 0x294   : > { %v4139_v22 = vpop.eup %4138  ;;  %4150 = vrcp.f32 %v1349_v7  ;;  %6155 = vst [vmem:[#allocation46_spill] sm:$0xff] %v5113_v35 }
 0x295   : > { %v1330_v60 = vmul.f32 1.442695, %v1271_v25  ;;  %v1437_v5 = vmul.f32 %v4139_v22, %v4936_v21  ;;  %v5123_v25 = vpop.f32.mrf.mxu0 }
 0x296   : > { %v1351_v38 = vpop.xlane.xlu1 %1350  ;;  %v1237_v53 = vpop.xlane.xlu0 %1236 }
 0x297   : > { %4152 = vpow2.f32 %v1330_v60  ;;  %v1272_v32 = vsub.f32 %v4969_v62, %v1237_v53  ;;  %v5109_v26 = vpack.c.bf16 %v1437_v5, %v1436_v8  ;;  %v5128_v5 = vpop.f32.mrf.mxu1 }
 0x298   : > { %v5111_v0 = vpop.eup %4140  ;;  %4154 = vrcp.f32 %v1351_v38  ;;  %6158 = vst [vmem:[#allocation48_spill] sm:$0xff] %v5128_v5  ;;  %v5130_v38 = vpop.f32.mrf.mxu0 }
 0x299   : > { %6154 = vst [vmem:[#allocation45_spill] sm:$0xff] %v5109_v26  ;;  %v1332_v34 = vmul.f32 1.442695, %v1272_v32  ;;  %1837 = vmatmul.mubr.bf16.vlgmr.msra.gmra.mxu1 %v5109_v26  ;;  %2030 = vmatmul.mubr.bf16.vlgmr.msra.gmra.mxu0 %v5109_v26  ;;  %v4143_v62 = vpop.eup %4142 }
 0x29a   : > { %1388 = vadd.xlane.f32.xlu0 %v5111_v0  ;;  %v1239_v7 = vpop.xlane.xlu1 %1238  ;;  %v1353_v21 = vpop.xlane.xlu0 %1352  ;;  %1846 = vmatprep.mubr.bf16.mxu1 %v6157_v17 }
 0x29b   : > { %4156 = vpow2.f32 %v1332_v34  ;;  %v1273_v20 = vsub.f32 %v4983_v50, %v1239_v7  ;;  %2039 = vmatprep.mubr.bf16.mxu0 %v6157_v17  ;;  %v1438_v34 = vmul.f32 %v4143_v62, %v4944_v48  ;;  %v5135_v26 = vpop.f32.mrf.mxu0 }
 0x29c   : > { %v5125_v22 = vpop.eup %4144  ;;  %4158 = vrcp.f32 %v1353_v21  ;;  %v5142_v21 = vpop.f32.mrf.mxu1 }
 0x29d   : > { %v4147_v60 = vpop.eup %4146  ;;  %v1334_v8 = vmul.f32 1.442695, %v1273_v20  ;;  %1390 = vadd.xlane.f32.xlu1 %v5125_v22  ;;  %6160 = vst [vmem:[#allocation50_spill] sm:$0xff] %v5142_v21  ;;  %v5144_v51 = vpop.f32.mrf.mxu0 }
 0x29e   : > { %v1355_v53 = vpop.xlane.xlu1 %1354  ;;  %v1241_v32 = vpop.xlane.xlu0 %1240  ;;  %v1439_v50 = vmul.f32 %v4147_v60, %v4958_v41 }
 0x29f   : > { %4160 = vpow2.f32 %v1334_v8  ;;  %v1274_v7 = vsub.f32 %v4991_v30, %v1241_v32  ;;  %v5151_v60 = vpop.f32.mrf.mxu0  ;;  %v4049_v32 = vld [vmem:[#allocation10 + $0x38] sm:$0xff]  }
 0x2a0   : > { %v5137_v35 = vpop.eup %4148  ;;  %4162 = vrcp.f32 %v1355_v53  ;;  %v5139_v20 = vpack.c.bf16 %v1439_v50, %v1438_v34  ;;  %6161 = vst [vmem:[#allocation51_spill] sm:$0xff] %v5151_v60  ;;  %v4048_v53 = vld [vmem:[#allocation10 + $0x78] sm:$0xff]  }
 0x2a1   : > { %v1336_v5 = vmul.f32 1.442695, %v1274_v7  ;;  %1392 = vadd.xlane.f32.xlu0 %v5137_v35  ;;  %v4151_v41 = vpop.eup %4150  ;;  %v5156_v7 = vpop.f32.mrf.mxu1  ;;  %3502 = vmatprep.subr.bf16.mxu1 %v4048_v53 }
 0x2a2   : > { %6159 = vst [vmem:[#allocation49_spill] sm:$0xff] %v5139_v20  ;;  %1847 = vmatmul.mubr.bf16.gmra.mxu1 %v5139_v20  ;;  %2040 = vmatmul.mubr.bf16.gmra.mxu0 %v5139_v20  ;;  %v1243_v48 = vpop.xlane.xlu1 %1242  ;;  %v1357_v62 = vpop.xlane.xlu0 %1356  ;;  %6162 = vst [vmem:[#allocation52_spill] sm:$0xff] %v5156_v7 }
 0x2a3   : > { %4164 = vpow2.f32 %v1336_v5  ;;  %v1275_v30 = vsub.f32 %v5005_v2, %v1243_v48  ;;  %1856 = vmatprep.mubr.bf16.mxu1 %v6157_v17  ;;  %2049 = vmatprep.mubr.bf16.mxu0 %v6157_v17  ;;  %v5158_v5 = vpop.f32.mrf.mxu0  ;;  %v1440_v48 = vmul.f32 %v4151_v41, %v4966_v31  ;;  %v5169_v7 = vpop.f32.mrf.mxu1 }
 0x2a4   : > { %v5153_v8 = vpop.eup %4152  ;;  %4166 = vrcp.f32 %v1357_v62  ;;  %3503 = vmatpush3.bf16.msra.mxu1 %v4049_v32  ;;  %6165 = vst [vmem:[#allocation55_spill] sm:$0xff] %v5169_v7 }
 0x2a5   : > { %v4155_v34 = vpop.eup %4154  ;;  %v1338_v50 = vmul.f32 1.442695, %v1275_v30  ;;  %1394 = vadd.xlane.f32.xlu1 %v5153_v8  ;;  %v5162_v21 = vpop.f32.mrf.mxu0 }
 0x2a6   : > { %v1359_v2 = vpop.xlane.xlu1 %1358  ;;  %v1441_v20 = vmul.f32 %v4155_v34, %v4978_v39  ;;  %6163 = vst [vmem:[#allocation53_spill] sm:$0xff] %v5162_v21  ;;  %v5182_v32 = vpop.f32.mrf.mxu1 }
 0x2a7   : > { %4168 = vpow2.f32 %v1338_v50  ;;  %v5171_v62 = vpop.f32.mrf.mxu0  ;;  %6167 = vst [vmem:[#allocation57_spill] sm:$0xff] %v5182_v32 }
 0x2a8   : > { %v5164_v36 = vpop.eup %4156  ;;  %4170 = vrcp.f32 %v1359_v2  ;;  %v5166_v30 = vpack.c.bf16 %v1441_v20, %v1440_v48 }
 0x2a9   : > { %1396 = vadd.xlane.f32.xlu0 %v5164_v36  ;;  %v4159_v39 = vpop.eup %4158  ;;  %v5177_v41 = vpop.f32.mrf.mxu0 }
 0x2aa   : > { %6164 = vst [vmem:[#allocation54_spill] sm:$0xff] %v5166_v30  ;;  %1857 = vmatmul.mubr.bf16.gmra.mxu1 %v5166_v30  ;;  %2050 = vmatmul.mubr.bf16.gmra.mxu0 %v5166_v30  ;;  %v1361_v31 = vpop.xlane.xlu0 %1360  ;;  %6166 = vst [vmem:[#allocation56_spill] sm:$0xff] %v5177_v41  ;;  %v1442_v2 = vmul.f32 %v4159_v39, %v4988_v63 }
 0x2ab   : > { %1866 = vmatprep.mubr.bf16.mxu1 %v6157_v17  ;;  %2059 = vmatprep.mubr.bf16.mxu0 %v6157_v17  ;;  %4172 = vrcp.f32 %v1361_v31  ;;  %v5184_v34 = vpop.f32.mrf.mxu0  ;;  %v5195_v31 = vpop.f32.mrf.mxu1 }
 0x2ac   : > { %v5179_v20 = vpop.eup %4160  ;;  %6168 = vst [vmem:[#allocation58_spill] sm:$0xff] %v5184_v34  ;;  %6171 = vst [vmem:[#allocation61_spill] sm:$0xff] %v5195_v31 }
 0x2ad   : > { %v4163_v53 = vpop.eup %4162  ;;  %1398 = vadd.xlane.f32.xlu1 %v5179_v20  ;;  %v5188_v30 = vpop.f32.mrf.mxu0 }
 0x2ae   : > { %v1363_v50 = vpop.xlane.xlu1 %1362  ;;  %v1443_v48 = vmul.f32 %v4163_v53, %v5000_v11  ;;  %6169 = vst [vmem:[#allocation59_spill] sm:$0xff] %v5188_v30  ;;  %v4050_v53 = vld [vmem:[#allocation10 + $0x70] sm:$0xff]   ;;  %v5208_v31 = vpop.f32.mrf.mxu1 }
 0x2af   : > { %4174 = vrcp.f32 %v1363_v50  ;;  %v5197_v45 = vpop.f32.mrf.mxu0  ;;  %v4051_v50 = vld [vmem:[#allocation10 + $0x30] sm:$0xff]   ;;  %6174 = vst [vmem:[#allocation64_spill] sm:$0xff] %v5208_v31  ;;  %3504 = vmatprep.subr.bf16.mxu1 %v4050_v53 }
 0x2b0   : > { %v5190_v7 = vpop.eup %4164  ;;  %v5192_v41 = vpack.c.bf16 %v1443_v48, %v1442_v2  ;;  %6172 = vst [vmem:[#allocation62_spill] sm:$0xff] %v5197_v45  ;;  %3505 = vmatpush3.bf16.msra.mxu1 %v4051_v50 }
 0x2b1   : > { %1400 = vadd.xlane.f32.xlu0 %v5190_v7  ;;  %v4167_v39 = vpop.eup %4166  ;;  %v5203_v11 = vpop.f32.mrf.mxu0 }
 0x2b2   : > { %6170 = vst [vmem:[#allocation60_spill] sm:$0xff] %v5192_v41  ;;  %1867 = vmatmul.mubr.bf16.gmra.mxu1 %v5192_v41  ;;  %2060 = vmatmul.mubr.bf16.gmra.mxu0 %v5192_v41  ;;  %v1365_v63 = vpop.xlane.xlu0 %1364  ;;  %6173 = vst [vmem:[#allocation63_spill] sm:$0xff] %v5203_v11  ;;  %v1444_v30 = vmul.f32 %v4167_v39, %v5010_v49  ;;  %v418_v11 = vsub.s32 4, %v4731_v3  ;;  %v5225_v39 = vld [vmem:[#allocation7] sm:$0x1f] }
 0x2b3   : > { %1876 = vmatprep.mubr.bf16.mxu1 %v6157_v17  ;;  %2069 = vmatprep.mubr.bf16.mxu0 %v6157_v17  ;;  %4176 = vrcp.f32 %v1365_v63  ;;  %v5210_v32 = vpop.f32.mrf.mxu0  ;;  %v5219_v63 = vpop.f32.mrf.mxu1 }
 0x2b4   : > { %v5205_v2 = vpop.eup %4168  ;;  %6175 = vst [vmem:[#allocation65_spill] sm:$0xff] %v5210_v32  ;;  %6178 = vst [vmem:[#allocation68_spill] sm:$0xff] %v5219_v63 }
 0x2b5   : > { %v4171_v48 = vpop.eup %4170  ;;  %1402 = vadd.xlane.f32.xlu1 %v5205_v2  ;;  %v5215_v34 = vpop.f32.mrf.mxu0 }
 0x2b6   : > { %v1367_v41 = vpop.xlane.xlu1 %1366  ;;  %v1445_v45 = vmul.f32 %v4171_v48, %v5015_v57  ;;  %6176 = vst [vmem:[#allocation66_spill] sm:$0xff] %v5215_v34  ;;  %v5228_v57 = vrot.slane %v5225_v39, %v418_v11  ;;  %v5237_v48 = vpop.f32.mrf.mxu1 }
 0x2b7   : > { %4178 = vrcp.f32 %v1367_v41  ;;  %v5221_v60 = vpop.f32.mrf.mxu0  ;;  %6181 = vst [vmem:[#allocation71_spill] sm:$0xff] %v5237_v48 }
 0x2b8   : > { %v5217_v21 = vpack.c.bf16 %v1445_v45, %v1444_v30  ;;  %6179 = vst [vmem:[#allocation69_spill] sm:$0xff] %v5221_v60  ;;  %v4173_v31 = vpop.eup %4172 }
 0x2b9   : > { %v3784_v45 = vpop.f32.mrf.mxu0  ;;  %v1446_v53 = vmul.f32 %v4173_v31, %v5019_v14  ;;  %v4052_v14 = vld [vmem:[#allocation10 + $0x68] sm:$0xff]   ;;  %v4054_v31 = vld [vmem:[#allocation10 + $0xf8] sm:$0xff]  }
 0x2ba   : > { %6177 = vst [vmem:[#allocation67_spill] sm:$0xff] %v5217_v21  ;;  %1877 = vmatmul.mubr.bf16.gmra.mxu1 %v5217_v21  ;;  %2070 = vmatmul.mubr.bf16.gmra.mxu0 %v5217_v21  ;;  %v1369_v49 = vpop.xlane.xlu0 %1368  ;;  %v5233_v41 = vadd.f32 %v3784_v45, %v5228_v57  ;;  %v5247_v45 = vpop.f32.mrf.mxu1 }
 0x2bb   : > { %1886 = vmatprep.mubr.bf16.mxu1 %v6157_v17  ;;  %2079 = vmatprep.mubr.bf16.mxu0 %v6157_v17  ;;  %4180 = vrcp.f32 %v1369_v49  ;;  %v1117_v21 = vpop.f32.mrf.mxu0  ;;  %6185 = vst [vmem:[#allocation75_spill] sm:$0xff] %v5247_v45 }
 0x2bc   : > { %v4175_v30 = vpop.eup %4174  ;;  %6180 = vst [vmem:[#allocation70_spill] sm:$0xff] %v5233_v41  ;;  %v5240_v11 = vadd.f32 %v1117_v21, %v5228_v57  ;;  %3506 = vmatprep.subr.bf16.mxu1 %v4052_v14  ;;  %3614 = vmatprep.subr.bf16.mxu0 %v4054_v31  ;;  %v4056_v31 = vld [vmem:[#allocation10 + $0xf0] sm:$0xff]  }
 0x2bd   : > { %v1447_v50 = vmul.f32 %v4175_v30, %v5023_v58  ;;  %v3785_v60 = vpop.f32.mrf.mxu0  ;;  %v4053_v58 = vld [vmem:[#allocation10 + $0x28] sm:$0xff]  }
 0x2be   : > { %v1371_v34 = vpop.xlane.xlu1 %1370  ;;  %6182 = vst [vmem:[#allocation72_spill] sm:$0xff] %v5240_v11  ;;  %v5245_v32 = vadd.f32 %v3785_v60, %v5228_v57  ;;  %v5260_v11 = vpop.f32.mrf.mxu1  ;;  %3507 = vmatpush3.bf16.msra.mxu1 %v4053_v58  ;;  %v4058_v58 = vld [vmem:[#allocation10 + $0xe8] sm:$0xff]  }
 0x2bf   : > { %4182 = vrcp.f32 %v1371_v34  ;;  %v5242_v63 = vpack.c.bf16 %v1447_v50, %v1446_v53  ;;  %v5249_v49 = vpop.f32.mrf.mxu0  ;;  %v4055_v34 = vld [vmem:[#allocation10 + $0xb8] sm:$0xff]  }
 0x2c0   : > { %6184 = vst [vmem:[#allocation74_spill] sm:$0xff] %v5245_v32  ;;  %6186 = vst [vmem:[#allocation76_spill] sm:$0xff] %v5249_v49  ;;  %v4177_v30 = vpop.eup %4176  ;;  %3615 = vmatpush3.bf16.msra.mxu0 %v4055_v34 }
 0x2c1   : > { %6183 = vst [vmem:[#allocation73_spill] sm:$0xff] %v5242_v63  ;;  %v3788_v60 = vpop.f32.mrf.mxu0  ;;  %v1448_v32 = vmul.f32 %v4177_v30, %v5027_v46  ;;  %v5270_v46 = vpop.f32.mrf.mxu1  ;;  %v4057_v30 = vld [vmem:[#allocation10 + $0xb0] sm:$0xff]   ;;  %3616 = vmatprep.subr.bf16.mxu0 %v4056_v31 }
 0x2c2   : > { %1887 = vmatmul.mubr.bf16.gmra.mxu1 %v5242_v63  ;;  %2080 = vmatmul.mubr.bf16.gmra.mxu0 %v5242_v63  ;;  %v1373_v21 = vpop.xlane.xlu0 %1372  ;;  %v5256_v50 = vadd.f32 %v3788_v60, %v5228_v57  ;;  %6191 = vst [vmem:[#allocation81_spill] sm:$0xff] %v5270_v46 }
 0x2c3   : > { %1896 = vmatprep.mubr.bf16.mxu1 %v6157_v17  ;;  %2089 = vmatprep.mubr.bf16.mxu0 %v6157_v17  ;;  %4184 = vrcp.f32 %v1373_v21  ;;  %v1133_v63 = vpop.f32.mrf.mxu0 }
 0x2c4   : > { %v4179_v53 = vpop.eup %4178  ;;  %6187 = vst [vmem:[#allocation77_spill] sm:$0xff] %v5256_v50  ;;  %v5263_v45 = vadd.f32 %v1133_v63, %v5228_v57  ;;  %3617 = vmatpush3.bf16.msra.mxu0 %v4057_v30 }
 0x2c5   : > { %v1449_v41 = vmul.f32 %v4179_v53, %v5031_v6  ;;  %v3789_v60 = vpop.f32.mrf.mxu0  ;;  %3618 = vmatprep.subr.bf16.mxu0 %v4058_v58  ;;  %v4065_v58 = vld [vmem:[#allocation10 + $0xd8] sm:$0xff]  }
 0x2c6   : > { %v1375_v49 = vpop.xlane.xlu1 %1374  ;;  %6188 = vst [vmem:[#allocation78_spill] sm:$0xff] %v5263_v45  ;;  %v5268_v14 = vadd.f32 %v3789_v60, %v5228_v57  ;;  %v5283_v60 = vpop.f32.mrf.mxu1 }
 0x2c7   : > { %4186 = vrcp.f32 %v1375_v49  ;;  %v5265_v48 = vpack.c.bf16 %v1449_v41, %v1448_v32  ;;  %v5272_v6 = vpop.f32.mrf.mxu0  ;;  %6194 = vst [vmem:[#allocation84_spill] sm:$0xff] %v5283_v60  ;;  %v4067_v60 = vld [vmem:[#allocation10 + $0x98] sm:$0xff]  }
 0x2c8   : > { %6190 = vst [vmem:[#allocation80_spill] sm:$0xff] %v5268_v14  ;;  %6192 = vst [vmem:[#allocation82_spill] sm:$0xff] %v5272_v6  ;;  %v4181_v21 = vpop.eup %4180  ;;  %v4059_v14 = vld [vmem:[#allocation10 + $0xa8] sm:$0xff]  }
 0x2c9   : > { %6189 = vst [vmem:[#allocation79_spill] sm:$0xff] %v5265_v48  ;;  %v3792_v32 = vpop.f32.mrf.mxu0  ;;  %v1450_v34 = vmul.f32 %v4181_v21, %v5035_v61  ;;  %v4060_v61 = vld [vmem:[#allocation10 + $0x60] sm:$0xff]   ;;  %3619 = vmatpush3.bf16.msra.mxu0 %v4059_v14 }
 0x2ca   : > { %1897 = vmatmul.mubr.bf16.gmra.mxu1 %v5265_v48  ;;  %2090 = vmatmul.mubr.bf16.gmra.mxu0 %v5265_v48  ;;  %v1377_v63 = vpop.xlane.xlu0 %1376  ;;  %v5279_v49 = vadd.f32 %v3792_v32, %v5228_v57  ;;  %v4061_v21 = vld [vmem:[#allocation10 + $0xe0] sm:$0xff]  }
 0x2cb   : > { %1906 = vmatprep.mubr.bf16.mxu1 %v6157_v17  ;;  %2099 = vmatprep.mubr.bf16.mxu0 %v6157_v17  ;;  %4188 = vrcp.f32 %v1377_v63  ;;  %v1149_v48 = vpop.f32.mrf.mxu0  ;;  %v4062_v63 = vld [vmem:[#allocation10 + $0x20] sm:$0xff]  }
 0x2cc   : > { %v4183_v41 = vpop.eup %4182  ;;  %6193 = vst [vmem:[#allocation83_spill] sm:$0xff] %v5279_v49  ;;  %v5286_v45 = vadd.f32 %v1149_v48, %v5228_v57  ;;  %3508 = vmatprep.subr.bf16.mxu1 %v4060_v61  ;;  %3620 = vmatprep.subr.bf16.mxu0 %v4061_v21 }
 0x2cd   : > { %v1451_v53 = vmul.f32 %v4183_v41, %v5039_v43  ;;  %v3793_v32 = vpop.f32.mrf.mxu0  ;;  %v5293_v43 = vpop.f32.mrf.mxu1  ;;  %v4063_v41 = vld [vmem:[#allocation10 + $0xa0] sm:$0xff]   ;;  %3509 = vmatpush3.bf16.msra.mxu1 %v4062_v63 }
 0x2ce   : > { %v1379_v50 = vpop.xlane.xlu1 %1378  ;;  %6195 = vst [vmem:[#allocation85_spill] sm:$0xff] %v5286_v45  ;;  %v5291_v31 = vadd.f32 %v3793_v32, %v5228_v57  ;;  %6198 = vst [vmem:[#allocation88_spill] sm:$0xff] %v5293_v43  ;;  %3621 = vmatpush3.bf16.msra.mxu0 %v4063_v41  ;;  %v4070_v41 = vld [vmem:[#allocation10 + $0x10] sm:$0xff]  }
 0x2cf   : > { %4190 = vrcp.f32 %v1379_v50  ;;  %v5288_v6 = vpack.c.bf16 %v1451_v53, %v1450_v34  ;;  %v5295_v30 = vpop.f32.mrf.mxu0  ;;  %v4064_v50 = vld [vmem:[#allocation10 + $0x58] sm:$0xff]   ;;  %3622 = vmatprep.subr.bf16.mxu0 %v4065_v58 }
 0x2d0   : > { %6197 = vst [vmem:[#allocation87_spill] sm:$0xff] %v5291_v31  ;;  %6199 = vst [vmem:[#allocation89_spill] sm:$0xff] %v5295_v30  ;;  %v4185_v49 = vpop.eup %4184  ;;  %v4066_v30 = vld [vmem:[#allocation10 + $0x18] sm:$0xff]   ;;  %3510 = vmatprep.subr.bf16.mxu1 %v4064_v50  ;;  %v4073_v50 = vld [vmem:[#allocation10 + $0xc8] sm:$0xff]  }
 0x2d1   : > { %6196 = vst [vmem:[#allocation86_spill] sm:$0xff] %v5288_v6  ;;  %v3796_v34 = vpop.f32.mrf.mxu0  ;;  %v1452_v32 = vmul.f32 %v4185_v49, %v5043_v1  ;;  %v4069_v49 = vld [vmem:[#allocation10 + $0xd0] sm:$0xff]   ;;  %3511 = vmatpush3.bf16.msra.mxu1 %v4066_v30 }
 0x2d2   : > { %1907 = vmatmul.mubr.bf16.gmra.mxu1 %v5288_v6  ;;  %2100 = vmatmul.mubr.bf16.gmra.mxu0 %v5288_v6  ;;  %v1381_v48 = vpop.xlane.xlu0 %1380  ;;  %v5302_v14 = vadd.f32 %v3796_v34, %v5228_v57  ;;  %v5306_v6 = vpop.f32.mrf.mxu1 }
 0x2d3   : > { %1916 = vmatprep.mubr.bf16.mxu1 %v6157_v17  ;;  %2109 = vmatprep.mubr.bf16.mxu0 %v6157_v17  ;;  %4192 = vrcp.f32 %v1381_v48  ;;  %v1165_v45 = vpop.f32.mrf.mxu0  ;;  %v4071_v48 = vld [vmem:[#allocation10 + $0x90] sm:$0xff]  }
 0x2d4   : > { %v4187_v53 = vpop.eup %4186  ;;  %6200 = vst [vmem:[#allocation90_spill] sm:$0xff] %v5302_v14  ;;  %v5309_v46 = vadd.f32 %v1165_v45, %v5228_v57  ;;  %v5316_v63 = vpop.f32.mrf.mxu1  ;;  %3623 = vmatpush3.bf16.msra.mxu0 %v4067_v60 }
 0x2d5   : > { %v1453_v31 = vmul.f32 %v4187_v53, %v5047_v52  ;;  %v3797_v21 = vpop.f32.mrf.mxu0  ;;  %v4068_v52 = vld [vmem:[#allocation10 + $0x50] sm:$0xff]   ;;  %3624 = vmatprep.subr.bf16.mxu0 %v4069_v49  ;;  %v4074_v53 = vld [vmem:[#allocation10 + $0x8] sm:$0xff]   ;;  %v4077_v49 = vld [vmem:[#allocation10 + $0xc0] sm:$0xff]  }
 0x2d6   : > { %v1383_v43 = vpop.xlane.xlu1 %1382  ;;  %6201 = vst [vmem:[#allocation91_spill] sm:$0xff] %v5309_v46  ;;  %v5314_v1 = vadd.f32 %v3797_v21, %v5228_v57  ;;  %3512 = vmatprep.subr.bf16.mxu1 %v4068_v52  ;;  %v5324_v58 = vpop.f32.mrf.mxu1  ;;  %v4076_v52 = vld [vmem:[#allocation10 + $0x40] sm:$0xff]  }
 0x2d7   : > { %4194 = vrcp.f32 %v1383_v43  ;;  %v5311_v61 = vpack.c.bf16 %v1453_v31, %v1452_v32  ;;  %v4072_v43 = vld [vmem:[#allocation10 + $0x48] sm:$0xff]   ;;  %3513 = vmatpush3.bf16.msra.mxu1 %v4070_v41 }
 0x2d8   : > { %6203 = vst [vmem:[#allocation93_spill] sm:$0xff] %v5314_v1  ;;  %v4189_v34 = vpop.eup %4188  ;;  %3625 = vmatpush3.bf16.msra.mxu0 %v4071_v48  ;;  %v4075_v32 = vld [vmem:[#allocation10 + $0x88] sm:$0xff]   ;;  %3514 = vmatprep.subr.bf16.mxu1 %v4072_v43  ;;  %v5328_v1 = vpop.f32.mrf.mxu1 }
 0x2d9   : > { %6202 = vst [vmem:[#allocation92_spill] sm:$0xff] %v5311_v61  ;;  %v1454_v60 = vmul.f32 %v4189_v34, %v5051_v24  ;;  %3626 = vmatprep.subr.bf16.mxu0 %v4073_v50  ;;  %v4078_v24 = vld [vmem:[#allocation10] sm:$0xff]  }
 0x2da   : > { %1917 = vmatmul.mubr.bf16.gmra.mxu1 %v5311_v61  ;;  %2110 = vmatmul.mubr.bf16.gmra.mxu0 %v5311_v61  ;;  %v1385_v45 = vpop.xlane.xlu0 %1384 }
 0x2db   : > { %1926 = vmatprep.mubr.bf16.mxu1 %v6157_v17  ;;  %2119 = vmatprep.mubr.bf16.mxu0 %v6157_v17  ;;  %4196 = vrcp.f32 %v1385_v45 }
 0x2dc   : > { %v4191_v31 = vpop.eup %4190  ;;  %3515 = vmatpush3.bf16.msra.mxu1 %v4074_v53  ;;  %3627 = vmatpush3.bf16.msra.mxu0 %v4075_v32 }
 0x2dd   : > { %v1455_v30 = vmul.f32 %v4191_v31, %v5055_v40  ;;  %v4079_v40 = vld [vmem:[#allocation10 + $0x80] sm:$0xff]   ;;  %3516 = vmatprep.subr.bf16.mxu1 %v4076_v52  ;;  %3628 = vmatprep.subr.bf16.mxu0 %v4077_v49  ;;  %v5336_v31 = vpop.f32.mrf.mxu1 }
 0x2de   : > { %v1387_v21 = vpop.xlane.xlu1 %1386 }
 0x2df   : > { %4198 = vrcp.f32 %v1387_v21  ;;  %v5326_v61 = vpack.c.bf16 %v1455_v30, %v1454_v60  ;;  %v5340_v50 = vpop.f32.mrf.mxu1 }
 0x2e0   : > { %v4193_v34 = vpop.eup %4192  ;;  %3517 = vmatpush3.bf16.msra.mxu1 %v4078_v24  ;;  %3629 = vmatpush3.bf16.msra.mxu0 %v4079_v40 }
 0x2e1   : > { %6204 = vst [vmem:[#allocation94_spill] sm:$0xff] %v5326_v61  ;;  %v1456_v48 = vmul.f32 %v4193_v34, %v5058_v16  ;;  %v5348_v53 = vpop.f32.mrf.mxu1 }
 0x2e2   : > { %1927 = vmatmul.mubr.bf16.gmra.mxu1 %v5326_v61  ;;  %2120 = vmatmul.mubr.bf16.gmra.mxu0 %v5326_v61 }
 0x2e3   : > { %1936 = vmatprep.mubr.bf16.mxu1 %v6157_v17  ;;  %2129 = vmatprep.mubr.bf16.mxu0 %v6157_v17  ;;  %v5352_v21 = vpop.f32.mrf.mxu1 }
 0x2e4   : > { %v4195_v41 = vpop.eup %4194 }
 0x2e5   : > { %v1457_v45 = vmul.f32 %v4195_v41, %v5061_v54  ;;  %v5358_v52 = vpop.f32.mrf.mxu1 }
 0x2e7   : > { %v5338_v43 = vpack.c.bf16 %v1457_v45, %v1456_v48  ;;  %v5360_v49 = vpop.f32.mrf.mxu1 }
 0x2e8   : > { %v4197_v60 = vpop.eup %4196 }
 0x2e9   : > { %6205 = vst [vmem:[#allocation95_spill] sm:$0xff] %v5338_v43  ;;  %v1458_v54 = vmul.f32 %v4197_v60, %v5064_v33  ;;  %v5362_v33 = vpop.f32.mrf.mxu1 }
 0x2ea   : > { %1937 = vmatmul.mubr.bf16.gmra.mxu1 %v5338_v43  ;;  %2130 = vmatmul.mubr.bf16.gmra.mxu0 %v5338_v43 }
 0x2eb   : > { %1946 = vmatprep.mubr.bf16.mxu1 %v6157_v17  ;;  %2139 = vmatprep.mubr.bf16.mxu0 %v6157_v17 }
 0x2ec   : > { %v4199_v16 = vpop.eup %4198 }
 0x2ed   : > { %v1459_v30 = vmul.f32 %v4199_v16, %v5067_v55  ;;  %v5364_v55 = vpop.f32.mrf.mxu1 }
 0x2ef   : > { %v5350_v32 = vpack.c.bf16 %v1459_v30, %v1458_v54  ;;  %v5366_v24 = vpop.f32.mrf.mxu1 }
 0x2f1   : > { %6206 = vst [vmem:[#allocation96_spill] sm:$0xff] %v5350_v32  ;;  %v5368_v40 = vpop.f32.mrf.mxu1 }
 0x2f2   : > { %1947 = vmatmul.mubr.bf16.gmra.mxu1 %v5350_v32  ;;  %2140 = vmatmul.mubr.bf16.gmra.mxu0 %v5350_v32  ;;  %6207 = vst [vmem:[#allocation97_spill] sm:$0xff] %v5368_v40  ;;  %v5384_v32 = vld [vmem:[#allocation10 + $0x138] sm:$0xff]  }
 0x2f3   : > { %1956 = vmatprep.mubr.bf16.mxu1 %v6157_v17  ;;  %2149 = vmatprep.mubr.bf16.mxu0 %v6157_v17  ;;  %v5370_v34 = vpop.f32.mrf.mxu1 }
 0x2f4   : > { %6208 = vst [vmem:[#allocation98_spill] sm:$0xff] %v5370_v34  ;;  %3798 = vmatprep.subr.bf16.mxu1 %v5384_v32 }
 0x2f5   : > { %v5372_v41 = vpop.f32.mrf.mxu1 }
 0x2f6   : > { %6209 = vst [vmem:[#allocation99_spill] sm:$0xff] %v5372_v41 }
 0x2f7   : > { %v5374_v48 = vpop.f32.mrf.mxu1 }
 0x2f9   : > { %v5376_v45 = vpop.f32.mrf.mxu1 }
 0x2fa   : > { %6210 = vst [vmem:[#allocation100_spill] sm:$0xff] %v5376_v45 }
 0x2fb   : > { %v5378_v60 = vpop.f32.mrf.mxu1 }
 0x2fc   : > { %6211 = vst [vmem:[#allocation101_spill] sm:$0xff] %v5378_v60 }
 0x2fd   : > { %v5380_v16 = vpop.f32.mrf.mxu1 }
 0x2fe   : > { %6212 = vst [vmem:[#allocation102_spill] sm:$0xff] %v5380_v16 }
 0x2ff   : > { %v5382_v30 = vpop.f32.mrf.mxu1 }
 0x300   : > { %6213 = vst [vmem:[#allocation103_spill] sm:$0xff] %v5382_v30 }
 0x301   : > { %v5387_v61 = vpop.f32.mrf.mxu1 }
 0x302   : > { %6214 = vst [vmem:[#allocation104_spill] sm:$0xff] %v5387_v61 }
 0x303   : > { %v5389_v46 = vpop.f32.mrf.mxu1 }
 0x304   : > { %6215 = vst [vmem:[#allocation105_spill] sm:$0xff] %v5389_v46 }
 0x305   : > { %v5391_v60 = vpop.f32.mrf.mxu1 }
 0x306   : > { %6216 = vst [vmem:[#allocation106_spill] sm:$0xff] %v5391_v60 }
 0x307   : > { %v5395_v41 = vpop.f32.mrf.mxu1 }
 0x308   : > { %6217 = vst [vmem:[#allocation107_spill] sm:$0xff] %v5395_v41 }
 0x323   : > { %v1389_v54 = vpop.xlane.xlu0 %1388 }
 0x324   : > { %4200 = vrcp.f32 %v1389_v54 }
 0x326   : > { %v1391_v43 = vpop.xlane.xlu1 %1390 }
 0x327   : > { %4202 = vrcp.f32 %v1391_v43 }
 0x32a   : > { %v1393_v14 = vpop.xlane.xlu0 %1392 }
 0x32b   : > { %4204 = vrcp.f32 %v1393_v14  ;;  %v5401_v14 = vpop.f32.mrf.mxu1 }
 0x32c   : > { %6219 = vst [vmem:[#allocation109_spill] sm:$0xff] %v5401_v14 }
 0x32e   : > { %v1395_v45 = vpop.xlane.xlu1 %1394 }
 0x32f   : > { %4206 = vrcp.f32 %v1395_v45 }
 0x331   : > { %v4201_v16 = vpop.eup %4200 }
 0x332   : > { %v1397_v54 = vpop.xlane.xlu0 %1396  ;;  %v1460_v30 = vmul.f32 %v4201_v16, %v5111_v0 }
 0x333   : > { %4208 = vrcp.f32 %v1397_v54 }
 0x334   : > { %v4203_v34 = vpop.eup %4202 }
 0x335   : > { %v1461_v43 = vmul.f32 %v4203_v34, %v5125_v22  ;;  %v5407_v34 = vpop.f32.mrf.mxu1 }
 0x336   : > { %v1399_v40 = vpop.xlane.xlu1 %1398  ;;  %6220 = vst [vmem:[#allocation110_spill] sm:$0xff] %v5407_v34 }
 0x337   : > { %4210 = vrcp.f32 %v1399_v40  ;;  %v5397_v61 = vpack.c.bf16 %v1461_v43, %v1460_v30  ;;  %v5413_v54 = vpop.f32.mrf.mxu1 }
 0x338   : > { %v4205_v45 = vpop.eup %4204  ;;  %6222 = vst [vmem:[#allocation112_spill] sm:$0xff] %v5413_v54 }
 0x339   : > { %6218 = vst [vmem:[#allocation108_spill] sm:$0xff] %v5397_v61  ;;  %1957 = vmatmul.mubr.bf16.gmra.mxu1 %v5397_v61  ;;  %2150 = vmatmul.mubr.bf16.gmra.mxu0 %v5397_v61  ;;  %v1462_v22 = vmul.f32 %v4205_v45, %v5137_v35  ;;  %v5419_v45 = vpop.f32.mrf.mxu1 }
 0x33a   : > { %v1401_v46 = vpop.xlane.xlu0 %1400  ;;  %1966 = vmatprep.mubr.bf16.mxu1 %v6157_v17  ;;  %2159 = vmatprep.mubr.bf16.mxu0 %v6157_v17  ;;  %6223 = vst [vmem:[#allocation113_spill] sm:$0xff] %v5419_v45 }
 0x33b   : > { %4212 = vrcp.f32 %v1401_v46 }
 0x33c   : > { %v4207_v0 = vpop.eup %4206 }
 0x33d   : > { %v1463_v40 = vmul.f32 %v4207_v0, %v5153_v8 }
 0x33e   : > { %v1403_v16 = vpop.xlane.xlu1 %1402 }
 0x33f   : > { %4214 = vrcp.f32 %v1403_v16  ;;  %v5409_v30 = vpack.c.bf16 %v1463_v40, %v1462_v22  ;;  %v5425_v22 = vpop.f32.mrf.mxu1 }
 0x340   : > { %v4209_v43 = vpop.eup %4208  ;;  %6225 = vst [vmem:[#allocation115_spill] sm:$0xff] %v5425_v22 }
 0x341   : > { %6221 = vst [vmem:[#allocation111_spill] sm:$0xff] %v5409_v30  ;;  %1967 = vmatmul.mubr.bf16.gmra.mxu1 %v5409_v30  ;;  %2160 = vmatmul.mubr.bf16.gmra.mxu0 %v5409_v30  ;;  %v1464_v8 = vmul.f32 %v4209_v43, %v5164_v36  ;;  %v5431_v43 = vpop.f32.mrf.mxu1 }
 0x342   : > { %1976 = vmatprep.mubr.bf16.mxu1 %v6157_v17  ;;  %2169 = vmatprep.mubr.bf16.mxu0 %v6157_v17  ;;  %6226 = vst [vmem:[#allocation116_spill] sm:$0xff] %v5431_v43 }
 0x344   : > { %v4211_v35 = vpop.eup %4210 }
 0x345   : > { %v1465_v46 = vmul.f32 %v4211_v35, %v5179_v20 }
 0x347   : > { %v5421_v0 = vpack.c.bf16 %v1465_v46, %v1464_v8  ;;  %v414_v8 = vsub.s32 3, %v4731_v3  ;;  %v5438_v46 = vpop.f32.mrf.mxu1 }
 0x348   : > { %v4213_v40 = vpop.eup %4212  ;;  %6228 = vst [vmem:[#allocation118_spill] sm:$0xff] %v5438_v46 }
 0x349   : > { %6224 = vst [vmem:[#allocation114_spill] sm:$0xff] %v5421_v0  ;;  %1977 = vmatmul.mubr.bf16.gmra.mxu1 %v5421_v0  ;;  %2170 = vmatmul.mubr.bf16.gmra.mxu0 %v5421_v0  ;;  %v1466_v36 = vmul.f32 %v4213_v40, %v5190_v7  ;;  %v406_v0 = vsub.s32 1, %v4731_v3  ;;  %v5443_v7 = vrot.slane %v5225_v39, %v414_v8  ;;  %v5447_v40 = vpop.f32.mrf.mxu0 }
 0x34a   : > { %1986 = vmatprep.mubr.bf16.mxu1 %v6157_v17  ;;  %2179 = vmatprep.mubr.bf16.mxu0 %v6157_v17  ;;  %v410_v17 = vsub.s32 2, %v4731_v3  ;;  %6230 = vst [vmem:[#allocation120_spill] sm:$0xff] %v5447_v40 }
 0x34b   : > { %v867_v8 = vadd.f32 %v5076_v37, %v5443_v7 }
 0x34c   : > { %v4215_v16 = vpop.eup %4214 }
 0x34d   : > { %v1467_v20 = vmul.f32 %v4215_v16, %v5205_v2  ;;  %v5445_v2 = vpop.f32.mrf.mxu1  ;;  %v5450_v16 = vrot.slane %v5225_v39, %v406_v0  ;;  %v1490_v37 = vmax.f32 %v867_v8, 0.0 }
 0x34e   : > { %6229 = vst [vmem:[#allocation119_spill] sm:$0xff] %v5445_v2 }
 0x34f   : > { %v5433_v35 = vpack.c.bf16 %v1467_v20, %v1466_v36  ;;  %v5453_v36 = vrot.slane %v5225_v39, %v410_v17  ;;  %v1054_v20 = vadd.f32 %v5130_v38, %v5228_v57  ;;  %v674_v3 = vadd.f32 %v4745_v12, %v5450_v16 }
 0x350   : > { %v670_v0 = vadd.f32 %v4739_v9, %v5450_v16  ;;  %v680_v9 = vadd.f32 %v4751_v15, %v5450_v16  ;;  %v1065_v15 = vadd.f32 %v5135_v26, %v5228_v57 }
 0x351   : > { %6227 = vst [vmem:[#allocation117_spill] sm:$0xff] %v5433_v35  ;;  %1987 = vmatmul.mubr.bf16.gmra.mxu1 %v5433_v35  ;;  %2180 = vmatmul.mubr.bf16.gmra.mxu0 %v5433_v35  ;;  %v1057_v35 = vadd.f32 %v5144_v51, %v5228_v57  ;;  %v861_v39 = vadd.f32 %v5070_v10, %v5453_v36  ;;  %v1487_v12 = vmax.f32 %v1054_v20, 0.0  ;;  %v1488_v22 = vmax.f32 %v674_v3, 0.0 }
 0x352   : > { %v865_v38 = vadd.f32 %v5074_v47, %v5453_v36  ;;  %v863_v51 = vadd.f32 %v5072_v29, %v5443_v7  ;;  %v1484_v40 = vmax.f32 %v670_v0, 0.0  ;;  %v684_v47 = vadd.f32 %v4757_v18, %v5450_v16 }
 0x353   : > { %v1491_v46 = vmax.f32 %v1057_v35, 0.0  ;;  %v1485_v54 = vmax.f32 %v861_v39, 0.0  ;;  %v1062_v0 = vadd.f32 %v5123_v25, %v5228_v57  ;;  %v871_v18 = vadd.f32 %v5078_v44, %v5453_v36 }
 0x354   : > { %v1489_v10 = vmax.f32 %v865_v38, 0.0  ;;  %v1486_v45 = vmax.f32 %v863_v51, 0.0  ;;  %v875_v25 = vadd.f32 %v5082_v13, %v5453_v36  ;;  %v5489_v51 = vadd.f32 %v4763_v23, %v5450_v16 }
 0x355   : > { %v1495_v44 = vmax.f32 %v1062_v0, 0.0  ;;  %v1073_v23 = vadd.f32 %v5171_v62, %v5228_v57  ;;  %v883_v62 = vadd.f32 %v5088_v28, %v5443_v7  ;;  %v6231_v28 = vld [vmem:[#allocation16_spill] sm:$0xff] }
 0x359   : > { %v1838_v30 = vpop.f32.mrf.mxu1  ;;  %v2031_v61 = vpop.f32.mrf.mxu0 }
 0x35a   : > { %v2190_v39 = vmul.f32 %v1838_v30, %v1484_v40  ;;  %v2192_v38 = vmul.f32 %v2031_v61, %v1486_v45  ;;  %v4081_v30 = vld [vmem:[#allocation10 + $0x130] sm:$0xff]   ;;  %v1496_v40 = vmax.f32 %v684_v47, 0.0 }
 0x35b   : > { %v1840_v17 = vpop.f32.mrf.mxu1  ;;  %v2033_v43 = vpop.f32.mrf.mxu0 }
 0x35c   : > { %v2191_v20 = vmul.f32 %v1840_v17, %v1485_v54  ;;  %v2193_v35 = vmul.f32 %v2033_v43, %v1487_v12  ;;  %v1493_v12 = vmax.f32 %v871_v18, 0.0 }
 0x35d   : > { %v1842_v2 = vpop.f32.mrf.mxu1  ;;  %v2035_v34 = vpop.f32.mrf.mxu0 }
 0x35e   : > { %v2194_v14 = vmul.f32 %v1842_v2, %v1488_v22  ;;  %v2196_v29 = vmul.f32 %v2035_v34, %v1490_v37  ;;  %v877_v34 = vadd.f32 %v5084_v56, %v5443_v7  ;;  %v1492_v56 = vmax.f32 %v680_v9, 0.0 }
 0x35f   : > { %v1844_v60 = vpop.f32.mrf.mxu1  ;;  %v2037_v41 = vpop.f32.mrf.mxu0  ;;  %v1070_v9 = vadd.f32 %v5158_v5, %v5228_v57 }
 0x360   : > { %v2195_v3 = vmul.f32 %v1844_v60, %v1489_v10  ;;  %v2197_v8 = vmul.f32 %v2037_v41, %v1491_v46  ;;  %v873_v41 = vadd.f32 %v5080_v59, %v5443_v7  ;;  %v2318_v60 = vpack.c.bf16 %v2194_v14, %v2190_v39 }
 0x361   : > { %v2320_v26 = vpack.c.bf16 %v2196_v29, %v2192_v38  ;;  %v1499_v46 = vmax.f32 %v1065_v15, 0.0  ;;  %v1498_v59 = vmax.f32 %v877_v34, 0.0  ;;  %v694_v14 = vadd.f32 %v4769_v27, %v5450_v16  ;;  %v4082_v29 = vld [vmem:[#allocation10 + $0x128] sm:$0xff]  }
 0x362   : > { %v2319_v22 = vpack.c.bf16 %v2195_v3, %v2191_v20  ;;  %v2321_v2 = vpack.c.bf16 %v2197_v8, %v2193_v35  ;;  %v1848_v54 = vpop.f32.mrf.mxu1  ;;  %v2041_v43 = vpop.f32.mrf.mxu0  ;;  %v1494_v37 = vmax.f32 %v873_v41, 0.0  ;;  %v1497_v10 = vmax.f32 %v875_v25, 0.0 }
 0x363   : > { %v881_v27 = vadd.f32 %v5086_v4, %v5453_v36  ;;  %v887_v39 = vadd.f32 %v5092_v42, %v5443_v7  ;;  %v2198_v38 = vmul.f32 %v1848_v54, %v1492_v56  ;;  %v1503_v42 = vmax.f32 %v1070_v9, 0.0  ;;  %v6232_v56 = vld [vmem:[#allocation17_spill] sm:$0xff] }
 0x364   : > { %v1850_v61 = vpop.f32.mrf.mxu1  ;;  %v2043_v45 = vpop.f32.mrf.mxu0  ;;  %2734 = vmatprep.mubr.bf16.mxu1 %v2319_v22  ;;  %2895 = vmatprep.mubr.bf16.mxu0 %v2321_v2  ;;  %v2200_v18 = vmul.f32 %v2041_v43, %v1494_v37  ;;  %v885_v22 = vadd.f32 %v5090_v19, %v5453_v36  ;;  %v1507_v54 = vmax.f32 %v1073_v23, 0.0  ;;  %v1500_v43 = vmax.f32 %v5489_v51, 0.0 }
 0x365   : > { %2735 = vmatmul.mubr.bf16.vlgmr.msra.gmra.mxu1 %v2318_v60  ;;  %2896 = vmatmul.mubr.bf16.vlgmr.msra.gmra.mxu0 %v2320_v26  ;;  %v2199_v8 = vmul.f32 %v1850_v61, %v1493_v12  ;;  %v4083_v61 = vld [vmem:[#allocation10 + $0x120] sm:$0xff]   ;;  %v1506_v19 = vmax.f32 %v887_v39, 0.0  ;;  %v6233_v12 = vld [vmem:[#allocation51_spill] sm:$0xff] }
 0x366   : > { %v1852_v17 = vpop.f32.mrf.mxu1  ;;  %v2045_v13 = vpop.f32.mrf.mxu0  ;;  %3799 = vmatpush3.bf16.msra.mxu1 %v5384_v32  ;;  %v2201_v32 = vmul.f32 %v2043_v45, %v1495_v44  ;;  %v5509_v45 = vadd.f32 %v6231_v28, %v5450_v16  ;;  %v1078_v51 = vadd.f32 %v6233_v12, %v5228_v57  ;;  %v4085_v28 = vld [vmem:[#allocation10 + $0x110] sm:$0xff]  }
 0x367   : > { %3800 = vmatprep.subr.bf16.mxu1 %v4081_v30  ;;  %v2202_v47 = vmul.f32 %v1852_v17, %v1496_v40  ;;  %v2204_v20 = vmul.f32 %v2045_v13, %v1498_v59  ;;  %v704_v40 = vadd.f32 %v6232_v56, %v5450_v16  ;;  %v1501_v59 = vmax.f32 %v881_v27, 0.0 }
 0x368   : > { %v1854_v35 = vpop.f32.mrf.mxu1  ;;  %v2047_v3 = vpop.f32.mrf.mxu0  ;;  %v1502_v17 = vmax.f32 %v883_v62, 0.0  ;;  %v1505_v13 = vmax.f32 %v885_v22, 0.0  ;;  %v6237_v22 = vld [vmem:[#allocation42_spill] sm:$0xff] }
 0x369   : > { %v2203_v0 = vmul.f32 %v1854_v35, %v1497_v10  ;;  %v2205_v15 = vmul.f32 %v2047_v3, %v1499_v46  ;;  %v2322_v25 = vpack.c.bf16 %v2202_v47, %v2198_v38  ;;  %v2324_v60 = vpack.c.bf16 %v2204_v20, %v2200_v18  ;;  %v4084_v20 = vld [vmem:[#allocation10 + $0x118] sm:$0xff]  }
 0x36a   : > { %v1858_v5 = vpop.f32.mrf.mxu1  ;;  %v2051_v34 = vpop.f32.mrf.mxu0  ;;  %3801 = vmatpush3.bf16.msra.mxu1 %v4081_v30  ;;  %v1504_v30 = vmax.f32 %v694_v14, 0.0  ;;  %v6234_v14 = vld [vmem:[#allocation53_spill] sm:$0xff] }
 0x36b   : > { %v2323_v2 = vpack.c.bf16 %v2203_v0, %v2199_v8  ;;  %v2325_v41 = vpack.c.bf16 %v2205_v15, %v2201_v32  ;;  %3802 = vmatprep.subr.bf16.mxu1 %v4082_v29  ;;  %v1081_v37 = vadd.f32 %v6234_v14, %v5228_v57  ;;  %v6235_v0 = vld [vmem:[#allocation41_spill] sm:$0xff]  ;;  %v2206_v39 = vmul.f32 %v1858_v5, %v1500_v43 }
 0x36c   : > { %v1860_v4 = vpop.f32.mrf.mxu1  ;;  %v2053_v26 = vpop.f32.mrf.mxu0  ;;  %v891_v15 = vadd.f32 %v6235_v0, %v5453_v36  ;;  %v2208_v38 = vmul.f32 %v2051_v34, %v1502_v17  ;;  %v1508_v34 = vmax.f32 %v5509_v45, 0.0  ;;  %v1512_v43 = vmax.f32 %v704_v40, 0.0  ;;  %v6240_v17 = vld [vmem:[#allocation19_spill] sm:$0xff]  ;;  %v6242_v40 = vld [vmem:[#allocation62_spill] sm:$0xff] }
 0x36d   : > { %2742 = vmatprep.mubr.bf16.mxu1 %v2323_v2  ;;  %2903 = vmatprep.mubr.bf16.mxu0 %v2325_v41  ;;  %v2207_v35 = vmul.f32 %v1860_v4, %v1501_v59  ;;  %v2209_v3 = vmul.f32 %v2053_v26, %v1503_v42  ;;  %v893_v2 = vadd.f32 %v6237_v22, %v5443_v7  ;;  %v6238_v41 = vld [vmem:[#allocation43_spill] sm:$0xff]  ;;  %v1515_v5 = vmax.f32 %v1081_v37, 0.0  ;;  %v6241_v37 = vld [vmem:[#allocation58_spill] sm:$0xff] }
 0x36e   : > { %v1862_v44 = vpop.f32.mrf.mxu1  ;;  %v2055_v46 = vpop.f32.mrf.mxu0  ;;  %2743 = vmatmul.mubr.bf16.gmra.mxu1 %v2322_v25  ;;  %2904 = vmatmul.mubr.bf16.gmra.mxu0 %v2324_v60  ;;  %v895_v25 = vadd.f32 %v6238_v41, %v5453_v36  ;;  %v1509_v12 = vmax.f32 %v891_v15, 0.0  ;;  %v1086_v45 = vadd.f32 %v6241_v37, %v5228_v57  ;;  %v6243_v15 = vld [vmem:[#allocation47_spill] sm:$0xff]  ;;  %v6245_v41 = vld [vmem:[#allocation48_spill] sm:$0xff] }
 0x36f   : > { %3803 = vmatpush3.bf16.msra.mxu1 %v4082_v29  ;;  %v2210_v10 = vmul.f32 %v1862_v44, %v1504_v30  ;;  %v2212_v9 = vmul.f32 %v2055_v46, %v1506_v19  ;;  %v6236_v29 = vld [vmem:[#allocation44_spill] sm:$0xff]  ;;  %v1511_v19 = vmax.f32 %v1078_v51, 0.0  ;;  %v6239_v44 = vld [vmem:[#allocation18_spill] sm:$0xff]  ;;  %v1510_v51 = vmax.f32 %v893_v2, 0.0 }
 0x370   : > { %v1864_v23 = vpop.f32.mrf.mxu1  ;;  %v2057_v47 = vpop.f32.mrf.mxu0  ;;  %3804 = vmatprep.subr.bf16.mxu1 %v4083_v61  ;;  %v897_v27 = vadd.f32 %v6236_v29, %v5443_v7  ;;  %v5528_v46 = vadd.f32 %v6239_v44, %v5450_v16  ;;  %v1513_v14 = vmax.f32 %v895_v25, 0.0  ;;  %v901_v29 = vadd.f32 %v6243_v15, %v5453_v36 }
 0x371   : > { %v2211_v8 = vmul.f32 %v1864_v23, %v1505_v13  ;;  %v2213_v32 = vmul.f32 %v2057_v47, %v1507_v54  ;;  %v2326_v26 = vpack.c.bf16 %v2210_v10, %v2206_v39  ;;  %v2328_v42 = vpack.c.bf16 %v2212_v9, %v2208_v38 }
 0x372   : > { %v1868_v18 = vpop.f32.mrf.mxu1  ;;  %v2061_v62 = vpop.f32.mrf.mxu0  ;;  %v1514_v56 = vmax.f32 %v897_v27, 0.0  ;;  %v714_v13 = vadd.f32 %v6240_v17, %v5450_v16  ;;  %v1089_v10 = vadd.f32 %v6242_v40, %v5228_v57  ;;  %v903_v25 = vadd.f32 %v6245_v41, %v5443_v7 }
 0x373   : > { %v2327_v60 = vpack.c.bf16 %v2211_v8, %v2207_v35  ;;  %v2329_v4 = vpack.c.bf16 %v2213_v32, %v2209_v3  ;;  %3805 = vmatpush3.bf16.msra.mxu1 %v4083_v61  ;;  %v2214_v39 = vmul.f32 %v1868_v18, %v1508_v34  ;;  %v2216_v38 = vmul.f32 %v2061_v62, %v1510_v51  ;;  %v6247_v34 = vld [vmem:[#allocation20_spill] sm:$0xff] }
 0x374   : > { %v1870_v54 = vpop.f32.mrf.mxu1  ;;  %v2063_v30 = vpop.f32.mrf.mxu0  ;;  %3806 = vmatprep.subr.bf16.mxu1 %v4084_v20  ;;  %v1523_v44 = vmax.f32 %v1089_v10, 0.0  ;;  %v1516_v18 = vmax.f32 %v5528_v46, 0.0  ;;  %v1520_v62 = vmax.f32 %v714_v13, 0.0  ;;  %v1517_v51 = vmax.f32 %v901_v29, 0.0  ;;  %v6250_v46 = vld [vmem:[#allocation59_spill] sm:$0xff]  ;;  %v6252_v29 = vld [vmem:[#allocation64_spill] sm:$0xff] }
 0x375   : > { %2750 = vmatprep.mubr.bf16.mxu1 %v2327_v60  ;;  %2911 = vmatprep.mubr.bf16.mxu0 %v2329_v4  ;;  %v2215_v3 = vmul.f32 %v1870_v54, %v1509_v12  ;;  %v2217_v8 = vmul.f32 %v2063_v30, %v1511_v19  ;;  %v6246_v60 = vld [vmem:[#allocation50_spill] sm:$0xff]  ;;  %v1097_v13 = vadd.f32 %v6250_v46, %v5228_v57  ;;  %v6257_v46 = vld [vmem:[#allocation65_spill] sm:$0xff] }
 0x376   : > { %v1872_v59 = vpop.f32.mrf.mxu1  ;;  %v2065_v61 = vpop.f32.mrf.mxu0  ;;  %2751 = vmatmul.mubr.bf16.gmra.mxu1 %v2326_v26  ;;  %2912 = vmatmul.mubr.bf16.gmra.mxu0 %v2328_v42  ;;  %v905_v4 = vadd.f32 %v6246_v60, %v5453_v36 }
 0x377   : > { %3807 = vmatpush3.bf16.msra.mxu1 %v4084_v20  ;;  %v2218_v9 = vmul.f32 %v1872_v59, %v1512_v43  ;;  %v2220_v23 = vmul.f32 %v2065_v61, %v1514_v56  ;;  %v6244_v20 = vld [vmem:[#allocation52_spill] sm:$0xff]  ;;  %v1519_v43 = vmax.f32 %v1086_v45, 0.0  ;;  %v5547_v56 = vadd.f32 %v6247_v34, %v5450_v16 }
 0x378   : > { %v1874_v47 = vpop.f32.mrf.mxu1  ;;  %v2067_v35 = vpop.f32.mrf.mxu0  ;;  %3808 = vmatprep.subr.bf16.mxu1 %v4085_v28  ;;  %v907_v27 = vadd.f32 %v6244_v20, %v5443_v7  ;;  %v1521_v37 = vmax.f32 %v905_v4, 0.0  ;;  %v6249_v45 = vld [vmem:[#allocation56_spill] sm:$0xff]  ;;  %v917_v20 = vadd.f32 %v6252_v29, %v5443_v7  ;;  %v6254_v4 = vld [vmem:[#allocation61_spill] sm:$0xff]  ;;  %v1531_v34 = vmax.f32 %v1097_v13, 0.0 }
 0x379   : > { %v2219_v32 = vmul.f32 %v1874_v47, %v1513_v14  ;;  %v2221_v0 = vmul.f32 %v2067_v35, %v1515_v5  ;;  %v2330_v54 = vpack.c.bf16 %v2218_v9, %v2214_v39  ;;  %v2332_v30 = vpack.c.bf16 %v2220_v23, %v2216_v38 }
 0x37a   : > { %v1878_v22 = vpop.f32.mrf.mxu1  ;;  %v2071_v2 = vpop.f32.mrf.mxu0  ;;  %v1522_v59 = vmax.f32 %v907_v27, 0.0  ;;  %v1518_v14 = vmax.f32 %v903_v25, 0.0  ;;  %v1094_v40 = vadd.f32 %v6249_v45, %v5228_v57  ;;  %v6253_v25 = vld [vmem:[#allocation57_spill] sm:$0xff]  ;;  %v927_v29 = vadd.f32 %v5260_v11, %v5443_v7 }
 0x37b   : > { %v2331_v26 = vpack.c.bf16 %v2219_v32, %v2215_v3  ;;  %v2333_v42 = vpack.c.bf16 %v2221_v0, %v2217_v8  ;;  %3809 = vmatpush3.bf16.msra.mxu1 %v4085_v28  ;;  %v6248_v28 = vld [vmem:[#allocation21_spill] sm:$0xff]  ;;  %v6251_v0 = vld [vmem:[#allocation55_spill] sm:$0xff]  ;;  %v2222_v27 = vmul.f32 %v1878_v22, %v1516_v18  ;;  %v913_v60 = vadd.f32 %v6253_v25, %v5443_v7  ;;  %v6255_v18 = vld [vmem:[#allocation22_spill] sm:$0xff] }
 0x37c   : > { %v1880_v19 = vpop.f32.mrf.mxu1  ;;  %v2073_v5 = vpop.f32.mrf.mxu0  ;;  %v724_v12 = vadd.f32 %v6248_v28, %v5450_v16  ;;  %v911_v15 = vadd.f32 %v6251_v0, %v5453_v36  ;;  %v2224_v39 = vmul.f32 %v2071_v2, %v1518_v14  ;;  %v1524_v22 = vmax.f32 %v5547_v56, 0.0  ;;  %v6259_v0 = vld [vmem:[#allocation68_spill] sm:$0xff] }
 0x37d   : > { %2758 = vmatprep.mubr.bf16.mxu1 %v2331_v26  ;;  %2919 = vmatprep.mubr.bf16.mxu0 %v2333_v42  ;;  %v2223_v35 = vmul.f32 %v1880_v19, %v1517_v51  ;;  %v2225_v3 = vmul.f32 %v2073_v5, %v1519_v43  ;;  %v915_v26 = vadd.f32 %v6254_v4, %v5453_v36  ;;  %v6256_v51 = vld [vmem:[#allocation23_spill] sm:$0xff]  ;;  %v1526_v45 = vmax.f32 %v913_v60, 0.0 }
 0x37e   : > { %v1882_v61 = vpop.f32.mrf.mxu1  ;;  %v2075_v17 = vpop.f32.mrf.mxu0  ;;  %2759 = vmatmul.mubr.bf16.gmra.mxu1 %v2330_v54  ;;  %2920 = vmatmul.mubr.bf16.gmra.mxu0 %v2332_v30  ;;  %v1528_v2 = vmax.f32 %v724_v12, 0.0  ;;  %v734_v14 = vadd.f32 %v6256_v51, %v5450_v16  ;;  %v1102_v56 = vadd.f32 %v6257_v46, %v5228_v57  ;;  %v6258_v12 = vld [vmem:[#allocation69_spill] sm:$0xff]  ;;  %v6260_v60 = vld [vmem:[#allocation71_spill] sm:$0xff] }
 0x37f   : > { %v2226_v10 = vmul.f32 %v1882_v61, %v1520_v62  ;;  %v2228_v9 = vmul.f32 %v2075_v17, %v1522_v59  ;;  %v1527_v62 = vmax.f32 %v1094_v40, 0.0  ;;  %v5566_v59 = vadd.f32 %v6255_v18, %v5450_v16  ;;  %v6262_v18 = vld [vmem:[#allocation24_spill] sm:$0xff] }
 0x380   : > { %v1884_v23 = vpop.f32.mrf.mxu1  ;;  %v2077_v47 = vpop.f32.mrf.mxu0  ;;  %v1530_v61 = vmax.f32 %v917_v20, 0.0  ;;  %v1529_v40 = vmax.f32 %v915_v26, 0.0  ;;  %v1105_v13 = vadd.f32 %v6258_v12, %v5228_v57  ;;  %v923_v4 = vadd.f32 %v6260_v60, %v5443_v7  ;;  %v6261_v26 = vld [vmem:[#allocation75_spill] sm:$0xff] }
 0x381   : > { %v2227_v8 = vmul.f32 %v1884_v23, %v1521_v37  ;;  %v2229_v32 = vmul.f32 %v2077_v47, %v1523_v44  ;;  %v2334_v30 = vpack.c.bf16 %v2226_v10, %v2222_v27  ;;  %v2336_v19 = vpack.c.bf16 %v2228_v9, %v2224_v39  ;;  %v4086_v44 = vld [vmem:[#allocation10 + $0x108] sm:$0xff]  }
 0x382   : > { %v1888_v38 = vpop.f32.mrf.mxu1  ;;  %v2081_v41 = vpop.f32.mrf.mxu0  ;;  %v1525_v37 = vmax.f32 %v911_v15, 0.0  ;;  %3810 = vmatprep.subr.bf16.mxu1 %v4086_v44  ;;  %v921_v15 = vadd.f32 %v6259_v0, %v5453_v36  ;;  %v1532_v11 = vmax.f32 %v5566_v59, 0.0 }
 0x383   : > { %v2335_v42 = vpack.c.bf16 %v2227_v8, %v2223_v35  ;;  %v2337_v54 = vpack.c.bf16 %v2229_v32, %v2225_v3  ;;  %3811 = vmatpush3.bf16.msra.mxu1 %v4086_v44  ;;  %v2230_v20 = vmul.f32 %v1888_v38, %v1524_v22  ;;  %v2232_v27 = vmul.f32 %v2081_v41, %v1526_v45 }
 0x384   : > { %v1890_v5 = vpop.f32.mrf.mxu1  ;;  %v2083_v43 = vpop.f32.mrf.mxu0  ;;  %v1536_v38 = vmax.f32 %v734_v14, 0.0  ;;  %v1538_v41 = vmax.f32 %v927_v29, 0.0  ;;  %v6266_v29 = vld [vmem:[#allocation81_spill] sm:$0xff] }
 0x385   : > { %2766 = vmatprep.mubr.bf16.mxu1 %v2335_v42  ;;  %2927 = vmatprep.mubr.bf16.mxu0 %v2337_v54  ;;  %v2231_v35 = vmul.f32 %v1890_v5, %v1525_v37  ;;  %v2233_v3 = vmul.f32 %v2083_v43, %v1527_v62  ;;  %v925_v42 = vadd.f32 %v6261_v26, %v5453_v36  ;;  %v1535_v62 = vmax.f32 %v1102_v56, 0.0  ;;  %v6263_v37 = vld [vmem:[#allocation63_spill] sm:$0xff] }
 0x386   : > { %v1892_v17 = vpop.f32.mrf.mxu1  ;;  %v2085_v28 = vpop.f32.mrf.mxu0  ;;  %2767 = vmatmul.mubr.bf16.gmra.mxu1 %v2334_v30  ;;  %2928 = vmatmul.mubr.bf16.gmra.mxu0 %v2336_v19  ;;  %v1110_v45 = vadd.f32 %v6263_v37, %v5228_v57 }
 0x387   : > { %v2234_v10 = vmul.f32 %v1892_v17, %v1528_v2  ;;  %v2236_v9 = vmul.f32 %v2085_v28, %v1530_v61  ;;  %v740_v61 = vadd.f32 %v6262_v18, %v5450_v16  ;;  %v1533_v17 = vmax.f32 %v921_v15, 0.0 }
 0x388   : > { %v1894_v23 = vpop.f32.mrf.mxu1  ;;  %v2087_v47 = vpop.f32.mrf.mxu0  ;;  %v1534_v28 = vmax.f32 %v923_v4, 0.0  ;;  %v1537_v51 = vmax.f32 %v925_v42, 0.0  ;;  %v6268_v42 = vld [vmem:[#allocation84_spill] sm:$0xff] }
 0x389   : > { %v2235_v8 = vmul.f32 %v1894_v23, %v1529_v40  ;;  %v2237_v32 = vmul.f32 %v2087_v47, %v1531_v34  ;;  %v2338_v19 = vpack.c.bf16 %v2234_v10, %v2230_v20  ;;  %v2340_v5 = vpack.c.bf16 %v2236_v9, %v2232_v27  ;;  %v6264_v40 = vld [vmem:[#allocation66_spill] sm:$0xff]  ;;  %v6265_v47 = vld [vmem:[#allocation25_spill] sm:$0xff]  ;;  %v6267_v27 = vld [vmem:[#allocation88_spill] sm:$0xff] }
 0x38a   : > { %v1898_v39 = vpop.f32.mrf.mxu1  ;;  %v2091_v25 = vpop.f32.mrf.mxu0  ;;  %v1539_v34 = vmax.f32 %v1105_v13, 0.0  ;;  %v1113_v46 = vadd.f32 %v6264_v40, %v5228_v57  ;;  %v931_v20 = vadd.f32 %v6266_v29, %v5453_v36  ;;  %v935_v60 = vadd.f32 %v6267_v27, %v5453_v36 }
 0x38b   : > { %v2339_v54 = vpack.c.bf16 %v2235_v8, %v2231_v35  ;;  %v2341_v30 = vpack.c.bf16 %v2237_v32, %v2233_v3  ;;  %v744_v35 = vadd.f32 %v6265_v47, %v5450_v16  ;;  %v937_v3 = vadd.f32 %v5306_v6, %v5443_v7  ;;  %v4087_v6 = vld [vmem:[#allocation10 + $0x100] sm:$0xff]  }
 0x38c   : > { %v1900_v43 = vpop.f32.mrf.mxu1  ;;  %v2093_v44 = vpop.f32.mrf.mxu0  ;;  %v2238_v8 = vmul.f32 %v1898_v39, %v1532_v11  ;;  %v2240_v32 = vmul.f32 %v2091_v25, %v1534_v28  ;;  %v1543_v39 = vmax.f32 %v1110_v45, 0.0  ;;  %v1547_v25 = vmax.f32 %v1113_v46, 0.0  ;;  %3812 = vmatprep.subr.bf16.mxu1 %v4087_v6  ;;  %v6270_v28 = vld [vmem:[#allocation76_spill] sm:$0xff] }
 0x38d   : > { %2774 = vmatprep.mubr.bf16.mxu1 %v2339_v54  ;;  %2935 = vmatprep.mubr.bf16.mxu0 %v2341_v30  ;;  %v2239_v13 = vmul.f32 %v1900_v43, %v1533_v17  ;;  %v2241_v10 = vmul.f32 %v2093_v44, %v1535_v62  ;;  %v933_v54 = vadd.f32 %v6268_v42, %v5443_v7  ;;  %v1544_v44 = vmax.f32 %v744_v35, 0.0 }
 0x38e   : > { %v1902_v22 = vpop.f32.mrf.mxu1  ;;  %v2095_v2 = vpop.f32.mrf.mxu0  ;;  %2775 = vmatmul.mubr.bf16.gmra.mxu1 %v2338_v19  ;;  %2936 = vmatmul.mubr.bf16.gmra.mxu0 %v2340_v5  ;;  %v1546_v62 = vmax.f32 %v937_v3, 0.0  ;;  %v1545_v18 = vmax.f32 %v935_v60, 0.0  ;;  %v941_v3 = vadd.f32 %v5316_v63, %v5453_v36 }
 0x38f   : > { %v2242_v56 = vmul.f32 %v1902_v22, %v1536_v38  ;;  %v2244_v59 = vmul.f32 %v2095_v2, %v1538_v41  ;;  %v1540_v38 = vmax.f32 %v740_v61, 0.0  ;;  %v6269_v41 = vld [vmem:[#allocation26_spill] sm:$0xff]  ;;  %v1541_v2 = vmax.f32 %v931_v20, 0.0  ;;  %3813 = vmatpush3.bf16.msra.mxu1 %v4087_v6  ;;  %v6271_v61 = vld [vmem:[#allocation27_spill] sm:$0xff] }
 0x390   : > { %v1904_v14 = vpop.f32.mrf.mxu1  ;;  %v2097_v12 = vpop.f32.mrf.mxu0  ;;  %v750_v22 = vadd.f32 %v6269_v41, %v5450_v16  ;;  %v1542_v17 = vmax.f32 %v933_v54, 0.0  ;;  %v943_v20 = vadd.f32 %v5324_v58, %v5443_v7  ;;  %v6273_v58 = vld [vmem:[#allocation28_spill] sm:$0xff] }
 0x391   : > { %v2243_v9 = vmul.f32 %v1904_v14, %v1537_v51  ;;  %v2245_v23 = vmul.f32 %v2097_v12, %v1539_v34  ;;  %v2342_v30 = vpack.c.bf16 %v2242_v56, %v2238_v8  ;;  %v2344_v19 = vpack.c.bf16 %v2244_v59, %v2240_v32 }
 0x392   : > { %v1908_v0 = vpop.f32.mrf.mxu1  ;;  %v2101_v15 = vpop.f32.mrf.mxu0  ;;  %v1121_v51 = vadd.f32 %v6270_v28, %v5228_v57  ;;  %v945_v8 = vadd.f32 %v5328_v1, %v5453_v36  ;;  %v1548_v1 = vmax.f32 %v750_v22, 0.0  ;;  %v1550_v6 = vmax.f32 %v943_v20, 0.0 }
 0x393   : > { %v2343_v4 = vpack.c.bf16 %v2243_v9, %v2239_v13  ;;  %v2345_v26 = vpack.c.bf16 %v2245_v23, %v2241_v10  ;;  %v754_v13 = vadd.f32 %v6271_v61, %v5450_v16  ;;  %v947_v10 = vadd.f32 %v5336_v31, %v5443_v7  ;;  %v6272_v31 = vld [vmem:[#allocation72_spill] sm:$0xff] }
 0x394   : > { %v1910_v5 = vpop.f32.mrf.mxu1  ;;  %v2103_v43 = vpop.f32.mrf.mxu0  ;;  %v2246_v9 = vmul.f32 %v1908_v0, %v1540_v38  ;;  %v2248_v23 = vmul.f32 %v2101_v15, %v1542_v17  ;;  %v1551_v0 = vmax.f32 %v6272_v31, 0.0  ;;  %v1555_v15 = vmax.f32 %v1121_v51, 0.0 }
 0x395   : > { %2782 = vmatprep.mubr.bf16.mxu1 %v2343_v4  ;;  %2943 = vmatprep.mubr.bf16.mxu0 %v2345_v26  ;;  %v2247_v56 = vmul.f32 %v1910_v5, %v1541_v2  ;;  %v2249_v59 = vmul.f32 %v2103_v43, %v1543_v39  ;;  %v1552_v42 = vmax.f32 %v754_v13, 0.0  ;;  %v1554_v54 = vmax.f32 %v947_v10, 0.0  ;;  %v6274_v2 = vld [vmem:[#allocation29_spill] sm:$0xff] }
 0x396   : > { %v1912_v34 = vpop.f32.mrf.mxu1  ;;  %v2105_v11 = vpop.f32.mrf.mxu0  ;;  %2783 = vmatmul.mubr.bf16.gmra.mxu1 %v2342_v30  ;;  %2944 = vmatmul.mubr.bf16.gmra.mxu0 %v2344_v19  ;;  %v1549_v19 = vmax.f32 %v941_v3, 0.0  ;;  %v1553_v5 = vmax.f32 %v945_v8, 0.0  ;;  %v760_v43 = vadd.f32 %v6273_v58, %v5450_v16  ;;  %v957_v22 = vadd.f32 %v5358_v52, %v5443_v7  ;;  %v6275_v52 = vld [vmem:[#allocation70_spill] sm:$0xff] }
 0x397   : > { %v2250_v37 = vmul.f32 %v1912_v34, %v1544_v44  ;;  %v2252_v45 = vmul.f32 %v2105_v11, %v1546_v62  ;;  %v1559_v10 = vmax.f32 %v6275_v52, 0.0  ;;  %v6281_v52 = vld [vmem:[#allocation33_spill] sm:$0xff] }
 0x398   : > { %v1914_v40 = vpop.f32.mrf.mxu1  ;;  %v2107_v46 = vpop.f32.mrf.mxu0 }
 0x399   : > { %v2251_v14 = vmul.f32 %v1914_v40, %v1545_v18  ;;  %v2253_v12 = vmul.f32 %v2107_v46, %v1547_v25  ;;  %v2346_v27 = vpack.c.bf16 %v2250_v37, %v2246_v9  ;;  %v2348_v60 = vpack.c.bf16 %v2252_v45, %v2248_v23  ;;  %v6276_v9 = vld [vmem:[#allocation74_spill] sm:$0xff] }
 0x39a   : > { %v1918_v47 = vpop.f32.mrf.mxu1  ;;  %v2111_v35 = vpop.f32.mrf.mxu0  ;;  %v764_v18 = vadd.f32 %v6274_v2, %v5450_v16  ;;  %v951_v45 = vadd.f32 %v5340_v50, %v5453_v36  ;;  %v955_v40 = vadd.f32 %v5352_v21, %v5453_v36  ;;  %v1563_v23 = vmax.f32 %v6276_v9, 0.0  ;;  %v6280_v2 = vld [vmem:[#allocation78_spill] sm:$0xff] }
 0x39b   : > { %v2347_v32 = vpack.c.bf16 %v2251_v14, %v2247_v56  ;;  %v2349_v29 = vpack.c.bf16 %v2253_v12, %v2249_v59  ;;  %v2254_v17 = vmul.f32 %v1918_v47, %v1548_v1  ;;  %v2256_v28 = vmul.f32 %v2111_v35, %v1550_v6 }
 0x39c   : > { %v1920_v4 = vpop.f32.mrf.mxu1  ;;  %v2113_v26 = vpop.f32.mrf.mxu0  ;;  %v953_v59 = vadd.f32 %v5348_v53, %v5443_v7  ;;  %v1560_v47 = vmax.f32 %v764_v18, 0.0  ;;  %v1562_v50 = vmax.f32 %v957_v22, 0.0  ;;  %v1556_v21 = vmax.f32 %v760_v43, 0.0 }
 0x39d   : > { %2790 = vmatprep.mubr.bf16.mxu1 %v2347_v32  ;;  %2951 = vmatprep.mubr.bf16.mxu0 %v2349_v29  ;;  %v2255_v34 = vmul.f32 %v1920_v4, %v1549_v19  ;;  %v2257_v11 = vmul.f32 %v2113_v26, %v1551_v0  ;;  %v1557_v8 = vmax.f32 %v951_v45, 0.0  ;;  %v1561_v32 = vmax.f32 %v955_v40, 0.0  ;;  %v6277_v29 = vld [vmem:[#allocation82_spill] sm:$0xff] }
 0x39e   : > { %v1922_v63 = vpop.f32.mrf.mxu1  ;;  %v2115_v30 = vpop.f32.mrf.mxu0  ;;  %2791 = vmatmul.mubr.bf16.gmra.mxu1 %v2346_v27  ;;  %2952 = vmatmul.mubr.bf16.gmra.mxu0 %v2348_v60  ;;  %v1558_v53 = vmax.f32 %v953_v59, 0.0  ;;  %v1137_v20 = vadd.f32 %v6277_v29, %v5228_v57  ;;  %v961_v43 = vadd.f32 %v5360_v49, %v5453_v36  ;;  %v965_v6 = vadd.f32 %v5364_v55, %v5453_v36 }
 0x39f   : > { %v2258_v39 = vmul.f32 %v1922_v63, %v1552_v42  ;;  %v2260_v25 = vmul.f32 %v2115_v30, %v1554_v54  ;;  %v6278_v54 = vld [vmem:[#allocation31_spill] sm:$0xff]  ;;  %v967_v30 = vadd.f32 %v5366_v24, %v5443_v7  ;;  %v1567_v18 = vmax.f32 %v6280_v2, 0.0 }
 0x3a0   : > { %v1924_v44 = vpop.f32.mrf.mxu1  ;;  %v2117_v62 = vpop.f32.mrf.mxu0  ;;  %v774_v63 = vadd.f32 %v6278_v54, %v5450_v16  ;;  %v1571_v22 = vmax.f32 %v1137_v20, 0.0  ;;  %v977_v9 = vadd.f32 %v5374_v48, %v5443_v7  ;;  %v6284_v20 = vld [vmem:[#allocation32_spill] sm:$0xff] }
 0x3a1   : > { %v2259_v38 = vmul.f32 %v1924_v44, %v1553_v5  ;;  %v2261_v41 = vmul.f32 %v2117_v62, %v1555_v15  ;;  %v2350_v14 = vpack.c.bf16 %v2258_v39, %v2254_v17  ;;  %v2352_v12 = vpack.c.bf16 %v2260_v25, %v2256_v28  ;;  %v6279_v44 = vld [vmem:[#allocation30_spill] sm:$0xff]  ;;  %v6287_v54 = vld [vmem:[#allocation80_spill] sm:$0xff] }
 0x3a2   : > { %v1928_v51 = vpop.f32.mrf.mxu1  ;;  %v2121_v37 = vpop.f32.mrf.mxu0  ;;  %v770_v62 = vadd.f32 %v6279_v44, %v5450_v16  ;;  %v1568_v49 = vmax.f32 %v774_v63, 0.0  ;;  %v1570_v17 = vmax.f32 %v967_v30, 0.0  ;;  %v1579_v63 = vmax.f32 %v6287_v54, 0.0 }
 0x3a3   : > { %v2351_v46 = vpack.c.bf16 %v2259_v38, %v2255_v34  ;;  %v2353_v56 = vpack.c.bf16 %v2261_v41, %v2257_v11  ;;  %v2262_v1 = vmul.f32 %v1928_v51, %v1556_v21  ;;  %v2264_v19 = vmul.f32 %v2121_v37, %v1558_v53 }
 0x3a4   : > { %v1930_v61 = vpop.f32.mrf.mxu1  ;;  %v2123_v13 = vpop.f32.mrf.mxu0  ;;  %v963_v34 = vadd.f32 %v5362_v33, %v5443_v7  ;;  %v1565_v51 = vmax.f32 %v961_v43, 0.0  ;;  %v1569_v37 = vmax.f32 %v965_v6, 0.0  ;;  %v1564_v45 = vmax.f32 %v770_v62, 0.0 }
 0x3a5   : > { %2798 = vmatprep.mubr.bf16.mxu1 %v2351_v46  ;;  %2959 = vmatprep.mubr.bf16.mxu0 %v2353_v56  ;;  %v2263_v31 = vmul.f32 %v1930_v61, %v1557_v8  ;;  %v2265_v0 = vmul.f32 %v2123_v13, %v1559_v10  ;;  %v784_v10 = vadd.f32 %v6281_v52, %v5450_v16  ;;  %v6283_v8 = vld [vmem:[#allocation99_spill] sm:$0xff] }
 0x3a6   : > { %v1932_v35 = vpop.f32.mrf.mxu1  ;;  %v2125_v3 = vpop.f32.mrf.mxu0  ;;  %2799 = vmatmul.mubr.bf16.gmra.mxu1 %v2350_v14  ;;  %2960 = vmatmul.mubr.bf16.gmra.mxu0 %v2352_v12  ;;  %v1566_v40 = vmax.f32 %v963_v34, 0.0 }
 0x3a7   : > { %v2266_v27 = vmul.f32 %v1932_v35, %v1560_v47  ;;  %v2268_v60 = vmul.f32 %v2125_v3, %v1562_v50  ;;  %v6282_v3 = vld [vmem:[#allocation97_spill] sm:$0xff]  ;;  %v1576_v30 = vmax.f32 %v784_v10, 0.0 }
 0x3a8   : > { %v1934_v4 = vpop.f32.mrf.mxu1  ;;  %v2127_v26 = vpop.f32.mrf.mxu0  ;;  %v971_v21 = vadd.f32 %v6282_v3, %v5453_v36  ;;  %v6294_v10 = vld [vmem:[#allocation101_spill] sm:$0xff] }
 0x3a9   : > { %v2267_v15 = vmul.f32 %v1934_v4, %v1561_v32  ;;  %v2269_v42 = vmul.f32 %v2127_v26, %v1563_v23  ;;  %v2354_v11 = vpack.c.bf16 %v2266_v27, %v2262_v1  ;;  %v2356_v24 = vpack.c.bf16 %v2268_v60, %v2264_v19  ;;  %v6285_v60 = vld [vmem:[#allocation98_spill] sm:$0xff] }
 0x3aa   : > { %v1938_v5 = vpop.f32.mrf.mxu1  ;;  %v2131_v58 = vpop.f32.mrf.mxu0  ;;  %v975_v32 = vadd.f32 %v6283_v8, %v5453_v36  ;;  %v780_v27 = vadd.f32 %v6284_v20, %v5450_v16  ;;  %v973_v4 = vadd.f32 %v6285_v60, %v5443_v7  ;;  %v1578_v1 = vmax.f32 %v977_v9, 0.0  ;;  %v6296_v60 = vld [vmem:[#allocation36_spill] sm:$0xff] }
 0x3ab   : > { %v2355_v39 = vpack.c.bf16 %v2267_v15, %v2263_v31  ;;  %v2357_v25 = vpack.c.bf16 %v2269_v42, %v2265_v0  ;;  %v2270_v23 = vmul.f32 %v1938_v5, %v1564_v45  ;;  %v2272_v47 = vmul.f32 %v2131_v58, %v1566_v40  ;;  %v6286_v15 = vld [vmem:[#allocation77_spill] sm:$0xff]  ;;  %v6290_v40 = vld [vmem:[#allocation103_spill] sm:$0xff] }
 0x3ac   : > { %v1940_v38 = vpop.f32.mrf.mxu1  ;;  %v2133_v41 = vpop.f32.mrf.mxu0  ;;  %v1575_v42 = vmax.f32 %v6286_v15, 0.0  ;;  %v1573_v58 = vmax.f32 %v971_v21, 0.0  ;;  %v1577_v43 = vmax.f32 %v975_v32, 0.0  ;;  %v1572_v6 = vmax.f32 %v780_v27, 0.0 }
 0x3ad   : > { %2806 = vmatprep.mubr.bf16.mxu1 %v2355_v39  ;;  %2967 = vmatprep.mubr.bf16.mxu0 %v2357_v25  ;;  %v2271_v14 = vmul.f32 %v1940_v38, %v1565_v51  ;;  %v2273_v12 = vmul.f32 %v2133_v41, %v1567_v18  ;;  %v1574_v39 = vmax.f32 %v973_v4, 0.0  ;;  %v983_v9 = vadd.f32 %v6294_v10, %v5443_v7 }
 0x3ae   : > { %v1942_v55 = vpop.f32.mrf.mxu1  ;;  %v2135_v28 = vpop.f32.mrf.mxu0  ;;  %2807 = vmatmul.mubr.bf16.gmra.mxu1 %v2354_v11  ;;  %2968 = vmatmul.mubr.bf16.gmra.mxu0 %v2356_v24  ;;  %v800_v4 = vadd.f32 %v6296_v60, %v5450_v16 }
 0x3af   : > { %v2274_v33 = vmul.f32 %v1942_v55, %v1568_v49  ;;  %v2276_v46 = vmul.f32 %v2135_v28, %v1570_v17  ;;  %v6288_v28 = vld [vmem:[#allocation34_spill] sm:$0xff] }
 0x3b0   : > { %v1944_v56 = vpop.f32.mrf.mxu1  ;;  %v2137_v59 = vpop.f32.mrf.mxu0  ;;  %v790_v51 = vadd.f32 %v6288_v28, %v5450_v16 }
 0x3b1   : > { %v2275_v61 = vmul.f32 %v1944_v56, %v1569_v37  ;;  %v2277_v13 = vmul.f32 %v2137_v59, %v1571_v22  ;;  %v2358_v26 = vpack.c.bf16 %v2274_v33, %v2270_v23  ;;  %v2360_v48 = vpack.c.bf16 %v2276_v46, %v2272_v47  ;;  %v6289_v37 = vld [vmem:[#allocation35_spill] sm:$0xff]  ;;  %v6291_v59 = vld [vmem:[#allocation100_spill] sm:$0xff] }
 0x3b2   : > { %v1948_v50 = vpop.f32.mrf.mxu1  ;;  %v2141_v35 = vpop.f32.mrf.mxu0  ;;  %v794_v45 = vadd.f32 %v6289_v37, %v5450_v16  ;;  %v987_v33 = vadd.f32 %v6290_v40, %v5443_v7 }
 0x3b3   : > { %v2359_v53 = vpack.c.bf16 %v2275_v61, %v2271_v14  ;;  %v2361_v29 = vpack.c.bf16 %v2277_v13, %v2273_v12  ;;  %v2278_v2 = vmul.f32 %v1948_v50, %v1572_v6  ;;  %v2280_v18 = vmul.f32 %v2141_v35, %v1574_v39  ;;  %v6292_v12 = vld [vmem:[#allocation102_spill] sm:$0xff]  ;;  %v6293_v13 = vld [vmem:[#allocation89_spill] sm:$0xff] }
 0x3b4   : > { %v1950_v31 = vpop.f32.mrf.mxu1  ;;  %v2143_v0 = vpop.f32.mrf.mxu0  ;;  %v981_v14 = vadd.f32 %v6291_v59, %v5453_v36  ;;  %v985_v61 = vadd.f32 %v6292_v12, %v5453_v36  ;;  %v1153_v52 = vadd.f32 %v6293_v13, %v5228_v57  ;;  %v1580_v50 = vmax.f32 %v790_v51, 0.0  ;;  %v6303_v59 = vld [vmem:[#allocation87_spill] sm:$0xff] }
 0x3b5   : > { %2814 = vmatprep.mubr.bf16.mxu1 %v2359_v53  ;;  %2975 = vmatprep.mubr.bf16.mxu0 %v2361_v29  ;;  %v2279_v11 = vmul.f32 %v1950_v31, %v1573_v58  ;;  %v2281_v24 = vmul.f32 %v2143_v0, %v1575_v42  ;;  %v1584_v35 = vmax.f32 %v794_v45, 0.0  ;;  %v1586_v3 = vmax.f32 %v987_v33, 0.0  ;;  %v6295_v29 = vld [vmem:[#allocation85_spill] sm:$0xff]  ;;  %v6304_v12 = vld [vmem:[#allocation39_spill] sm:$0xff] }
 0x3b6   : > { %v1952_v19 = vpop.f32.mrf.mxu1  ;;  %v2145_v5 = vpop.f32.mrf.mxu0  ;;  %2815 = vmatmul.mubr.bf16.gmra.mxu1 %v2358_v26  ;;  %2976 = vmatmul.mubr.bf16.gmra.mxu0 %v2360_v48  ;;  %v1581_v32 = vmax.f32 %v981_v14, 0.0  ;;  %v1585_v53 = vmax.f32 %v985_v61, 0.0  ;;  %v1583_v20 = vmax.f32 %v6295_v29, 0.0  ;;  %v1587_v27 = vmax.f32 %v1153_v52, 0.0 }
 0x3b7   : > { %v2282_v25 = vmul.f32 %v1952_v19, %v1576_v30  ;;  %v2284_v44 = vmul.f32 %v2145_v5, %v1578_v1  ;;  %v1582_v26 = vmax.f32 %v983_v9, 0.0  ;;  %v6297_v1 = vld [vmem:[#allocation37_spill] sm:$0xff]  ;;  %v6298_v5 = vld [vmem:[#allocation107_spill] sm:$0xff]  ;;  %v1595_v14 = vmax.f32 %v6303_v59, 0.0 }
 0x3b8   : > { %v1954_v62 = vpop.f32.mrf.mxu1  ;;  %v2147_v34 = vpop.f32.mrf.mxu0  ;;  %v804_v19 = vadd.f32 %v6297_v1, %v5450_v16  ;;  %v997_v58 = vadd.f32 %v6298_v5, %v5443_v7  ;;  %v814_v61 = vadd.f32 %v6304_v12, %v5450_v16 }
 0x3b9   : > { %v2283_v38 = vmul.f32 %v1954_v62, %v1577_v43  ;;  %v2285_v41 = vmul.f32 %v2147_v34, %v1579_v63  ;;  %v2362_v17 = vpack.c.bf16 %v2282_v25, %v2278_v2  ;;  %v2364_v55 = vpack.c.bf16 %v2284_v44, %v2280_v18  ;;  %v6299_v44 = vld [vmem:[#allocation104_spill] sm:$0xff]  ;;  %v6300_v34 = vld [vmem:[#allocation106_spill] sm:$0xff] }
 0x3ba   : > { %v991_v62 = vadd.f32 %v6299_v44, %v5453_v36  ;;  %v1592_v28 = vmax.f32 %v804_v19, 0.0  ;;  %v1594_v51 = vmax.f32 %v997_v58, 0.0 }
 0x3bb   : > { %v2363_v22 = vpack.c.bf16 %v2283_v38, %v2279_v11  ;;  %v2365_v49 = vpack.c.bf16 %v2285_v41, %v2281_v24  ;;  %v995_v11 = vadd.f32 %v6300_v34, %v5453_v36  ;;  %v6301_v41 = vld [vmem:[#allocation105_spill] sm:$0xff] }
 0x3bc   : > { %v993_v2 = vadd.f32 %v6301_v41, %v5443_v7  ;;  %v1589_v40 = vmax.f32 %v991_v62, 0.0  ;;  %v6311_v62 = vld [vmem:[#allocation91_spill] sm:$0xff] }
 0x3bd   : > { %2822 = vmatprep.mubr.bf16.mxu1 %v2363_v22  ;;  %2983 = vmatprep.mubr.bf16.mxu0 %v2365_v49  ;;  %v1593_v33 = vmax.f32 %v995_v11, 0.0  ;;  %v1599_v34 = vmax.f32 %v6311_v62, 0.0  ;;  %v6321_v62 = vld [vmem:[#allocation49_spill] sm:$0xff] }
 0x3be   : > { %2823 = vmatmul.mubr.bf16.gmra.mxu1 %v2362_v17  ;;  %2984 = vmatmul.mubr.bf16.gmra.mxu0 %v2364_v55  ;;  %v1588_v55 = vmax.f32 %v800_v4, 0.0  ;;  %v1590_v13 = vmax.f32 %v993_v2, 0.0  ;;  %v6307_v4 = vld [vmem:[#allocation112_spill] sm:$0xff] }
 0x3f9   : > { %v1958_v46 = vpop.f32.mrf.mxu1  ;;  %v2151_v56 = vpop.f32.mrf.mxu0 }
 0x3fa   : > { %v2286_v43 = vmul.f32 %v1958_v46, %v1580_v50  ;;  %v2288_v6 = vmul.f32 %v2151_v56, %v1582_v26  ;;  %v6302_v46 = vld [vmem:[#allocation83_spill] sm:$0xff]  ;;  %v1005_v26 = vadd.f32 %v6307_v4, %v5453_v36 }
 0x3fb   : > { %v1960_v23 = vpop.f32.mrf.mxu1  ;;  %v2153_v47 = vpop.f32.mrf.mxu0  ;;  %v1591_v56 = vmax.f32 %v6302_v46, 0.0 }
 0x3fc   : > { %v2287_v42 = vmul.f32 %v1960_v23, %v1581_v32  ;;  %v2289_v54 = vmul.f32 %v2153_v47, %v1583_v20  ;;  %v6306_v32 = vld [vmem:[#allocation113_spill] sm:$0xff]  ;;  %v1601_v44 = vmax.f32 %v1005_v26, 0.0 }
 0x3fd   : > { %v1962_v21 = vpop.f32.mrf.mxu1  ;;  %v2155_v8 = vpop.f32.mrf.mxu0 }
 0x3fe   : > { %v2290_v48 = vmul.f32 %v1962_v21, %v1584_v35  ;;  %v2292_v31 = vmul.f32 %v2155_v8, %v1586_v3  ;;  %v6305_v21 = vld [vmem:[#allocation109_spill] sm:$0xff] }
 0x3ff   : > { %v1964_v0 = vpop.f32.mrf.mxu1  ;;  %v2157_v15 = vpop.f32.mrf.mxu0  ;;  %v1001_v8 = vadd.f32 %v6305_v21, %v5453_v36 }
 0x400   : > { %v2291_v63 = vmul.f32 %v1964_v0, %v1585_v53  ;;  %v2293_v30 = vmul.f32 %v2157_v15, %v1587_v27  ;;  %v2366_v18 = vpack.c.bf16 %v2290_v48, %v2286_v43  ;;  %v2368_v22 = vpack.c.bf16 %v2292_v31, %v2288_v6  ;;  %v6308_v48 = vld [vmem:[#allocation120_spill] sm:$0xff] }
 0x401   : > { %v1968_v39 = vpop.f32.mrf.mxu1  ;;  %v2161_v25 = vpop.f32.mrf.mxu0  ;;  %v1007_v53 = vadd.f32 %v6306_v32, %v5443_v7  ;;  %v1169_v31 = vadd.f32 %v6308_v48, %v5228_v57  ;;  %v1600_v43 = vmax.f32 %v814_v61, 0.0  ;;  %v1597_v57 = vmax.f32 %v1001_v8, 0.0  ;;  %v6315_v61 = vld [vmem:[#allocation118_spill] sm:$0xff] }
 0x402   : > { %v2367_v24 = vpack.c.bf16 %v2291_v63, %v2287_v42  ;;  %v2369_v38 = vpack.c.bf16 %v2293_v30, %v2289_v54  ;;  %v2294_v29 = vmul.f32 %v1968_v39, %v1588_v55  ;;  %v2296_v20 = vmul.f32 %v2161_v25, %v1590_v13  ;;  %v6309_v42 = vld [vmem:[#allocation38_spill] sm:$0xff] }
 0x403   : > { %v1970_v49 = vpop.f32.mrf.mxu1  ;;  %v2163_v17 = vpop.f32.mrf.mxu0  ;;  %v810_v54 = vadd.f32 %v6309_v42, %v5450_v16  ;;  %v6310_v63 = vld [vmem:[#allocation110_spill] sm:$0xff]  ;;  %v1602_v6 = vmax.f32 %v1007_v53, 0.0  ;;  %v1603_v11 = vmax.f32 %v1169_v31, 0.0  ;;  %v1015_v13 = vadd.f32 %v6315_v61, %v5453_v36 }
 0x404   : > { %2830 = vmatprep.mubr.bf16.mxu1 %v2367_v24  ;;  %2991 = vmatprep.mubr.bf16.mxu0 %v2369_v38  ;;  %v2295_v47 = vmul.f32 %v1970_v49, %v1589_v40  ;;  %v2297_v50 = vmul.f32 %v2163_v17, %v1591_v56  ;;  %v1003_v30 = vadd.f32 %v6310_v63, %v5443_v7 }
 0x405   : > { %v1972_v37 = vpop.f32.mrf.mxu1  ;;  %v2165_v45 = vpop.f32.mrf.mxu0  ;;  %2831 = vmatmul.mubr.bf16.gmra.mxu1 %v2366_v18  ;;  %2992 = vmatmul.mubr.bf16.gmra.mxu0 %v2368_v22  ;;  %v1596_v24 = vmax.f32 %v810_v54, 0.0  ;;  %v1609_v4 = vmax.f32 %v1015_v13, 0.0  ;;  %v6325_v13 = vld [vmem:[#allocation73_spill] sm:$0xff] }
 0x406   : > { %v2298_v52 = vmul.f32 %v1972_v37, %v1592_v28  ;;  %v2300_v10 = vmul.f32 %v2165_v45, %v1594_v51  ;;  %v1598_v38 = vmax.f32 %v1003_v30, 0.0  ;;  %v6312_v51 = vld [vmem:[#allocation46_spill] sm:$0xff]  ;;  %v6313_v45 = vld [vmem:[#allocation119_spill] sm:$0xff] }
 0x407   : > { %v1974_v9 = vpop.f32.mrf.mxu1  ;;  %v2167_v23 = vpop.f32.mrf.mxu0  ;;  %v824_v37 = vadd.f32 %v6312_v51, %v5450_v16  ;;  %v1017_v40 = vadd.f32 %v6313_v45, %v5443_v7  ;;  %v6323_v51 = vld [vmem:[#allocation60_spill] sm:$0xff]  ;;  %v6324_v45 = vld [vmem:[#allocation67_spill] sm:$0xff] }
 0x408   : > { %v2299_v35 = vmul.f32 %v1974_v9, %v1593_v33  ;;  %v2301_v3 = vmul.f32 %v2167_v23, %v1595_v14  ;;  %v2370_v1 = vpack.c.bf16 %v2298_v52, %v2294_v29  ;;  %v2372_v19 = vpack.c.bf16 %v2300_v10, %v2296_v20  ;;  %v6314_v14 = vld [vmem:[#allocation115_spill] sm:$0xff]  ;;  %v6316_v9 = vld [vmem:[#allocation40_spill] sm:$0xff] }
 0x409   : > { %v1978_v27 = vpop.f32.mrf.mxu1  ;;  %v2171_v60 = vpop.f32.mrf.mxu0  ;;  %v1011_v12 = vadd.f32 %v6314_v14, %v5453_v36  ;;  %v820_v23 = vadd.f32 %v6316_v9, %v5450_v16  ;;  %v1608_v32 = vmax.f32 %v824_v37, 0.0  ;;  %v1610_v53 = vmax.f32 %v1017_v40, 0.0  ;;  %v6319_v16 = vld [vmem:[#allocation93_spill] sm:$0xff] }
 0x40a   : > { %v2371_v0 = vpack.c.bf16 %v2299_v35, %v2295_v47  ;;  %v2373_v15 = vpack.c.bf16 %v2301_v3, %v2297_v50  ;;  %v2302_v33 = vmul.f32 %v1978_v27, %v1596_v24  ;;  %v2304_v46 = vmul.f32 %v2171_v60, %v1598_v38  ;;  %v6317_v47 = vld [vmem:[#allocation116_spill] sm:$0xff]  ;;  %v6318_v27 = vld [vmem:[#allocation90_spill] sm:$0xff] }
 0x40b   : > { %v1980_v5 = vpop.f32.mrf.mxu1  ;;  %v2173_v58 = vpop.f32.mrf.mxu0  ;;  %v1013_v50 = vadd.f32 %v6317_v47, %v5443_v7  ;;  %v1605_v36 = vmax.f32 %v1011_v12, 0.0  ;;  %v1607_v60 = vmax.f32 %v6318_v27, 0.0  ;;  %v1611_v26 = vmax.f32 %v6319_v16, 0.0 }
 0x40c   : > { %2838 = vmatprep.mubr.bf16.mxu1 %v2371_v0  ;;  %2999 = vmatprep.mubr.bf16.mxu0 %v2373_v15  ;;  %v2303_v49 = vmul.f32 %v1980_v5, %v1597_v57  ;;  %v2305_v17 = vmul.f32 %v2173_v58, %v1599_v34  ;;  %v1604_v48 = vmax.f32 %v820_v23, 0.0  ;;  %v6322_v34 = vld [vmem:[#allocation54_spill] sm:$0xff] }
 0x40d   : > { %v1982_v39 = vpop.f32.mrf.mxu1  ;;  %v2175_v25 = vpop.f32.mrf.mxu0  ;;  %2839 = vmatmul.mubr.bf16.gmra.mxu1 %v2370_v1  ;;  %3000 = vmatmul.mubr.bf16.gmra.mxu0 %v2372_v19  ;;  %v1606_v7 = vmax.f32 %v1013_v50, 0.0 }
 0x40e   : > { %v2306_v41 = vmul.f32 %v1982_v39, %v1600_v43  ;;  %v2308_v2 = vmul.f32 %v2175_v25, %v1602_v6  ;;  %v6320_v25 = vld [vmem:[#allocation45_spill] sm:$0xff] }
 0x40f   : > { %v1984_v18 = vpop.f32.mrf.mxu1  ;;  %v2177_v22 = vpop.f32.mrf.mxu0 }
 0x410   : > { %v2307_v55 = vmul.f32 %v1984_v18, %v1601_v44  ;;  %v2309_v28 = vmul.f32 %v2177_v22, %v1603_v11  ;;  %v2374_v35 = vpack.c.bf16 %v2306_v41, %v2302_v33  ;;  %v2376_v3 = vpack.c.bf16 %v2308_v2, %v2304_v46 }
 0x411   : > { %v1988_v56 = vpop.f32.mrf.mxu1  ;;  %v2181_v59 = vpop.f32.mrf.mxu0 }
 0x412   : > { %v2375_v52 = vpack.c.bf16 %v2307_v55, %v2303_v49  ;;  %v2377_v10 = vpack.c.bf16 %v2309_v28, %v2305_v17  ;;  %v2310_v19 = vmul.f32 %v1988_v56, %v1604_v48  ;;  %v2312_v5 = vmul.f32 %v2181_v59, %v1606_v7  ;;  %v6330_v7 = vld [vmem:[#allocation95_spill] sm:$0xff] }
 0x413   : > { %v1990_v21 = vpop.f32.mrf.mxu1  ;;  %v2183_v8 = vpop.f32.mrf.mxu0 }
 0x414   : > { %2846 = vmatprep.mubr.bf16.mxu1 %v2375_v52  ;;  %3007 = vmatprep.mubr.bf16.mxu0 %v2377_v10  ;;  %v2311_v54 = vmul.f32 %v1990_v21, %v1605_v36  ;;  %v2313_v63 = vmul.f32 %v2183_v8, %v1607_v60  ;;  %v6326_v10 = vld [vmem:[#allocation79_spill] sm:$0xff]  ;;  %v6327_v8 = vld [vmem:[#allocation86_spill] sm:$0xff] }
 0x415   : > { %v1992_v29 = vpop.f32.mrf.mxu1  ;;  %v2185_v20 = vpop.f32.mrf.mxu0  ;;  %2847 = vmatmul.mubr.bf16.gmra.mxu1 %v2374_v35  ;;  %3008 = vmatmul.mubr.bf16.gmra.mxu0 %v2376_v3 }
 0x416   : > { %v2314_v31 = vmul.f32 %v1992_v29, %v1608_v32  ;;  %v2316_v0 = vmul.f32 %v2185_v20, %v1610_v53  ;;  %v6328_v53 = vld [vmem:[#allocation92_spill] sm:$0xff] }
 0x417   : > { %v1994_v15 = vpop.f32.mrf.mxu1  ;;  %v2187_v42 = vpop.f32.mrf.mxu0 }
 0x418   : > { %v2315_v30 = vmul.f32 %v1994_v15, %v1609_v4  ;;  %v2317_v1 = vmul.f32 %v2187_v42, %v1611_v26  ;;  %v2378_v6 = vpack.c.bf16 %v2314_v31, %v2310_v19  ;;  %v2380_v39 = vpack.c.bf16 %v2316_v0, %v2312_v5  ;;  %v6329_v26 = vld [vmem:[#allocation94_spill] sm:$0xff]  ;;  %v6332_v5 = vld [vmem:[#allocation108_spill] sm:$0xff] }
 0x41a   : > { %v2379_v58 = vpack.c.bf16 %v2315_v30, %v2311_v54  ;;  %v2381_v43 = vpack.c.bf16 %v2317_v1, %v2313_v63  ;;  %v6331_v1 = vld [vmem:[#allocation96_spill] sm:$0xff] }
 0x41c   : > { %2854 = vmatprep.mubr.bf16.mxu1 %v2379_v58  ;;  %3015 = vmatprep.mubr.bf16.mxu0 %v2381_v43 }
 0x41d   : > { %2855 = vmatmul.mubr.bf16.gmra.mxu1 %v2378_v6  ;;  %3016 = vmatmul.mubr.bf16.gmra.mxu0 %v2380_v39 }
 0x41e   : > { %3814 = vmatprep.mubr.bf16.mxu1 %v6320_v25 }
 0x425   : > { %v3518_v57 = vpop.f32.mrf.mxu1  ;;  %v3630_v44 = vpop.f32.mrf.mxu0  ;;  %3815 = vmatmul.mubr.bf16.vlgmr.msra.gmra.mxu1 %v6321_v62  ;;  %v6333_v62 = vld [vmem:[#allocation111_spill] sm:$0xff] }
 0x426   : > { %3818 = vmatprep.mubr.bf16.mxu1 %v6322_v34 }
 0x427   : > { %v3519_v11 = vpop.f32.mrf.mxu1  ;;  %v3631_v24 = vpop.f32.mrf.mxu0 }
 0x428   : > { %v3520_v38 = vadd.f32 %v3519_v11, %v3518_v57  ;;  %v3632_v41 = vadd.f32 %v3631_v24, %v3630_v44  ;;  %v6334_v11 = vld [vmem:[#allocation114_spill] sm:$0xff] }
 0x429   : > { %v3521_v2 = vpop.f32.mrf.mxu1  ;;  %v3633_v18 = vpop.f32.mrf.mxu0 }
 0x42a   : > { %v5718_v22 = vadd.f32 %v3632_v41, %v3520_v38 }
 0x42b   : > { %v3522_v49 = vpop.f32.mrf.mxu1  ;;  %v3634_v17 = vpop.f32.mrf.mxu0 }
 0x42c   : > { %v3523_v55 = vadd.f32 %v3522_v49, %v3521_v2  ;;  %v3635_v28 = vadd.f32 %v3634_v17, %v3633_v18 }
 0x42d   : > { %3819 = vmatmul.mubr.bf16.gmra.mxu1 %v6323_v51 }
 0x42e   : > { %v3524_v37 = vpop.f32.mrf.mxu1  ;;  %3822 = vmatprep.mubr.bf16.mxu1 %v6324_v45  ;;  %v5722_v40 = vadd.f32 %v3635_v28, %v3523_v55  ;;  %v5724_v33 = vpop.f32.mrf.mxu0  ;;  %v6335_v55 = vld [vmem:[#allocation117_spill] sm:$0xff] }
 0x430   : > { %v3525_v46 = vpop.f32.mrf.mxu1  ;;  %v5728_v14 = vpop.f32.mrf.mxu0 }
 0x431   : > { %v5726_v56 = vadd.f32 %v3525_v46, %v3524_v37 }
 0x432   : > { %v3527_v59 = vpop.f32.mrf.mxu1  ;;  %v5734_v9 = vpop.f32.mrf.mxu0 }
 0x434   : > { %v3528_v12 = vpop.f32.mrf.mxu1  ;;  %v5738_v35 = vpop.f32.mrf.mxu0 }
 0x435   : > { %v5730_v61 = vadd.f32 %v3528_v12, %v3527_v59  ;;  %3823 = vmatmul.mubr.bf16.gmra.mxu1 %v6325_v13 }
 0x436   : > { %v3530_v52 = vpop.f32.mrf.mxu1  ;;  %3826 = vmatprep.mubr.bf16.mxu1 %v6326_v10  ;;  %v5744_v29 = vpop.f32.mrf.mxu0 }
 0x438   : > { %v3531_v23 = vpop.f32.mrf.mxu1  ;;  %v5748_v60 = vpop.f32.mrf.mxu0 }
 0x439   : > { %v5736_v47 = vadd.f32 %v3531_v23, %v3530_v52 }
 0x43a   : > { %v3533_v50 = vpop.f32.mrf.mxu1  ;;  %v5754_v31 = vpop.f32.mrf.mxu0 }
 0x43c   : > { %v3534_v3 = vpop.f32.mrf.mxu1  ;;  %v5758_v54 = vpop.f32.mrf.mxu0 }
 0x43d   : > { %v5740_v21 = vadd.f32 %v3534_v3, %v3533_v50  ;;  %3827 = vmatmul.mubr.bf16.gmra.mxu1 %v6327_v8 }
 0x43e   : > { %v3536_v32 = vpop.f32.mrf.mxu1  ;;  %3830 = vmatprep.mubr.bf16.mxu1 %v6328_v53  ;;  %v5764_v58 = vpop.f32.mrf.mxu0 }
 0x440   : > { %v3537_v20 = vpop.f32.mrf.mxu1  ;;  %v5768_v25 = vpop.f32.mrf.mxu0 }
 0x441   : > { %v5746_v36 = vadd.f32 %v3537_v20, %v3536_v32 }
 0x442   : > { %v3539_v27 = vpop.f32.mrf.mxu1  ;;  %v5774_v24 = vpop.f32.mrf.mxu0 }
 0x444   : > { %v3540_v4 = vpop.f32.mrf.mxu1  ;;  %v5778_v18 = vpop.f32.mrf.mxu0 }
 0x445   : > { %v5750_v16 = vadd.f32 %v3540_v4, %v3539_v27  ;;  %3831 = vmatmul.mubr.bf16.gmra.mxu1 %v6329_v26 }
 0x446   : > { %v3542_v48 = vpop.f32.mrf.mxu1  ;;  %3834 = vmatprep.mubr.bf16.mxu1 %v6330_v7  ;;  %v5783_v51 = vpop.f32.mrf.mxu0 }
 0x448   : > { %v3543_v0 = vpop.f32.mrf.mxu1  ;;  %v5787_v59 = vpop.f32.mrf.mxu0 }
 0x449   : > { %v5756_v15 = vadd.f32 %v3543_v0, %v3542_v48 }
 0x44a   : > { %v3545_v42 = vpop.f32.mrf.mxu1  ;;  %v5791_v10 = vpop.f32.mrf.mxu0 }
 0x44c   : > { %v3546_v63 = vpop.f32.mrf.mxu1  ;;  %v5795_v8 = vpop.f32.mrf.mxu0 }
 0x44d   : > { %v5760_v30 = vadd.f32 %v3546_v63, %v3545_v42  ;;  %3835 = vmatmul.mubr.bf16.gmra.mxu1 %v6331_v1 }
 0x44e   : > { %v3548_v19 = vpop.f32.mrf.mxu1  ;;  %3838 = vmatprep.mubr.bf16.mxu1 %v6332_v5  ;;  %v5799_v27 = vpop.f32.mrf.mxu0 }
 0x450   : > { %v3549_v43 = vpop.f32.mrf.mxu1  ;;  %v5803_v7 = vpop.f32.mrf.mxu0 }
 0x451   : > { %v5766_v6 = vadd.f32 %v3549_v43, %v3548_v19 }
 0x452   : > { %v3551_v39 = vpop.f32.mrf.mxu1  ;;  %v5807_v1 = vpop.f32.mrf.mxu0 }
 0x454   : > { %v3552_v57 = vpop.f32.mrf.mxu1 }
 0x455   : > { %v5770_v44 = vadd.f32 %v3552_v57, %v3551_v39  ;;  %3839 = vmatmul.mubr.bf16.gmra.mxu1 %v6333_v62  ;;  %v5811_v39 = vpop.f32.mrf.mxu0 }
 0x456   : > { %v3554_v34 = vpop.f32.mrf.mxu1  ;;  %3842 = vmatprep.mubr.bf16.mxu1 %v6334_v11 }
 0x457   : > { %v5815_v11 = vpop.f32.mrf.mxu0 }
 0x458   : > { %v3555_v38 = vpop.f32.mrf.mxu1 }
 0x459   : > { %v5776_v41 = vadd.f32 %v3555_v38, %v3554_v34 }
 0x45a   : > { %v3557_v2 = vpop.f32.mrf.mxu1 }
 0x45c   : > { %v3558_v49 = vpop.f32.mrf.mxu1 }
 0x45d   : > { %v5780_v17 = vadd.f32 %v3558_v49, %v3557_v2  ;;  %3843 = vmatmul.mubr.bf16.gmra.mxu1 %v6335_v55  ;;  %v5819_v55 = vpop.f32.mrf.mxu0 }
 0x45e   : > { %v3560_v28 = vpop.f32.mrf.mxu1 }
 0x460   : > { %v3561_v37 = vpop.f32.mrf.mxu1 }
 0x461   : > { %v5785_v45 = vadd.f32 %v3561_v37, %v3560_v28 }
 0x462   : > { %v3563_v46 = vpop.f32.mrf.mxu1 }
 0x464   : > { %v3564_v12 = vpop.f32.mrf.mxu1 }
 0x465   : > { %v5789_v13 = vadd.f32 %v3564_v12, %v3563_v46  ;;  %v5823_v46 = vpop.f32.mrf.mxu0 }
 0x466   : > { %v3566_v52 = vpop.f32.mrf.mxu1 }
 0x467   : > { %v5825_v12 = vpop.f32.mrf.mxu0 }
 0x468   : > { %v3567_v23 = vpop.f32.mrf.mxu1 }
 0x469   : > { %v5793_v50 = vadd.f32 %v3567_v23, %v3566_v52  ;;  %v5827_v52 = vpop.f32.mrf.mxu0 }
 0x46a   : > { %v3569_v3 = vpop.f32.mrf.mxu1 }
 0x46b   : > { %6336 = vst [vmem:[#allocation16_spill] sm:$0xff] %v5793_v50  ;;  %v5829_v23 = vpop.f32.mrf.mxu0 }
 0x46c   : > { %v3570_v32 = vpop.f32.mrf.mxu1 }
 0x46d   : > { %v5797_v53 = vadd.f32 %v3570_v32, %v3569_v3  ;;  %v5831_v3 = vpop.f32.mrf.mxu0 }
 0x46e   : > { %v3572_v20 = vpop.f32.mrf.mxu1 }
 0x46f   : > { %6337 = vst [vmem:[#allocation17_spill] sm:$0xff] %v5797_v53  ;;  %v5833_v32 = vpop.f32.mrf.mxu0 }
 0x470   : > { %v3573_v4 = vpop.f32.mrf.mxu1 }
 0x471   : > { %v5801_v26 = vadd.f32 %v3573_v4, %v3572_v20  ;;  %v5835_v20 = vpop.f32.mrf.mxu0 }
 0x472   : > { %v3575_v48 = vpop.f32.mrf.mxu1 }
 0x473   : > { %6338 = vst [vmem:[#allocation51_spill] sm:$0xff] %v5801_v26  ;;  %v5837_v4 = vpop.f32.mrf.mxu0 }
 0x474   : > { %v3576_v0 = vpop.f32.mrf.mxu1 }
 0x475   : > { %v5805_v42 = vadd.f32 %v3576_v0, %v3575_v48  ;;  %v5839_v48 = vpop.f32.mrf.mxu0 }
 0x476   : > { %v3578_v63 = vpop.f32.mrf.mxu1  ;;  %6344 = vst [vmem:[#allocation18_spill] sm:$0xff] %v5839_v48 }
 0x477   : > { %6339 = vst [vmem:[#allocation53_spill] sm:$0xff] %v5805_v42  ;;  %v5841_v0 = vpop.f32.mrf.mxu0 }
 0x478   : > { %v3579_v19 = vpop.f32.mrf.mxu1  ;;  %6345 = vst [vmem:[#allocation19_spill] sm:$0xff] %v5841_v0 }
 0x479   : > { %v5809_v5 = vadd.f32 %v3579_v19, %v3578_v63  ;;  %v5843_v63 = vpop.f32.mrf.mxu0 }
 0x47a   : > { %v3581_v43 = vpop.f32.mrf.mxu1 }
 0x47b   : > { %6340 = vst [vmem:[#allocation41_spill] sm:$0xff] %v5809_v5  ;;  %v5845_v19 = vpop.f32.mrf.mxu0 }
 0x47c   : > { %v3582_v57 = vpop.f32.mrf.mxu1 }
 0x47d   : > { %v5813_v62 = vadd.f32 %v3582_v57, %v3581_v43  ;;  %v5847_v43 = vpop.f32.mrf.mxu0 }
 0x47e   : > { %v3584_v34 = vpop.f32.mrf.mxu1 }
 0x47f   : > { %6341 = vst [vmem:[#allocation44_spill] sm:$0xff] %v5813_v62  ;;  %v5849_v57 = vpop.f32.mrf.mxu0 }
 0x480   : > { %v3585_v38 = vpop.f32.mrf.mxu1  ;;  %6346 = vst [vmem:[#allocation58_spill] sm:$0xff] %v5849_v57 }
 0x481   : > { %v5817_v2 = vadd.f32 %v3585_v38, %v3584_v34  ;;  %v5851_v34 = vpop.f32.mrf.mxu0 }
 0x482   : > { %v3587_v49 = vpop.f32.mrf.mxu1  ;;  %6347 = vst [vmem:[#allocation62_spill] sm:$0xff] %v5851_v34 }
 0x483   : > { %6342 = vst [vmem:[#allocation42_spill] sm:$0xff] %v5817_v2  ;;  %v5853_v38 = vpop.f32.mrf.mxu0 }
 0x484   : > { %v3588_v28 = vpop.f32.mrf.mxu1  ;;  %6348 = vst [vmem:[#allocation47_spill] sm:$0xff] %v5853_v38 }
 0x485   : > { %v5821_v37 = vadd.f32 %v3588_v28, %v3587_v49  ;;  %v5855_v28 = vpop.f32.mrf.mxu0 }
 0x486   : > { %6349 = vst [vmem:[#allocation52_spill] sm:$0xff] %v5855_v28 }
 0x487   : > { %6343 = vst [vmem:[#allocation43_spill] sm:$0xff] %v5821_v37  ;;  %v5859_v2 = vpop.f32.mrf.mxu0 }
 0x488   : > { %6351 = vst [vmem:[#allocation50_spill] sm:$0xff] %v5859_v2 }
 0x489   : > { %v5863_v0 = vpop.f32.mrf.mxu0 }
 0x48a   : > { %6353 = vst [vmem:[#allocation21_spill] sm:$0xff] %v5863_v0 }
 0x48b   : > { %v5867_v38 = vpop.f32.mrf.mxu0 }
 0x4c5   : > { %v3590_v49 = vpop.f32.mrf.mxu1 }
 0x4c7   : > { %v3591_v62 = vpop.f32.mrf.mxu1 }
 0x4c8   : > { %v5857_v37 = vadd.f32 %v3591_v62, %v3590_v49  ;;  %v5871_v49 = vpop.f32.mrf.mxu0 }
 0x4c9   : > { %v3593_v5 = vpop.f32.mrf.mxu1 }
 0x4ca   : > { %6350 = vst [vmem:[#allocation48_spill] sm:$0xff] %v5857_v37 }
 0x4cb   : > { %v3594_v53 = vpop.f32.mrf.mxu1 }
 0x4cc   : > { %v5861_v42 = vadd.f32 %v3594_v53, %v3593_v5  ;;  %v5875_v5 = vpop.f32.mrf.mxu0 }
 0x4cd   : > { %v3596_v50 = vpop.f32.mrf.mxu1 }
 0x4ce   : > { %6352 = vst [vmem:[#allocation20_spill] sm:$0xff] %v5861_v42 }
 0x4cf   : > { %v3597_v48 = vpop.f32.mrf.mxu1 }
 0x4d0   : > { %v5865_v26 = vadd.f32 %v3597_v48, %v3596_v50  ;;  %v5879_v50 = vpop.f32.mrf.mxu0 }
 0x4d1   : > { %v3599_v34 = vpop.f32.mrf.mxu1 }
 0x4d2   : > { %6354 = vst [vmem:[#allocation56_spill] sm:$0xff] %v5865_v26 }
 0x4d3   : > { %v3600_v57 = vpop.f32.mrf.mxu1 }
 0x4d4   : > { %v5869_v28 = vadd.f32 %v3600_v57, %v3599_v34  ;;  %v3638_v57 = vadd.f32 %v5728_v14, %v5724_v33  ;;  %v5887_v34 = vpop.f32.mrf.mxu0 }
 0x4d5   : > { %v3602_v62 = vpop.f32.mrf.mxu1 }
 0x4d6   : > { %6355 = vst [vmem:[#allocation59_spill] sm:$0xff] %v5869_v28 }
 0x4d7   : > { %v3603_v37 = vpop.f32.mrf.mxu1 }
 0x4d8   : > { %v5873_v2 = vadd.f32 %v3603_v37, %v3602_v62 }
 0x4d9   : > { %v3605_v53 = vpop.f32.mrf.mxu1 }
 0x4da   : > { %6356 = vst [vmem:[#allocation55_spill] sm:$0xff] %v5873_v2  ;;  %v3641_v2 = vadd.f32 %v5738_v35, %v5734_v9  ;;  %v3644_v35 = vadd.f32 %v5748_v60, %v5744_v29 }
 0x4db   : > { %v3606_v42 = vpop.f32.mrf.mxu1 }
 0x4dc   : > { %v5877_v0 = vadd.f32 %v3606_v42, %v3605_v53  ;;  %v2906_v42 = vadd.f32 %v3638_v57, %v5726_v56  ;;  %v5896_v53 = vpop.f32.mrf.mxu0  ;;  %v2909_v56 = vadd.f32 %v3641_v2, %v5730_v61  ;;  %v2914_v60 = vadd.f32 %v3644_v35, %v5736_v47 }
 0x4dd   : > { %v5881_v48 = vpop.f32.mrf.mxu1 }
 0x4de   : > { %6357 = vst [vmem:[#allocation64_spill] sm:$0xff] %v5877_v0  ;;  %6358 = vst [vmem:[#allocation57_spill] sm:$0xff] %v5881_v48  ;;  %v5907_v14 = vpop.f32.mrf.mxu0 }
 0x4df   : > { %v5883_v26 = vpop.f32.mrf.mxu1 }
 0x4e0   : > { %6359 = vst [vmem:[#allocation61_spill] sm:$0xff] %v5883_v26  ;;  %v3650_v26 = vadd.f32 %v5768_v25, %v5764_v58  ;;  %v5917_v61 = vpop.f32.mrf.mxu0 }
 0x4e1   : > { %v5889_v37 = vpop.f32.mrf.mxu1 }
 0x4e3   : > { %v5891_v62 = vpop.f32.mrf.mxu1 }
 0x4e5   : > { %v3816_v0 = vpop.f32.mrf.mxu1 }
 0x4e6   : > { %v3067_v28 = vadd.f32 %v3816_v0, %v2906_v42  ;;  %v3653_v0 = vadd.f32 %v5778_v18, %v5774_v24  ;;  %v3662_v24 = vadd.f32 %v5803_v7, %v5799_v27  ;;  %v5927_v18 = vpop.f32.mrf.mxu0  ;;  %v3665_v27 = vadd.f32 %v5811_v39, %v5807_v1 }
 0x4e7   : > { %v3058_v48 = vpop.f32.mrf.mxu1  ;;  %v3674_v1 = vadd.f32 %v5829_v23, %v5827_v52  ;;  %v3677_v52 = vadd.f32 %v5833_v32, %v5831_v3  ;;  %v3686_v3 = vadd.f32 %v5845_v19, %v5843_v63 }
 0x4e8   : > { %3187 = vst [vmem:[%s5902_s24 + $0x10] sm:$0xff] %v3067_v28  ;;  %v3059_v33 = vadd.f32 %v3058_v48, %v5718_v22  ;;  %v2922_v22 = vadd.f32 %v3650_v26, %v5746_v36  ;;  %v3647_v48 = vadd.f32 %v5758_v54, %v5754_v31  ;;  %v2925_v36 = vadd.f32 %v3653_v0, %v5750_v16 }
 0x4e9   : > { %v3817_v9 = vpop.f32.mrf.mxu1  ;;  %v3656_v31 = vadd.f32 %v5787_v59, %v5783_v51  ;;  %v2938_v16 = vadd.f32 %v3662_v24, %v5766_v6  ;;  %v3659_v51 = vadd.f32 %v5795_v8, %v5791_v10  ;;  %v2941_v6 = vadd.f32 %v3665_v27, %v5770_v44  ;;  %v6366_v27 = vld [vmem:[#allocation53_spill] sm:$0xff] }
 0x4ea   : > { %3185 = vst [vmem:[%s5902_s24] sm:$0xff] %v3059_v33  ;;  %v3070_v58 = vadd.f32 %v3817_v9, %v2909_v56  ;;  %v2917_v47 = vadd.f32 %v3647_v48, %v5740_v21  ;;  %v5937_v33 = vpop.f32.mrf.mxu0  ;;  %v3668_v10 = vadd.f32 %v5819_v55, %v5815_v11  ;;  %v2954_v44 = vadd.f32 %v3674_v1, %v5785_v45  ;;  %v6369_v1 = vld [vmem:[#allocation17_spill] sm:$0xff] }
 0x4eb   : > { %v3061_v25 = vpop.f32.mrf.mxu1  ;;  %v2930_v21 = vadd.f32 %v3656_v31, %v5756_v15  ;;  %v2933_v15 = vadd.f32 %v3659_v51, %v5760_v30  ;;  %v3671_v11 = vadd.f32 %v5825_v12, %v5823_v46  ;;  %v2957_v45 = vadd.f32 %v3677_v52, %v5789_v13  ;;  %v6364_v31 = vld [vmem:[#allocation16_spill] sm:$0xff]  ;;  %v6367_v51 = vld [vmem:[#allocation62_spill] sm:$0xff] }
 0x4ec   : > { %3188 = vst [vmem:[%s5902_s24 + $0x18] sm:$0xff] %v3070_v58  ;;  %v3062_v28 = vadd.f32 %v3061_v25, %v5722_v40  ;;  %v5947_v35 = vpop.f32.mrf.mxu0  ;;  %v2946_v30 = vadd.f32 %v3668_v10, %v5776_v41  ;;  %v3680_v46 = vadd.f32 %v5837_v4, %v5835_v20  ;;  %v6370_v10 = vld [vmem:[#allocation42_spill] sm:$0xff]  ;;  %v6371_v52 = vld [vmem:[#allocation52_spill] sm:$0xff] }
 0x4ed   : > { %v3820_v2 = vpop.f32.mrf.mxu1  ;;  %v2949_v41 = vadd.f32 %v3671_v11, %v5780_v17  ;;  %v6373_v11 = vld [vmem:[#allocation41_spill] sm:$0xff] }
 0x4ee   : > { %3186 = vst [vmem:[%s5902_s24 + $0x8] sm:$0xff] %v3062_v28  ;;  %v3083_v29 = vadd.f32 %v3820_v2, %v2922_v22  ;;  %v5957_v0 = vpop.f32.mrf.mxu0  ;;  %v2962_v17 = vadd.f32 %v3680_v46, %v6364_v31  ;;  %v6380_v31 = vld [vmem:[#allocation59_spill] sm:$0xff] }
 0x4ef   : > { %v3074_v57 = vpop.f32.mrf.mxu1 }
 0x4f0   : > { %3191 = vst [vmem:[%s5902_s24 + $0x30] sm:$0xff] %v3083_v29  ;;  %v3075_v40 = vadd.f32 %v3074_v57, %v2914_v60  ;;  %v5967_v2 = vpop.f32.mrf.mxu0  ;;  %v6360_v60 = vld [vmem:[#allocation58_spill] sm:$0xff]  ;;  %v6361_v57 = vld [vmem:[#allocation51_spill] sm:$0xff] }
 0x4f1   : > { %v3821_v26 = vpop.f32.mrf.mxu1  ;;  %v3689_v63 = vadd.f32 %v6360_v60, %v5847_v43  ;;  %v2970_v13 = vadd.f32 %v3686_v3, %v6361_v57  ;;  %v3713_v60 = vadd.f32 %v5947_v35, %v5937_v33 }
 0x4f2   : > { %3189 = vst [vmem:[%s5902_s24 + $0x20] sm:$0xff] %v3075_v40  ;;  %v3086_v54 = vadd.f32 %v3821_v26, %v2925_v36  ;;  %v5977_v24 = vpop.f32.mrf.mxu0  ;;  %v6362_v36 = vld [vmem:[#allocation18_spill] sm:$0xff]  ;;  %v6363_v26 = vld [vmem:[#allocation19_spill] sm:$0xff] }
 0x4f3   : > { %v3077_v42 = vpop.f32.mrf.mxu1  ;;  %v3683_v20 = vadd.f32 %v6363_v26, %v6362_v36  ;;  %v6378_v26 = vld [vmem:[#allocation57_spill] sm:$0xff] }
 0x4f4   : > { %3192 = vst [vmem:[%s5902_s24 + $0x38] sm:$0xff] %v3086_v54  ;;  %v3078_v7 = vadd.f32 %v3077_v42, %v2917_v47  ;;  %v6365_v47 = vld [vmem:[#allocation21_spill] sm:$0xff] }
 0x4f5   : > { %v3824_v56 = vpop.f32.mrf.mxu1  ;;  %v3698_v43 = vadd.f32 %v5867_v38, %v6365_v47 }
 0x4f6   : > { %3190 = vst [vmem:[%s5902_s24 + $0x28] sm:$0xff] %v3078_v7  ;;  %v3099_v59 = vadd.f32 %v3824_v56, %v2938_v16  ;;  %v2973_v7 = vadd.f32 %v3689_v63, %v6366_v27  ;;  %v3718_v16 = vpop.f32.mrf.mxu0 }
 0x4f7   : > { %v3090_v9 = vpop.f32.mrf.mxu1 }
 0x4f8   : > { %3195 = vst [vmem:[%s5902_s24 + $0x50] sm:$0xff] %v3099_v59  ;;  %v3091_v39 = vadd.f32 %v3090_v9, %v2930_v21  ;;  %v6368_v59 = vld [vmem:[#allocation47_spill] sm:$0xff] }
 0x4f9   : > { %v3825_v58 = vpop.f32.mrf.mxu1  ;;  %v3692_v21 = vadd.f32 %v6368_v59, %v6367_v51 }
 0x4fa   : > { %3193 = vst [vmem:[%s5902_s24 + $0x40] sm:$0xff] %v3091_v39  ;;  %v3102_v8 = vadd.f32 %v3825_v58, %v2941_v6  ;;  %v2965_v39 = vadd.f32 %v3683_v20, %v6369_v1  ;;  %v3701_v58 = vadd.f32 %v5875_v5, %v5871_v49  ;;  %v6374_v5 = vld [vmem:[#allocation43_spill] sm:$0xff]  ;;  %v6379_v20 = vld [vmem:[#allocation61_spill] sm:$0xff] }
 0x4fb   : > { %v3093_v25 = vpop.f32.mrf.mxu1 }
 0x4fc   : > { %3196 = vst [vmem:[%s5902_s24 + $0x58] sm:$0xff] %v3102_v8  ;;  %v3094_v23 = vadd.f32 %v3093_v25, %v2933_v15  ;;  %v2986_v8 = vadd.f32 %v3698_v43, %v6370_v10  ;;  %v3720_v15 = vpop.f32.mrf.mxu0  ;;  %v2989_v3 = vadd.f32 %v3701_v58, %v6374_v5  ;;  %v6381_v43 = vld [vmem:[#allocation20_spill] sm:$0xff] }
 0x4fd   : > { %v3828_v28 = vpop.f32.mrf.mxu1 }
 0x4fe   : > { %3194 = vst [vmem:[%s5902_s24 + $0x48] sm:$0xff] %v3094_v23  ;;  %v3115_v55 = vadd.f32 %v3828_v28, %v2954_v44  ;;  %v6372_v23 = vld [vmem:[#allocation50_spill] sm:$0xff] }
 0x4ff   : > { %v3106_v22 = vpop.f32.mrf.mxu1  ;;  %v3695_v44 = vadd.f32 %v6372_v23, %v6371_v52 }
 0x500   : > { %3199 = vst [vmem:[%s5902_s24 + $0x70] sm:$0xff] %v3115_v55  ;;  %v3107_v32 = vadd.f32 %v3106_v22, %v2946_v30  ;;  %v2978_v55 = vadd.f32 %v3692_v21, %v6373_v11  ;;  %v3710_v22 = vadd.f32 %v5927_v18, %v5917_v61  ;;  %v6376_v18 = vld [vmem:[#allocation56_spill] sm:$0xff] }
 0x501   : > { %v3829_v48 = vpop.f32.mrf.mxu1 }
 0x502   : > { %3197 = vst [vmem:[%s5902_s24 + $0x60] sm:$0xff] %v3107_v32  ;;  %v3118_v12 = vadd.f32 %v3829_v48, %v2957_v45  ;;  %v3721_v32 = vpop.f32.mrf.mxu0  ;;  %v3704_v48 = vadd.f32 %v5887_v34, %v5879_v50  ;;  %v3002_v63 = vadd.f32 %v3710_v22, %v6376_v18  ;;  %v6377_v34 = vld [vmem:[#allocation48_spill] sm:$0xff] }
 0x503   : > { %v3109_v29 = vpop.f32.mrf.mxu1  ;;  %v3722_v33 = vadd.f32 %v3721_v32, %v3720_v15 }
 0x504   : > { %3200 = vst [vmem:[%s5902_s24 + $0x78] sm:$0xff] %v3118_v12  ;;  %v3110_v19 = vadd.f32 %v3109_v29, %v2949_v41  ;;  %v6375_v12 = vld [vmem:[#allocation44_spill] sm:$0xff] }
 0x505   : > { %v3832_v40 = vpop.f32.mrf.mxu1  ;;  %v2981_v41 = vadd.f32 %v3695_v44, %v6375_v12 }
 0x506   : > { %3198 = vst [vmem:[%s5902_s24 + $0x68] sm:$0xff] %v3110_v19  ;;  %v3131_v4 = vadd.f32 %v3832_v40, %v2970_v13  ;;  %v3723_v19 = vpop.f32.mrf.mxu0  ;;  %v3707_v13 = vadd.f32 %v5907_v14, %v5896_v53  ;;  %v2994_v40 = vadd.f32 %v3704_v48, %v6377_v34  ;;  %v3716_v53 = vadd.f32 %v5967_v2, %v5957_v0  ;;  %v6382_v2 = vld [vmem:[#allocation55_spill] sm:$0xff] }
 0x507   : > { %v3122_v54 = vpop.f32.mrf.mxu1 }
 0x508   : > { %3203 = vst [vmem:[%s5902_s24 + $0x90] sm:$0xff] %v3131_v4  ;;  %v3123_v42 = vadd.f32 %v3122_v54, %v2962_v17  ;;  %v3610_v4 = vadd.f32 %v6379_v20, %v6378_v26  ;;  %v3005_v17 = vadd.f32 %v3713_v60, %v6380_v31  ;;  %v3724_v54 = vpop.f32.mrf.mxu0  ;;  %v3010_v1 = vadd.f32 %v3716_v53, %v6382_v2 }
 0x509   : > { %v3833_v56 = vpop.f32.mrf.mxu1 }
 0x50a   : > { %3201 = vst [vmem:[%s5902_s24 + $0x80] sm:$0xff] %v3123_v42  ;;  %v3134_v9 = vadd.f32 %v3833_v56, %v2973_v7  ;;  %v2997_v42 = vadd.f32 %v3707_v13, %v6381_v43  ;;  %v3613_v7 = vadd.f32 %v5891_v62, %v5889_v37  ;;  %v3725_v56 = vadd.f32 %v3724_v54, %v3723_v19 }
 0x50b   : > { %v3125_v6 = vpop.f32.mrf.mxu1  ;;  %v3018_v59 = vadd.f32 %v3722_v33, %v3610_v4 }
 0x50c   : > { %3204 = vst [vmem:[%s5902_s24 + $0x98] sm:$0xff] %v3134_v9  ;;  %v3126_v38 = vadd.f32 %v3125_v6, %v2965_v39  ;;  %v3719_v9 = vadd.f32 %v3718_v16, %v5977_v24  ;;  %v3021_v58 = vadd.f32 %v3725_v56, %v3613_v7 }
 0x50d   : > { %v3836_v25 = vpop.f32.mrf.mxu1 }
 0x50e   : > { %3202 = vst [vmem:[%s5902_s24 + $0x88] sm:$0xff] %v3126_v38  ;;  %v3147_v28 = vadd.f32 %v3836_v25, %v2986_v8  ;;  %v6383_v38 = vld [vmem:[#allocation64_spill] sm:$0xff] }
 0x50f   : > { %v3138_v30 = vpop.f32.mrf.mxu1  ;;  %v3013_v10 = vadd.f32 %v3719_v9, %v6383_v38 }
 0x510   : > { %3207 = vst [vmem:[%s5902_s24 + $0xb0] sm:$0xff] %v3147_v28  ;;  %v3139_v49 = vadd.f32 %v3138_v30, %v2978_v55 }
 0x511   : > { %v3837_v45 = vpop.f32.mrf.mxu1 }
 0x512   : > { %3205 = vst [vmem:[%s5902_s24 + $0xa0] sm:$0xff] %v3139_v49  ;;  %v3150_v46 = vadd.f32 %v3837_v45, %v2989_v3 }
 0x513   : > { %v3141_v29 = vpop.f32.mrf.mxu1 }
 0x514   : > { %3208 = vst [vmem:[%s5902_s24 + $0xb8] sm:$0xff] %v3150_v46  ;;  %v3142_v61 = vadd.f32 %v3141_v29, %v2981_v41 }
 0x515   : > { %v3840_v57 = vpop.f32.mrf.mxu1 }
 0x516   : > { %3206 = vst [vmem:[%s5902_s24 + $0xa8] sm:$0xff] %v3142_v61  ;;  %v3163_v50 = vadd.f32 %v3840_v57, %v3002_v63 }
 0x517   : > { %v3154_v36 = vpop.f32.mrf.mxu1 }
 0x518   : > { %3211 = vst [vmem:[%s5902_s24 + $0xd0] sm:$0xff] %v3163_v50  ;;  %v3155_v35 = vadd.f32 %v3154_v36, %v2994_v40 }
 0x519   : > { %v3841_v47 = vpop.f32.mrf.mxu1 }
 0x51a   : > { %3209 = vst [vmem:[%s5902_s24 + $0xc0] sm:$0xff] %v3155_v35  ;;  %v3166_v14 = vadd.f32 %v3841_v47, %v3005_v17 }
 0x51b   : > { %v3157_v27 = vpop.f32.mrf.mxu1 }
 0x51c   : > { %3212 = vst [vmem:[%s5902_s24 + $0xd8] sm:$0xff] %v3166_v14  ;;  %v3158_v51 = vadd.f32 %v3157_v27, %v2997_v42 }
 0x51d   : > { %v3844_v21 = vpop.f32.mrf.mxu1 }
 0x51e   : > { %3210 = vst [vmem:[%s5902_s24 + $0xc8] sm:$0xff] %v3158_v51  ;;  %v3179_v0 = vadd.f32 %v3844_v21, %v3018_v59 }
 0x51f   : > { %v3170_v39 = vpop.f32.mrf.mxu1 }
 0x520   : > { %3215 = vst [vmem:[%s5902_s24 + $0xf0] sm:$0xff] %v3179_v0  ;;  %v3171_v6 = vadd.f32 %v3170_v39, %v3010_v1 }
 0x521   : > { %v3845_v37 = vpop.f32.mrf.mxu1 }
 0x522   : > { %3213 = vst [vmem:[%s5902_s24 + $0xe0] sm:$0xff] %v3171_v6  ;;  %v3182_v62 = vadd.f32 %v3845_v37, %v3021_v58 }
 0x523   : > { %v3173_v24 = vpop.f32.mrf.mxu1 }
 0x524   : > { %3216 = vst [vmem:[%s5902_s24 + $0xf8] sm:$0xff] %v3182_v62  ;;  %v3174_v16 = vadd.f32 %v3173_v24, %v3013_v10 }
 0x526   : > { %3214 = vst [vmem:[%s5902_s24 + $0xe8] sm:$0xff] %v3174_v16 }
 0x527   : > { %4362 = shalt.err (!%p4359_p5)
}
 0x528   : > { %s4363_s12 = scalar_lea.hbm %s6037_s11, 4096  ;;  %s4367_s27 = scalar_lea.hbm %s6089_s5, 8192 }
 0x529   : > { %p4364_p0 = scmp.ne.s32.totalorder %s6037_s11, %s4363_s12  ;;  %p4368_p10 = scmp.lt.s32.totalorder %s6037_s11, %s6089_s5 }
 0x52a   : > { %p4369_p1 = scmp.lt.s32.totalorder %s4367_s27, %s4363_s12 }
 0x52b   : > { %p4365_p7 = pnand %p4364_p0, %p6384_p8 }
 0x52c   : > { %p4370_p2 = por %p4369_p1, %p4368_p10 }
 0x52d   : > { %p4366_p11 = pneg %p4365_p7 }
 0x52f   : > { %p4371_p4 = pnand %p4370_p2, %p4366_p11 }
 0x531   : > { %4374 = shalt.err (!%p4371_p4)
}
 0x532   : > { %s4438_s26 = smov 128   ;;  %s4439_s9 = smov 8  }
 0x533   : > { %3864 = dma.vmem_to_hbm [thread:$0]  (%p6384_p8), %s6039_s6, 4096, %s6037_s11, %s3218_s22, %s4438_s26, %s4438_s26, %s4439_s9  }
 0x534 PF: > { %s3246_s10 = sand.u32 1, %s4409_s18   ;;  %p6385_p12 = scmp.ne.s32.totalorder %s6113_s25, 0 }
 0x535   : > { %p6386_p6 = scmp.ge.s32.totalorder %s4421_s21, 2  ;;  %s3247_s29 = scalar_lea.sflag [#allocation4], %s3246_s10 }
 0x537   : > { %p3884_p3 = pnand %p6386_p6, %p6385_p12 }
 0x539   : > { %p3885_p9 = pneg %p3884_p3 }
 0x53b   : > { %4404 = dma.done.wait (%p3885_p9), %s3247_s29, 4096  }
 0x53c   : > { %4406 = vsyncadd (%p3885_p9), %s3247_s29, 4294963200  ;;  %p20_p13 = scmp.ge.s32.totalorder %s4558_s14, 4   ;;  %s6387_s18 = smov %s4413_s19 }
 0x53d   : > { %s6388_s19 = smov %s4417_s20  ;;  %s6389_s20 = smov %s4567_s17 }
 0x53e   : > { %s6390_s21 = smov %s4558_s14  ;;  %22 = sbr.rel (!%p20_p13) target bundleno = 7 (0x7), region = 101 }
 0x543   :  { %3252 = vsyncpa [#allocation3], 1 }
 0x544   :  { %3254 = vsyncpa [#allocation3 + $0x1], 1 }
 0x545   :  { %3255 = vsyncpa [#allocation6], 1 }
 0x546   :  { %3256 = vsyncpa [#allocation9], 1 }
 0x547   :  { %3257 = vsyncpa [#allocation4], 1 }
 0x548   :  { %3259 = vsyncpa [#allocation4 + $0x1], 1 }

// kernel: tpu_custom_call.1
= control target key start
LH: loop header
LB: loop body
LE: loop exit
PB: predicated region body
PF: predicated region fallthrough
CT: control target
= control target key end

     0   :  { %10 = vsyncpa [#allocation3], 0  ;;  %s6084_s0 = inlined_call_operand.hbm [shape: f32[512,128], index: 0, kind: input, shape index: {}]   ;;  %s6085_s1 = inlined_call_operand.hbm [shape: bf16[128,640], index: 1, kind: input, shape index: {}]   ;;  %s6086_s2 = inlined_call_operand.hbm [shape: f32[1,640], index: 2, kind: input, shape index: {}]   ;;  %s6087_s3 = inlined_call_operand.hbm [shape: bf16[128,512], index: 3, kind: input, shape index: {}]   ;;  %s6088_s4 = inlined_call_operand.hbm [shape: bf16[640,128], index: 4, kind: input, shape index: {}]   ;;  %s6089_s5 = inlined_call_operand.hbm [shape: f32[512,128], index: 5, kind: output, shape index: {}]  }
   0x1   :  { %12 = vsyncpa [#allocation3 + $0x1], 0 }
   0x2   :  { %13 = vsyncpa [#allocation6], 0 }
   0x3   :  { %14 = vsyncpa [#allocation9], 0 }
   0x4   :  { %15 = vsyncpa [#allocation4], 0 }
   0x5   :  { %17 = vsyncpa [#allocation4 + $0x1], 0  ;;  %s4470_s18 = smov 0   ;;  %s4472_s19 = smov 0  }
   0x6   :  { %s4474_s20 = smov 0   ;;  %s4476_s21 = smov 0  }
   0x7 LB: > { %s4491_s22 = sadd.s32 4294967295, %s4421_s21   ;;  %s3342_s23 = sadd.s32 4294967294, %s4421_s21   ;;  %s4421_s21 = sphi %s4476_s21, %s6390_s21   ;;  %s4417_s20 = sphi %s4474_s20, %s6389_s20   ;;  %s4413_s19 = sphi %s4472_s19, %s6388_s19   ;;  %s4409_s18 = sphi %s4470_s18, %s6387_s18  }
   0x8   : > { %p43_p0 = scmp.ne.s32.totalorder %s4413_s19, %s4409_s18  ;;  %p6090_p1 = scmp.eq.s32.totalorder %s4491_s22, 0 }
   0x9   : > { %p157_p3 = scmp.eq.s32.totalorder %s3342_s23, 1  ;;  %p3343_p5 = scmp.ge.s32.totalorder %s4421_s21, 1 }
   0xa   : > { %p4500_p4 = por %p6090_p1, %p43_p0  ;;  %p164_p7 = scmp.lt.s32.totalorder %s4421_s21, 3 }
   0xb   : > { %p4505_p6 = por %p157_p3, %p43_p0  ;;  %s4423_s27 = smov [#allocation5]  }
   0xc   : > { %s6112_s24 = scalar_select %p4500_p4, 1, 0 }
   0xd   : > { %s6113_s25 = scalar_select %p4505_p6, 1, 0 }
   0xe   : > { %p4510_p8 = pnand %p3343_p5, %p164_p7  ;;  %s176_s28 = sshll.u32 %s4423_s27, 4  ;;  %s177_s28 = int_to_ptr.vmem [resolvable:$true] %s176_s28 }
   0xf   : > { %s4424_s30 = smov [#allocation8]   ;;  %s4228_s7 = scalar_lea.vmem %s177_s28, 5120 }
  0x10   : > { %s6114_s26 = scalar_select %p4510_p8, 1, 0 }
  0x11   : > { %p3866_p9 = pneg %p4510_p8  ;;  %s200_s6 = sshll.u32 %s4424_s30, 4  ;;  %s201_s6 = int_to_ptr.vmem [resolvable:$true] %s200_s6 }
  0x12   : > { %p4229_p13 = scmp.ne.s32.totalorder %s177_s28, %s4228_s7  ;;  %p4236_p5 = scmp.lt.s32.totalorder %s177_s28, %s177_s28 }
  0x13   : > { %p4519_p11 = pnand %p3866_p9, %p6090_p1  ;;  %p4237_p7 = scmp.lt.s32.totalorder %s4228_s7, %s4228_s7 }
  0x15   : > { %p4219_p12 = pneg %p4519_p11  ;;  %p4238_p10 = por %p4237_p7, %p4236_p5 }
  0x17   : > { %p4231_p0 = pnand %p4229_p13, %p4219_p12 }
  0x19   : > { %p4232_p3 = pneg %p4231_p0 }
  0x1b   : > { %p4239_p9 = pnand %p4238_p10, %p4232_p3 }
  0x1d   : > { %4242 = shalt.err (!%p4239_p9)
}
  0x1e   : > { %s4425_s8 = smov 320   ;;  %s4426_s9 = smov 20  }
  0x1f   : > { %3869 = dma.hbm_to_vmem [thread:$0]  (!%p4519_p11), %s6085_s1, 5120, %s177_s28, [#allocation6], %s4425_s8, %s4425_s8, %s4426_s9  }
  0x20   : > { %s4254_s12 = scalar_lea.vmem %s201_s6, 4096  ;;  %p4262_p2 = scmp.lt.s32.totalorder %s201_s6, %s201_s6 }
  0x21   : > { %p4255_p1 = scmp.ne.s32.totalorder %s201_s6, %s4254_s12  ;;  %p4263_p6 = scmp.lt.s32.totalorder %s4254_s12, %s4254_s12 }
  0x23   : > { %p4257_p13 = pnand %p4255_p1, %p4219_p12  ;;  %p4264_p5 = por %p4263_p6, %p4262_p2 }
  0x25   : > { %p4258_p0 = pneg %p4257_p13 }
  0x27   : > { %p4265_p10 = pnand %p4264_p5, %p4258_p0 }
  0x29   : > { %4268 = shalt.err (!%p4265_p10)
}
  0x2a   : > { %s4427_s13 = smov 256   ;;  %s4428_s14 = smov 16  }
  0x2b   : > { %3875 = dma.hbm_to_vmem [thread:$0]  (!%p4519_p11), %s6087_s3, 4096, %s201_s6, [#allocation9], %s4427_s13, %s4427_s13, %s4428_s14  }
  0x2c   : > { %s4429_s17 = smov [#allocation7]   ;;  %s4430_s27 = smov [#allocation10]  }
  0x2d   : > { %s190_s23 = sshll.u32 %s4429_s17, 4  ;;  %s213_s28 = sshll.u32 %s4430_s27, 4  ;;  %s191_s23 = int_to_ptr.vmem [resolvable:$true] %s190_s23  ;;  %s214_s28 = int_to_ptr.vmem [resolvable:$true] %s213_s28 }
  0x2e   : > { %s4280_s30 = scalar_lea.vmem %s191_s23, 80  ;;  %s4287_s7 = scalar_lea.vmem %s191_s23, 96 }
  0x2f   : > { %p4281_p1 = scmp.ne.s32.totalorder %s191_s23, %s4280_s30  ;;  %p4288_p3 = scmp.lt.s32.totalorder %s191_s23, %s191_s23 }
  0x30   : > { %p4289_p7 = scmp.lt.s32.totalorder %s4287_s7, %s4280_s30 }
  0x31   : > { %p4283_p2 = pnand %p4281_p1, %p4219_p12 }
  0x32   : > { %p4290_p9 = por %p4289_p7, %p4288_p3 }
  0x33   : > { %p4284_p6 = pneg %p4283_p2 }
  0x35   : > { %p4291_p13 = pnand %p4290_p9, %p4284_p6 }
  0x37   : > { %4294 = shalt.err (!%p4291_p13)
}
  0x38   : > { %3872 = dma.hbm_to_vmem [thread:$0]  (!%p4519_p11), %s6086_s2, 80, %s191_s23, [#allocation6]  }
  0x39   : > { %s4306_s9 = scalar_lea.vmem %s214_s28, 5120  ;;  %p4314_p1 = scmp.lt.s32.totalorder %s214_s28, %s214_s28 }
  0x3a   : > { %p4307_p0 = scmp.ne.s32.totalorder %s214_s28, %s4306_s9  ;;  %p4315_p2 = scmp.lt.s32.totalorder %s4306_s9, %s4306_s9 }
  0x3c   : > { %p4309_p5 = pnand %p4307_p0, %p4219_p12  ;;  %p4316_p4 = por %p4315_p2, %p4314_p1 }
  0x3e   : > { %p4310_p10 = pneg %p4309_p5 }
  0x40   : > { %p4317_p8 = pnand %p4316_p4, %p4310_p10 }
  0x42   : > { %4320 = shalt.err (!%p4317_p8)
}
  0x43   : > { %s4431_s10 = smov 64   ;;  %s4432_s11 = smov 4  }
  0x44   : > { %3878 = dma.hbm_to_vmem [thread:$0]  (!%p4519_p11), %s6088_s4, 5120, %s214_s28, [#allocation9], %s4431_s10, %s4431_s10, %s4432_s11  }
  0x45   : > { %s4558_s14 = sadd.s32 1, %s4421_s21   ;;  %s30_s16 = sadd.s32 1, %s4417_s20 }
  0x46   : > { %s27_s15 = ssub.s32 %s4421_s21, %s4558_s14  ;;  %p37_p8 = scmp.ne.s32.totalorder %s4417_s20, %s4413_s19 }
  0x47   : > { %p28_p4 = scmp.eq.s32.totalorder %s27_s15, 0  ;;  %p38_p12 = scmp.eq.s32.totalorder %s4421_s21, 0 }
  0x48   : > { %p6116_p3 = scmp.eq.s32.totalorder %s4491_s22, 1  ;;  %p3891_p9 = scmp.lt.s32.totalorder %s4421_s21, 2 }
  0x49   : > { %s4567_s17 = scalar_select %p28_p4, %s4417_s20, %s30_s16  }
  0x4a   : > { %p39_p6 = por %p38_p12, %p37_p8  ;;  %p4571_p7 = por %p6116_p3, %p37_p8 }
  0x4b   : > { %s227_s29 = sand.u32 1, %s4417_s20   ;;  %s3476_s28 = sshll.u32 %s4421_s21, 12 }
  0x4c   : > { %s6117_s23 = scalar_select %p4571_p7, 1, 0 }
  0x4d   : > { %s3349_s27 = sshll.u32 %s227_s29, 8  ;;  %s4581_s6 = scalar_lea.hbm %s6084_s0, %s3476_s28 }
  0x4e   : > { %s231_s8 = scalar_lea.vmem [#allocation2], %s3349_s27  ;;  %p4585_p11 = pnand %p3891_p9, %p39_p6 }
  0x4f   : > { %s238_s9 = sshll.u32 %s231_s8, 4  ;;  %s4589_s11 = scalar_lea.sflag [#allocation3], %s227_s29  ;;  %s4583_s9 = int_to_ptr.vmem [resolvable:$true] %s238_s9 }
  0x50   : > { %s4321_s12 = scalar_lea.hbm %s4581_s6, 4096  ;;  %p4323_p0 = pneg %p4585_p11 }
  0x51   : > { %p4322_p13 = scmp.ne.s32.totalorder %s4581_s6, %s4321_s12  ;;  %s4326_s16 = scalar_lea.hbm %s6084_s0, 8192 }
  0x52   : > { %p4327_p1 = scmp.lt.s32.totalorder %s4581_s6, %s6084_s0  ;;  %p4328_p2 = scmp.lt.s32.totalorder %s4326_s16, %s4321_s12 }
  0x53   : > { %p4324_p5 = pnand %p4323_p0, %p4322_p13 }
  0x54   : > { %p4329_p4 = por %p4328_p2, %p4327_p1 }
  0x55   : > { %p4325_p10 = pneg %p4324_p5 }
  0x57   : > { %p4330_p8 = pnand %p4329_p4, %p4325_p10 }
  0x59   : > { %4333 = shalt.err (!%p4330_p8)
}
  0x5a   : > { %s4334_s29 = scalar_lea.vmem %s4583_s9, 4096  ;;  %s4433_s30 = smov [#allocation2]  }
  0x5b   : > { %p4335_p12 = scmp.ne.s32.totalorder %s4583_s9, %s4334_s29  ;;  %s4339_s7 = sshll.u32 %s4433_s30, 4  ;;  %s4340_s7 = int_to_ptr.vmem [resolvable:$false] %s4339_s7 }
  0x5c   : > { %s4341_s8 = scalar_lea.vmem %s4340_s7, 8192  ;;  %p4342_p9 = scmp.lt.s32.totalorder %s4583_s9, %s4340_s7 }
  0x5d   : > { %p4337_p6 = pnand %p4335_p12, %p4323_p0  ;;  %p4343_p13 = scmp.lt.s32.totalorder %s4341_s8, %s4334_s29 }
  0x5f   : > { %p4338_p3 = pneg %p4337_p6  ;;  %p4344_p5 = por %p4343_p13, %p4342_p9 }
  0x61   : > { %p4345_p7 = pnand %p4344_p5, %p4338_p3 }
  0x63   : > { %4348 = shalt.err (!%p4345_p7)
}
  0x64   : > { %s4434_s12 = smov 128   ;;  %s4435_s13 = smov 8  }
  0x65   : > { %3882 = dma.hbm_to_vmem [thread:$0]  (!%p4585_p11), %s4581_s6, 4096, %s4583_s9, %s4589_s11, %s4434_s12, %s4434_s12, %s4435_s13  }
  0x66   : > { %p6119_p0 = scmp.ne.s32.totalorder %s6114_s26, 0 }
  0x68   : > { %250 = sbr.rel (%p6119_p0) target bundleno = 1332 (0x534), region = 40 }
  0x6d   : > { %s4613_s15 = sand.u32 1, %s4413_s19   ;;  %p6120_p7 = scmp.ne.s32.totalorder %s6112_s24, 0 }
  0x6e   : > { %s3353_s16 = sshll.u32 %s4613_s15, 8  ;;  %s253_s27 = scalar_lea.sflag [#allocation3], %s4613_s15 }
  0x6f   : > { %s4619_s28 = scalar_lea.vmem [#allocation2], %s3353_s16 }
  0x70   : > { %4392 = dma.done.wait (%p6120_p7), %s253_s27, 4096  }
  0x71   : > { %4394 = vsyncadd (%p6120_p7), %s253_s27, 4294963200  ;;  %p6121_p11 = scmp.eq.s32.totalorder %s4491_s22, 0 }
  0x73   : > { %4396 = dma.done.wait (%p6121_p11), [#allocation6], 5200   ;;  %p6122_p10 = pmov %p6121_p11 }
  0x75   : > { %4398 = vsyncadd (%p6122_p10), [#allocation6], 4294962096  ;;  %p6123_p1 = pmov %p6122_p10 }
  0x77   : > { %4400 = dma.done.wait (%p6123_p1), [#allocation9], 9216   ;;  %p6124_p2 = pmov %p6123_p1 }
  0x78   : > { %v6094_v0 = vmov 0   ;;  %v3944_v1 = vld [vmem:[#allocation5 + $0x11c] ss:$20 sps:$4 sm:$0xff]   ;;  %v3946_v2 = vld [vmem:[#allocation5 + $0x118] ss:$20 sps:$4 sm:$0xff]   ;;  %v302_v17 = vld [vmem:[%s4619_s28] sm:$0xff] }
  0x79   : > { %4402 = vsyncadd (%p6124_p2), [#allocation9], 4294958080  ;;  %665 = vmatprep.mubr.bf16.mxu0 %v6094_v0  ;;  %858 = vmatprep.mubr.bf16.mxu1 %v6094_v0  ;;  %v3947_v3 = vld [vmem:[#allocation5 + $0xf4] ss:$20 sps:$4 sm:$0xff]   ;;  %v3949_v4 = vld [vmem:[#allocation5 + $0xf0] ss:$20 sps:$4 sm:$0xff]  }
  0x7a   : > { %633 = vmatprep.subr.bf16.mxu0 %v3944_v1  ;;  %v3950_v5 = vld [vmem:[#allocation5 + $0xcc] ss:$20 sps:$4 sm:$0xff]   ;;  %v3952_v6 = vld [vmem:[#allocation5 + $0xc8] ss:$20 sps:$4 sm:$0xff]   ;;  %v3953_v7 = vld [vmem:[#allocation5 + $0xa4] ss:$20 sps:$4 sm:$0xff]  }
  0x7b   : > { %634 = vmatpush1.bf16.msra.mxu0 %v3946_v2  ;;  %v3955_v8 = vld [vmem:[#allocation5 + $0xa0] ss:$20 sps:$4 sm:$0xff]   ;;  %v3956_v9 = vld [vmem:[#allocation5 + $0x7c] ss:$20 sps:$4 sm:$0xff]   ;;  %v3958_v10 = vld [vmem:[#allocation5 + $0x78] ss:$20 sps:$4 sm:$0xff]   ;;  %v400_v2 = vlaneseq }
  0x7c   : > { %635 = vmatprep.subr.bf16.mxu0 %v3947_v3  ;;  %v3959_v11 = vld [vmem:[#allocation5 + $0x54] ss:$20 sps:$4 sm:$0xff]   ;;  %v3961_v12 = vld [vmem:[#allocation5 + $0x50] ss:$20 sps:$4 sm:$0xff]   ;;  %v3962_v13 = vld [vmem:[#allocation5 + $0x2c] ss:$20 sps:$4 sm:$0xff]  }
  0x7d   : > { %v3964_v14 = vld [vmem:[#allocation5 + $0x28] ss:$20 sps:$4 sm:$0xff]   ;;  %v3965_v15 = vld [vmem:[#allocation5 + $0x4] ss:$20 sps:$4 sm:$0xff]   ;;  %v3967_v16 = vld [vmem:[#allocation5] ss:$20 sps:$4 sm:$0xff]  }
  0x7e   : > { %v303_v18 = vld [vmem:[%s4619_s28 + $0x8] sm:$0xff]  ;;  %v304_v20 = vld [vmem:[%s4619_s28 + $0x10] sm:$0xff]  ;;  %v305_v21 = vld [vmem:[%s4619_s28 + $0x18] sm:$0xff]  ;;  %v4731_v3 = vshrl.u32 %v400_v2, 7  ;;  %s5902_s24 = scalar_lea.vmem [#allocation11], %s3353_s16  ;;  %s3477_s26 = sshll.u32 %s4491_s22, 12 }
  0x7f   : > { %636 = vmatpush1.bf16.msra.mxu0 %v3949_v4  ;;  %v4637_v19 = vpack.c.bf16 %v303_v18, %v302_v17  ;;  %v4643_v22 = vpack.c.bf16 %v305_v21, %v304_v20  ;;  %v306_v23 = vld [vmem:[%s4619_s28 + $0x20] sm:$0xff]  ;;  %v307_v24 = vld [vmem:[%s4619_s28 + $0x28] sm:$0xff]  ;;  %v308_v26 = vld [vmem:[%s4619_s28 + $0x30] sm:$0xff]  ;;  %s3231_s6 = sshll.u32 %s5902_s24, 4  ;;  %s6037_s11 = scalar_lea.hbm %s6089_s5, %s3477_s26  ;;  %s6039_s6 = int_to_ptr.vmem [resolvable:$true] %s3231_s6 }
  0x80   : > { %637 = vmatprep.subr.bf16.mxu0 %v3950_v5  ;;  %v4649_v25 = vpack.c.bf16 %v307_v24, %v306_v23  ;;  %v309_v27 = vld [vmem:[%s4619_s28 + $0x38] sm:$0xff]  ;;  %v310_v29 = vld [vmem:[%s4619_s28 + $0x40] sm:$0xff]  ;;  %v311_v30 = vld [vmem:[%s4619_s28 + $0x48] sm:$0xff]  ;;  %v402_v4 = vsub.s32 0, %v4731_v3  ;;  %s3218_s22 = scalar_lea.sflag [#allocation4], %s4613_s15  ;;  %s4349_s29 = scalar_lea.vmem %s6039_s6, 4096 }
  0x81   : > { %v4655_v28 = vpack.c.bf16 %v309_v27, %v308_v26  ;;  %v4661_v31 = vpack.c.bf16 %v311_v30, %v310_v29  ;;  %v312_v32 = vld [vmem:[%s4619_s28 + $0x50] sm:$0xff]  ;;  %v313_v33 = vld [vmem:[%s4619_s28 + $0x58] sm:$0xff]  ;;  %v314_v35 = vld [vmem:[%s4619_s28 + $0x60] sm:$0xff]  ;;  %p4350_p4 = scmp.ne.s32.totalorder %s6039_s6, %s4349_s29  ;;  %p6384_p8 = scmp.ne.s32.totalorder %s6117_s23, 0 }
  0x82   : > { %v4667_v34 = vpack.c.bf16 %v313_v33, %v312_v32  ;;  %v315_v36 = vld [vmem:[%s4619_s28 + $0x68] sm:$0xff]  ;;  %v316_v38 = vld [vmem:[%s4619_s28 + $0x70] sm:$0xff]  ;;  %v317_v39 = vld [vmem:[%s4619_s28 + $0x78] sm:$0xff]  ;;  %s4437_s30 = smov [#allocation11]  }
  0x83   : > { %638 = vmatpush1.bf16.msra.mxu0 %v3952_v6  ;;  %v4673_v37 = vpack.c.bf16 %v315_v36, %v314_v35  ;;  %v4679_v40 = vpack.c.bf16 %v317_v39, %v316_v38  ;;  %v318_v41 = vld [vmem:[%s4619_s28 + $0x80] sm:$0xff]  ;;  %v319_v42 = vld [vmem:[%s4619_s28 + $0x88] sm:$0xff]  ;;  %v320_v44 = vld [vmem:[%s4619_s28 + $0x90] sm:$0xff]  ;;  %p4351_p12 = pnand %p4350_p4, %p6384_p8  ;;  %s4353_s7 = sshll.u32 %s4437_s30, 4  ;;  %s4354_s7 = int_to_ptr.vmem [resolvable:$false] %s4353_s7 }
  0x84   : > { %639 = vmatprep.subr.bf16.mxu0 %v3953_v7  ;;  %v4685_v43 = vpack.c.bf16 %v319_v42, %v318_v41  ;;  %v321_v45 = vld [vmem:[%s4619_s28 + $0x98] sm:$0xff]  ;;  %v322_v47 = vld [vmem:[%s4619_s28 + $0xa0] sm:$0xff]  ;;  %v323_v48 = vld [vmem:[%s4619_s28 + $0xa8] sm:$0xff]  ;;  %s4355_s8 = scalar_lea.vmem %s4354_s7, 8192  ;;  %p4356_p3 = scmp.lt.s32.totalorder %s6039_s6, %s4354_s7 }
  0x85   : > { %v4691_v46 = vpack.c.bf16 %v321_v45, %v320_v44  ;;  %v4697_v49 = vpack.c.bf16 %v323_v48, %v322_v47  ;;  %v324_v50 = vld [vmem:[%s4619_s28 + $0xb0] sm:$0xff]  ;;  %v325_v51 = vld [vmem:[%s4619_s28 + $0xb8] sm:$0xff]  ;;  %v326_v53 = vld [vmem:[%s4619_s28 + $0xc0] sm:$0xff]  ;;  %p4352_p6 = pneg %p4351_p12  ;;  %p4357_p9 = scmp.lt.s32.totalorder %s4355_s8, %s4349_s29 }
  0x86   : > { %v4703_v52 = vpack.c.bf16 %v325_v51, %v324_v50  ;;  %v327_v54 = vld [vmem:[%s4619_s28 + $0xc8] sm:$0xff]  ;;  %v328_v56 = vld [vmem:[%s4619_s28 + $0xd0] sm:$0xff]  ;;  %v329_v57 = vld [vmem:[%s4619_s28 + $0xd8] sm:$0xff] }
  0x87   : > { %640 = vmatpush1.bf16.msra.mxu0 %v3955_v8  ;;  %v4709_v55 = vpack.c.bf16 %v327_v54, %v326_v53  ;;  %v4715_v58 = vpack.c.bf16 %v329_v57, %v328_v56  ;;  %v330_v59 = vld [vmem:[%s4619_s28 + $0xe0] sm:$0xff]  ;;  %v331_v60 = vld [vmem:[%s4619_s28 + $0xe8] sm:$0xff]  ;;  %v332_v62 = vld [vmem:[%s4619_s28 + $0xf0] sm:$0xff]  ;;  %p4358_p13 = por %p4357_p9, %p4356_p3 }
  0x88   : > { %641 = vmatprep.subr.bf16.mxu0 %v3956_v9  ;;  %v4721_v61 = vpack.c.bf16 %v331_v60, %v330_v59  ;;  %v333_v63 = vld [vmem:[%s4619_s28 + $0xf8] sm:$0xff]  ;;  %v398_v5 = vld [vmem:[#allocation7] sm:$0x1f]  ;;  %v3974_v51 = vld [vmem:[#allocation5 + $0xd4] ss:$20 sps:$4 sm:$0xff]  }
  0x89   : > { %v4727_v1 = vpack.c.bf16 %v333_v63, %v332_v62  ;;  %v4734_v6 = vrot.slane %v398_v5, %v402_v4  ;;  %v3968_v36 = vld [vmem:[#allocation5 + $0x124] ss:$20 sps:$4 sm:$0xff]   ;;  %v3970_v39 = vld [vmem:[#allocation5 + $0x120] ss:$20 sps:$4 sm:$0xff]   ;;  %v3971_v44 = vld [vmem:[#allocation5 + $0xfc] ss:$20 sps:$4 sm:$0xff]   ;;  %p4359_p5 = pnand %p4358_p13, %p4352_p6 }
  0x8a   : > { %826 = vmatprep.subr.bf16.mxu1 %v3968_v36  ;;  %v3973_v47 = vld [vmem:[#allocation5 + $0xf8] ss:$20 sps:$4 sm:$0xff]   ;;  %v3976_v54 = vld [vmem:[#allocation5 + $0xd0] ss:$20 sps:$4 sm:$0xff]   ;;  %v3979_v62 = vld [vmem:[#allocation5 + $0xa8] ss:$20 sps:$4 sm:$0xff]  }
  0x8b   : > { %642 = vmatpush1.bf16.msra.mxu0 %v3958_v10  ;;  %827 = vmatpush1.bf16.msra.mxu1 %v3970_v39  ;;  %v3977_v59 = vld [vmem:[#allocation5 + $0xac] ss:$20 sps:$4 sm:$0xff]   ;;  %v3980_v4 = vld [vmem:[#allocation5 + $0x84] ss:$20 sps:$4 sm:$0xff]   ;;  %v3986_v36 = vld [vmem:[#allocation5 + $0x34] ss:$20 sps:$4 sm:$0xff]  }
  0x8c   : > { %643 = vmatprep.subr.bf16.mxu0 %v3959_v11  ;;  %828 = vmatprep.subr.bf16.mxu1 %v3971_v44 }
  0x8f   : > { %644 = vmatpush1.bf16.msra.mxu0 %v3961_v12  ;;  %829 = vmatpush1.bf16.msra.mxu1 %v3973_v47 }
  0x90   : > { %645 = vmatprep.subr.bf16.mxu0 %v3962_v13  ;;  %830 = vmatprep.subr.bf16.mxu1 %v3974_v51 }
  0x93   : > { %646 = vmatpush1.bf16.msra.mxu0 %v3964_v14  ;;  %831 = vmatpush1.bf16.msra.mxu1 %v3976_v54  ;;  %v3991_v54 = vld [vmem:[#allocation5 + $0x8] ss:$20 sps:$4 sm:$0xff]  }
  0x94   : > { %647 = vmatprep.subr.bf16.mxu0 %v3965_v15  ;;  %832 = vmatprep.subr.bf16.mxu1 %v3977_v59 }
  0x97   : > { %648 = vmatpush1.bf16.msra.mxu0 %v3967_v16  ;;  %833 = vmatpush1.bf16.msra.mxu1 %v3979_v62 }
  0x98   : > { %834 = vmatprep.subr.bf16.mxu1 %v3980_v4 }
  0x9a   : > { %666 = vmatmul.mubr.bf16.vlgmr.msra.gmra.mxu0 %v4637_v19 }
  0x9b   : > { %675 = vmatprep.mubr.bf16.mxu0 %v6094_v0 }
  0xa2   : > { %676 = vmatmul.mubr.bf16.gmra.mxu0 %v4643_v22 }
  0xa3   : > { %685 = vmatprep.mubr.bf16.mxu0 %v6094_v0 }
  0xaa   : > { %686 = vmatmul.mubr.bf16.gmra.mxu0 %v4649_v25 }
  0xab   : > { %695 = vmatprep.mubr.bf16.mxu0 %v6094_v0 }
  0xb2   : > { %696 = vmatmul.mubr.bf16.gmra.mxu0 %v4655_v28 }
  0xb3   : > { %705 = vmatprep.mubr.bf16.mxu0 %v6094_v0 }
  0xba   : > { %706 = vmatmul.mubr.bf16.gmra.mxu0 %v4661_v31 }
  0xbb   : > { %715 = vmatprep.mubr.bf16.mxu0 %v6094_v0 }
  0xc2   : > { %716 = vmatmul.mubr.bf16.gmra.mxu0 %v4667_v34 }
  0xc3   : > { %725 = vmatprep.mubr.bf16.mxu0 %v6094_v0 }
  0xca   : > { %726 = vmatmul.mubr.bf16.gmra.mxu0 %v4673_v37 }
  0xcb   : > { %735 = vmatprep.mubr.bf16.mxu0 %v6094_v0 }
  0xd2   : > { %736 = vmatmul.mubr.bf16.gmra.mxu0 %v4679_v40 }
  0xd3   : > { %745 = vmatprep.mubr.bf16.mxu0 %v6094_v0 }
  0xda   : > { %746 = vmatmul.mubr.bf16.gmra.mxu0 %v4685_v43 }
  0xdb   : > { %755 = vmatprep.mubr.bf16.mxu0 %v6094_v0 }
  0xe2   : > { %756 = vmatmul.mubr.bf16.gmra.mxu0 %v4691_v46 }
  0xe3   : > { %765 = vmatprep.mubr.bf16.mxu0 %v6094_v0 }
  0xea   : > { %766 = vmatmul.mubr.bf16.gmra.mxu0 %v4697_v49 }
  0xeb   : > { %775 = vmatprep.mubr.bf16.mxu0 %v6094_v0 }
  0xf2   : > { %776 = vmatmul.mubr.bf16.gmra.mxu0 %v4703_v52 }
  0xf3   : > { %785 = vmatprep.mubr.bf16.mxu0 %v6094_v0 }
  0xfa   : > { %786 = vmatmul.mubr.bf16.gmra.mxu0 %v4709_v55 }
  0xfb   : > { %795 = vmatprep.mubr.bf16.mxu0 %v6094_v0 }
 0x102   : > { %796 = vmatmul.mubr.bf16.gmra.mxu0 %v4715_v58 }
 0x103   : > { %805 = vmatprep.mubr.bf16.mxu0 %v6094_v0 }
 0x10a   : > { %806 = vmatmul.mubr.bf16.gmra.mxu0 %v4721_v61 }
 0x10b   : > { %815 = vmatprep.mubr.bf16.mxu0 %v6094_v0 }
 0x112   : > { %816 = vmatmul.mubr.bf16.gmra.mxu0 %v4727_v1 }
 0x113   : > { %3766 = vmatprep.mubr.bf16.mxu0 %v4637_v19 }
 0x15a   : > { %v667_v7 = vpop.f32.mrf.mxu0 }
 0x15b   : > { %v4737_v8 = vadd.f32 %v667_v7, %v4734_v6  ;;  %v3982_v7 = vld [vmem:[#allocation5 + $0x80] ss:$20 sps:$4 sm:$0xff]  }
 0x15c   : > { %v4739_v9 = vpop.f32.mrf.mxu0  ;;  %835 = vmatpush1.bf16.msra.mxu1 %v3982_v7 }
 0x15d   : > { %1180 = vmax.xlane.f32.xlu0 %v4737_v8 }
 0x15e   : > { %v671_v10 = vpop.f32.mrf.mxu0 }
 0x15f   : > { %v4743_v11 = vadd.f32 %v671_v10, %v4734_v6 }
 0x160   : > { %v4745_v12 = vpop.f32.mrf.mxu0 }
 0x161   : > { %1182 = vmax.xlane.f32.xlu0 %v4743_v11 }
 0x162   : > { %v677_v13 = vpop.f32.mrf.mxu0 }
 0x163   : > { %v4749_v14 = vadd.f32 %v677_v13, %v4734_v6 }
 0x164   : > { %v4751_v15 = vpop.f32.mrf.mxu0 }
 0x165   : > { %1184 = vmax.xlane.f32.xlu1 %v4749_v14 }
 0x166   : > { %v681_v16 = vpop.f32.mrf.mxu0 }
 0x167   : > { %v4755_v17 = vadd.f32 %v681_v16, %v4734_v6  ;;  %v3983_v16 = vld [vmem:[#allocation5 + $0x5c] ss:$20 sps:$4 sm:$0xff]  }
 0x168   : > { %v4757_v18 = vpop.f32.mrf.mxu0  ;;  %836 = vmatprep.subr.bf16.mxu1 %v3983_v16 }
 0x169   : > { %1186 = vmax.xlane.f32.xlu1 %v4755_v17 }
 0x16a   : > { %v687_v20 = vpop.f32.mrf.mxu0 }
 0x16b   : > { %v4761_v21 = vadd.f32 %v687_v20, %v4734_v6 }
 0x16c   : > { %v4763_v23 = vpop.f32.mrf.mxu0 }
 0x16d   : > { %1188 = vmax.xlane.f32.xlu0 %v4761_v21 }
 0x16e   : > { %v691_v24 = vpop.f32.mrf.mxu0 }
 0x16f   : > { %v4767_v26 = vadd.f32 %v691_v24, %v4734_v6  ;;  %v3985_v24 = vld [vmem:[#allocation5 + $0x58] ss:$20 sps:$4 sm:$0xff]  }
 0x170   : > { %v4769_v27 = vpop.f32.mrf.mxu0  ;;  %837 = vmatpush1.bf16.msra.mxu1 %v3985_v24 }
 0x171   : > { %1190 = vmax.xlane.f32.xlu1 %v4767_v26  ;;  %838 = vmatprep.subr.bf16.mxu1 %v3986_v36 }
 0x172   : > { %v697_v29 = vpop.f32.mrf.mxu0 }
 0x173   : > { %v4773_v30 = vadd.f32 %v697_v29, %v4734_v6 }
 0x174   : > { %v4775_v32 = vpop.f32.mrf.mxu0 }
 0x175   : > { %6125 = vst [vmem:[#allocation16_spill] sm:$0xff] %v4775_v32  ;;  %1192 = vmax.xlane.f32.xlu0 %v4773_v30 }
 0x176   : > { %v701_v33 = vpop.f32.mrf.mxu0 }
 0x177   : > { %v4779_v35 = vadd.f32 %v701_v33, %v4734_v6 }
 0x178   : > { %v4781_v38 = vpop.f32.mrf.mxu0 }
 0x179   : > { %6126 = vst [vmem:[#allocation17_spill] sm:$0xff] %v4781_v38  ;;  %1194 = vmax.xlane.f32.xlu1 %v4779_v35 }
 0x17a   : > { %v707_v41 = vpop.f32.mrf.mxu0 }
 0x17b   : > { %v4785_v42 = vadd.f32 %v707_v41, %v4734_v6  ;;  %v3988_v41 = vld [vmem:[#allocation5 + $0x30] ss:$20 sps:$4 sm:$0xff]  }
 0x17c   : > { %v4787_v45 = vpop.f32.mrf.mxu0  ;;  %839 = vmatpush1.bf16.msra.mxu1 %v3988_v41 }
 0x17d   : > { %6127 = vst [vmem:[#allocation18_spill] sm:$0xff] %v4787_v45  ;;  %1196 = vmax.xlane.f32.xlu0 %v4785_v42 }
 0x17e   : > { %v711_v48 = vpop.f32.mrf.mxu0 }
 0x17f   : > { %v4791_v50 = vadd.f32 %v711_v48, %v4734_v6  ;;  %v3989_v48 = vld [vmem:[#allocation5 + $0xc] ss:$20 sps:$4 sm:$0xff]  }
 0x180   : > { %v4793_v53 = vpop.f32.mrf.mxu0  ;;  %840 = vmatprep.subr.bf16.mxu1 %v3989_v48 }
 0x181   : > { %6128 = vst [vmem:[#allocation19_spill] sm:$0xff] %v4793_v53  ;;  %1198 = vmax.xlane.f32.xlu1 %v4791_v50  ;;  %841 = vmatpush1.bf16.msra.mxu1 %v3991_v54 }
 0x182   : > { %v717_v56 = vpop.f32.mrf.mxu0 }
 0x183   : > { %v4797_v57 = vadd.f32 %v717_v56, %v4734_v6 }
 0x184   : > { %v4799_v60 = vpop.f32.mrf.mxu0  ;;  %859 = vmatmul.mubr.bf16.vlgmr.msra.gmra.mxu1 %v4637_v19 }
 0x185   : > { %6129 = vst [vmem:[#allocation20_spill] sm:$0xff] %v4799_v60  ;;  %1200 = vmax.xlane.f32.xlu0 %v4797_v57  ;;  %868 = vmatprep.mubr.bf16.mxu1 %v6094_v0 }
 0x186   : > { %v721_v63 = vpop.f32.mrf.mxu0 }
 0x187   : > { %v4803_v2 = vadd.f32 %v721_v63, %v4734_v6 }
 0x188   : > { %v4805_v5 = vpop.f32.mrf.mxu0 }
 0x189   : > { %6130 = vst [vmem:[#allocation21_spill] sm:$0xff] %v4805_v5  ;;  %1202 = vmax.xlane.f32.xlu1 %v4803_v2 }
 0x18a   : > { %v727_v10 = vpop.f32.mrf.mxu0 }
 0x18b   : > { %v4809_v13 = vadd.f32 %v727_v10, %v4734_v6 }
 0x18c   : > { %v4811_v20 = vpop.f32.mrf.mxu0  ;;  %869 = vmatmul.mubr.bf16.gmra.mxu1 %v4643_v22 }
 0x18d   : > { %6131 = vst [vmem:[#allocation22_spill] sm:$0xff] %v4811_v20  ;;  %1204 = vmax.xlane.f32.xlu0 %v4809_v13  ;;  %878 = vmatprep.mubr.bf16.mxu1 %v6094_v0  ;;  %v4014_v20 = vld [vmem:[#allocation8 + $0xcc] ss:$16 sps:$4 sm:$0xff]  }
 0x18e   : > { %v731_v29 = vpop.f32.mrf.mxu0 }
 0x18f   : > { %v4815_v33 = vadd.f32 %v731_v29, %v4734_v6 }
 0x190   : > { %v4817_v39 = vpop.f32.mrf.mxu0 }
 0x191   : > { %6132 = vst [vmem:[#allocation23_spill] sm:$0xff] %v4817_v39  ;;  %1206 = vmax.xlane.f32.xlu1 %v4815_v33  ;;  %v4003_v39 = vld [vmem:[#allocation8 + $0xc0] ss:$16 sps:$4 sm:$0xff]  }
 0x192   : > { %v737_v44 = vpop.f32.mrf.mxu0 }
 0x193   : > { %v4821_v47 = vadd.f32 %v737_v44, %v4734_v6 }
 0x194   : > { %v4823_v51 = vpop.f32.mrf.mxu0  ;;  %879 = vmatmul.mubr.bf16.gmra.mxu1 %v4649_v25 }
 0x195   : > { %6133 = vst [vmem:[#allocation24_spill] sm:$0xff] %v4823_v51  ;;  %1208 = vmax.xlane.f32.xlu0 %v4821_v47  ;;  %888 = vmatprep.mubr.bf16.mxu1 %v6094_v0  ;;  %v4011_v51 = vld [vmem:[#allocation8 + $0xec] ss:$16 sps:$4 sm:$0xff]  }
 0x196   : > { %v741_v56 = vpop.f32.mrf.mxu0 }
 0x197   : > { %v4827_v59 = vadd.f32 %v741_v56, %v4734_v6 }
 0x198   : > { %v4829_v62 = vpop.f32.mrf.mxu0 }
 0x199   : > { %6134 = vst [vmem:[#allocation25_spill] sm:$0xff] %v4829_v62  ;;  %1210 = vmax.xlane.f32.xlu1 %v4827_v59  ;;  %v4005_v62 = vld [vmem:[#allocation8 + $0xc4] ss:$16 sps:$4 sm:$0xff]  }
 0x19a   : > { %v747_v63 = vpop.f32.mrf.mxu0 }
 0x19b   : > { %v4835_v4 = vadd.f32 %v747_v63, %v4734_v6 }
 0x19c   : > { %v4837_v7 = vpop.f32.mrf.mxu0  ;;  %889 = vmatmul.mubr.bf16.gmra.mxu1 %v4655_v28 }
 0x19d   : > { %6135 = vst [vmem:[#allocation26_spill] sm:$0xff] %v4837_v7  ;;  %1212 = vmax.xlane.f32.xlu0 %v4835_v4  ;;  %898 = vmatprep.mubr.bf16.mxu1 %v6094_v0  ;;  %v3997_v7 = vld [vmem:[#allocation5 + $0x60] ss:$20 sps:$4 sm:$0xff]  }
 0x19e   : > { %v751_v10 = vpop.f32.mrf.mxu0 }
 0x19f   : > { %v4841_v16 = vadd.f32 %v751_v10, %v4734_v6 }
 0x1a0   : > { %v4843_v24 = vpop.f32.mrf.mxu0 }
 0x1a1   : > { %6136 = vst [vmem:[#allocation27_spill] sm:$0xff] %v4843_v24  ;;  %1214 = vmax.xlane.f32.xlu1 %v4841_v16  ;;  %v3992_v24 = vld [vmem:[#allocation5 + $0x128] ss:$20 sps:$4 sm:$0xff]  }
 0x1a2   : > { %v757_v19 = vpop.f32.mrf.mxu0  ;;  %3750 = vmatprep.subr.bf16.mxu0 %v3992_v24 }
 0x1a3   : > { %v4849_v29 = vadd.f32 %v757_v19, %v4734_v6  ;;  %3751 = vmatpush3.bf16.msra.mxu0 %v3992_v24  ;;  %v3998_v24 = vld [vmem:[#allocation5 + $0x38] ss:$20 sps:$4 sm:$0xff]  }
 0x1a4   : > { %v4851_v36 = vpop.f32.mrf.mxu0  ;;  %899 = vmatmul.mubr.bf16.gmra.mxu1 %v4661_v31 }
 0x1a5   : > { %6137 = vst [vmem:[#allocation28_spill] sm:$0xff] %v4851_v36  ;;  %1216 = vmax.xlane.f32.xlu0 %v4849_v29  ;;  %908 = vmatprep.mubr.bf16.mxu1 %v6094_v0 }
 0x1a6   : > { %v761_v41 = vpop.f32.mrf.mxu0 }
 0x1a7   : > { %v4855_v44 = vadd.f32 %v761_v41, %v4734_v6 }
 0x1a8   : > { %v4857_v48 = vpop.f32.mrf.mxu0 }
 0x1a9   : > { %6138 = vst [vmem:[#allocation29_spill] sm:$0xff] %v4857_v48  ;;  %1218 = vmax.xlane.f32.xlu1 %v4855_v44 }
 0x1aa   : > { %v767_v54 = vpop.f32.mrf.mxu0 }
 0x1ab   : > { %v4863_v56 = vadd.f32 %v767_v54, %v4734_v6 }
 0x1ac   : > { %v4865_v63 = vpop.f32.mrf.mxu0  ;;  %909 = vmatmul.mubr.bf16.gmra.mxu1 %v4667_v34 }
 0x1ad   : > { %6139 = vst [vmem:[#allocation30_spill] sm:$0xff] %v4865_v63  ;;  %1220 = vmax.xlane.f32.xlu0 %v4863_v56  ;;  %918 = vmatprep.mubr.bf16.mxu1 %v6094_v0 }
 0x1ae   : > { %v771_v10 = vpop.f32.mrf.mxu0 }
 0x1af   : > { %v4869_v19 = vadd.f32 %v771_v10, %v4734_v6 }
 0x1b0   : > { %v4871_v41 = vpop.f32.mrf.mxu0 }
 0x1b1   : > { %6140 = vst [vmem:[#allocation31_spill] sm:$0xff] %v4871_v41  ;;  %1222 = vmax.xlane.f32.xlu1 %v4869_v19  ;;  %v3993_v41 = vld [vmem:[#allocation5 + $0x100] ss:$20 sps:$4 sm:$0xff]  }
 0x1b2   : > { %v777_v48 = vpop.f32.mrf.mxu0  ;;  %3752 = vmatprep.subr.bf16.mxu0 %v3993_v41 }
 0x1b3   : > { %v4877_v54 = vadd.f32 %v777_v48, %v4734_v6  ;;  %3753 = vmatpush3.bf16.msra.mxu0 %v3993_v41  ;;  %v3994_v48 = vld [vmem:[#allocation5 + $0xd8] ss:$20 sps:$4 sm:$0xff]   ;;  %v3999_v41 = vld [vmem:[#allocation5 + $0x10] ss:$20 sps:$4 sm:$0xff]  }
 0x1b4   : > { %v4879_v36 = vpop.f32.mrf.mxu0  ;;  %3754 = vmatprep.subr.bf16.mxu0 %v3994_v48  ;;  %919 = vmatmul.mubr.bf16.gmra.mxu1 %v4673_v37 }
 0x1b5   : > { %6141 = vst [vmem:[#allocation32_spill] sm:$0xff] %v4879_v36  ;;  %1224 = vmax.xlane.f32.xlu0 %v4877_v54  ;;  %v3996_v36 = vld [vmem:[#allocation5 + $0x88] ss:$20 sps:$4 sm:$0xff]   ;;  %928 = vmatprep.mubr.bf16.mxu1 %v6094_v0 }
 0x1b6   : > { %v781_v63 = vpop.f32.mrf.mxu0 }
 0x1b7   : > { %v4883_v10 = vadd.f32 %v781_v63, %v4734_v6  ;;  %3755 = vmatpush3.bf16.msra.mxu0 %v3994_v48  ;;  %v3995_v63 = vld [vmem:[#allocation5 + $0xb0] ss:$20 sps:$4 sm:$0xff]  }
 0x1b8   : > { %3756 = vmatprep.subr.bf16.mxu0 %v3995_v63  ;;  %v4000_v48 = vld [vmem:[#allocation8 + $0xe0] ss:$16 sps:$4 sm:$0xff]   ;;  %v4895_v5 = vpop.f32.mrf.mxu0 }
 0x1b9   : > { %1226 = vmax.xlane.f32.xlu1 %v4883_v10  ;;  %6142 = vst [vmem:[#allocation33_spill] sm:$0xff] %v4895_v5 }
 0x1bb   : > { %3757 = vmatpush3.bf16.msra.mxu0 %v3995_v63  ;;  %v4002_v63 = vld [vmem:[#allocation8 + $0xe4] ss:$16 sps:$4 sm:$0xff]  }
 0x1bc   : > { %3758 = vmatprep.subr.bf16.mxu0 %v3996_v36  ;;  %929 = vmatmul.mubr.bf16.gmra.mxu1 %v4679_v40 }
 0x1bd   : > { %938 = vmatprep.mubr.bf16.mxu1 %v6094_v0  ;;  %1804 = vmatprep.subr.bf16.mxu1 %v4002_v63  ;;  %v787_v63 = vpop.f32.mrf.mxu0 }
 0x1be   : > { %1805 = vmatpush1.bf16.msra.mxu1 %v4000_v48  ;;  %v4017_v48 = vld [vmem:[#allocation8 + $0xac] ss:$16 sps:$4 sm:$0xff]  }
 0x1bf   : > { %3759 = vmatpush3.bf16.msra.mxu0 %v3996_v36  ;;  %v4009_v36 = vld [vmem:[#allocation8 + $0xe8] ss:$16 sps:$4 sm:$0xff]   ;;  %1806 = vmatprep.subr.bf16.mxu1 %v4005_v62 }
 0x1c0   : > { %3760 = vmatprep.subr.bf16.mxu0 %v3997_v7  ;;  %v4015_v62 = vld [vmem:[#allocation8 + $0xa8] ss:$16 sps:$4 sm:$0xff]  }
 0x1c2   : > { %1807 = vmatpush1.bf16.msra.mxu1 %v4003_v39 }
 0x1c3   : > { %3761 = vmatpush3.bf16.msra.mxu0 %v3997_v7  ;;  %v4008_v7 = vld [vmem:[#allocation8 + $0xa4] ss:$16 sps:$4 sm:$0xff]  }
 0x1c4   : > { %3762 = vmatprep.subr.bf16.mxu0 %v3998_v24  ;;  %939 = vmatmul.mubr.bf16.gmra.mxu1 %v4685_v43 }
 0x1c5   : > { %948 = vmatprep.mubr.bf16.mxu1 %v6094_v0  ;;  %1808 = vmatprep.subr.bf16.mxu1 %v4008_v7 }
 0x1c7   : > { %3763 = vmatpush3.bf16.msra.mxu0 %v3998_v24  ;;  %v4006_v24 = vld [vmem:[#allocation8 + $0xa0] ss:$16 sps:$4 sm:$0xff]  }
 0x1c8   : > { %3764 = vmatprep.subr.bf16.mxu0 %v3999_v41  ;;  %1809 = vmatpush1.bf16.msra.mxu1 %v4006_v24 }
 0x1cb   : > { %3765 = vmatpush3.bf16.msra.mxu0 %v3999_v41  ;;  %v4012_v41 = vld [vmem:[#allocation8 + $0xc8] ss:$16 sps:$4 sm:$0xff]  }
 0x1cc   : > { %1997 = vmatprep.subr.bf16.mxu0 %v4011_v51  ;;  %949 = vmatmul.mubr.bf16.gmra.mxu1 %v4691_v46 }
 0x1cd   : > { %958 = vmatprep.mubr.bf16.mxu1 %v6094_v0 }
 0x1ce   : > { %3767 = vmatmul.mubr.bf16.vlgmr.msra.gmra.mxu0 %v4643_v22  ;;  %v4901_v22 = vpop.f32.mrf.mxu0 }
 0x1cf   : > { %3770 = vmatprep.mubr.bf16.mxu0 %v4649_v25  ;;  %1998 = vmatpush1.bf16.msra.mxu0 %v4009_v36  ;;  %6143 = vst [vmem:[#allocation34_spill] sm:$0xff] %v4901_v22 }
 0x1d0   : > { %1999 = vmatprep.subr.bf16.mxu0 %v4014_v20  ;;  %v791_v39 = vpop.f32.mrf.mxu0 }
 0x1d2   : > { %v4908_v7 = vpop.f32.mrf.mxu0 }
 0x1d3   : > { %2000 = vmatpush1.bf16.msra.mxu0 %v4012_v41  ;;  %6144 = vst [vmem:[#allocation35_spill] sm:$0xff] %v4908_v7 }
 0x1d4   : > { %2001 = vmatprep.subr.bf16.mxu0 %v4017_v48  ;;  %959 = vmatmul.mubr.bf16.gmra.mxu1 %v4697_v49  ;;  %v797_v41 = vpop.f32.mrf.mxu0 }
 0x1d5   : > { %968 = vmatprep.mubr.bf16.mxu1 %v6094_v0 }
 0x1d6   : > { %3771 = vmatmul.mubr.bf16.gmra.mxu0 %v4655_v28 }
 0x1d7   : > { %3774 = vmatprep.mubr.bf16.mxu0 %v4661_v31  ;;  %2002 = vmatpush1.bf16.msra.mxu0 %v4015_v62 }
 0x1dc   : > { %969 = vmatmul.mubr.bf16.gmra.mxu1 %v4703_v52 }
 0x1dd   : > { %978 = vmatprep.mubr.bf16.mxu1 %v6094_v0 }
 0x1de   : > { %3775 = vmatmul.mubr.bf16.gmra.mxu0 %v4667_v34 }
 0x1df   : > { %3778 = vmatprep.mubr.bf16.mxu0 %v4673_v37 }
 0x1e4   : > { %979 = vmatmul.mubr.bf16.gmra.mxu1 %v4709_v55 }
 0x1e5   : > { %988 = vmatprep.mubr.bf16.mxu1 %v6094_v0 }
 0x1e6   : > { %v1181_v25 = vpop.xlane.xlu0 %1180  ;;  %3779 = vmatmul.mubr.bf16.gmra.mxu0 %v4679_v40 }
 0x1e7   : > { %v1244_v20 = vsub.f32 %v4737_v8, %v1181_v25  ;;  %v4916_v25 = vpop.f32.mrf.mxu0  ;;  %3782 = vmatprep.mubr.bf16.mxu0 %v4685_v43 }
 0x1e8   : > { %6145 = vst [vmem:[#allocation36_spill] sm:$0xff] %v4916_v25 }
 0x1e9   : > { %v1276_v51 = vmul.f32 1.442695, %v1244_v20  ;;  %v801_v20 = vpop.f32.mrf.mxu0 }
 0x1ea   : > { %v1183_v36 = vpop.xlane.xlu0 %1182 }
 0x1eb   : > { %4088 = vpow2.f32 %v1276_v51  ;;  %v1245_v28 = vsub.f32 %v4743_v11, %v1183_v36  ;;  %v4926_v36 = vadd.f32 %v787_v63, %v4734_v6 }
 0x1ec   : > { %989 = vmatmul.mubr.bf16.gmra.mxu1 %v4715_v58 }
 0x1ed   : > { %v1278_v31 = vmul.f32 1.442695, %v1245_v28  ;;  %998 = vmatprep.mubr.bf16.mxu1 %v6094_v0 }
 0x1ee   : > { %v1185_v24 = vpop.xlane.xlu1 %1184  ;;  %3783 = vmatmul.mubr.bf16.gmra.mxu0 %v4691_v46 }
 0x1ef   : > { %4090 = vpow2.f32 %v1278_v31  ;;  %v1246_v8 = vsub.f32 %v4749_v14, %v1185_v24  ;;  %3786 = vmatprep.mubr.bf16.mxu0 %v4697_v49 }
 0x1f1   : > { %v1280_v48 = vmul.f32 1.442695, %v1246_v8  ;;  %v4941_v8 = vadd.f32 %v791_v39, %v4734_v6  ;;  %v4018_v39 = vld [vmem:[#allocation8 + $0x80] ss:$16 sps:$4 sm:$0xff]  }
 0x1f2   : > { %v1187_v62 = vpop.xlane.xlu1 %1186 }
 0x1f3   : > { %4092 = vpow2.f32 %v1280_v48  ;;  %v1247_v34 = vsub.f32 %v4755_v17, %v1187_v62  ;;  %v4930_v17 = vpop.f32.mrf.mxu0 }
 0x1f4   : > { %6146 = vst [vmem:[#allocation37_spill] sm:$0xff] %v4930_v17  ;;  %999 = vmatmul.mubr.bf16.gmra.mxu1 %v4721_v61 }
 0x1f5   : > { %v1282_v37 = vmul.f32 1.442695, %v1247_v34  ;;  %v807_v24 = vpop.f32.mrf.mxu0  ;;  %1008 = vmatprep.mubr.bf16.mxu1 %v6094_v0 }
 0x1f6   : > { %v1189_v11 = vpop.xlane.xlu0 %1188  ;;  %3787 = vmatmul.mubr.bf16.gmra.mxu0 %v4703_v52 }
 0x1f7   : > { %4094 = vpow2.f32 %v1282_v37  ;;  %v1248_v14 = vsub.f32 %v4761_v21, %v1189_v11  ;;  %v4951_v34 = vpop.f32.mrf.mxu0  ;;  %v4020_v37 = vld [vmem:[#allocation8 + $0x84] ss:$16 sps:$4 sm:$0xff]   ;;  %v4021_v11 = vld [vmem:[#allocation8 + $0x88] ss:$16 sps:$4 sm:$0xff]   ;;  %3790 = vmatprep.mubr.bf16.mxu0 %v4709_v55 }
 0x1f8   : > { %v4923_v51 = vpop.eup %4088  ;;  %6147 = vst [vmem:[#allocation38_spill] sm:$0xff] %v4951_v34  ;;  %1810 = vmatprep.subr.bf16.mxu1 %v4020_v37  ;;  %v4026_v55 = vld [vmem:[#allocation8 + $0x64] ss:$16 sps:$4 sm:$0xff]  }
 0x1f9   : > { %v1284_v28 = vmul.f32 1.442695, %v1248_v14  ;;  %1340 = vadd.xlane.f32.xlu0 %v4923_v51  ;;  %v4023_v14 = vld [vmem:[#allocation8 + $0x8c] ss:$16 sps:$4 sm:$0xff]   ;;  %v811_v52 = vpop.f32.mrf.mxu0  ;;  %1811 = vmatpush1.bf16.msra.mxu1 %v4018_v39 }
 0x1fa   : > { %v1191_v40 = vpop.xlane.xlu1 %1190  ;;  %2003 = vmatprep.subr.bf16.mxu0 %v4023_v14  ;;  %1812 = vmatprep.subr.bf16.mxu1 %v4026_v55 }
 0x1fb   : > { %4096 = vpow2.f32 %v1284_v28  ;;  %v1249_v43 = vsub.f32 %v4767_v26, %v1191_v40  ;;  %v4947_v26 = vadd.f32 %v797_v41, %v4734_v6  ;;  %2004 = vmatpush1.bf16.msra.mxu0 %v4021_v11  ;;  %v4035_v11 = vld [vmem:[#allocation8 + $0x4c] ss:$16 sps:$4 sm:$0xff]  }
 0x1fc   : > { %v4936_v21 = vpop.eup %4090  ;;  %1009 = vmatmul.mubr.bf16.gmra.mxu1 %v4727_v1 }
 0x1fd   : > { %v1286_v63 = vmul.f32 1.442695, %v1249_v43  ;;  %1228 = vmax.xlane.f32.xlu0 %v4926_v36  ;;  %1342 = vadd.xlane.f32.xlu1 %v4936_v21 }
 0x1fe   : > { %v1193_v31 = vpop.xlane.xlu0 %1192  ;;  %3791 = vmatmul.mubr.bf16.gmra.mxu0 %v4715_v58  ;;  %1836 = vmatprep.mubr.bf16.mxu1 %v6094_v0 }
 0x1ff   : > { %4098 = vpow2.f32 %v1286_v63  ;;  %v1250_v46 = vsub.f32 %v4773_v30, %v1193_v31  ;;  %v4029_v63 = vld [vmem:[#allocation8 + $0x6c] ss:$16 sps:$4 sm:$0xff]   ;;  %3794 = vmatprep.mubr.bf16.mxu0 %v4721_v61 }
 0x200   : > { %v4944_v48 = vpop.eup %4092  ;;  %2005 = vmatprep.subr.bf16.mxu0 %v4029_v63 }
 0x201   : > { %v1288_v49 = vmul.f32 1.442695, %v1250_v46  ;;  %1344 = vadd.xlane.f32.xlu0 %v4944_v48  ;;  %1230 = vmax.xlane.f32.xlu1 %v4941_v8  ;;  %v4024_v46 = vld [vmem:[#allocation8 + $0x60] ss:$16 sps:$4 sm:$0xff]  }
 0x202   : > { %v1195_v62 = vpop.xlane.xlu1 %1194  ;;  %1813 = vmatpush1.bf16.msra.mxu1 %v4024_v46  ;;  %v4038_v46 = vld [vmem:[#allocation8 + $0x24] ss:$16 sps:$4 sm:$0xff]  }
 0x203   : > { %4100 = vpow2.f32 %v1288_v49  ;;  %v1251_v30 = vsub.f32 %v4779_v35, %v1195_v62  ;;  %v4963_v35 = vadd.f32 %v801_v20, %v4734_v6  ;;  %v4027_v49 = vld [vmem:[#allocation8 + $0x68] ss:$16 sps:$4 sm:$0xff]   ;;  %v4969_v62 = vadd.f32 %v807_v24, %v4734_v6  ;;  %v4973_v20 = vpop.f32.mrf.mxu0  ;;  %v4032_v24 = vld [vmem:[#allocation8 + $0x44] ss:$16 sps:$4 sm:$0xff]  }
 0x204   : > { %v4958_v41 = vpop.eup %4094  ;;  %6148 = vst [vmem:[#allocation39_spill] sm:$0xff] %v4973_v20  ;;  %2006 = vmatpush1.bf16.msra.mxu0 %v4027_v49  ;;  %1814 = vmatprep.subr.bf16.mxu1 %v4032_v24  ;;  %v4041_v49 = vld [vmem:[#allocation8 + $0x2c] ss:$16 sps:$4 sm:$0xff]  }
 0x205   : > { %v1290_v28 = vmul.f32 1.442695, %v1251_v30  ;;  %1232 = vmax.xlane.f32.xlu0 %v4947_v26  ;;  %1346 = vadd.xlane.f32.xlu1 %v4958_v41 }
 0x206   : > { %v1197_v40 = vpop.xlane.xlu0 %1196  ;;  %2007 = vmatprep.subr.bf16.mxu0 %v4035_v11  ;;  %3795 = vmatmul.mubr.bf16.gmra.mxu0 %v4727_v1 }
 0x207   : > { %4102 = vpow2.f32 %v1290_v28  ;;  %v1252_v43 = vsub.f32 %v4785_v42, %v1197_v40  ;;  %v4030_v28 = vld [vmem:[#allocation8 + $0x40] ss:$16 sps:$4 sm:$0xff]   ;;  %v4033_v40 = vld [vmem:[#allocation8 + $0x48] ss:$16 sps:$4 sm:$0xff]   ;;  %2029 = vmatprep.mubr.bf16.mxu0 %v6094_v0 }
 0x208   : > { %v4966_v31 = vpop.eup %4096  ;;  %1815 = vmatpush1.bf16.msra.mxu1 %v4030_v28  ;;  %2008 = vmatpush1.bf16.msra.mxu0 %v4033_v40  ;;  %v4047_v28 = vld [vmem:[#allocation8 + $0xc] ss:$16 sps:$4 sm:$0xff]  }
 0x209   : > { %v1292_v30 = vmul.f32 1.442695, %v1252_v43  ;;  %1234 = vmax.xlane.f32.xlu1 %v4963_v35  ;;  %1348 = vadd.xlane.f32.xlu0 %v4966_v31  ;;  %v817_v43 = vpop.f32.mrf.mxu0 }
 0x20a   : > { %v1199_v37 = vpop.xlane.xlu1 %1198  ;;  %1816 = vmatprep.subr.bf16.mxu1 %v4038_v46  ;;  %2009 = vmatprep.subr.bf16.mxu0 %v4041_v49 }
 0x20b   : > { %4104 = vpow2.f32 %v1292_v30  ;;  %v1253_v42 = vsub.f32 %v4791_v50, %v1199_v37  ;;  %v4983_v50 = vadd.f32 %v811_v52, %v4734_v6  ;;  %v4991_v30 = vadd.f32 %v817_v43, %v4734_v6  ;;  %v4036_v52 = vld [vmem:[#allocation8 + $0x20] ss:$16 sps:$4 sm:$0xff]  }
 0x20c   : > { %v4978_v39 = vpop.eup %4098  ;;  %1817 = vmatpush1.bf16.msra.mxu1 %v4036_v52  ;;  %v4042_v43 = vld [vmem:[#allocation8] ss:$16 sps:$4 sm:$0xff]  }
 0x20d   : > { %v1294_v14 = vmul.f32 1.442695, %v1253_v42  ;;  %1350 = vadd.xlane.f32.xlu1 %v4978_v39  ;;  %1236 = vmax.xlane.f32.xlu0 %v4969_v62  ;;  %v4995_v42 = vpop.f32.mrf.mxu0 }
 0x20e   : > { %v1201_v58 = vpop.xlane.xlu0 %1200  ;;  %6149 = vst [vmem:[#allocation40_spill] sm:$0xff] %v4995_v42 }
 0x20f   : > { %4106 = vpow2.f32 %v1294_v14  ;;  %v1254_v55 = vsub.f32 %v4797_v57, %v1201_v58  ;;  %v4039_v57 = vld [vmem:[#allocation8 + $0x28] ss:$16 sps:$4 sm:$0xff]   ;;  %v4044_v14 = vld [vmem:[#allocation8 + $0x4] ss:$16 sps:$4 sm:$0xff]  }
 0x210   : > { %v4988_v63 = vpop.eup %4100  ;;  %2010 = vmatpush1.bf16.msra.mxu0 %v4039_v57  ;;  %v4045_v58 = vld [vmem:[#allocation8 + $0x8] ss:$16 sps:$4 sm:$0xff]   ;;  %1818 = vmatprep.subr.bf16.mxu1 %v4044_v14 }
 0x211   : > { %v1296_v37 = vmul.f32 1.442695, %v1254_v55  ;;  %1238 = vmax.xlane.f32.xlu1 %v4983_v50  ;;  %1352 = vadd.xlane.f32.xlu0 %v4988_v63  ;;  %v821_v55 = vpop.f32.mrf.mxu0 }
 0x212   : > { %v1203_v24 = vpop.xlane.xlu1 %1202  ;;  %2011 = vmatprep.subr.bf16.mxu0 %v4047_v28  ;;  %1819 = vmatpush1.bf16.msra.mxu1 %v4042_v43 }
 0x213   : > { %4108 = vpow2.f32 %v1296_v37  ;;  %v1255_v61 = vsub.f32 %v4803_v2, %v1203_v24  ;;  %v5005_v2 = vadd.f32 %v821_v55, %v4734_v6 }
 0x214   : > { %v5000_v11 = vpop.eup %4102  ;;  %2012 = vmatpush1.bf16.msra.mxu0 %v4045_v58 }
 0x215   : > { %v1298_v40 = vmul.f32 1.442695, %v1255_v61  ;;  %1354 = vadd.xlane.f32.xlu1 %v5000_v11  ;;  %1240 = vmax.xlane.f32.xlu0 %v4991_v30 }
 0x216   : > { %v1205_v1 = vpop.xlane.xlu0 %1204 }
 0x217   : > { %4110 = vpow2.f32 %v1298_v40  ;;  %v1256_v46 = vsub.f32 %v4809_v13, %v1205_v1 }
 0x218   : > { %v5010_v49 = vpop.eup %4104 }
 0x219   : > { %v1300_v37 = vmul.f32 1.442695, %v1256_v46  ;;  %1242 = vmax.xlane.f32.xlu1 %v5005_v2  ;;  %1356 = vadd.xlane.f32.xlu0 %v5010_v49 }
 0x21a   : > { %v1207_v52 = vpop.xlane.xlu1 %1206 }
 0x21b   : > { %4112 = vpow2.f32 %v1300_v37  ;;  %v1257_v6 = vsub.f32 %v4815_v33, %v1207_v52 }
 0x21c   : > { %v5015_v57 = vpop.eup %4106 }
 0x21d   : > { %v1302_v13 = vmul.f32 1.442695, %v1257_v6  ;;  %1358 = vadd.xlane.f32.xlu1 %v5015_v57 }
 0x21e   : > { %v1209_v24 = vpop.xlane.xlu0 %1208 }
 0x21f   : > { %4114 = vpow2.f32 %v1302_v13  ;;  %v1258_v61 = vsub.f32 %v4821_v47, %v1209_v24 }
 0x220   : > { %v5019_v14 = vpop.eup %4108 }
 0x221   : > { %v1304_v28 = vmul.f32 1.442695, %v1258_v61  ;;  %1360 = vadd.xlane.f32.xlu0 %v5019_v14 }
 0x222   : > { %v1211_v40 = vpop.xlane.xlu1 %1210 }
 0x223   : > { %4116 = vpow2.f32 %v1304_v28  ;;  %v1259_v43 = vsub.f32 %v4827_v59, %v1211_v40 }
 0x224   : > { %v5023_v58 = vpop.eup %4110 }
 0x225   : > { %v1306_v33 = vmul.f32 1.442695, %v1259_v43  ;;  %1362 = vadd.xlane.f32.xlu1 %v5023_v58 }
 0x226   : > { %v1213_v55 = vpop.xlane.xlu0 %1212 }
 0x227   : > { %4118 = vpow2.f32 %v1306_v33  ;;  %v1260_v1 = vsub.f32 %v4835_v4, %v1213_v55 }
 0x228   : > { %v5027_v46 = vpop.eup %4112 }
 0x229   : > { %v1308_v47 = vmul.f32 1.442695, %v1260_v1  ;;  %1364 = vadd.xlane.f32.xlu0 %v5027_v46 }
 0x22a   : > { %v1215_v37 = vpop.xlane.xlu1 %1214 }
 0x22b   : > { %4120 = vpow2.f32 %v1308_v47  ;;  %v1261_v52 = vsub.f32 %v4841_v16, %v1215_v37 }
 0x22c   : > { %v5031_v6 = vpop.eup %4114 }
 0x22d   : > { %v1310_v59 = vmul.f32 1.442695, %v1261_v52  ;;  %1366 = vadd.xlane.f32.xlu1 %v5031_v6 }
 0x22e   : > { %v1217_v13 = vpop.xlane.xlu0 %1216 }
 0x22f   : > { %4122 = vpow2.f32 %v1310_v59  ;;  %v1262_v24 = vsub.f32 %v4849_v29, %v1217_v13 }
 0x230   : > { %v5035_v61 = vpop.eup %4116 }
 0x231   : > { %v1312_v4 = vmul.f32 1.442695, %v1262_v24  ;;  %1368 = vadd.xlane.f32.xlu0 %v5035_v61 }
 0x232   : > { %v1219_v28 = vpop.xlane.xlu1 %1218 }
 0x233   : > { %4124 = vpow2.f32 %v1312_v4  ;;  %v1263_v40 = vsub.f32 %v4855_v44, %v1219_v28 }
 0x234   : > { %v5039_v43 = vpop.eup %4118 }
 0x235   : > { %v1314_v16 = vmul.f32 1.442695, %v1263_v40  ;;  %1370 = vadd.xlane.f32.xlu1 %v5039_v43 }
 0x236   : > { %v1221_v33 = vpop.xlane.xlu0 %1220 }
 0x237   : > { %4126 = vpow2.f32 %v1314_v16  ;;  %v1264_v55 = vsub.f32 %v4863_v56, %v1221_v33 }
 0x238   : > { %v5043_v1 = vpop.eup %4120 }
 0x239   : > { %v1316_v29 = vmul.f32 1.442695, %v1264_v55  ;;  %1372 = vadd.xlane.f32.xlu0 %v5043_v1 }
 0x23a   : > { %v1223_v47 = vpop.xlane.xlu1 %1222 }
 0x23b   : > { %4128 = vpow2.f32 %v1316_v29  ;;  %v1265_v37 = vsub.f32 %v4869_v19, %v1223_v47 }
 0x23c   : > { %v5047_v52 = vpop.eup %4122 }
 0x23d   : > { %v1318_v44 = vmul.f32 1.442695, %v1265_v37  ;;  %1374 = vadd.xlane.f32.xlu1 %v5047_v52 }
 0x23e   : > { %v1225_v59 = vpop.xlane.xlu0 %1224 }
 0x23f   : > { %4130 = vpow2.f32 %v1318_v44  ;;  %v1266_v13 = vsub.f32 %v4877_v54, %v1225_v59 }
 0x240   : > { %v5051_v24 = vpop.eup %4124 }
 0x241   : > { %v1320_v56 = vmul.f32 1.442695, %v1266_v13  ;;  %1376 = vadd.xlane.f32.xlu0 %v5051_v24 }
 0x242   : > { %v1227_v4 = vpop.xlane.xlu1 %1226 }
 0x243   : > { %4132 = vpow2.f32 %v1320_v56  ;;  %v1267_v28 = vsub.f32 %v4883_v10, %v1227_v4 }
 0x244   : > { %v5055_v40 = vpop.eup %4126  ;;  %v5070_v10 = vpop.f32.mrf.mxu1 }
 0x245   : > { %v1322_v19 = vmul.f32 1.442695, %v1267_v28  ;;  %1378 = vadd.xlane.f32.xlu1 %v5055_v40 }
 0x246   : > { %v5072_v29 = vpop.f32.mrf.mxu1 }
 0x247   : > { %4134 = vpow2.f32 %v1322_v19 }
 0x248   : > { %v5058_v16 = vpop.eup %4128  ;;  %v5074_v47 = vpop.f32.mrf.mxu1 }
 0x249   : > { %1380 = vadd.xlane.f32.xlu0 %v5058_v16 }
 0x24a   : > { %v5076_v37 = vpop.f32.mrf.mxu1 }
 0x24c   : > { %v5061_v54 = vpop.eup %4130  ;;  %v5078_v44 = vpop.f32.mrf.mxu1 }
 0x24d   : > { %1382 = vadd.xlane.f32.xlu1 %v5061_v54 }
 0x24e   : > { %v5080_v59 = vpop.f32.mrf.mxu1 }
 0x250   : > { %v5064_v33 = vpop.eup %4132  ;;  %v5082_v13 = vpop.f32.mrf.mxu1 }
 0x251   : > { %1384 = vadd.xlane.f32.xlu0 %v5064_v33 }
 0x252   : > { %v5084_v56 = vpop.f32.mrf.mxu1 }
 0x254   : > { %v5067_v55 = vpop.eup %4134  ;;  %v5086_v4 = vpop.f32.mrf.mxu1 }
 0x255   : > { %1386 = vadd.xlane.f32.xlu1 %v5067_v55 }
 0x256   : > { %v5088_v28 = vpop.f32.mrf.mxu1 }
 0x258   : > { %v5090_v19 = vpop.f32.mrf.mxu1 }
 0x25a   : > { %v5092_v42 = vpop.f32.mrf.mxu1 }
 0x25c   : > { %v5095_v7 = vpop.f32.mrf.mxu1 }
 0x25d   : > { %6150 = vst [vmem:[#allocation41_spill] sm:$0xff] %v5095_v7 }
 0x25e   : > { %v5098_v45 = vpop.f32.mrf.mxu1 }
 0x25f   : > { %6151 = vst [vmem:[#allocation42_spill] sm:$0xff] %v5098_v45 }
 0x282   : > { %v1341_v0 = vpop.xlane.xlu0 %1340 }
 0x283   : > { %4136 = vrcp.f32 %v1341_v0 }
 0x286   : > { %v1343_v34 = vpop.xlane.xlu1 %1342  ;;  %v1229_v20 = vpop.xlane.xlu0 %1228 }
 0x287   : > { %4138 = vrcp.f32 %v1343_v34  ;;  %v1268_v17 = vsub.f32 %v4926_v36, %v1229_v20  ;;  %v5101_v36 = vpop.f32.mrf.mxu1 }
 0x288   : > { %6152 = vst [vmem:[#allocation43_spill] sm:$0xff] %v5101_v36 }
 0x289   : > { %v1324_v25 = vmul.f32 1.442695, %v1268_v17  ;;  %v5106_v45 = vpop.f32.mrf.mxu1 }
 0x28a   : > { %v1231_v22 = vpop.xlane.xlu1 %1230  ;;  %v1345_v5 = vpop.xlane.xlu0 %1344  ;;  %6153 = vst [vmem:[#allocation44_spill] sm:$0xff] %v5106_v45 }
 0x28b   : > { %4140 = vpow2.f32 %v1324_v25  ;;  %v1269_v60 = vsub.f32 %v4941_v8, %v1231_v22 }
 0x28c   : > { %4142 = vrcp.f32 %v1345_v5 }
 0x28d   : > { %v1326_v53 = vmul.f32 1.442695, %v1269_v60 }
 0x28e   : > { %v1347_v0 = vpop.xlane.xlu1 %1346  ;;  %v1233_v38 = vpop.xlane.xlu0 %1232 }
 0x28f   : > { %4144 = vpow2.f32 %v1326_v53  ;;  %v1270_v32 = vsub.f32 %v4947_v26, %v1233_v38 }
 0x290   : > { %4146 = vrcp.f32 %v1347_v0  ;;  %v4137_v17 = vpop.eup %4136 }
 0x291   : > { %v1328_v34 = vmul.f32 1.442695, %v1270_v32  ;;  %v1436_v8 = vmul.f32 %v4137_v17, %v4923_v51  ;;  %v5117_v51 = vpop.f32.mrf.mxu1  ;;  %v6157_v17 = vmov 0  }
 0x292   : > { %v1235_v20 = vpop.xlane.xlu1 %1234  ;;  %v1349_v7 = vpop.xlane.xlu0 %1348  ;;  %6156 = vst [vmem:[#allocation47_spill] sm:$0xff] %v5117_v51 }
 0x293   : > { %4148 = vpow2.f32 %v1328_v34  ;;  %v1271_v25 = vsub.f32 %v4963_v35, %v1235_v20  ;;  %v5113_v35 = vpop.f32.mrf.mxu0 }
 0x294   : > { %v4139_v22 = vpop.eup %4138  ;;  %4150 = vrcp.f32 %v1349_v7  ;;  %6155 = vst [vmem:[#allocation46_spill] sm:$0xff] %v5113_v35 }
 0x295   : > { %v1330_v60 = vmul.f32 1.442695, %v1271_v25  ;;  %v1437_v5 = vmul.f32 %v4139_v22, %v4936_v21  ;;  %v5123_v25 = vpop.f32.mrf.mxu0 }
 0x296   : > { %v1351_v38 = vpop.xlane.xlu1 %1350  ;;  %v1237_v53 = vpop.xlane.xlu0 %1236 }
 0x297   : > { %4152 = vpow2.f32 %v1330_v60  ;;  %v1272_v32 = vsub.f32 %v4969_v62, %v1237_v53  ;;  %v5109_v26 = vpack.c.bf16 %v1437_v5, %v1436_v8  ;;  %v5128_v5 = vpop.f32.mrf.mxu1 }
 0x298   : > { %v5111_v0 = vpop.eup %4140  ;;  %4154 = vrcp.f32 %v1351_v38  ;;  %6158 = vst [vmem:[#allocation48_spill] sm:$0xff] %v5128_v5  ;;  %v5130_v38 = vpop.f32.mrf.mxu0 }
 0x299   : > { %6154 = vst [vmem:[#allocation45_spill] sm:$0xff] %v5109_v26  ;;  %v1332_v34 = vmul.f32 1.442695, %v1272_v32  ;;  %1837 = vmatmul.mubr.bf16.vlgmr.msra.gmra.mxu1 %v5109_v26  ;;  %2030 = vmatmul.mubr.bf16.vlgmr.msra.gmra.mxu0 %v5109_v26  ;;  %v4143_v62 = vpop.eup %4142 }
 0x29a   : > { %1388 = vadd.xlane.f32.xlu0 %v5111_v0  ;;  %v1239_v7 = vpop.xlane.xlu1 %1238  ;;  %v1353_v21 = vpop.xlane.xlu0 %1352  ;;  %1846 = vmatprep.mubr.bf16.mxu1 %v6157_v17 }
 0x29b   : > { %4156 = vpow2.f32 %v1332_v34  ;;  %v1273_v20 = vsub.f32 %v4983_v50, %v1239_v7  ;;  %2039 = vmatprep.mubr.bf16.mxu0 %v6157_v17  ;;  %v1438_v34 = vmul.f32 %v4143_v62, %v4944_v48  ;;  %v5135_v26 = vpop.f32.mrf.mxu0 }
 0x29c   : > { %v5125_v22 = vpop.eup %4144  ;;  %4158 = vrcp.f32 %v1353_v21  ;;  %v5142_v21 = vpop.f32.mrf.mxu1 }
 0x29d   : > { %v4147_v60 = vpop.eup %4146  ;;  %v1334_v8 = vmul.f32 1.442695, %v1273_v20  ;;  %1390 = vadd.xlane.f32.xlu1 %v5125_v22  ;;  %6160 = vst [vmem:[#allocation50_spill] sm:$0xff] %v5142_v21  ;;  %v5144_v51 = vpop.f32.mrf.mxu0 }
 0x29e   : > { %v1355_v53 = vpop.xlane.xlu1 %1354  ;;  %v1241_v32 = vpop.xlane.xlu0 %1240  ;;  %v1439_v50 = vmul.f32 %v4147_v60, %v4958_v41 }
 0x29f   : > { %4160 = vpow2.f32 %v1334_v8  ;;  %v1274_v7 = vsub.f32 %v4991_v30, %v1241_v32  ;;  %v5151_v60 = vpop.f32.mrf.mxu0  ;;  %v4049_v32 = vld [vmem:[#allocation10 + $0x38] sm:$0xff]  }
 0x2a0   : > { %v5137_v35 = vpop.eup %4148  ;;  %4162 = vrcp.f32 %v1355_v53  ;;  %v5139_v20 = vpack.c.bf16 %v1439_v50, %v1438_v34  ;;  %6161 = vst [vmem:[#allocation51_spill] sm:$0xff] %v5151_v60  ;;  %v4048_v53 = vld [vmem:[#allocation10 + $0x78] sm:$0xff]  }
 0x2a1   : > { %v1336_v5 = vmul.f32 1.442695, %v1274_v7  ;;  %1392 = vadd.xlane.f32.xlu0 %v5137_v35  ;;  %v4151_v41 = vpop.eup %4150  ;;  %v5156_v7 = vpop.f32.mrf.mxu1  ;;  %3502 = vmatprep.subr.bf16.mxu1 %v4048_v53 }
 0x2a2   : > { %6159 = vst [vmem:[#allocation49_spill] sm:$0xff] %v5139_v20  ;;  %1847 = vmatmul.mubr.bf16.gmra.mxu1 %v5139_v20  ;;  %2040 = vmatmul.mubr.bf16.gmra.mxu0 %v5139_v20  ;;  %v1243_v48 = vpop.xlane.xlu1 %1242  ;;  %v1357_v62 = vpop.xlane.xlu0 %1356  ;;  %6162 = vst [vmem:[#allocation52_spill] sm:$0xff] %v5156_v7 }
 0x2a3   : > { %4164 = vpow2.f32 %v1336_v5  ;;  %v1275_v30 = vsub.f32 %v5005_v2, %v1243_v48  ;;  %1856 = vmatprep.mubr.bf16.mxu1 %v6157_v17  ;;  %2049 = vmatprep.mubr.bf16.mxu0 %v6157_v17  ;;  %v5158_v5 = vpop.f32.mrf.mxu0  ;;  %v1440_v48 = vmul.f32 %v4151_v41, %v4966_v31  ;;  %v5169_v7 = vpop.f32.mrf.mxu1 }
 0x2a4   : > { %v5153_v8 = vpop.eup %4152  ;;  %4166 = vrcp.f32 %v1357_v62  ;;  %3503 = vmatpush3.bf16.msra.mxu1 %v4049_v32  ;;  %6165 = vst [vmem:[#allocation55_spill] sm:$0xff] %v5169_v7 }
 0x2a5   : > { %v4155_v34 = vpop.eup %4154  ;;  %v1338_v50 = vmul.f32 1.442695, %v1275_v30  ;;  %1394 = vadd.xlane.f32.xlu1 %v5153_v8  ;;  %v5162_v21 = vpop.f32.mrf.mxu0 }
 0x2a6   : > { %v1359_v2 = vpop.xlane.xlu1 %1358  ;;  %v1441_v20 = vmul.f32 %v4155_v34, %v4978_v39  ;;  %6163 = vst [vmem:[#allocation53_spill] sm:$0xff] %v5162_v21  ;;  %v5182_v32 = vpop.f32.mrf.mxu1 }
 0x2a7   : > { %4168 = vpow2.f32 %v1338_v50  ;;  %v5171_v62 = vpop.f32.mrf.mxu0  ;;  %6167 = vst [vmem:[#allocation57_spill] sm:$0xff] %v5182_v32 }
 0x2a8   : > { %v5164_v36 = vpop.eup %4156  ;;  %4170 = vrcp.f32 %v1359_v2  ;;  %v5166_v30 = vpack.c.bf16 %v1441_v20, %v1440_v48 }
 0x2a9   : > { %1396 = vadd.xlane.f32.xlu0 %v5164_v36  ;;  %v4159_v39 = vpop.eup %4158  ;;  %v5177_v41 = vpop.f32.mrf.mxu0 }
 0x2aa   : > { %6164 = vst [vmem:[#allocation54_spill] sm:$0xff] %v5166_v30  ;;  %1857 = vmatmul.mubr.bf16.gmra.mxu1 %v5166_v30  ;;  %2050 = vmatmul.mubr.bf16.gmra.mxu0 %v5166_v30  ;;  %v1361_v31 = vpop.xlane.xlu0 %1360  ;;  %6166 = vst [vmem:[#allocation56_spill] sm:$0xff] %v5177_v41  ;;  %v1442_v2 = vmul.f32 %v4159_v39, %v4988_v63 }
 0x2ab   : > { %1866 = vmatprep.mubr.bf16.mxu1 %v6157_v17  ;;  %2059 = vmatprep.mubr.bf16.mxu0 %v6157_v17  ;;  %4172 = vrcp.f32 %v1361_v31  ;;  %v5184_v34 = vpop.f32.mrf.mxu0  ;;  %v5195_v31 = vpop.f32.mrf.mxu1 }
 0x2ac   : > { %v5179_v20 = vpop.eup %4160  ;;  %6168 = vst [vmem:[#allocation58_spill] sm:$0xff] %v5184_v34  ;;  %6171 = vst [vmem:[#allocation61_spill] sm:$0xff] %v5195_v31 }
 0x2ad   : > { %v4163_v53 = vpop.eup %4162  ;;  %1398 = vadd.xlane.f32.xlu1 %v5179_v20  ;;  %v5188_v30 = vpop.f32.mrf.mxu0 }
 0x2ae   : > { %v1363_v50 = vpop.xlane.xlu1 %1362  ;;  %v1443_v48 = vmul.f32 %v4163_v53, %v5000_v11  ;;  %6169 = vst [vmem:[#allocation59_spill] sm:$0xff] %v5188_v30  ;;  %v4050_v53 = vld [vmem:[#allocation10 + $0x70] sm:$0xff]   ;;  %v5208_v31 = vpop.f32.mrf.mxu1 }
 0x2af   : > { %4174 = vrcp.f32 %v1363_v50  ;;  %v5197_v45 = vpop.f32.mrf.mxu0  ;;  %v4051_v50 = vld [vmem:[#allocation10 + $0x30] sm:$0xff]   ;;  %6174 = vst [vmem:[#allocation64_spill] sm:$0xff] %v5208_v31  ;;  %3504 = vmatprep.subr.bf16.mxu1 %v4050_v53 }
 0x2b0   : > { %v5190_v7 = vpop.eup %4164  ;;  %v5192_v41 = vpack.c.bf16 %v1443_v48, %v1442_v2  ;;  %6172 = vst [vmem:[#allocation62_spill] sm:$0xff] %v5197_v45  ;;  %3505 = vmatpush3.bf16.msra.mxu1 %v4051_v50 }
 0x2b1   : > { %1400 = vadd.xlane.f32.xlu0 %v5190_v7  ;;  %v4167_v39 = vpop.eup %4166  ;;  %v5203_v11 = vpop.f32.mrf.mxu0 }
 0x2b2   : > { %6170 = vst [vmem:[#allocation60_spill] sm:$0xff] %v5192_v41  ;;  %1867 = vmatmul.mubr.bf16.gmra.mxu1 %v5192_v41  ;;  %2060 = vmatmul.mubr.bf16.gmra.mxu0 %v5192_v41  ;;  %v1365_v63 = vpop.xlane.xlu0 %1364  ;;  %6173 = vst [vmem:[#allocation63_spill] sm:$0xff] %v5203_v11  ;;  %v1444_v30 = vmul.f32 %v4167_v39, %v5010_v49  ;;  %v418_v11 = vsub.s32 4, %v4731_v3  ;;  %v5225_v39 = vld [vmem:[#allocation7] sm:$0x1f] }
 0x2b3   : > { %1876 = vmatprep.mubr.bf16.mxu1 %v6157_v17  ;;  %2069 = vmatprep.mubr.bf16.mxu0 %v6157_v17  ;;  %4176 = vrcp.f32 %v1365_v63  ;;  %v5210_v32 = vpop.f32.mrf.mxu0  ;;  %v5219_v63 = vpop.f32.mrf.mxu1 }
 0x2b4   : > { %v5205_v2 = vpop.eup %4168  ;;  %6175 = vst [vmem:[#allocation65_spill] sm:$0xff] %v5210_v32  ;;  %6178 = vst [vmem:[#allocation68_spill] sm:$0xff] %v5219_v63 }
 0x2b5   : > { %v4171_v48 = vpop.eup %4170  ;;  %1402 = vadd.xlane.f32.xlu1 %v5205_v2  ;;  %v5215_v34 = vpop.f32.mrf.mxu0 }
 0x2b6   : > { %v1367_v41 = vpop.xlane.xlu1 %1366  ;;  %v1445_v45 = vmul.f32 %v4171_v48, %v5015_v57  ;;  %6176 = vst [vmem:[#allocation66_spill] sm:$0xff] %v5215_v34  ;;  %v5228_v57 = vrot.slane %v5225_v39, %v418_v11  ;;  %v5237_v48 = vpop.f32.mrf.mxu1 }
 0x2b7   : > { %4178 = vrcp.f32 %v1367_v41  ;;  %v5221_v60 = vpop.f32.mrf.mxu0  ;;  %6181 = vst [vmem:[#allocation71_spill] sm:$0xff] %v5237_v48 }
 0x2b8   : > { %v5217_v21 = vpack.c.bf16 %v1445_v45, %v1444_v30  ;;  %6179 = vst [vmem:[#allocation69_spill] sm:$0xff] %v5221_v60  ;;  %v4173_v31 = vpop.eup %4172 }
 0x2b9   : > { %v3784_v45 = vpop.f32.mrf.mxu0  ;;  %v1446_v53 = vmul.f32 %v4173_v31, %v5019_v14  ;;  %v4052_v14 = vld [vmem:[#allocation10 + $0x68] sm:$0xff]   ;;  %v4054_v31 = vld [vmem:[#allocation10 + $0xf8] sm:$0xff]  }
 0x2ba   : > { %6177 = vst [vmem:[#allocation67_spill] sm:$0xff] %v5217_v21  ;;  %1877 = vmatmul.mubr.bf16.gmra.mxu1 %v5217_v21  ;;  %2070 = vmatmul.mubr.bf16.gmra.mxu0 %v5217_v21  ;;  %v1369_v49 = vpop.xlane.xlu0 %1368  ;;  %v5233_v41 = vadd.f32 %v3784_v45, %v5228_v57  ;;  %v5247_v45 = vpop.f32.mrf.mxu1 }
 0x2bb   : > { %1886 = vmatprep.mubr.bf16.mxu1 %v6157_v17  ;;  %2079 = vmatprep.mubr.bf16.mxu0 %v6157_v17  ;;  %4180 = vrcp.f32 %v1369_v49  ;;  %v1117_v21 = vpop.f32.mrf.mxu0  ;;  %6185 = vst [vmem:[#allocation75_spill] sm:$0xff] %v5247_v45 }
 0x2bc   : > { %v4175_v30 = vpop.eup %4174  ;;  %6180 = vst [vmem:[#allocation70_spill] sm:$0xff] %v5233_v41  ;;  %v5240_v11 = vadd.f32 %v1117_v21, %v5228_v57  ;;  %3506 = vmatprep.subr.bf16.mxu1 %v4052_v14  ;;  %3614 = vmatprep.subr.bf16.mxu0 %v4054_v31  ;;  %v4056_v31 = vld [vmem:[#allocation10 + $0xf0] sm:$0xff]  }
 0x2bd   : > { %v1447_v50 = vmul.f32 %v4175_v30, %v5023_v58  ;;  %v3785_v60 = vpop.f32.mrf.mxu0  ;;  %v4053_v58 = vld [vmem:[#allocation10 + $0x28] sm:$0xff]  }
 0x2be   : > { %v1371_v34 = vpop.xlane.xlu1 %1370  ;;  %6182 = vst [vmem:[#allocation72_spill] sm:$0xff] %v5240_v11  ;;  %v5245_v32 = vadd.f32 %v3785_v60, %v5228_v57  ;;  %v5260_v11 = vpop.f32.mrf.mxu1  ;;  %3507 = vmatpush3.bf16.msra.mxu1 %v4053_v58  ;;  %v4058_v58 = vld [vmem:[#allocation10 + $0xe8] sm:$0xff]  }
 0x2bf   : > { %4182 = vrcp.f32 %v1371_v34  ;;  %v5242_v63 = vpack.c.bf16 %v1447_v50, %v1446_v53  ;;  %v5249_v49 = vpop.f32.mrf.mxu0  ;;  %v4055_v34 = vld [vmem:[#allocation10 + $0xb8] sm:$0xff]  }
 0x2c0   : > { %6184 = vst [vmem:[#allocation74_spill] sm:$0xff] %v5245_v32  ;;  %6186 = vst [vmem:[#allocation76_spill] sm:$0xff] %v5249_v49  ;;  %v4177_v30 = vpop.eup %4176  ;;  %3615 = vmatpush3.bf16.msra.mxu0 %v4055_v34 }
 0x2c1   : > { %6183 = vst [vmem:[#allocation73_spill] sm:$0xff] %v5242_v63  ;;  %v3788_v60 = vpop.f32.mrf.mxu0  ;;  %v1448_v32 = vmul.f32 %v4177_v30, %v5027_v46  ;;  %v5270_v46 = vpop.f32.mrf.mxu1  ;;  %v4057_v30 = vld [vmem:[#allocation10 + $0xb0] sm:$0xff]   ;;  %3616 = vmatprep.subr.bf16.mxu0 %v4056_v31 }
 0x2c2   : > { %1887 = vmatmul.mubr.bf16.gmra.mxu1 %v5242_v63  ;;  %2080 = vmatmul.mubr.bf16.gmra.mxu0 %v5242_v63  ;;  %v1373_v21 = vpop.xlane.xlu0 %1372  ;;  %v5256_v50 = vadd.f32 %v3788_v60, %v5228_v57  ;;  %6191 = vst [vmem:[#allocation81_spill] sm:$0xff] %v5270_v46 }
 0x2c3   : > { %1896 = vmatprep.mubr.bf16.mxu1 %v6157_v17  ;;  %2089 = vmatprep.mubr.bf16.mxu0 %v6157_v17  ;;  %4184 = vrcp.f32 %v1373_v21  ;;  %v1133_v63 = vpop.f32.mrf.mxu0 }
 0x2c4   : > { %v4179_v53 = vpop.eup %4178  ;;  %6187 = vst [vmem:[#allocation77_spill] sm:$0xff] %v5256_v50  ;;  %v5263_v45 = vadd.f32 %v1133_v63, %v5228_v57  ;;  %3617 = vmatpush3.bf16.msra.mxu0 %v4057_v30 }
 0x2c5   : > { %v1449_v41 = vmul.f32 %v4179_v53, %v5031_v6  ;;  %v3789_v60 = vpop.f32.mrf.mxu0  ;;  %3618 = vmatprep.subr.bf16.mxu0 %v4058_v58  ;;  %v4065_v58 = vld [vmem:[#allocation10 + $0xd8] sm:$0xff]  }
 0x2c6   : > { %v1375_v49 = vpop.xlane.xlu1 %1374  ;;  %6188 = vst [vmem:[#allocation78_spill] sm:$0xff] %v5263_v45  ;;  %v5268_v14 = vadd.f32 %v3789_v60, %v5228_v57  ;;  %v5283_v60 = vpop.f32.mrf.mxu1 }
 0x2c7   : > { %4186 = vrcp.f32 %v1375_v49  ;;  %v5265_v48 = vpack.c.bf16 %v1449_v41, %v1448_v32  ;;  %v5272_v6 = vpop.f32.mrf.mxu0  ;;  %6194 = vst [vmem:[#allocation84_spill] sm:$0xff] %v5283_v60  ;;  %v4067_v60 = vld [vmem:[#allocation10 + $0x98] sm:$0xff]  }
 0x2c8   : > { %6190 = vst [vmem:[#allocation80_spill] sm:$0xff] %v5268_v14  ;;  %6192 = vst [vmem:[#allocation82_spill] sm:$0xff] %v5272_v6  ;;  %v4181_v21 = vpop.eup %4180  ;;  %v4059_v14 = vld [vmem:[#allocation10 + $0xa8] sm:$0xff]  }
 0x2c9   : > { %6189 = vst [vmem:[#allocation79_spill] sm:$0xff] %v5265_v48  ;;  %v3792_v32 = vpop.f32.mrf.mxu0  ;;  %v1450_v34 = vmul.f32 %v4181_v21, %v5035_v61  ;;  %v4060_v61 = vld [vmem:[#allocation10 + $0x60] sm:$0xff]   ;;  %3619 = vmatpush3.bf16.msra.mxu0 %v4059_v14 }
 0x2ca   : > { %1897 = vmatmul.mubr.bf16.gmra.mxu1 %v5265_v48  ;;  %2090 = vmatmul.mubr.bf16.gmra.mxu0 %v5265_v48  ;;  %v1377_v63 = vpop.xlane.xlu0 %1376  ;;  %v5279_v49 = vadd.f32 %v3792_v32, %v5228_v57  ;;  %v4061_v21 = vld [vmem:[#allocation10 + $0xe0] sm:$0xff]  }
 0x2cb   : > { %1906 = vmatprep.mubr.bf16.mxu1 %v6157_v17  ;;  %2099 = vmatprep.mubr.bf16.mxu0 %v6157_v17  ;;  %4188 = vrcp.f32 %v1377_v63  ;;  %v1149_v48 = vpop.f32.mrf.mxu0  ;;  %v4062_v63 = vld [vmem:[#allocation10 + $0x20] sm:$0xff]  }
 0x2cc   : > { %v4183_v41 = vpop.eup %4182  ;;  %6193 = vst [vmem:[#allocation83_spill] sm:$0xff] %v5279_v49  ;;  %v5286_v45 = vadd.f32 %v1149_v48, %v5228_v57  ;;  %3508 = vmatprep.subr.bf16.mxu1 %v4060_v61  ;;  %3620 = vmatprep.subr.bf16.mxu0 %v4061_v21 }
 0x2cd   : > { %v1451_v53 = vmul.f32 %v4183_v41, %v5039_v43  ;;  %v3793_v32 = vpop.f32.mrf.mxu0  ;;  %v5293_v43 = vpop.f32.mrf.mxu1  ;;  %v4063_v41 = vld [vmem:[#allocation10 + $0xa0] sm:$0xff]   ;;  %3509 = vmatpush3.bf16.msra.mxu1 %v4062_v63 }
 0x2ce   : > { %v1379_v50 = vpop.xlane.xlu1 %1378  ;;  %6195 = vst [vmem:[#allocation85_spill] sm:$0xff] %v5286_v45  ;;  %v5291_v31 = vadd.f32 %v3793_v32, %v5228_v57  ;;  %6198 = vst [vmem:[#allocation88_spill] sm:$0xff] %v5293_v43  ;;  %3621 = vmatpush3.bf16.msra.mxu0 %v4063_v41  ;;  %v4070_v41 = vld [vmem:[#allocation10 + $0x10] sm:$0xff]  }
 0x2cf   : > { %4190 = vrcp.f32 %v1379_v50  ;;  %v5288_v6 = vpack.c.bf16 %v1451_v53, %v1450_v34  ;;  %v5295_v30 = vpop.f32.mrf.mxu0  ;;  %v4064_v50 = vld [vmem:[#allocation10 + $0x58] sm:$0xff]   ;;  %3622 = vmatprep.subr.bf16.mxu0 %v4065_v58 }
 0x2d0   : > { %6197 = vst [vmem:[#allocation87_spill] sm:$0xff] %v5291_v31  ;;  %6199 = vst [vmem:[#allocation89_spill] sm:$0xff] %v5295_v30  ;;  %v4185_v49 = vpop.eup %4184  ;;  %v4066_v30 = vld [vmem:[#allocation10 + $0x18] sm:$0xff]   ;;  %3510 = vmatprep.subr.bf16.mxu1 %v4064_v50  ;;  %v4073_v50 = vld [vmem:[#allocation10 + $0xc8] sm:$0xff]  }
 0x2d1   : > { %6196 = vst [vmem:[#allocation86_spill] sm:$0xff] %v5288_v6  ;;  %v3796_v34 = vpop.f32.mrf.mxu0  ;;  %v1452_v32 = vmul.f32 %v4185_v49, %v5043_v1  ;;  %v4069_v49 = vld [vmem:[#allocation10 + $0xd0] sm:$0xff]   ;;  %3511 = vmatpush3.bf16.msra.mxu1 %v4066_v30 }
 0x2d2   : > { %1907 = vmatmul.mubr.bf16.gmra.mxu1 %v5288_v6  ;;  %2100 = vmatmul.mubr.bf16.gmra.mxu0 %v5288_v6  ;;  %v1381_v48 = vpop.xlane.xlu0 %1380  ;;  %v5302_v14 = vadd.f32 %v3796_v34, %v5228_v57  ;;  %v5306_v6 = vpop.f32.mrf.mxu1 }
 0x2d3   : > { %1916 = vmatprep.mubr.bf16.mxu1 %v6157_v17  ;;  %2109 = vmatprep.mubr.bf16.mxu0 %v6157_v17  ;;  %4192 = vrcp.f32 %v1381_v48  ;;  %v1165_v45 = vpop.f32.mrf.mxu0  ;;  %v4071_v48 = vld [vmem:[#allocation10 + $0x90] sm:$0xff]  }
 0x2d4   : > { %v4187_v53 = vpop.eup %4186  ;;  %6200 = vst [vmem:[#allocation90_spill] sm:$0xff] %v5302_v14  ;;  %v5309_v46 = vadd.f32 %v1165_v45, %v5228_v57  ;;  %v5316_v63 = vpop.f32.mrf.mxu1  ;;  %3623 = vmatpush3.bf16.msra.mxu0 %v4067_v60 }
 0x2d5   : > { %v1453_v31 = vmul.f32 %v4187_v53, %v5047_v52  ;;  %v3797_v21 = vpop.f32.mrf.mxu0  ;;  %v4068_v52 = vld [vmem:[#allocation10 + $0x50] sm:$0xff]   ;;  %3624 = vmatprep.subr.bf16.mxu0 %v4069_v49  ;;  %v4074_v53 = vld [vmem:[#allocation10 + $0x8] sm:$0xff]   ;;  %v4077_v49 = vld [vmem:[#allocation10 + $0xc0] sm:$0xff]  }
 0x2d6   : > { %v1383_v43 = vpop.xlane.xlu1 %1382  ;;  %6201 = vst [vmem:[#allocation91_spill] sm:$0xff] %v5309_v46  ;;  %v5314_v1 = vadd.f32 %v3797_v21, %v5228_v57  ;;  %3512 = vmatprep.subr.bf16.mxu1 %v4068_v52  ;;  %v5324_v58 = vpop.f32.mrf.mxu1  ;;  %v4076_v52 = vld [vmem:[#allocation10 + $0x40] sm:$0xff]  }
 0x2d7   : > { %4194 = vrcp.f32 %v1383_v43  ;;  %v5311_v61 = vpack.c.bf16 %v1453_v31, %v1452_v32  ;;  %v4072_v43 = vld [vmem:[#allocation10 + $0x48] sm:$0xff]   ;;  %3513 = vmatpush3.bf16.msra.mxu1 %v4070_v41 }
 0x2d8   : > { %6203 = vst [vmem:[#allocation93_spill] sm:$0xff] %v5314_v1  ;;  %v4189_v34 = vpop.eup %4188  ;;  %3625 = vmatpush3.bf16.msra.mxu0 %v4071_v48  ;;  %v4075_v32 = vld [vmem:[#allocation10 + $0x88] sm:$0xff]   ;;  %3514 = vmatprep.subr.bf16.mxu1 %v4072_v43  ;;  %v5328_v1 = vpop.f32.mrf.mxu1 }
 0x2d9   : > { %6202 = vst [vmem:[#allocation92_spill] sm:$0xff] %v5311_v61  ;;  %v1454_v60 = vmul.f32 %v4189_v34, %v5051_v24  ;;  %3626 = vmatprep.subr.bf16.mxu0 %v4073_v50  ;;  %v4078_v24 = vld [vmem:[#allocation10] sm:$0xff]  }
 0x2da   : > { %1917 = vmatmul.mubr.bf16.gmra.mxu1 %v5311_v61  ;;  %2110 = vmatmul.mubr.bf16.gmra.mxu0 %v5311_v61  ;;  %v1385_v45 = vpop.xlane.xlu0 %1384 }
 0x2db   : > { %1926 = vmatprep.mubr.bf16.mxu1 %v6157_v17  ;;  %2119 = vmatprep.mubr.bf16.mxu0 %v6157_v17  ;;  %4196 = vrcp.f32 %v1385_v45 }
 0x2dc   : > { %v4191_v31 = vpop.eup %4190  ;;  %3515 = vmatpush3.bf16.msra.mxu1 %v4074_v53  ;;  %3627 = vmatpush3.bf16.msra.mxu0 %v4075_v32 }
 0x2dd   : > { %v1455_v30 = vmul.f32 %v4191_v31, %v5055_v40  ;;  %v4079_v40 = vld [vmem:[#allocation10 + $0x80] sm:$0xff]   ;;  %3516 = vmatprep.subr.bf16.mxu1 %v4076_v52  ;;  %3628 = vmatprep.subr.bf16.mxu0 %v4077_v49  ;;  %v5336_v31 = vpop.f32.mrf.mxu1 }
 0x2de   : > { %v1387_v21 = vpop.xlane.xlu1 %1386 }
 0x2df   : > { %4198 = vrcp.f32 %v1387_v21  ;;  %v5326_v61 = vpack.c.bf16 %v1455_v30, %v1454_v60  ;;  %v5340_v50 = vpop.f32.mrf.mxu1 }
 0x2e0   : > { %v4193_v34 = vpop.eup %4192  ;;  %3517 = vmatpush3.bf16.msra.mxu1 %v4078_v24  ;;  %3629 = vmatpush3.bf16.msra.mxu0 %v4079_v40 }
 0x2e1   : > { %6204 = vst [vmem:[#allocation94_spill] sm:$0xff] %v5326_v61  ;;  %v1456_v48 = vmul.f32 %v4193_v34, %v5058_v16  ;;  %v5348_v53 = vpop.f32.mrf.mxu1 }
 0x2e2   : > { %1927 = vmatmul.mubr.bf16.gmra.mxu1 %v5326_v61  ;;  %2120 = vmatmul.mubr.bf16.gmra.mxu0 %v5326_v61 }
 0x2e3   : > { %1936 = vmatprep.mubr.bf16.mxu1 %v6157_v17  ;;  %2129 = vmatprep.mubr.bf16.mxu0 %v6157_v17  ;;  %v5352_v21 = vpop.f32.mrf.mxu1 }
 0x2e4   : > { %v4195_v41 = vpop.eup %4194 }
 0x2e5   : > { %v1457_v45 = vmul.f32 %v4195_v41, %v5061_v54  ;;  %v5358_v52 = vpop.f32.mrf.mxu1 }
 0x2e7   : > { %v5338_v43 = vpack.c.bf16 %v1457_v45, %v1456_v48  ;;  %v5360_v49 = vpop.f32.mrf.mxu1 }
 0x2e8   : > { %v4197_v60 = vpop.eup %4196 }
 0x2e9   : > { %6205 = vst [vmem:[#allocation95_spill] sm:$0xff] %v5338_v43  ;;  %v1458_v54 = vmul.f32 %v4197_v60, %v5064_v33  ;;  %v5362_v33 = vpop.f32.mrf.mxu1 }
 0x2ea   : > { %1937 = vmatmul.mubr.bf16.gmra.mxu1 %v5338_v43  ;;  %2130 = vmatmul.mubr.bf16.gmra.mxu0 %v5338_v43 }
 0x2eb   : > { %1946 = vmatprep.mubr.bf16.mxu1 %v6157_v17  ;;  %2139 = vmatprep.mubr.bf16.mxu0 %v6157_v17 }
 0x2ec   : > { %v4199_v16 = vpop.eup %4198 }
 0x2ed   : > { %v1459_v30 = vmul.f32 %v4199_v16, %v5067_v55  ;;  %v5364_v55 = vpop.f32.mrf.mxu1 }
 0x2ef   : > { %v5350_v32 = vpack.c.bf16 %v1459_v30, %v1458_v54  ;;  %v5366_v24 = vpop.f32.mrf.mxu1 }
 0x2f1   : > { %6206 = vst [vmem:[#allocation96_spill] sm:$0xff] %v5350_v32  ;;  %v5368_v40 = vpop.f32.mrf.mxu1 }
 0x2f2   : > { %1947 = vmatmul.mubr.bf16.gmra.mxu1 %v5350_v32  ;;  %2140 = vmatmul.mubr.bf16.gmra.mxu0 %v5350_v32  ;;  %6207 = vst [vmem:[#allocation97_spill] sm:$0xff] %v5368_v40  ;;  %v5384_v32 = vld [vmem:[#allocation10 + $0x138] sm:$0xff]  }
 0x2f3   : > { %1956 = vmatprep.mubr.bf16.mxu1 %v6157_v17  ;;  %2149 = vmatprep.mubr.bf16.mxu0 %v6157_v17  ;;  %v5370_v34 = vpop.f32.mrf.mxu1 }
 0x2f4   : > { %6208 = vst [vmem:[#allocation98_spill] sm:$0xff] %v5370_v34  ;;  %3798 = vmatprep.subr.bf16.mxu1 %v5384_v32 }
 0x2f5   : > { %v5372_v41 = vpop.f32.mrf.mxu1 }
 0x2f6   : > { %6209 = vst [vmem:[#allocation99_spill] sm:$0xff] %v5372_v41 }
 0x2f7   : > { %v5374_v48 = vpop.f32.mrf.mxu1 }
 0x2f9   : > { %v5376_v45 = vpop.f32.mrf.mxu1 }
 0x2fa   : > { %6210 = vst [vmem:[#allocation100_spill] sm:$0xff] %v5376_v45 }
 0x2fb   : > { %v5378_v60 = vpop.f32.mrf.mxu1 }
 0x2fc   : > { %6211 = vst [vmem:[#allocation101_spill] sm:$0xff] %v5378_v60 }
 0x2fd   : > { %v5380_v16 = vpop.f32.mrf.mxu1 }
 0x2fe   : > { %6212 = vst [vmem:[#allocation102_spill] sm:$0xff] %v5380_v16 }
 0x2ff   : > { %v5382_v30 = vpop.f32.mrf.mxu1 }
 0x300   : > { %6213 = vst [vmem:[#allocation103_spill] sm:$0xff] %v5382_v30 }
 0x301   : > { %v5387_v61 = vpop.f32.mrf.mxu1 }
 0x302   : > { %6214 = vst [vmem:[#allocation104_spill] sm:$0xff] %v5387_v61 }
 0x303   : > { %v5389_v46 = vpop.f32.mrf.mxu1 }
 0x304   : > { %6215 = vst [vmem:[#allocation105_spill] sm:$0xff] %v5389_v46 }
 0x305   : > { %v5391_v60 = vpop.f32.mrf.mxu1 }
 0x306   : > { %6216 = vst [vmem:[#allocation106_spill] sm:$0xff] %v5391_v60 }
 0x307   : > { %v5395_v41 = vpop.f32.mrf.mxu1 }
 0x308   : > { %6217 = vst [vmem:[#allocation107_spill] sm:$0xff] %v5395_v41 }
 0x323   : > { %v1389_v54 = vpop.xlane.xlu0 %1388 }
 0x324   : > { %4200 = vrcp.f32 %v1389_v54 }
 0x326   : > { %v1391_v43 = vpop.xlane.xlu1 %1390 }
 0x327   : > { %4202 = vrcp.f32 %v1391_v43 }
 0x32a   : > { %v1393_v14 = vpop.xlane.xlu0 %1392 }
 0x32b   : > { %4204 = vrcp.f32 %v1393_v14  ;;  %v5401_v14 = vpop.f32.mrf.mxu1 }
 0x32c   : > { %6219 = vst [vmem:[#allocation109_spill] sm:$0xff] %v5401_v14 }
 0x32e   : > { %v1395_v45 = vpop.xlane.xlu1 %1394 }
 0x32f   : > { %4206 = vrcp.f32 %v1395_v45 }
 0x331   : > { %v4201_v16 = vpop.eup %4200 }
 0x332   : > { %v1397_v54 = vpop.xlane.xlu0 %1396  ;;  %v1460_v30 = vmul.f32 %v4201_v16, %v5111_v0 }
 0x333   : > { %4208 = vrcp.f32 %v1397_v54 }
 0x334   : > { %v4203_v34 = vpop.eup %4202 }
 0x335   : > { %v1461_v43 = vmul.f32 %v4203_v34, %v5125_v22  ;;  %v5407_v34 = vpop.f32.mrf.mxu1 }
 0x336   : > { %v1399_v40 = vpop.xlane.xlu1 %1398  ;;  %6220 = vst [vmem:[#allocation110_spill] sm:$0xff] %v5407_v34 }
 0x337   : > { %4210 = vrcp.f32 %v1399_v40  ;;  %v5397_v61 = vpack.c.bf16 %v1461_v43, %v1460_v30  ;;  %v5413_v54 = vpop.f32.mrf.mxu1 }
 0x338   : > { %v4205_v45 = vpop.eup %4204  ;;  %6222 = vst [vmem:[#allocation112_spill] sm:$0xff] %v5413_v54 }
 0x339   : > { %6218 = vst [vmem:[#allocation108_spill] sm:$0xff] %v5397_v61  ;;  %1957 = vmatmul.mubr.bf16.gmra.mxu1 %v5397_v61  ;;  %2150 = vmatmul.mubr.bf16.gmra.mxu0 %v5397_v61  ;;  %v1462_v22 = vmul.f32 %v4205_v45, %v5137_v35  ;;  %v5419_v45 = vpop.f32.mrf.mxu1 }
 0x33a   : > { %v1401_v46 = vpop.xlane.xlu0 %1400  ;;  %1966 = vmatprep.mubr.bf16.mxu1 %v6157_v17  ;;  %2159 = vmatprep.mubr.bf16.mxu0 %v6157_v17  ;;  %6223 = vst [vmem:[#allocation113_spill] sm:$0xff] %v5419_v45 }
 0x33b   : > { %4212 = vrcp.f32 %v1401_v46 }
 0x33c   : > { %v4207_v0 = vpop.eup %4206 }
 0x33d   : > { %v1463_v40 = vmul.f32 %v4207_v0, %v5153_v8 }
 0x33e   : > { %v1403_v16 = vpop.xlane.xlu1 %1402 }
 0x33f   : > { %4214 = vrcp.f32 %v1403_v16  ;;  %v5409_v30 = vpack.c.bf16 %v1463_v40, %v1462_v22  ;;  %v5425_v22 = vpop.f32.mrf.mxu1 }
 0x340   : > { %v4209_v43 = vpop.eup %4208  ;;  %6225 = vst [vmem:[#allocation115_spill] sm:$0xff] %v5425_v22 }
 0x341   : > { %6221 = vst [vmem:[#allocation111_spill] sm:$0xff] %v5409_v30  ;;  %1967 = vmatmul.mubr.bf16.gmra.mxu1 %v5409_v30  ;;  %2160 = vmatmul.mubr.bf16.gmra.mxu0 %v5409_v30  ;;  %v1464_v8 = vmul.f32 %v4209_v43, %v5164_v36  ;;  %v5431_v43 = vpop.f32.mrf.mxu1 }
 0x342   : > { %1976 = vmatprep.mubr.bf16.mxu1 %v6157_v17  ;;  %2169 = vmatprep.mubr.bf16.mxu0 %v6157_v17  ;;  %6226 = vst [vmem:[#allocation116_spill] sm:$0xff] %v5431_v43 }
 0x344   : > { %v4211_v35 = vpop.eup %4210 }
 0x345   : > { %v1465_v46 = vmul.f32 %v4211_v35, %v5179_v20 }
 0x347   : > { %v5421_v0 = vpack.c.bf16 %v1465_v46, %v1464_v8  ;;  %v414_v8 = vsub.s32 3, %v4731_v3  ;;  %v5438_v46 = vpop.f32.mrf.mxu1 }
 0x348   : > { %v4213_v40 = vpop.eup %4212  ;;  %6228 = vst [vmem:[#allocation118_spill] sm:$0xff] %v5438_v46 }
 0x349   : > { %6224 = vst [vmem:[#allocation114_spill] sm:$0xff] %v5421_v0  ;;  %1977 = vmatmul.mubr.bf16.gmra.mxu1 %v5421_v0  ;;  %2170 = vmatmul.mubr.bf16.gmra.mxu0 %v5421_v0  ;;  %v1466_v36 = vmul.f32 %v4213_v40, %v5190_v7  ;;  %v406_v0 = vsub.s32 1, %v4731_v3  ;;  %v5443_v7 = vrot.slane %v5225_v39, %v414_v8  ;;  %v5447_v40 = vpop.f32.mrf.mxu0 }
 0x34a   : > { %1986 = vmatprep.mubr.bf16.mxu1 %v6157_v17  ;;  %2179 = vmatprep.mubr.bf16.mxu0 %v6157_v17  ;;  %v410_v17 = vsub.s32 2, %v4731_v3  ;;  %6230 = vst [vmem:[#allocation120_spill] sm:$0xff] %v5447_v40 }
 0x34b   : > { %v867_v8 = vadd.f32 %v5076_v37, %v5443_v7 }
 0x34c   : > { %v4215_v16 = vpop.eup %4214 }
 0x34d   : > { %v1467_v20 = vmul.f32 %v4215_v16, %v5205_v2  ;;  %v5445_v2 = vpop.f32.mrf.mxu1  ;;  %v5450_v16 = vrot.slane %v5225_v39, %v406_v0  ;;  %v1490_v37 = vmax.f32 %v867_v8, 0.0 }
 0x34e   : > { %6229 = vst [vmem:[#allocation119_spill] sm:$0xff] %v5445_v2 }
 0x34f   : > { %v5433_v35 = vpack.c.bf16 %v1467_v20, %v1466_v36  ;;  %v5453_v36 = vrot.slane %v5225_v39, %v410_v17  ;;  %v1054_v20 = vadd.f32 %v5130_v38, %v5228_v57  ;;  %v674_v3 = vadd.f32 %v4745_v12, %v5450_v16 }
 0x350   : > { %v670_v0 = vadd.f32 %v4739_v9, %v5450_v16  ;;  %v680_v9 = vadd.f32 %v4751_v15, %v5450_v16  ;;  %v1065_v15 = vadd.f32 %v5135_v26, %v5228_v57 }
 0x351   : > { %6227 = vst [vmem:[#allocation117_spill] sm:$0xff] %v5433_v35  ;;  %1987 = vmatmul.mubr.bf16.gmra.mxu1 %v5433_v35  ;;  %2180 = vmatmul.mubr.bf16.gmra.mxu0 %v5433_v35  ;;  %v1057_v35 = vadd.f32 %v5144_v51, %v5228_v57  ;;  %v861_v39 = vadd.f32 %v5070_v10, %v5453_v36  ;;  %v1487_v12 = vmax.f32 %v1054_v20, 0.0  ;;  %v1488_v22 = vmax.f32 %v674_v3, 0.0 }
 0x352   : > { %v865_v38 = vadd.f32 %v5074_v47, %v5453_v36  ;;  %v863_v51 = vadd.f32 %v5072_v29, %v5443_v7  ;;  %v1484_v40 = vmax.f32 %v670_v0, 0.0  ;;  %v684_v47 = vadd.f32 %v4757_v18, %v5450_v16 }
 0x353   : > { %v1491_v46 = vmax.f32 %v1057_v35, 0.0  ;;  %v1485_v54 = vmax.f32 %v861_v39, 0.0  ;;  %v1062_v0 = vadd.f32 %v5123_v25, %v5228_v57  ;;  %v871_v18 = vadd.f32 %v5078_v44, %v5453_v36 }
 0x354   : > { %v1489_v10 = vmax.f32 %v865_v38, 0.0  ;;  %v1486_v45 = vmax.f32 %v863_v51, 0.0  ;;  %v875_v25 = vadd.f32 %v5082_v13, %v5453_v36  ;;  %v5489_v51 = vadd.f32 %v4763_v23, %v5450_v16 }
 0x355   : > { %v1495_v44 = vmax.f32 %v1062_v0, 0.0  ;;  %v1073_v23 = vadd.f32 %v5171_v62, %v5228_v57  ;;  %v883_v62 = vadd.f32 %v5088_v28, %v5443_v7  ;;  %v6231_v28 = vld [vmem:[#allocation16_spill] sm:$0xff] }
 0x359   : > { %v1838_v30 = vpop.f32.mrf.mxu1  ;;  %v2031_v61 = vpop.f32.mrf.mxu0 }
 0x35a   : > { %v2190_v39 = vmul.f32 %v1838_v30, %v1484_v40  ;;  %v2192_v38 = vmul.f32 %v2031_v61, %v1486_v45  ;;  %v4081_v30 = vld [vmem:[#allocation10 + $0x130] sm:$0xff]   ;;  %v1496_v40 = vmax.f32 %v684_v47, 0.0 }
 0x35b   : > { %v1840_v17 = vpop.f32.mrf.mxu1  ;;  %v2033_v43 = vpop.f32.mrf.mxu0 }
 0x35c   : > { %v2191_v20 = vmul.f32 %v1840_v17, %v1485_v54  ;;  %v2193_v35 = vmul.f32 %v2033_v43, %v1487_v12  ;;  %v1493_v12 = vmax.f32 %v871_v18, 0.0 }
 0x35d   : > { %v1842_v2 = vpop.f32.mrf.mxu1  ;;  %v2035_v34 = vpop.f32.mrf.mxu0 }
 0x35e   : > { %v2194_v14 = vmul.f32 %v1842_v2, %v1488_v22  ;;  %v2196_v29 = vmul.f32 %v2035_v34, %v1490_v37  ;;  %v877_v34 = vadd.f32 %v5084_v56, %v5443_v7  ;;  %v1492_v56 = vmax.f32 %v680_v9, 0.0 }
 0x35f   : > { %v1844_v60 = vpop.f32.mrf.mxu1  ;;  %v2037_v41 = vpop.f32.mrf.mxu0  ;;  %v1070_v9 = vadd.f32 %v5158_v5, %v5228_v57 }
 0x360   : > { %v2195_v3 = vmul.f32 %v1844_v60, %v1489_v10  ;;  %v2197_v8 = vmul.f32 %v2037_v41, %v1491_v46  ;;  %v873_v41 = vadd.f32 %v5080_v59, %v5443_v7  ;;  %v2318_v60 = vpack.c.bf16 %v2194_v14, %v2190_v39 }
 0x361   : > { %v2320_v26 = vpack.c.bf16 %v2196_v29, %v2192_v38  ;;  %v1499_v46 = vmax.f32 %v1065_v15, 0.0  ;;  %v1498_v59 = vmax.f32 %v877_v34, 0.0  ;;  %v694_v14 = vadd.f32 %v4769_v27, %v5450_v16  ;;  %v4082_v29 = vld [vmem:[#allocation10 + $0x128] sm:$0xff]  }
 0x362   : > { %v2319_v22 = vpack.c.bf16 %v2195_v3, %v2191_v20  ;;  %v2321_v2 = vpack.c.bf16 %v2197_v8, %v2193_v35  ;;  %v1848_v54 = vpop.f32.mrf.mxu1  ;;  %v2041_v43 = vpop.f32.mrf.mxu0  ;;  %v1494_v37 = vmax.f32 %v873_v41, 0.0  ;;  %v1497_v10 = vmax.f32 %v875_v25, 0.0 }
 0x363   : > { %v881_v27 = vadd.f32 %v5086_v4, %v5453_v36  ;;  %v887_v39 = vadd.f32 %v5092_v42, %v5443_v7  ;;  %v2198_v38 = vmul.f32 %v1848_v54, %v1492_v56  ;;  %v1503_v42 = vmax.f32 %v1070_v9, 0.0  ;;  %v6232_v56 = vld [vmem:[#allocation17_spill] sm:$0xff] }
 0x364   : > { %v1850_v61 = vpop.f32.mrf.mxu1  ;;  %v2043_v45 = vpop.f32.mrf.mxu0  ;;  %2734 = vmatprep.mubr.bf16.mxu1 %v2319_v22  ;;  %2895 = vmatprep.mubr.bf16.mxu0 %v2321_v2  ;;  %v2200_v18 = vmul.f32 %v2041_v43, %v1494_v37  ;;  %v885_v22 = vadd.f32 %v5090_v19, %v5453_v36  ;;  %v1507_v54 = vmax.f32 %v1073_v23, 0.0  ;;  %v1500_v43 = vmax.f32 %v5489_v51, 0.0 }
 0x365   : > { %2735 = vmatmul.mubr.bf16.vlgmr.msra.gmra.mxu1 %v2318_v60  ;;  %2896 = vmatmul.mubr.bf16.vlgmr.msra.gmra.mxu0 %v2320_v26  ;;  %v2199_v8 = vmul.f32 %v1850_v61, %v1493_v12  ;;  %v4083_v61 = vld [vmem:[#allocation10 + $0x120] sm:$0xff]   ;;  %v1506_v19 = vmax.f32 %v887_v39, 0.0  ;;  %v6233_v12 = vld [vmem:[#allocation51_spill] sm:$0xff] }
 0x366   : > { %v1852_v17 = vpop.f32.mrf.mxu1  ;;  %v2045_v13 = vpop.f32.mrf.mxu0  ;;  %3799 = vmatpush3.bf16.msra.mxu1 %v5384_v32  ;;  %v2201_v32 = vmul.f32 %v2043_v45, %v1495_v44  ;;  %v5509_v45 = vadd.f32 %v6231_v28, %v5450_v16  ;;  %v1078_v51 = vadd.f32 %v6233_v12, %v5228_v57  ;;  %v4085_v28 = vld [vmem:[#allocation10 + $0x110] sm:$0xff]  }
 0x367   : > { %3800 = vmatprep.subr.bf16.mxu1 %v4081_v30  ;;  %v2202_v47 = vmul.f32 %v1852_v17, %v1496_v40  ;;  %v2204_v20 = vmul.f32 %v2045_v13, %v1498_v59  ;;  %v704_v40 = vadd.f32 %v6232_v56, %v5450_v16  ;;  %v1501_v59 = vmax.f32 %v881_v27, 0.0 }
 0x368   : > { %v1854_v35 = vpop.f32.mrf.mxu1  ;;  %v2047_v3 = vpop.f32.mrf.mxu0  ;;  %v1502_v17 = vmax.f32 %v883_v62, 0.0  ;;  %v1505_v13 = vmax.f32 %v885_v22, 0.0  ;;  %v6237_v22 = vld [vmem:[#allocation42_spill] sm:$0xff] }
 0x369   : > { %v2203_v0 = vmul.f32 %v1854_v35, %v1497_v10  ;;  %v2205_v15 = vmul.f32 %v2047_v3, %v1499_v46  ;;  %v2322_v25 = vpack.c.bf16 %v2202_v47, %v2198_v38  ;;  %v2324_v60 = vpack.c.bf16 %v2204_v20, %v2200_v18  ;;  %v4084_v20 = vld [vmem:[#allocation10 + $0x118] sm:$0xff]  }
 0x36a   : > { %v1858_v5 = vpop.f32.mrf.mxu1  ;;  %v2051_v34 = vpop.f32.mrf.mxu0  ;;  %3801 = vmatpush3.bf16.msra.mxu1 %v4081_v30  ;;  %v1504_v30 = vmax.f32 %v694_v14, 0.0  ;;  %v6234_v14 = vld [vmem:[#allocation53_spill] sm:$0xff] }
 0x36b   : > { %v2323_v2 = vpack.c.bf16 %v2203_v0, %v2199_v8  ;;  %v2325_v41 = vpack.c.bf16 %v2205_v15, %v2201_v32  ;;  %3802 = vmatprep.subr.bf16.mxu1 %v4082_v29  ;;  %v1081_v37 = vadd.f32 %v6234_v14, %v5228_v57  ;;  %v6235_v0 = vld [vmem:[#allocation41_spill] sm:$0xff]  ;;  %v2206_v39 = vmul.f32 %v1858_v5, %v1500_v43 }
 0x36c   : > { %v1860_v4 = vpop.f32.mrf.mxu1  ;;  %v2053_v26 = vpop.f32.mrf.mxu0  ;;  %v891_v15 = vadd.f32 %v6235_v0, %v5453_v36  ;;  %v2208_v38 = vmul.f32 %v2051_v34, %v1502_v17  ;;  %v1508_v34 = vmax.f32 %v5509_v45, 0.0  ;;  %v1512_v43 = vmax.f32 %v704_v40, 0.0  ;;  %v6240_v17 = vld [vmem:[#allocation19_spill] sm:$0xff]  ;;  %v6242_v40 = vld [vmem:[#allocation62_spill] sm:$0xff] }
 0x36d   : > { %2742 = vmatprep.mubr.bf16.mxu1 %v2323_v2  ;;  %2903 = vmatprep.mubr.bf16.mxu0 %v2325_v41  ;;  %v2207_v35 = vmul.f32 %v1860_v4, %v1501_v59  ;;  %v2209_v3 = vmul.f32 %v2053_v26, %v1503_v42  ;;  %v893_v2 = vadd.f32 %v6237_v22, %v5443_v7  ;;  %v6238_v41 = vld [vmem:[#allocation43_spill] sm:$0xff]  ;;  %v1515_v5 = vmax.f32 %v1081_v37, 0.0  ;;  %v6241_v37 = vld [vmem:[#allocation58_spill] sm:$0xff] }
 0x36e   : > { %v1862_v44 = vpop.f32.mrf.mxu1  ;;  %v2055_v46 = vpop.f32.mrf.mxu0  ;;  %2743 = vmatmul.mubr.bf16.gmra.mxu1 %v2322_v25  ;;  %2904 = vmatmul.mubr.bf16.gmra.mxu0 %v2324_v60  ;;  %v895_v25 = vadd.f32 %v6238_v41, %v5453_v36  ;;  %v1509_v12 = vmax.f32 %v891_v15, 0.0  ;;  %v1086_v45 = vadd.f32 %v6241_v37, %v5228_v57  ;;  %v6243_v15 = vld [vmem:[#allocation47_spill] sm:$0xff]  ;;  %v6245_v41 = vld [vmem:[#allocation48_spill] sm:$0xff] }
 0x36f   : > { %3803 = vmatpush3.bf16.msra.mxu1 %v4082_v29  ;;  %v2210_v10 = vmul.f32 %v1862_v44, %v1504_v30  ;;  %v2212_v9 = vmul.f32 %v2055_v46, %v1506_v19  ;;  %v6236_v29 = vld [vmem:[#allocation44_spill] sm:$0xff]  ;;  %v1511_v19 = vmax.f32 %v1078_v51, 0.0  ;;  %v6239_v44 = vld [vmem:[#allocation18_spill] sm:$0xff]  ;;  %v1510_v51 = vmax.f32 %v893_v2, 0.0 }
 0x370   : > { %v1864_v23 = vpop.f32.mrf.mxu1  ;;  %v2057_v47 = vpop.f32.mrf.mxu0  ;;  %3804 = vmatprep.subr.bf16.mxu1 %v4083_v61  ;;  %v897_v27 = vadd.f32 %v6236_v29, %v5443_v7  ;;  %v5528_v46 = vadd.f32 %v6239_v44, %v5450_v16  ;;  %v1513_v14 = vmax.f32 %v895_v25, 0.0  ;;  %v901_v29 = vadd.f32 %v6243_v15, %v5453_v36 }
 0x371   : > { %v2211_v8 = vmul.f32 %v1864_v23, %v1505_v13  ;;  %v2213_v32 = vmul.f32 %v2057_v47, %v1507_v54  ;;  %v2326_v26 = vpack.c.bf16 %v2210_v10, %v2206_v39  ;;  %v2328_v42 = vpack.c.bf16 %v2212_v9, %v2208_v38 }
 0x372   : > { %v1868_v18 = vpop.f32.mrf.mxu1  ;;  %v2061_v62 = vpop.f32.mrf.mxu0  ;;  %v1514_v56 = vmax.f32 %v897_v27, 0.0  ;;  %v714_v13 = vadd.f32 %v6240_v17, %v5450_v16  ;;  %v1089_v10 = vadd.f32 %v6242_v40, %v5228_v57  ;;  %v903_v25 = vadd.f32 %v6245_v41, %v5443_v7 }
 0x373   : > { %v2327_v60 = vpack.c.bf16 %v2211_v8, %v2207_v35  ;;  %v2329_v4 = vpack.c.bf16 %v2213_v32, %v2209_v3  ;;  %3805 = vmatpush3.bf16.msra.mxu1 %v4083_v61  ;;  %v2214_v39 = vmul.f32 %v1868_v18, %v1508_v34  ;;  %v2216_v38 = vmul.f32 %v2061_v62, %v1510_v51  ;;  %v6247_v34 = vld [vmem:[#allocation20_spill] sm:$0xff] }
 0x374   : > { %v1870_v54 = vpop.f32.mrf.mxu1  ;;  %v2063_v30 = vpop.f32.mrf.mxu0  ;;  %3806 = vmatprep.subr.bf16.mxu1 %v4084_v20  ;;  %v1523_v44 = vmax.f32 %v1089_v10, 0.0  ;;  %v1516_v18 = vmax.f32 %v5528_v46, 0.0  ;;  %v1520_v62 = vmax.f32 %v714_v13, 0.0  ;;  %v1517_v51 = vmax.f32 %v901_v29, 0.0  ;;  %v6250_v46 = vld [vmem:[#allocation59_spill] sm:$0xff]  ;;  %v6252_v29 = vld [vmem:[#allocation64_spill] sm:$0xff] }
 0x375   : > { %2750 = vmatprep.mubr.bf16.mxu1 %v2327_v60  ;;  %2911 = vmatprep.mubr.bf16.mxu0 %v2329_v4  ;;  %v2215_v3 = vmul.f32 %v1870_v54, %v1509_v12  ;;  %v2217_v8 = vmul.f32 %v2063_v30, %v1511_v19  ;;  %v6246_v60 = vld [vmem:[#allocation50_spill] sm:$0xff]  ;;  %v1097_v13 = vadd.f32 %v6250_v46, %v5228_v57  ;;  %v6257_v46 = vld [vmem:[#allocation65_spill] sm:$0xff] }
 0x376   : > { %v1872_v59 = vpop.f32.mrf.mxu1  ;;  %v2065_v61 = vpop.f32.mrf.mxu0  ;;  %2751 = vmatmul.mubr.bf16.gmra.mxu1 %v2326_v26  ;;  %2912 = vmatmul.mubr.bf16.gmra.mxu0 %v2328_v42  ;;  %v905_v4 = vadd.f32 %v6246_v60, %v5453_v36 }
 0x377   : > { %3807 = vmatpush3.bf16.msra.mxu1 %v4084_v20  ;;  %v2218_v9 = vmul.f32 %v1872_v59, %v1512_v43  ;;  %v2220_v23 = vmul.f32 %v2065_v61, %v1514_v56  ;;  %v6244_v20 = vld [vmem:[#allocation52_spill] sm:$0xff]  ;;  %v1519_v43 = vmax.f32 %v1086_v45, 0.0  ;;  %v5547_v56 = vadd.f32 %v6247_v34, %v5450_v16 }
 0x378   : > { %v1874_v47 = vpop.f32.mrf.mxu1  ;;  %v2067_v35 = vpop.f32.mrf.mxu0  ;;  %3808 = vmatprep.subr.bf16.mxu1 %v4085_v28  ;;  %v907_v27 = vadd.f32 %v6244_v20, %v5443_v7  ;;  %v1521_v37 = vmax.f32 %v905_v4, 0.0  ;;  %v6249_v45 = vld [vmem:[#allocation56_spill] sm:$0xff]  ;;  %v917_v20 = vadd.f32 %v6252_v29, %v5443_v7  ;;  %v6254_v4 = vld [vmem:[#allocation61_spill] sm:$0xff]  ;;  %v1531_v34 = vmax.f32 %v1097_v13, 0.0 }
 0x379   : > { %v2219_v32 = vmul.f32 %v1874_v47, %v1513_v14  ;;  %v2221_v0 = vmul.f32 %v2067_v35, %v1515_v5  ;;  %v2330_v54 = vpack.c.bf16 %v2218_v9, %v2214_v39  ;;  %v2332_v30 = vpack.c.bf16 %v2220_v23, %v2216_v38 }
 0x37a   : > { %v1878_v22 = vpop.f32.mrf.mxu1  ;;  %v2071_v2 = vpop.f32.mrf.mxu0  ;;  %v1522_v59 = vmax.f32 %v907_v27, 0.0  ;;  %v1518_v14 = vmax.f32 %v903_v25, 0.0  ;;  %v1094_v40 = vadd.f32 %v6249_v45, %v5228_v57  ;;  %v6253_v25 = vld [vmem:[#allocation57_spill] sm:$0xff]  ;;  %v927_v29 = vadd.f32 %v5260_v11, %v5443_v7 }
 0x37b   : > { %v2331_v26 = vpack.c.bf16 %v2219_v32, %v2215_v3  ;;  %v2333_v42 = vpack.c.bf16 %v2221_v0, %v2217_v8  ;;  %3809 = vmatpush3.bf16.msra.mxu1 %v4085_v28  ;;  %v6248_v28 = vld [vmem:[#allocation21_spill] sm:$0xff]  ;;  %v6251_v0 = vld [vmem:[#allocation55_spill] sm:$0xff]  ;;  %v2222_v27 = vmul.f32 %v1878_v22, %v1516_v18  ;;  %v913_v60 = vadd.f32 %v6253_v25, %v5443_v7  ;;  %v6255_v18 = vld [vmem:[#allocation22_spill] sm:$0xff] }
 0x37c   : > { %v1880_v19 = vpop.f32.mrf.mxu1  ;;  %v2073_v5 = vpop.f32.mrf.mxu0  ;;  %v724_v12 = vadd.f32 %v6248_v28, %v5450_v16  ;;  %v911_v15 = vadd.f32 %v6251_v0, %v5453_v36  ;;  %v2224_v39 = vmul.f32 %v2071_v2, %v1518_v14  ;;  %v1524_v22 = vmax.f32 %v5547_v56, 0.0  ;;  %v6259_v0 = vld [vmem:[#allocation68_spill] sm:$0xff] }
 0x37d   : > { %2758 = vmatprep.mubr.bf16.mxu1 %v2331_v26  ;;  %2919 = vmatprep.mubr.bf16.mxu0 %v2333_v42  ;;  %v2223_v35 = vmul.f32 %v1880_v19, %v1517_v51  ;;  %v2225_v3 = vmul.f32 %v2073_v5, %v1519_v43  ;;  %v915_v26 = vadd.f32 %v6254_v4, %v5453_v36  ;;  %v6256_v51 = vld [vmem:[#allocation23_spill] sm:$0xff]  ;;  %v1526_v45 = vmax.f32 %v913_v60, 0.0 }
 0x37e   : > { %v1882_v61 = vpop.f32.mrf.mxu1  ;;  %v2075_v17 = vpop.f32.mrf.mxu0  ;;  %2759 = vmatmul.mubr.bf16.gmra.mxu1 %v2330_v54  ;;  %2920 = vmatmul.mubr.bf16.gmra.mxu0 %v2332_v30  ;;  %v1528_v2 = vmax.f32 %v724_v12, 0.0  ;;  %v734_v14 = vadd.f32 %v6256_v51, %v5450_v16  ;;  %v1102_v56 = vadd.f32 %v6257_v46, %v5228_v57  ;;  %v6258_v12 = vld [vmem:[#allocation69_spill] sm:$0xff]  ;;  %v6260_v60 = vld [vmem:[#allocation71_spill] sm:$0xff] }
 0x37f   : > { %v2226_v10 = vmul.f32 %v1882_v61, %v1520_v62  ;;  %v2228_v9 = vmul.f32 %v2075_v17, %v1522_v59  ;;  %v1527_v62 = vmax.f32 %v1094_v40, 0.0  ;;  %v5566_v59 = vadd.f32 %v6255_v18, %v5450_v16  ;;  %v6262_v18 = vld [vmem:[#allocation24_spill] sm:$0xff] }
 0x380   : > { %v1884_v23 = vpop.f32.mrf.mxu1  ;;  %v2077_v47 = vpop.f32.mrf.mxu0  ;;  %v1530_v61 = vmax.f32 %v917_v20, 0.0  ;;  %v1529_v40 = vmax.f32 %v915_v26, 0.0  ;;  %v1105_v13 = vadd.f32 %v6258_v12, %v5228_v57  ;;  %v923_v4 = vadd.f32 %v6260_v60, %v5443_v7  ;;  %v6261_v26 = vld [vmem:[#allocation75_spill] sm:$0xff] }
 0x381   : > { %v2227_v8 = vmul.f32 %v1884_v23, %v1521_v37  ;;  %v2229_v32 = vmul.f32 %v2077_v47, %v1523_v44  ;;  %v2334_v30 = vpack.c.bf16 %v2226_v10, %v2222_v27  ;;  %v2336_v19 = vpack.c.bf16 %v2228_v9, %v2224_v39  ;;  %v4086_v44 = vld [vmem:[#allocation10 + $0x108] sm:$0xff]  }
 0x382   : > { %v1888_v38 = vpop.f32.mrf.mxu1  ;;  %v2081_v41 = vpop.f32.mrf.mxu0  ;;  %v1525_v37 = vmax.f32 %v911_v15, 0.0  ;;  %3810 = vmatprep.subr.bf16.mxu1 %v4086_v44  ;;  %v921_v15 = vadd.f32 %v6259_v0, %v5453_v36  ;;  %v1532_v11 = vmax.f32 %v5566_v59, 0.0 }
 0x383   : > { %v2335_v42 = vpack.c.bf16 %v2227_v8, %v2223_v35  ;;  %v2337_v54 = vpack.c.bf16 %v2229_v32, %v2225_v3  ;;  %3811 = vmatpush3.bf16.msra.mxu1 %v4086_v44  ;;  %v2230_v20 = vmul.f32 %v1888_v38, %v1524_v22  ;;  %v2232_v27 = vmul.f32 %v2081_v41, %v1526_v45 }
 0x384   : > { %v1890_v5 = vpop.f32.mrf.mxu1  ;;  %v2083_v43 = vpop.f32.mrf.mxu0  ;;  %v1536_v38 = vmax.f32 %v734_v14, 0.0  ;;  %v1538_v41 = vmax.f32 %v927_v29, 0.0  ;;  %v6266_v29 = vld [vmem:[#allocation81_spill] sm:$0xff] }
 0x385   : > { %2766 = vmatprep.mubr.bf16.mxu1 %v2335_v42  ;;  %2927 = vmatprep.mubr.bf16.mxu0 %v2337_v54  ;;  %v2231_v35 = vmul.f32 %v1890_v5, %v1525_v37  ;;  %v2233_v3 = vmul.f32 %v2083_v43, %v1527_v62  ;;  %v925_v42 = vadd.f32 %v6261_v26, %v5453_v36  ;;  %v1535_v62 = vmax.f32 %v1102_v56, 0.0  ;;  %v6263_v37 = vld [vmem:[#allocation63_spill] sm:$0xff] }
 0x386   : > { %v1892_v17 = vpop.f32.mrf.mxu1  ;;  %v2085_v28 = vpop.f32.mrf.mxu0  ;;  %2767 = vmatmul.mubr.bf16.gmra.mxu1 %v2334_v30  ;;  %2928 = vmatmul.mubr.bf16.gmra.mxu0 %v2336_v19  ;;  %v1110_v45 = vadd.f32 %v6263_v37, %v5228_v57 }
 0x387   : > { %v2234_v10 = vmul.f32 %v1892_v17, %v1528_v2  ;;  %v2236_v9 = vmul.f32 %v2085_v28, %v1530_v61  ;;  %v740_v61 = vadd.f32 %v6262_v18, %v5450_v16  ;;  %v1533_v17 = vmax.f32 %v921_v15, 0.0 }
 0x388   : > { %v1894_v23 = vpop.f32.mrf.mxu1  ;;  %v2087_v47 = vpop.f32.mrf.mxu0  ;;  %v1534_v28 = vmax.f32 %v923_v4, 0.0  ;;  %v1537_v51 = vmax.f32 %v925_v42, 0.0  ;;  %v6268_v42 = vld [vmem:[#allocation84_spill] sm:$0xff] }
 0x389   : > { %v2235_v8 = vmul.f32 %v1894_v23, %v1529_v40  ;;  %v2237_v32 = vmul.f32 %v2087_v47, %v1531_v34  ;;  %v2338_v19 = vpack.c.bf16 %v2234_v10, %v2230_v20  ;;  %v2340_v5 = vpack.c.bf16 %v2236_v9, %v2232_v27  ;;  %v6264_v40 = vld [vmem:[#allocation66_spill] sm:$0xff]  ;;  %v6265_v47 = vld [vmem:[#allocation25_spill] sm:$0xff]  ;;  %v6267_v27 = vld [vmem:[#allocation88_spill] sm:$0xff] }
 0x38a   : > { %v1898_v39 = vpop.f32.mrf.mxu1  ;;  %v2091_v25 = vpop.f32.mrf.mxu0  ;;  %v1539_v34 = vmax.f32 %v1105_v13, 0.0  ;;  %v1113_v46 = vadd.f32 %v6264_v40, %v5228_v57  ;;  %v931_v20 = vadd.f32 %v6266_v29, %v5453_v36  ;;  %v935_v60 = vadd.f32 %v6267_v27, %v5453_v36 }
 0x38b   : > { %v2339_v54 = vpack.c.bf16 %v2235_v8, %v2231_v35  ;;  %v2341_v30 = vpack.c.bf16 %v2237_v32, %v2233_v3  ;;  %v744_v35 = vadd.f32 %v6265_v47, %v5450_v16  ;;  %v937_v3 = vadd.f32 %v5306_v6, %v5443_v7  ;;  %v4087_v6 = vld [vmem:[#allocation10 + $0x100] sm:$0xff]  }
 0x38c   : > { %v1900_v43 = vpop.f32.mrf.mxu1  ;;  %v2093_v44 = vpop.f32.mrf.mxu0  ;;  %v2238_v8 = vmul.f32 %v1898_v39, %v1532_v11  ;;  %v2240_v32 = vmul.f32 %v2091_v25, %v1534_v28  ;;  %v1543_v39 = vmax.f32 %v1110_v45, 0.0  ;;  %v1547_v25 = vmax.f32 %v1113_v46, 0.0  ;;  %3812 = vmatprep.subr.bf16.mxu1 %v4087_v6  ;;  %v6270_v28 = vld [vmem:[#allocation76_spill] sm:$0xff] }
 0x38d   : > { %2774 = vmatprep.mubr.bf16.mxu1 %v2339_v54  ;;  %2935 = vmatprep.mubr.bf16.mxu0 %v2341_v30  ;;  %v2239_v13 = vmul.f32 %v1900_v43, %v1533_v17  ;;  %v2241_v10 = vmul.f32 %v2093_v44, %v1535_v62  ;;  %v933_v54 = vadd.f32 %v6268_v42, %v5443_v7  ;;  %v1544_v44 = vmax.f32 %v744_v35, 0.0 }
 0x38e   : > { %v1902_v22 = vpop.f32.mrf.mxu1  ;;  %v2095_v2 = vpop.f32.mrf.mxu0  ;;  %2775 = vmatmul.mubr.bf16.gmra.mxu1 %v2338_v19  ;;  %2936 = vmatmul.mubr.bf16.gmra.mxu0 %v2340_v5  ;;  %v1546_v62 = vmax.f32 %v937_v3, 0.0  ;;  %v1545_v18 = vmax.f32 %v935_v60, 0.0  ;;  %v941_v3 = vadd.f32 %v5316_v63, %v5453_v36 }
 0x38f   : > { %v2242_v56 = vmul.f32 %v1902_v22, %v1536_v38  ;;  %v2244_v59 = vmul.f32 %v2095_v2, %v1538_v41  ;;  %v1540_v38 = vmax.f32 %v740_v61, 0.0  ;;  %v6269_v41 = vld [vmem:[#allocation26_spill] sm:$0xff]  ;;  %v1541_v2 = vmax.f32 %v931_v20, 0.0  ;;  %3813 = vmatpush3.bf16.msra.mxu1 %v4087_v6  ;;  %v6271_v61 = vld [vmem:[#allocation27_spill] sm:$0xff] }
 0x390   : > { %v1904_v14 = vpop.f32.mrf.mxu1  ;;  %v2097_v12 = vpop.f32.mrf.mxu0  ;;  %v750_v22 = vadd.f32 %v6269_v41, %v5450_v16  ;;  %v1542_v17 = vmax.f32 %v933_v54, 0.0  ;;  %v943_v20 = vadd.f32 %v5324_v58, %v5443_v7  ;;  %v6273_v58 = vld [vmem:[#allocation28_spill] sm:$0xff] }
 0x391   : > { %v2243_v9 = vmul.f32 %v1904_v14, %v1537_v51  ;;  %v2245_v23 = vmul.f32 %v2097_v12, %v1539_v34  ;;  %v2342_v30 = vpack.c.bf16 %v2242_v56, %v2238_v8  ;;  %v2344_v19 = vpack.c.bf16 %v2244_v59, %v2240_v32 }
 0x392   : > { %v1908_v0 = vpop.f32.mrf.mxu1  ;;  %v2101_v15 = vpop.f32.mrf.mxu0  ;;  %v1121_v51 = vadd.f32 %v6270_v28, %v5228_v57  ;;  %v945_v8 = vadd.f32 %v5328_v1, %v5453_v36  ;;  %v1548_v1 = vmax.f32 %v750_v22, 0.0  ;;  %v1550_v6 = vmax.f32 %v943_v20, 0.0 }
 0x393   : > { %v2343_v4 = vpack.c.bf16 %v2243_v9, %v2239_v13  ;;  %v2345_v26 = vpack.c.bf16 %v2245_v23, %v2241_v10  ;;  %v754_v13 = vadd.f32 %v6271_v61, %v5450_v16  ;;  %v947_v10 = vadd.f32 %v5336_v31, %v5443_v7  ;;  %v6272_v31 = vld [vmem:[#allocation72_spill] sm:$0xff] }
 0x394   : > { %v1910_v5 = vpop.f32.mrf.mxu1  ;;  %v2103_v43 = vpop.f32.mrf.mxu0  ;;  %v2246_v9 = vmul.f32 %v1908_v0, %v1540_v38  ;;  %v2248_v23 = vmul.f32 %v2101_v15, %v1542_v17  ;;  %v1551_v0 = vmax.f32 %v6272_v31, 0.0  ;;  %v1555_v15 = vmax.f32 %v1121_v51, 0.0 }
 0x395   : > { %2782 = vmatprep.mubr.bf16.mxu1 %v2343_v4  ;;  %2943 = vmatprep.mubr.bf16.mxu0 %v2345_v26  ;;  %v2247_v56 = vmul.f32 %v1910_v5, %v1541_v2  ;;  %v2249_v59 = vmul.f32 %v2103_v43, %v1543_v39  ;;  %v1552_v42 = vmax.f32 %v754_v13, 0.0  ;;  %v1554_v54 = vmax.f32 %v947_v10, 0.0  ;;  %v6274_v2 = vld [vmem:[#allocation29_spill] sm:$0xff] }
 0x396   : > { %v1912_v34 = vpop.f32.mrf.mxu1  ;;  %v2105_v11 = vpop.f32.mrf.mxu0  ;;  %2783 = vmatmul.mubr.bf16.gmra.mxu1 %v2342_v30  ;;  %2944 = vmatmul.mubr.bf16.gmra.mxu0 %v2344_v19  ;;  %v1549_v19 = vmax.f32 %v941_v3, 0.0  ;;  %v1553_v5 = vmax.f32 %v945_v8, 0.0  ;;  %v760_v43 = vadd.f32 %v6273_v58, %v5450_v16  ;;  %v957_v22 = vadd.f32 %v5358_v52, %v5443_v7  ;;  %v6275_v52 = vld [vmem:[#allocation70_spill] sm:$0xff] }
 0x397   : > { %v2250_v37 = vmul.f32 %v1912_v34, %v1544_v44  ;;  %v2252_v45 = vmul.f32 %v2105_v11, %v1546_v62  ;;  %v1559_v10 = vmax.f32 %v6275_v52, 0.0  ;;  %v6281_v52 = vld [vmem:[#allocation33_spill] sm:$0xff] }
 0x398   : > { %v1914_v40 = vpop.f32.mrf.mxu1  ;;  %v2107_v46 = vpop.f32.mrf.mxu0 }
 0x399   : > { %v2251_v14 = vmul.f32 %v1914_v40, %v1545_v18  ;;  %v2253_v12 = vmul.f32 %v2107_v46, %v1547_v25  ;;  %v2346_v27 = vpack.c.bf16 %v2250_v37, %v2246_v9  ;;  %v2348_v60 = vpack.c.bf16 %v2252_v45, %v2248_v23  ;;  %v6276_v9 = vld [vmem:[#allocation74_spill] sm:$0xff] }
 0x39a   : > { %v1918_v47 = vpop.f32.mrf.mxu1  ;;  %v2111_v35 = vpop.f32.mrf.mxu0  ;;  %v764_v18 = vadd.f32 %v6274_v2, %v5450_v16  ;;  %v951_v45 = vadd.f32 %v5340_v50, %v5453_v36  ;;  %v955_v40 = vadd.f32 %v5352_v21, %v5453_v36  ;;  %v1563_v23 = vmax.f32 %v6276_v9, 0.0  ;;  %v6280_v2 = vld [vmem:[#allocation78_spill] sm:$0xff] }
 0x39b   : > { %v2347_v32 = vpack.c.bf16 %v2251_v14, %v2247_v56  ;;  %v2349_v29 = vpack.c.bf16 %v2253_v12, %v2249_v59  ;;  %v2254_v17 = vmul.f32 %v1918_v47, %v1548_v1  ;;  %v2256_v28 = vmul.f32 %v2111_v35, %v1550_v6 }
 0x39c   : > { %v1920_v4 = vpop.f32.mrf.mxu1  ;;  %v2113_v26 = vpop.f32.mrf.mxu0  ;;  %v953_v59 = vadd.f32 %v5348_v53, %v5443_v7  ;;  %v1560_v47 = vmax.f32 %v764_v18, 0.0  ;;  %v1562_v50 = vmax.f32 %v957_v22, 0.0  ;;  %v1556_v21 = vmax.f32 %v760_v43, 0.0 }
 0x39d   : > { %2790 = vmatprep.mubr.bf16.mxu1 %v2347_v32  ;;  %2951 = vmatprep.mubr.bf16.mxu0 %v2349_v29  ;;  %v2255_v34 = vmul.f32 %v1920_v4, %v1549_v19  ;;  %v2257_v11 = vmul.f32 %v2113_v26, %v1551_v0  ;;  %v1557_v8 = vmax.f32 %v951_v45, 0.0  ;;  %v1561_v32 = vmax.f32 %v955_v40, 0.0  ;;  %v6277_v29 = vld [vmem:[#allocation82_spill] sm:$0xff] }
 0x39e   : > { %v1922_v63 = vpop.f32.mrf.mxu1  ;;  %v2115_v30 = vpop.f32.mrf.mxu0  ;;  %2791 = vmatmul.mubr.bf16.gmra.mxu1 %v2346_v27  ;;  %2952 = vmatmul.mubr.bf16.gmra.mxu0 %v2348_v60  ;;  %v1558_v53 = vmax.f32 %v953_v59, 0.0  ;;  %v1137_v20 = vadd.f32 %v6277_v29, %v5228_v57  ;;  %v961_v43 = vadd.f32 %v5360_v49, %v5453_v36  ;;  %v965_v6 = vadd.f32 %v5364_v55, %v5453_v36 }
 0x39f   : > { %v2258_v39 = vmul.f32 %v1922_v63, %v1552_v42  ;;  %v2260_v25 = vmul.f32 %v2115_v30, %v1554_v54  ;;  %v6278_v54 = vld [vmem:[#allocation31_spill] sm:$0xff]  ;;  %v967_v30 = vadd.f32 %v5366_v24, %v5443_v7  ;;  %v1567_v18 = vmax.f32 %v6280_v2, 0.0 }
 0x3a0   : > { %v1924_v44 = vpop.f32.mrf.mxu1  ;;  %v2117_v62 = vpop.f32.mrf.mxu0  ;;  %v774_v63 = vadd.f32 %v6278_v54, %v5450_v16  ;;  %v1571_v22 = vmax.f32 %v1137_v20, 0.0  ;;  %v977_v9 = vadd.f32 %v5374_v48, %v5443_v7  ;;  %v6284_v20 = vld [vmem:[#allocation32_spill] sm:$0xff] }
 0x3a1   : > { %v2259_v38 = vmul.f32 %v1924_v44, %v1553_v5  ;;  %v2261_v41 = vmul.f32 %v2117_v62, %v1555_v15  ;;  %v2350_v14 = vpack.c.bf16 %v2258_v39, %v2254_v17  ;;  %v2352_v12 = vpack.c.bf16 %v2260_v25, %v2256_v28  ;;  %v6279_v44 = vld [vmem:[#allocation30_spill] sm:$0xff]  ;;  %v6287_v54 = vld [vmem:[#allocation80_spill] sm:$0xff] }
 0x3a2   : > { %v1928_v51 = vpop.f32.mrf.mxu1  ;;  %v2121_v37 = vpop.f32.mrf.mxu0  ;;  %v770_v62 = vadd.f32 %v6279_v44, %v5450_v16  ;;  %v1568_v49 = vmax.f32 %v774_v63, 0.0  ;;  %v1570_v17 = vmax.f32 %v967_v30, 0.0  ;;  %v1579_v63 = vmax.f32 %v6287_v54, 0.0 }
 0x3a3   : > { %v2351_v46 = vpack.c.bf16 %v2259_v38, %v2255_v34  ;;  %v2353_v56 = vpack.c.bf16 %v2261_v41, %v2257_v11  ;;  %v2262_v1 = vmul.f32 %v1928_v51, %v1556_v21  ;;  %v2264_v19 = vmul.f32 %v2121_v37, %v1558_v53 }
 0x3a4   : > { %v1930_v61 = vpop.f32.mrf.mxu1  ;;  %v2123_v13 = vpop.f32.mrf.mxu0  ;;  %v963_v34 = vadd.f32 %v5362_v33, %v5443_v7  ;;  %v1565_v51 = vmax.f32 %v961_v43, 0.0  ;;  %v1569_v37 = vmax.f32 %v965_v6, 0.0  ;;  %v1564_v45 = vmax.f32 %v770_v62, 0.0 }
 0x3a5   : > { %2798 = vmatprep.mubr.bf16.mxu1 %v2351_v46  ;;  %2959 = vmatprep.mubr.bf16.mxu0 %v2353_v56  ;;  %v2263_v31 = vmul.f32 %v1930_v61, %v1557_v8  ;;  %v2265_v0 = vmul.f32 %v2123_v13, %v1559_v10  ;;  %v784_v10 = vadd.f32 %v6281_v52, %v5450_v16  ;;  %v6283_v8 = vld [vmem:[#allocation99_spill] sm:$0xff] }
 0x3a6   : > { %v1932_v35 = vpop.f32.mrf.mxu1  ;;  %v2125_v3 = vpop.f32.mrf.mxu0  ;;  %2799 = vmatmul.mubr.bf16.gmra.mxu1 %v2350_v14  ;;  %2960 = vmatmul.mubr.bf16.gmra.mxu0 %v2352_v12  ;;  %v1566_v40 = vmax.f32 %v963_v34, 0.0 }
 0x3a7   : > { %v2266_v27 = vmul.f32 %v1932_v35, %v1560_v47  ;;  %v2268_v60 = vmul.f32 %v2125_v3, %v1562_v50  ;;  %v6282_v3 = vld [vmem:[#allocation97_spill] sm:$0xff]  ;;  %v1576_v30 = vmax.f32 %v784_v10, 0.0 }
 0x3a8   : > { %v1934_v4 = vpop.f32.mrf.mxu1  ;;  %v2127_v26 = vpop.f32.mrf.mxu0  ;;  %v971_v21 = vadd.f32 %v6282_v3, %v5453_v36  ;;  %v6294_v10 = vld [vmem:[#allocation101_spill] sm:$0xff] }
 0x3a9   : > { %v2267_v15 = vmul.f32 %v1934_v4, %v1561_v32  ;;  %v2269_v42 = vmul.f32 %v2127_v26, %v1563_v23  ;;  %v2354_v11 = vpack.c.bf16 %v2266_v27, %v2262_v1  ;;  %v2356_v24 = vpack.c.bf16 %v2268_v60, %v2264_v19  ;;  %v6285_v60 = vld [vmem:[#allocation98_spill] sm:$0xff] }
 0x3aa   : > { %v1938_v5 = vpop.f32.mrf.mxu1  ;;  %v2131_v58 = vpop.f32.mrf.mxu0  ;;  %v975_v32 = vadd.f32 %v6283_v8, %v5453_v36  ;;  %v780_v27 = vadd.f32 %v6284_v20, %v5450_v16  ;;  %v973_v4 = vadd.f32 %v6285_v60, %v5443_v7  ;;  %v1578_v1 = vmax.f32 %v977_v9, 0.0  ;;  %v6296_v60 = vld [vmem:[#allocation36_spill] sm:$0xff] }
 0x3ab   : > { %v2355_v39 = vpack.c.bf16 %v2267_v15, %v2263_v31  ;;  %v2357_v25 = vpack.c.bf16 %v2269_v42, %v2265_v0  ;;  %v2270_v23 = vmul.f32 %v1938_v5, %v1564_v45  ;;  %v2272_v47 = vmul.f32 %v2131_v58, %v1566_v40  ;;  %v6286_v15 = vld [vmem:[#allocation77_spill] sm:$0xff]  ;;  %v6290_v40 = vld [vmem:[#allocation103_spill] sm:$0xff] }
 0x3ac   : > { %v1940_v38 = vpop.f32.mrf.mxu1  ;;  %v2133_v41 = vpop.f32.mrf.mxu0  ;;  %v1575_v42 = vmax.f32 %v6286_v15, 0.0  ;;  %v1573_v58 = vmax.f32 %v971_v21, 0.0  ;;  %v1577_v43 = vmax.f32 %v975_v32, 0.0  ;;  %v1572_v6 = vmax.f32 %v780_v27, 0.0 }
 0x3ad   : > { %2806 = vmatprep.mubr.bf16.mxu1 %v2355_v39  ;;  %2967 = vmatprep.mubr.bf16.mxu0 %v2357_v25  ;;  %v2271_v14 = vmul.f32 %v1940_v38, %v1565_v51  ;;  %v2273_v12 = vmul.f32 %v2133_v41, %v1567_v18  ;;  %v1574_v39 = vmax.f32 %v973_v4, 0.0  ;;  %v983_v9 = vadd.f32 %v6294_v10, %v5443_v7 }
 0x3ae   : > { %v1942_v55 = vpop.f32.mrf.mxu1  ;;  %v2135_v28 = vpop.f32.mrf.mxu0  ;;  %2807 = vmatmul.mubr.bf16.gmra.mxu1 %v2354_v11  ;;  %2968 = vmatmul.mubr.bf16.gmra.mxu0 %v2356_v24  ;;  %v800_v4 = vadd.f32 %v6296_v60, %v5450_v16 }
 0x3af   : > { %v2274_v33 = vmul.f32 %v1942_v55, %v1568_v49  ;;  %v2276_v46 = vmul.f32 %v2135_v28, %v1570_v17  ;;  %v6288_v28 = vld [vmem:[#allocation34_spill] sm:$0xff] }
 0x3b0   : > { %v1944_v56 = vpop.f32.mrf.mxu1  ;;  %v2137_v59 = vpop.f32.mrf.mxu0  ;;  %v790_v51 = vadd.f32 %v6288_v28, %v5450_v16 }
 0x3b1   : > { %v2275_v61 = vmul.f32 %v1944_v56, %v1569_v37  ;;  %v2277_v13 = vmul.f32 %v2137_v59, %v1571_v22  ;;  %v2358_v26 = vpack.c.bf16 %v2274_v33, %v2270_v23  ;;  %v2360_v48 = vpack.c.bf16 %v2276_v46, %v2272_v47  ;;  %v6289_v37 = vld [vmem:[#allocation35_spill] sm:$0xff]  ;;  %v6291_v59 = vld [vmem:[#allocation100_spill] sm:$0xff] }
 0x3b2   : > { %v1948_v50 = vpop.f32.mrf.mxu1  ;;  %v2141_v35 = vpop.f32.mrf.mxu0  ;;  %v794_v45 = vadd.f32 %v6289_v37, %v5450_v16  ;;  %v987_v33 = vadd.f32 %v6290_v40, %v5443_v7 }
 0x3b3   : > { %v2359_v53 = vpack.c.bf16 %v2275_v61, %v2271_v14  ;;  %v2361_v29 = vpack.c.bf16 %v2277_v13, %v2273_v12  ;;  %v2278_v2 = vmul.f32 %v1948_v50, %v1572_v6  ;;  %v2280_v18 = vmul.f32 %v2141_v35, %v1574_v39  ;;  %v6292_v12 = vld [vmem:[#allocation102_spill] sm:$0xff]  ;;  %v6293_v13 = vld [vmem:[#allocation89_spill] sm:$0xff] }
 0x3b4   : > { %v1950_v31 = vpop.f32.mrf.mxu1  ;;  %v2143_v0 = vpop.f32.mrf.mxu0  ;;  %v981_v14 = vadd.f32 %v6291_v59, %v5453_v36  ;;  %v985_v61 = vadd.f32 %v6292_v12, %v5453_v36  ;;  %v1153_v52 = vadd.f32 %v6293_v13, %v5228_v57  ;;  %v1580_v50 = vmax.f32 %v790_v51, 0.0  ;;  %v6303_v59 = vld [vmem:[#allocation87_spill] sm:$0xff] }
 0x3b5   : > { %2814 = vmatprep.mubr.bf16.mxu1 %v2359_v53  ;;  %2975 = vmatprep.mubr.bf16.mxu0 %v2361_v29  ;;  %v2279_v11 = vmul.f32 %v1950_v31, %v1573_v58  ;;  %v2281_v24 = vmul.f32 %v2143_v0, %v1575_v42  ;;  %v1584_v35 = vmax.f32 %v794_v45, 0.0  ;;  %v1586_v3 = vmax.f32 %v987_v33, 0.0  ;;  %v6295_v29 = vld [vmem:[#allocation85_spill] sm:$0xff]  ;;  %v6304_v12 = vld [vmem:[#allocation39_spill] sm:$0xff] }
 0x3b6   : > { %v1952_v19 = vpop.f32.mrf.mxu1  ;;  %v2145_v5 = vpop.f32.mrf.mxu0  ;;  %2815 = vmatmul.mubr.bf16.gmra.mxu1 %v2358_v26  ;;  %2976 = vmatmul.mubr.bf16.gmra.mxu0 %v2360_v48  ;;  %v1581_v32 = vmax.f32 %v981_v14, 0.0  ;;  %v1585_v53 = vmax.f32 %v985_v61, 0.0  ;;  %v1583_v20 = vmax.f32 %v6295_v29, 0.0  ;;  %v1587_v27 = vmax.f32 %v1153_v52, 0.0 }
 0x3b7   : > { %v2282_v25 = vmul.f32 %v1952_v19, %v1576_v30  ;;  %v2284_v44 = vmul.f32 %v2145_v5, %v1578_v1  ;;  %v1582_v26 = vmax.f32 %v983_v9, 0.0  ;;  %v6297_v1 = vld [vmem:[#allocation37_spill] sm:$0xff]  ;;  %v6298_v5 = vld [vmem:[#allocation107_spill] sm:$0xff]  ;;  %v1595_v14 = vmax.f32 %v6303_v59, 0.0 }
 0x3b8   : > { %v1954_v62 = vpop.f32.mrf.mxu1  ;;  %v2147_v34 = vpop.f32.mrf.mxu0  ;;  %v804_v19 = vadd.f32 %v6297_v1, %v5450_v16  ;;  %v997_v58 = vadd.f32 %v6298_v5, %v5443_v7  ;;  %v814_v61 = vadd.f32 %v6304_v12, %v5450_v16 }
 0x3b9   : > { %v2283_v38 = vmul.f32 %v1954_v62, %v1577_v43  ;;  %v2285_v41 = vmul.f32 %v2147_v34, %v1579_v63  ;;  %v2362_v17 = vpack.c.bf16 %v2282_v25, %v2278_v2  ;;  %v2364_v55 = vpack.c.bf16 %v2284_v44, %v2280_v18  ;;  %v6299_v44 = vld [vmem:[#allocation104_spill] sm:$0xff]  ;;  %v6300_v34 = vld [vmem:[#allocation106_spill] sm:$0xff] }
 0x3ba   : > { %v991_v62 = vadd.f32 %v6299_v44, %v5453_v36  ;;  %v1592_v28 = vmax.f32 %v804_v19, 0.0  ;;  %v1594_v51 = vmax.f32 %v997_v58, 0.0 }
 0x3bb   : > { %v2363_v22 = vpack.c.bf16 %v2283_v38, %v2279_v11  ;;  %v2365_v49 = vpack.c.bf16 %v2285_v41, %v2281_v24  ;;  %v995_v11 = vadd.f32 %v6300_v34, %v5453_v36  ;;  %v6301_v41 = vld [vmem:[#allocation105_spill] sm:$0xff] }
 0x3bc   : > { %v993_v2 = vadd.f32 %v6301_v41, %v5443_v7  ;;  %v1589_v40 = vmax.f32 %v991_v62, 0.0  ;;  %v6311_v62 = vld [vmem:[#allocation91_spill] sm:$0xff] }
 0x3bd   : > { %2822 = vmatprep.mubr.bf16.mxu1 %v2363_v22  ;;  %2983 = vmatprep.mubr.bf16.mxu0 %v2365_v49  ;;  %v1593_v33 = vmax.f32 %v995_v11, 0.0  ;;  %v1599_v34 = vmax.f32 %v6311_v62, 0.0  ;;  %v6321_v62 = vld [vmem:[#allocation49_spill] sm:$0xff] }
 0x3be   : > { %2823 = vmatmul.mubr.bf16.gmra.mxu1 %v2362_v17  ;;  %2984 = vmatmul.mubr.bf16.gmra.mxu0 %v2364_v55  ;;  %v1588_v55 = vmax.f32 %v800_v4, 0.0  ;;  %v1590_v13 = vmax.f32 %v993_v2, 0.0  ;;  %v6307_v4 = vld [vmem:[#allocation112_spill] sm:$0xff] }
 0x3f9   : > { %v1958_v46 = vpop.f32.mrf.mxu1  ;;  %v2151_v56 = vpop.f32.mrf.mxu0 }
 0x3fa   : > { %v2286_v43 = vmul.f32 %v1958_v46, %v1580_v50  ;;  %v2288_v6 = vmul.f32 %v2151_v56, %v1582_v26  ;;  %v6302_v46 = vld [vmem:[#allocation83_spill] sm:$0xff]  ;;  %v1005_v26 = vadd.f32 %v6307_v4, %v5453_v36 }
 0x3fb   : > { %v1960_v23 = vpop.f32.mrf.mxu1  ;;  %v2153_v47 = vpop.f32.mrf.mxu0  ;;  %v1591_v56 = vmax.f32 %v6302_v46, 0.0 }
 0x3fc   : > { %v2287_v42 = vmul.f32 %v1960_v23, %v1581_v32  ;;  %v2289_v54 = vmul.f32 %v2153_v47, %v1583_v20  ;;  %v6306_v32 = vld [vmem:[#allocation113_spill] sm:$0xff]  ;;  %v1601_v44 = vmax.f32 %v1005_v26, 0.0 }
 0x3fd   : > { %v1962_v21 = vpop.f32.mrf.mxu1  ;;  %v2155_v8 = vpop.f32.mrf.mxu0 }
 0x3fe   : > { %v2290_v48 = vmul.f32 %v1962_v21, %v1584_v35  ;;  %v2292_v31 = vmul.f32 %v2155_v8, %v1586_v3  ;;  %v6305_v21 = vld [vmem:[#allocation109_spill] sm:$0xff] }
 0x3ff   : > { %v1964_v0 = vpop.f32.mrf.mxu1  ;;  %v2157_v15 = vpop.f32.mrf.mxu0  ;;  %v1001_v8 = vadd.f32 %v6305_v21, %v5453_v36 }
 0x400   : > { %v2291_v63 = vmul.f32 %v1964_v0, %v1585_v53  ;;  %v2293_v30 = vmul.f32 %v2157_v15, %v1587_v27  ;;  %v2366_v18 = vpack.c.bf16 %v2290_v48, %v2286_v43  ;;  %v2368_v22 = vpack.c.bf16 %v2292_v31, %v2288_v6  ;;  %v6308_v48 = vld [vmem:[#allocation120_spill] sm:$0xff] }
 0x401   : > { %v1968_v39 = vpop.f32.mrf.mxu1  ;;  %v2161_v25 = vpop.f32.mrf.mxu0  ;;  %v1007_v53 = vadd.f32 %v6306_v32, %v5443_v7  ;;  %v1169_v31 = vadd.f32 %v6308_v48, %v5228_v57  ;;  %v1600_v43 = vmax.f32 %v814_v61, 0.0  ;;  %v1597_v57 = vmax.f32 %v1001_v8, 0.0  ;;  %v6315_v61 = vld [vmem:[#allocation118_spill] sm:$0xff] }
 0x402   : > { %v2367_v24 = vpack.c.bf16 %v2291_v63, %v2287_v42  ;;  %v2369_v38 = vpack.c.bf16 %v2293_v30, %v2289_v54  ;;  %v2294_v29 = vmul.f32 %v1968_v39, %v1588_v55  ;;  %v2296_v20 = vmul.f32 %v2161_v25, %v1590_v13  ;;  %v6309_v42 = vld [vmem:[#allocation38_spill] sm:$0xff] }
 0x403   : > { %v1970_v49 = vpop.f32.mrf.mxu1  ;;  %v2163_v17 = vpop.f32.mrf.mxu0  ;;  %v810_v54 = vadd.f32 %v6309_v42, %v5450_v16  ;;  %v6310_v63 = vld [vmem:[#allocation110_spill] sm:$0xff]  ;;  %v1602_v6 = vmax.f32 %v1007_v53, 0.0  ;;  %v1603_v11 = vmax.f32 %v1169_v31, 0.0  ;;  %v1015_v13 = vadd.f32 %v6315_v61, %v5453_v36 }
 0x404   : > { %2830 = vmatprep.mubr.bf16.mxu1 %v2367_v24  ;;  %2991 = vmatprep.mubr.bf16.mxu0 %v2369_v38  ;;  %v2295_v47 = vmul.f32 %v1970_v49, %v1589_v40  ;;  %v2297_v50 = vmul.f32 %v2163_v17, %v1591_v56  ;;  %v1003_v30 = vadd.f32 %v6310_v63, %v5443_v7 }
 0x405   : > { %v1972_v37 = vpop.f32.mrf.mxu1  ;;  %v2165_v45 = vpop.f32.mrf.mxu0  ;;  %2831 = vmatmul.mubr.bf16.gmra.mxu1 %v2366_v18  ;;  %2992 = vmatmul.mubr.bf16.gmra.mxu0 %v2368_v22  ;;  %v1596_v24 = vmax.f32 %v810_v54, 0.0  ;;  %v1609_v4 = vmax.f32 %v1015_v13, 0.0  ;;  %v6325_v13 = vld [vmem:[#allocation73_spill] sm:$0xff] }
 0x406   : > { %v2298_v52 = vmul.f32 %v1972_v37, %v1592_v28  ;;  %v2300_v10 = vmul.f32 %v2165_v45, %v1594_v51  ;;  %v1598_v38 = vmax.f32 %v1003_v30, 0.0  ;;  %v6312_v51 = vld [vmem:[#allocation46_spill] sm:$0xff]  ;;  %v6313_v45 = vld [vmem:[#allocation119_spill] sm:$0xff] }
 0x407   : > { %v1974_v9 = vpop.f32.mrf.mxu1  ;;  %v2167_v23 = vpop.f32.mrf.mxu0  ;;  %v824_v37 = vadd.f32 %v6312_v51, %v5450_v16  ;;  %v1017_v40 = vadd.f32 %v6313_v45, %v5443_v7  ;;  %v6323_v51 = vld [vmem:[#allocation60_spill] sm:$0xff]  ;;  %v6324_v45 = vld [vmem:[#allocation67_spill] sm:$0xff] }
 0x408   : > { %v2299_v35 = vmul.f32 %v1974_v9, %v1593_v33  ;;  %v2301_v3 = vmul.f32 %v2167_v23, %v1595_v14  ;;  %v2370_v1 = vpack.c.bf16 %v2298_v52, %v2294_v29  ;;  %v2372_v19 = vpack.c.bf16 %v2300_v10, %v2296_v20  ;;  %v6314_v14 = vld [vmem:[#allocation115_spill] sm:$0xff]  ;;  %v6316_v9 = vld [vmem:[#allocation40_spill] sm:$0xff] }
 0x409   : > { %v1978_v27 = vpop.f32.mrf.mxu1  ;;  %v2171_v60 = vpop.f32.mrf.mxu0  ;;  %v1011_v12 = vadd.f32 %v6314_v14, %v5453_v36  ;;  %v820_v23 = vadd.f32 %v6316_v9, %v5450_v16  ;;  %v1608_v32 = vmax.f32 %v824_v37, 0.0  ;;  %v1610_v53 = vmax.f32 %v1017_v40, 0.0  ;;  %v6319_v16 = vld [vmem:[#allocation93_spill] sm:$0xff] }
 0x40a   : > { %v2371_v0 = vpack.c.bf16 %v2299_v35, %v2295_v47  ;;  %v2373_v15 = vpack.c.bf16 %v2301_v3, %v2297_v50  ;;  %v2302_v33 = vmul.f32 %v1978_v27, %v1596_v24  ;;  %v2304_v46 = vmul.f32 %v2171_v60, %v1598_v38  ;;  %v6317_v47 = vld [vmem:[#allocation116_spill] sm:$0xff]  ;;  %v6318_v27 = vld [vmem:[#allocation90_spill] sm:$0xff] }
 0x40b   : > { %v1980_v5 = vpop.f32.mrf.mxu1  ;;  %v2173_v58 = vpop.f32.mrf.mxu0  ;;  %v1013_v50 = vadd.f32 %v6317_v47, %v5443_v7  ;;  %v1605_v36 = vmax.f32 %v1011_v12, 0.0  ;;  %v1607_v60 = vmax.f32 %v6318_v27, 0.0  ;;  %v1611_v26 = vmax.f32 %v6319_v16, 0.0 }
 0x40c   : > { %2838 = vmatprep.mubr.bf16.mxu1 %v2371_v0  ;;  %2999 = vmatprep.mubr.bf16.mxu0 %v2373_v15  ;;  %v2303_v49 = vmul.f32 %v1980_v5, %v1597_v57  ;;  %v2305_v17 = vmul.f32 %v2173_v58, %v1599_v34  ;;  %v1604_v48 = vmax.f32 %v820_v23, 0.0  ;;  %v6322_v34 = vld [vmem:[#allocation54_spill] sm:$0xff] }
 0x40d   : > { %v1982_v39 = vpop.f32.mrf.mxu1  ;;  %v2175_v25 = vpop.f32.mrf.mxu0  ;;  %2839 = vmatmul.mubr.bf16.gmra.mxu1 %v2370_v1  ;;  %3000 = vmatmul.mubr.bf16.gmra.mxu0 %v2372_v19  ;;  %v1606_v7 = vmax.f32 %v1013_v50, 0.0 }
 0x40e   : > { %v2306_v41 = vmul.f32 %v1982_v39, %v1600_v43  ;;  %v2308_v2 = vmul.f32 %v2175_v25, %v1602_v6  ;;  %v6320_v25 = vld [vmem:[#allocation45_spill] sm:$0xff] }
 0x40f   : > { %v1984_v18 = vpop.f32.mrf.mxu1  ;;  %v2177_v22 = vpop.f32.mrf.mxu0 }
 0x410   : > { %v2307_v55 = vmul.f32 %v1984_v18, %v1601_v44  ;;  %v2309_v28 = vmul.f32 %v2177_v22, %v1603_v11  ;;  %v2374_v35 = vpack.c.bf16 %v2306_v41, %v2302_v33  ;;  %v2376_v3 = vpack.c.bf16 %v2308_v2, %v2304_v46 }
 0x411   : > { %v1988_v56 = vpop.f32.mrf.mxu1  ;;  %v2181_v59 = vpop.f32.mrf.mxu0 }
 0x412   : > { %v2375_v52 = vpack.c.bf16 %v2307_v55, %v2303_v49  ;;  %v2377_v10 = vpack.c.bf16 %v2309_v28, %v2305_v17  ;;  %v2310_v19 = vmul.f32 %v1988_v56, %v1604_v48  ;;  %v2312_v5 = vmul.f32 %v2181_v59, %v1606_v7  ;;  %v6330_v7 = vld [vmem:[#allocation95_spill] sm:$0xff] }
 0x413   : > { %v1990_v21 = vpop.f32.mrf.mxu1  ;;  %v2183_v8 = vpop.f32.mrf.mxu0 }
 0x414   : > { %2846 = vmatprep.mubr.bf16.mxu1 %v2375_v52  ;;  %3007 = vmatprep.mubr.bf16.mxu0 %v2377_v10  ;;  %v2311_v54 = vmul.f32 %v1990_v21, %v1605_v36  ;;  %v2313_v63 = vmul.f32 %v2183_v8, %v1607_v60  ;;  %v6326_v10 = vld [vmem:[#allocation79_spill] sm:$0xff]  ;;  %v6327_v8 = vld [vmem:[#allocation86_spill] sm:$0xff] }
 0x415   : > { %v1992_v29 = vpop.f32.mrf.mxu1  ;;  %v2185_v20 = vpop.f32.mrf.mxu0  ;;  %2847 = vmatmul.mubr.bf16.gmra.mxu1 %v2374_v35  ;;  %3008 = vmatmul.mubr.bf16.gmra.mxu0 %v2376_v3 }
 0x416   : > { %v2314_v31 = vmul.f32 %v1992_v29, %v1608_v32  ;;  %v2316_v0 = vmul.f32 %v2185_v20, %v1610_v53  ;;  %v6328_v53 = vld [vmem:[#allocation92_spill] sm:$0xff] }
 0x417   : > { %v1994_v15 = vpop.f32.mrf.mxu1  ;;  %v2187_v42 = vpop.f32.mrf.mxu0 }
 0x418   : > { %v2315_v30 = vmul.f32 %v1994_v15, %v1609_v4  ;;  %v2317_v1 = vmul.f32 %v2187_v42, %v1611_v26  ;;  %v2378_v6 = vpack.c.bf16 %v2314_v31, %v2310_v19  ;;  %v2380_v39 = vpack.c.bf16 %v2316_v0, %v2312_v5  ;;  %v6329_v26 = vld [vmem:[#allocation94_spill] sm:$0xff]  ;;  %v6332_v5 = vld [vmem:[#allocation108_spill] sm:$0xff] }
 0x41a   : > { %v2379_v58 = vpack.c.bf16 %v2315_v30, %v2311_v54  ;;  %v2381_v43 = vpack.c.bf16 %v2317_v1, %v2313_v63  ;;  %v6331_v1 = vld [vmem:[#allocation96_spill] sm:$0xff] }
 0x41c   : > { %2854 = vmatprep.mubr.bf16.mxu1 %v2379_v58  ;;  %3015 = vmatprep.mubr.bf16.mxu0 %v2381_v43 }
 0x41d   : > { %2855 = vmatmul.mubr.bf16.gmra.mxu1 %v2378_v6  ;;  %3016 = vmatmul.mubr.bf16.gmra.mxu0 %v2380_v39 }
 0x41e   : > { %3814 = vmatprep.mubr.bf16.mxu1 %v6320_v25 }
 0x425   : > { %v3518_v57 = vpop.f32.mrf.mxu1  ;;  %v3630_v44 = vpop.f32.mrf.mxu0  ;;  %3815 = vmatmul.mubr.bf16.vlgmr.msra.gmra.mxu1 %v6321_v62  ;;  %v6333_v62 = vld [vmem:[#allocation111_spill] sm:$0xff] }
 0x426   : > { %3818 = vmatprep.mubr.bf16.mxu1 %v6322_v34 }
 0x427   : > { %v3519_v11 = vpop.f32.mrf.mxu1  ;;  %v3631_v24 = vpop.f32.mrf.mxu0 }
 0x428   : > { %v3520_v38 = vadd.f32 %v3519_v11, %v3518_v57  ;;  %v3632_v41 = vadd.f32 %v3631_v24, %v3630_v44  ;;  %v6334_v11 = vld [vmem:[#allocation114_spill] sm:$0xff] }
 0x429   : > { %v3521_v2 = vpop.f32.mrf.mxu1  ;;  %v3633_v18 = vpop.f32.mrf.mxu0 }
 0x42a   : > { %v5718_v22 = vadd.f32 %v3632_v41, %v3520_v38 }
 0x42b   : > { %v3522_v49 = vpop.f32.mrf.mxu1  ;;  %v3634_v17 = vpop.f32.mrf.mxu0 }
 0x42c   : > { %v3523_v55 = vadd.f32 %v3522_v49, %v3521_v2  ;;  %v3635_v28 = vadd.f32 %v3634_v17, %v3633_v18 }
 0x42d   : > { %3819 = vmatmul.mubr.bf16.gmra.mxu1 %v6323_v51 }
 0x42e   : > { %v3524_v37 = vpop.f32.mrf.mxu1  ;;  %3822 = vmatprep.mubr.bf16.mxu1 %v6324_v45  ;;  %v5722_v40 = vadd.f32 %v3635_v28, %v3523_v55  ;;  %v5724_v33 = vpop.f32.mrf.mxu0  ;;  %v6335_v55 = vld [vmem:[#allocation117_spill] sm:$0xff] }
 0x430   : > { %v3525_v46 = vpop.f32.mrf.mxu1  ;;  %v5728_v14 = vpop.f32.mrf.mxu0 }
 0x431   : > { %v5726_v56 = vadd.f32 %v3525_v46, %v3524_v37 }
 0x432   : > { %v3527_v59 = vpop.f32.mrf.mxu1  ;;  %v5734_v9 = vpop.f32.mrf.mxu0 }
 0x434   : > { %v3528_v12 = vpop.f32.mrf.mxu1  ;;  %v5738_v35 = vpop.f32.mrf.mxu0 }
 0x435   : > { %v5730_v61 = vadd.f32 %v3528_v12, %v3527_v59  ;;  %3823 = vmatmul.mubr.bf16.gmra.mxu1 %v6325_v13 }
 0x436   : > { %v3530_v52 = vpop.f32.mrf.mxu1  ;;  %3826 = vmatprep.mubr.bf16.mxu1 %v6326_v10  ;;  %v5744_v29 = vpop.f32.mrf.mxu0 }
 0x438   : > { %v3531_v23 = vpop.f32.mrf.mxu1  ;;  %v5748_v60 = vpop.f32.mrf.mxu0 }
 0x439   : > { %v5736_v47 = vadd.f32 %v3531_v23, %v3530_v52 }
 0x43a   : > { %v3533_v50 = vpop.f32.mrf.mxu1  ;;  %v5754_v31 = vpop.f32.mrf.mxu0 }
 0x43c   : > { %v3534_v3 = vpop.f32.mrf.mxu1  ;;  %v5758_v54 = vpop.f32.mrf.mxu0 }
 0x43d   : > { %v5740_v21 = vadd.f32 %v3534_v3, %v3533_v50  ;;  %3827 = vmatmul.mubr.bf16.gmra.mxu1 %v6327_v8 }
 0x43e   : > { %v3536_v32 = vpop.f32.mrf.mxu1  ;;  %3830 = vmatprep.mubr.bf16.mxu1 %v6328_v53  ;;  %v5764_v58 = vpop.f32.mrf.mxu0 }
 0x440   : > { %v3537_v20 = vpop.f32.mrf.mxu1  ;;  %v5768_v25 = vpop.f32.mrf.mxu0 }
 0x441   : > { %v5746_v36 = vadd.f32 %v3537_v20, %v3536_v32 }
 0x442   : > { %v3539_v27 = vpop.f32.mrf.mxu1  ;;  %v5774_v24 = vpop.f32.mrf.mxu0 }
 0x444   : > { %v3540_v4 = vpop.f32.mrf.mxu1  ;;  %v5778_v18 = vpop.f32.mrf.mxu0 }
 0x445   : > { %v5750_v16 = vadd.f32 %v3540_v4, %v3539_v27  ;;  %3831 = vmatmul.mubr.bf16.gmra.mxu1 %v6329_v26 }
 0x446   : > { %v3542_v48 = vpop.f32.mrf.mxu1  ;;  %3834 = vmatprep.mubr.bf16.mxu1 %v6330_v7  ;;  %v5783_v51 = vpop.f32.mrf.mxu0 }
 0x448   : > { %v3543_v0 = vpop.f32.mrf.mxu1  ;;  %v5787_v59 = vpop.f32.mrf.mxu0 }
 0x449   : > { %v5756_v15 = vadd.f32 %v3543_v0, %v3542_v48 }
 0x44a   : > { %v3545_v42 = vpop.f32.mrf.mxu1  ;;  %v5791_v10 = vpop.f32.mrf.mxu0 }
 0x44c   : > { %v3546_v63 = vpop.f32.mrf.mxu1  ;;  %v5795_v8 = vpop.f32.mrf.mxu0 }
 0x44d   : > { %v5760_v30 = vadd.f32 %v3546_v63, %v3545_v42  ;;  %3835 = vmatmul.mubr.bf16.gmra.mxu1 %v6331_v1 }
 0x44e   : > { %v3548_v19 = vpop.f32.mrf.mxu1  ;;  %3838 = vmatprep.mubr.bf16.mxu1 %v6332_v5  ;;  %v5799_v27 = vpop.f32.mrf.mxu0 }
 0x450   : > { %v3549_v43 = vpop.f32.mrf.mxu1  ;;  %v5803_v7 = vpop.f32.mrf.mxu0 }
 0x451   : > { %v5766_v6 = vadd.f32 %v3549_v43, %v3548_v19 }
 0x452   : > { %v3551_v39 = vpop.f32.mrf.mxu1  ;;  %v5807_v1 = vpop.f32.mrf.mxu0 }
 0x454   : > { %v3552_v57 = vpop.f32.mrf.mxu1 }
 0x455   : > { %v5770_v44 = vadd.f32 %v3552_v57, %v3551_v39  ;;  %3839 = vmatmul.mubr.bf16.gmra.mxu1 %v6333_v62  ;;  %v5811_v39 = vpop.f32.mrf.mxu0 }
 0x456   : > { %v3554_v34 = vpop.f32.mrf.mxu1  ;;  %3842 = vmatprep.mubr.bf16.mxu1 %v6334_v11 }
 0x457   : > { %v5815_v11 = vpop.f32.mrf.mxu0 }
 0x458   : > { %v3555_v38 = vpop.f32.mrf.mxu1 }
 0x459   : > { %v5776_v41 = vadd.f32 %v3555_v38, %v3554_v34 }
 0x45a   : > { %v3557_v2 = vpop.f32.mrf.mxu1 }
 0x45c   : > { %v3558_v49 = vpop.f32.mrf.mxu1 }
 0x45d   : > { %v5780_v17 = vadd.f32 %v3558_v49, %v3557_v2  ;;  %3843 = vmatmul.mubr.bf16.gmra.mxu1 %v6335_v55  ;;  %v5819_v55 = vpop.f32.mrf.mxu0 }
 0x45e   : > { %v3560_v28 = vpop.f32.mrf.mxu1 }
 0x460   : > { %v3561_v37 = vpop.f32.mrf.mxu1 }
 0x461   : > { %v5785_v45 = vadd.f32 %v3561_v37, %v3560_v28 }
 0x462   : > { %v3563_v46 = vpop.f32.mrf.mxu1 }
 0x464   : > { %v3564_v12 = vpop.f32.mrf.mxu1 }
 0x465   : > { %v5789_v13 = vadd.f32 %v3564_v12, %v3563_v46  ;;  %v5823_v46 = vpop.f32.mrf.mxu0 }
 0x466   : > { %v3566_v52 = vpop.f32.mrf.mxu1 }
 0x467   : > { %v5825_v12 = vpop.f32.mrf.mxu0 }
 0x468   : > { %v3567_v23 = vpop.f32.mrf.mxu1 }
 0x469   : > { %v5793_v50 = vadd.f32 %v3567_v23, %v3566_v52  ;;  %v5827_v52 = vpop.f32.mrf.mxu0 }
 0x46a   : > { %v3569_v3 = vpop.f32.mrf.mxu1 }
 0x46b   : > { %6336 = vst [vmem:[#allocation16_spill] sm:$0xff] %v5793_v50  ;;  %v5829_v23 = vpop.f32.mrf.mxu0 }
 0x46c   : > { %v3570_v32 = vpop.f32.mrf.mxu1 }
 0x46d   : > { %v5797_v53 = vadd.f32 %v3570_v32, %v3569_v3  ;;  %v5831_v3 = vpop.f32.mrf.mxu0 }
 0x46e   : > { %v3572_v20 = vpop.f32.mrf.mxu1 }
 0x46f   : > { %6337 = vst [vmem:[#allocation17_spill] sm:$0xff] %v5797_v53  ;;  %v5833_v32 = vpop.f32.mrf.mxu0 }
 0x470   : > { %v3573_v4 = vpop.f32.mrf.mxu1 }
 0x471   : > { %v5801_v26 = vadd.f32 %v3573_v4, %v3572_v20  ;;  %v5835_v20 = vpop.f32.mrf.mxu0 }
 0x472   : > { %v3575_v48 = vpop.f32.mrf.mxu1 }
 0x473   : > { %6338 = vst [vmem:[#allocation51_spill] sm:$0xff] %v5801_v26  ;;  %v5837_v4 = vpop.f32.mrf.mxu0 }
 0x474   : > { %v3576_v0 = vpop.f32.mrf.mxu1 }
 0x475   : > { %v5805_v42 = vadd.f32 %v3576_v0, %v3575_v48  ;;  %v5839_v48 = vpop.f32.mrf.mxu0 }
 0x476   : > { %v3578_v63 = vpop.f32.mrf.mxu1  ;;  %6344 = vst [vmem:[#allocation18_spill] sm:$0xff] %v5839_v48 }
 0x477   : > { %6339 = vst [vmem:[#allocation53_spill] sm:$0xff] %v5805_v42  ;;  %v5841_v0 = vpop.f32.mrf.mxu0 }
 0x478   : > { %v3579_v19 = vpop.f32.mrf.mxu1  ;;  %6345 = vst [vmem:[#allocation19_spill] sm:$0xff] %v5841_v0 }
 0x479   : > { %v5809_v5 = vadd.f32 %v3579_v19, %v3578_v63  ;;  %v5843_v63 = vpop.f32.mrf.mxu0 }
 0x47a   : > { %v3581_v43 = vpop.f32.mrf.mxu1 }
 0x47b   : > { %6340 = vst [vmem:[#allocation41_spill] sm:$0xff] %v5809_v5  ;;  %v5845_v19 = vpop.f32.mrf.mxu0 }
 0x47c   : > { %v3582_v57 = vpop.f32.mrf.mxu1 }
 0x47d   : > { %v5813_v62 = vadd.f32 %v3582_v57, %v3581_v43  ;;  %v5847_v43 = vpop.f32.mrf.mxu0 }
 0x47e   : > { %v3584_v34 = vpop.f32.mrf.mxu1 }
 0x47f   : > { %6341 = vst [vmem:[#allocation44_spill] sm:$0xff] %v5813_v62  ;;  %v5849_v57 = vpop.f32.mrf.mxu0 }
 0x480   : > { %v3585_v38 = vpop.f32.mrf.mxu1  ;;  %6346 = vst [vmem:[#allocation58_spill] sm:$0xff] %v5849_v57 }
 0x481   : > { %v5817_v2 = vadd.f32 %v3585_v38, %v3584_v34  ;;  %v5851_v34 = vpop.f32.mrf.mxu0 }
 0x482   : > { %v3587_v49 = vpop.f32.mrf.mxu1  ;;  %6347 = vst [vmem:[#allocation62_spill] sm:$0xff] %v5851_v34 }
 0x483   : > { %6342 = vst [vmem:[#allocation42_spill] sm:$0xff] %v5817_v2  ;;  %v5853_v38 = vpop.f32.mrf.mxu0 }
 0x484   : > { %v3588_v28 = vpop.f32.mrf.mxu1  ;;  %6348 = vst [vmem:[#allocation47_spill] sm:$0xff] %v5853_v38 }
 0x485   : > { %v5821_v37 = vadd.f32 %v3588_v28, %v3587_v49  ;;  %v5855_v28 = vpop.f32.mrf.mxu0 }
 0x486   : > { %6349 = vst [vmem:[#allocation52_spill] sm:$0xff] %v5855_v28 }
 0x487   : > { %6343 = vst [vmem:[#allocation43_spill] sm:$0xff] %v5821_v37  ;;  %v5859_v2 = vpop.f32.mrf.mxu0 }
 0x488   : > { %6351 = vst [vmem:[#allocation50_spill] sm:$0xff] %v5859_v2 }
 0x489   : > { %v5863_v0 = vpop.f32.mrf.mxu0 }
 0x48a   : > { %6353 = vst [vmem:[#allocation21_spill] sm:$0xff] %v5863_v0 }
 0x48b   : > { %v5867_v38 = vpop.f32.mrf.mxu0 }
 0x4c5   : > { %v3590_v49 = vpop.f32.mrf.mxu1 }
 0x4c7   : > { %v3591_v62 = vpop.f32.mrf.mxu1 }
 0x4c8   : > { %v5857_v37 = vadd.f32 %v3591_v62, %v3590_v49  ;;  %v5871_v49 = vpop.f32.mrf.mxu0 }
 0x4c9   : > { %v3593_v5 = vpop.f32.mrf.mxu1 }
 0x4ca   : > { %6350 = vst [vmem:[#allocation48_spill] sm:$0xff] %v5857_v37 }
 0x4cb   : > { %v3594_v53 = vpop.f32.mrf.mxu1 }
 0x4cc   : > { %v5861_v42 = vadd.f32 %v3594_v53, %v3593_v5  ;;  %v5875_v5 = vpop.f32.mrf.mxu0 }
 0x4cd   : > { %v3596_v50 = vpop.f32.mrf.mxu1 }
 0x4ce   : > { %6352 = vst [vmem:[#allocation20_spill] sm:$0xff] %v5861_v42 }
 0x4cf   : > { %v3597_v48 = vpop.f32.mrf.mxu1 }
 0x4d0   : > { %v5865_v26 = vadd.f32 %v3597_v48, %v3596_v50  ;;  %v5879_v50 = vpop.f32.mrf.mxu0 }
 0x4d1   : > { %v3599_v34 = vpop.f32.mrf.mxu1 }
 0x4d2   : > { %6354 = vst [vmem:[#allocation56_spill] sm:$0xff] %v5865_v26 }
 0x4d3   : > { %v3600_v57 = vpop.f32.mrf.mxu1 }
 0x4d4   : > { %v5869_v28 = vadd.f32 %v3600_v57, %v3599_v34  ;;  %v3638_v57 = vadd.f32 %v5728_v14, %v5724_v33  ;;  %v5887_v34 = vpop.f32.mrf.mxu0 }
 0x4d5   : > { %v3602_v62 = vpop.f32.mrf.mxu1 }
 0x4d6   : > { %6355 = vst [vmem:[#allocation59_spill] sm:$0xff] %v5869_v28 }
 0x4d7   : > { %v3603_v37 = vpop.f32.mrf.mxu1 }
 0x4d8   : > { %v5873_v2 = vadd.f32 %v3603_v37, %v3602_v62 }
 0x4d9   : > { %v3605_v53 = vpop.f32.mrf.mxu1 }
 0x4da   : > { %6356 = vst [vmem:[#allocation55_spill] sm:$0xff] %v5873_v2  ;;  %v3641_v2 = vadd.f32 %v5738_v35, %v5734_v9  ;;  %v3644_v35 = vadd.f32 %v5748_v60, %v5744_v29 }
 0x4db   : > { %v3606_v42 = vpop.f32.mrf.mxu1 }
 0x4dc   : > { %v5877_v0 = vadd.f32 %v3606_v42, %v3605_v53  ;;  %v2906_v42 = vadd.f32 %v3638_v57, %v5726_v56  ;;  %v5896_v53 = vpop.f32.mrf.mxu0  ;;  %v2909_v56 = vadd.f32 %v3641_v2, %v5730_v61  ;;  %v2914_v60 = vadd.f32 %v3644_v35, %v5736_v47 }
 0x4dd   : > { %v5881_v48 = vpop.f32.mrf.mxu1 }
 0x4de   : > { %6357 = vst [vmem:[#allocation64_spill] sm:$0xff] %v5877_v0  ;;  %6358 = vst [vmem:[#allocation57_spill] sm:$0xff] %v5881_v48  ;;  %v5907_v14 = vpop.f32.mrf.mxu0 }
 0x4df   : > { %v5883_v26 = vpop.f32.mrf.mxu1 }
 0x4e0   : > { %6359 = vst [vmem:[#allocation61_spill] sm:$0xff] %v5883_v26  ;;  %v3650_v26 = vadd.f32 %v5768_v25, %v5764_v58  ;;  %v5917_v61 = vpop.f32.mrf.mxu0 }
 0x4e1   : > { %v5889_v37 = vpop.f32.mrf.mxu1 }
 0x4e3   : > { %v5891_v62 = vpop.f32.mrf.mxu1 }
 0x4e5   : > { %v3816_v0 = vpop.f32.mrf.mxu1 }
 0x4e6   : > { %v3067_v28 = vadd.f32 %v3816_v0, %v2906_v42  ;;  %v3653_v0 = vadd.f32 %v5778_v18, %v5774_v24  ;;  %v3662_v24 = vadd.f32 %v5803_v7, %v5799_v27  ;;  %v5927_v18 = vpop.f32.mrf.mxu0  ;;  %v3665_v27 = vadd.f32 %v5811_v39, %v5807_v1 }
 0x4e7   : > { %v3058_v48 = vpop.f32.mrf.mxu1  ;;  %v3674_v1 = vadd.f32 %v5829_v23, %v5827_v52  ;;  %v3677_v52 = vadd.f32 %v5833_v32, %v5831_v3  ;;  %v3686_v3 = vadd.f32 %v5845_v19, %v5843_v63 }
 0x4e8   : > { %3187 = vst [vmem:[%s5902_s24 + $0x10] sm:$0xff] %v3067_v28  ;;  %v3059_v33 = vadd.f32 %v3058_v48, %v5718_v22  ;;  %v2922_v22 = vadd.f32 %v3650_v26, %v5746_v36  ;;  %v3647_v48 = vadd.f32 %v5758_v54, %v5754_v31  ;;  %v2925_v36 = vadd.f32 %v3653_v0, %v5750_v16 }
 0x4e9   : > { %v3817_v9 = vpop.f32.mrf.mxu1  ;;  %v3656_v31 = vadd.f32 %v5787_v59, %v5783_v51  ;;  %v2938_v16 = vadd.f32 %v3662_v24, %v5766_v6  ;;  %v3659_v51 = vadd.f32 %v5795_v8, %v5791_v10  ;;  %v2941_v6 = vadd.f32 %v3665_v27, %v5770_v44  ;;  %v6366_v27 = vld [vmem:[#allocation53_spill] sm:$0xff] }
 0x4ea   : > { %3185 = vst [vmem:[%s5902_s24] sm:$0xff] %v3059_v33  ;;  %v3070_v58 = vadd.f32 %v3817_v9, %v2909_v56  ;;  %v2917_v47 = vadd.f32 %v3647_v48, %v5740_v21  ;;  %v5937_v33 = vpop.f32.mrf.mxu0  ;;  %v3668_v10 = vadd.f32 %v5819_v55, %v5815_v11  ;;  %v2954_v44 = vadd.f32 %v3674_v1, %v5785_v45  ;;  %v6369_v1 = vld [vmem:[#allocation17_spill] sm:$0xff] }
 0x4eb   : > { %v3061_v25 = vpop.f32.mrf.mxu1  ;;  %v2930_v21 = vadd.f32 %v3656_v31, %v5756_v15  ;;  %v2933_v15 = vadd.f32 %v3659_v51, %v5760_v30  ;;  %v3671_v11 = vadd.f32 %v5825_v12, %v5823_v46  ;;  %v2957_v45 = vadd.f32 %v3677_v52, %v5789_v13  ;;  %v6364_v31 = vld [vmem:[#allocation16_spill] sm:$0xff]  ;;  %v6367_v51 = vld [vmem:[#allocation62_spill] sm:$0xff] }
 0x4ec   : > { %3188 = vst [vmem:[%s5902_s24 + $0x18] sm:$0xff] %v3070_v58  ;;  %v3062_v28 = vadd.f32 %v3061_v25, %v5722_v40  ;;  %v5947_v35 = vpop.f32.mrf.mxu0  ;;  %v2946_v30 = vadd.f32 %v3668_v10, %v5776_v41  ;;  %v3680_v46 = vadd.f32 %v5837_v4, %v5835_v20  ;;  %v6370_v10 = vld [vmem:[#allocation42_spill] sm:$0xff]  ;;  %v6371_v52 = vld [vmem:[#allocation52_spill] sm:$0xff] }
 0x4ed   : > { %v3820_v2 = vpop.f32.mrf.mxu1  ;;  %v2949_v41 = vadd.f32 %v3671_v11, %v5780_v17  ;;  %v6373_v11 = vld [vmem:[#allocation41_spill] sm:$0xff] }
 0x4ee   : > { %3186 = vst [vmem:[%s5902_s24 + $0x8] sm:$0xff] %v3062_v28  ;;  %v3083_v29 = vadd.f32 %v3820_v2, %v2922_v22  ;;  %v5957_v0 = vpop.f32.mrf.mxu0  ;;  %v2962_v17 = vadd.f32 %v3680_v46, %v6364_v31  ;;  %v6380_v31 = vld [vmem:[#allocation59_spill] sm:$0xff] }
 0x4ef   : > { %v3074_v57 = vpop.f32.mrf.mxu1 }
 0x4f0   : > { %3191 = vst [vmem:[%s5902_s24 + $0x30] sm:$0xff] %v3083_v29  ;;  %v3075_v40 = vadd.f32 %v3074_v57, %v2914_v60  ;;  %v5967_v2 = vpop.f32.mrf.mxu0  ;;  %v6360_v60 = vld [vmem:[#allocation58_spill] sm:$0xff]  ;;  %v6361_v57 = vld [vmem:[#allocation51_spill] sm:$0xff] }
 0x4f1   : > { %v3821_v26 = vpop.f32.mrf.mxu1  ;;  %v3689_v63 = vadd.f32 %v6360_v60, %v5847_v43  ;;  %v2970_v13 = vadd.f32 %v3686_v3, %v6361_v57  ;;  %v3713_v60 = vadd.f32 %v5947_v35, %v5937_v33 }
 0x4f2   : > { %3189 = vst [vmem:[%s5902_s24 + $0x20] sm:$0xff] %v3075_v40  ;;  %v3086_v54 = vadd.f32 %v3821_v26, %v2925_v36  ;;  %v5977_v24 = vpop.f32.mrf.mxu0  ;;  %v6362_v36 = vld [vmem:[#allocation18_spill] sm:$0xff]  ;;  %v6363_v26 = vld [vmem:[#allocation19_spill] sm:$0xff] }
 0x4f3   : > { %v3077_v42 = vpop.f32.mrf.mxu1  ;;  %v3683_v20 = vadd.f32 %v6363_v26, %v6362_v36  ;;  %v6378_v26 = vld [vmem:[#allocation57_spill] sm:$0xff] }
 0x4f4   : > { %3192 = vst [vmem:[%s5902_s24 + $0x38] sm:$0xff] %v3086_v54  ;;  %v3078_v7 = vadd.f32 %v3077_v42, %v2917_v47  ;;  %v6365_v47 = vld [vmem:[#allocation21_spill] sm:$0xff] }
 0x4f5   : > { %v3824_v56 = vpop.f32.mrf.mxu1  ;;  %v3698_v43 = vadd.f32 %v5867_v38, %v6365_v47 }
 0x4f6   : > { %3190 = vst [vmem:[%s5902_s24 + $0x28] sm:$0xff] %v3078_v7  ;;  %v3099_v59 = vadd.f32 %v3824_v56, %v2938_v16  ;;  %v2973_v7 = vadd.f32 %v3689_v63, %v6366_v27  ;;  %v3718_v16 = vpop.f32.mrf.mxu0 }
 0x4f7   : > { %v3090_v9 = vpop.f32.mrf.mxu1 }
 0x4f8   : > { %3195 = vst [vmem:[%s5902_s24 + $0x50] sm:$0xff] %v3099_v59  ;;  %v3091_v39 = vadd.f32 %v3090_v9, %v2930_v21  ;;  %v6368_v59 = vld [vmem:[#allocation47_spill] sm:$0xff] }
 0x4f9   : > { %v3825_v58 = vpop.f32.mrf.mxu1  ;;  %v3692_v21 = vadd.f32 %v6368_v59, %v6367_v51 }
 0x4fa   : > { %3193 = vst [vmem:[%s5902_s24 + $0x40] sm:$0xff] %v3091_v39  ;;  %v3102_v8 = vadd.f32 %v3825_v58, %v2941_v6  ;;  %v2965_v39 = vadd.f32 %v3683_v20, %v6369_v1  ;;  %v3701_v58 = vadd.f32 %v5875_v5, %v5871_v49  ;;  %v6374_v5 = vld [vmem:[#allocation43_spill] sm:$0xff]  ;;  %v6379_v20 = vld [vmem:[#allocation61_spill] sm:$0xff] }
 0x4fb   : > { %v3093_v25 = vpop.f32.mrf.mxu1 }
 0x4fc   : > { %3196 = vst [vmem:[%s5902_s24 + $0x58] sm:$0xff] %v3102_v8  ;;  %v3094_v23 = vadd.f32 %v3093_v25, %v2933_v15  ;;  %v2986_v8 = vadd.f32 %v3698_v43, %v6370_v10  ;;  %v3720_v15 = vpop.f32.mrf.mxu0  ;;  %v2989_v3 = vadd.f32 %v3701_v58, %v6374_v5  ;;  %v6381_v43 = vld [vmem:[#allocation20_spill] sm:$0xff] }
 0x4fd   : > { %v3828_v28 = vpop.f32.mrf.mxu1 }
 0x4fe   : > { %3194 = vst [vmem:[%s5902_s24 + $0x48] sm:$0xff] %v3094_v23  ;;  %v3115_v55 = vadd.f32 %v3828_v28, %v2954_v44  ;;  %v6372_v23 = vld [vmem:[#allocation50_spill] sm:$0xff] }
 0x4ff   : > { %v3106_v22 = vpop.f32.mrf.mxu1  ;;  %v3695_v44 = vadd.f32 %v6372_v23, %v6371_v52 }
 0x500   : > { %3199 = vst [vmem:[%s5902_s24 + $0x70] sm:$0xff] %v3115_v55  ;;  %v3107_v32 = vadd.f32 %v3106_v22, %v2946_v30  ;;  %v2978_v55 = vadd.f32 %v3692_v21, %v6373_v11  ;;  %v3710_v22 = vadd.f32 %v5927_v18, %v5917_v61  ;;  %v6376_v18 = vld [vmem:[#allocation56_spill] sm:$0xff] }
 0x501   : > { %v3829_v48 = vpop.f32.mrf.mxu1 }
 0x502   : > { %3197 = vst [vmem:[%s5902_s24 + $0x60] sm:$0xff] %v3107_v32  ;;  %v3118_v12 = vadd.f32 %v3829_v48, %v2957_v45  ;;  %v3721_v32 = vpop.f32.mrf.mxu0  ;;  %v3704_v48 = vadd.f32 %v5887_v34, %v5879_v50  ;;  %v3002_v63 = vadd.f32 %v3710_v22, %v6376_v18  ;;  %v6377_v34 = vld [vmem:[#allocation48_spill] sm:$0xff] }
 0x503   : > { %v3109_v29 = vpop.f32.mrf.mxu1  ;;  %v3722_v33 = vadd.f32 %v3721_v32, %v3720_v15 }
 0x504   : > { %3200 = vst [vmem:[%s5902_s24 + $0x78] sm:$0xff] %v3118_v12  ;;  %v3110_v19 = vadd.f32 %v3109_v29, %v2949_v41  ;;  %v6375_v12 = vld [vmem:[#allocation44_spill] sm:$0xff] }
 0x505   : > { %v3832_v40 = vpop.f32.mrf.mxu1  ;;  %v2981_v41 = vadd.f32 %v3695_v44, %v6375_v12 }
 0x506   : > { %3198 = vst [vmem:[%s5902_s24 + $0x68] sm:$0xff] %v3110_v19  ;;  %v3131_v4 = vadd.f32 %v3832_v40, %v2970_v13  ;;  %v3723_v19 = vpop.f32.mrf.mxu0  ;;  %v3707_v13 = vadd.f32 %v5907_v14, %v5896_v53  ;;  %v2994_v40 = vadd.f32 %v3704_v48, %v6377_v34  ;;  %v3716_v53 = vadd.f32 %v5967_v2, %v5957_v0  ;;  %v6382_v2 = vld [vmem:[#allocation55_spill] sm:$0xff] }
 0x507   : > { %v3122_v54 = vpop.f32.mrf.mxu1 }
 0x508   : > { %3203 = vst [vmem:[%s5902_s24 + $0x90] sm:$0xff] %v3131_v4  ;;  %v3123_v42 = vadd.f32 %v3122_v54, %v2962_v17  ;;  %v3610_v4 = vadd.f32 %v6379_v20, %v6378_v26  ;;  %v3005_v17 = vadd.f32 %v3713_v60, %v6380_v31  ;;  %v3724_v54 = vpop.f32.mrf.mxu0  ;;  %v3010_v1 = vadd.f32 %v3716_v53, %v6382_v2 }
 0x509   : > { %v3833_v56 = vpop.f32.mrf.mxu1 }
 0x50a   : > { %3201 = vst [vmem:[%s5902_s24 + $0x80] sm:$0xff] %v3123_v42  ;;  %v3134_v9 = vadd.f32 %v3833_v56, %v2973_v7  ;;  %v2997_v42 = vadd.f32 %v3707_v13, %v6381_v43  ;;  %v3613_v7 = vadd.f32 %v5891_v62, %v5889_v37  ;;  %v3725_v56 = vadd.f32 %v3724_v54, %v3723_v19 }
 0x50b   : > { %v3125_v6 = vpop.f32.mrf.mxu1  ;;  %v3018_v59 = vadd.f32 %v3722_v33, %v3610_v4 }
 0x50c   : > { %3204 = vst [vmem:[%s5902_s24 + $0x98] sm:$0xff] %v3134_v9  ;;  %v3126_v38 = vadd.f32 %v3125_v6, %v2965_v39  ;;  %v3719_v9 = vadd.f32 %v3718_v16, %v5977_v24  ;;  %v3021_v58 = vadd.f32 %v3725_v56, %v3613_v7 }
 0x50d   : > { %v3836_v25 = vpop.f32.mrf.mxu1 }
 0x50e   : > { %3202 = vst [vmem:[%s5902_s24 + $0x88] sm:$0xff] %v3126_v38  ;;  %v3147_v28 = vadd.f32 %v3836_v25, %v2986_v8  ;;  %v6383_v38 = vld [vmem:[#allocation64_spill] sm:$0xff] }
 0x50f   : > { %v3138_v30 = vpop.f32.mrf.mxu1  ;;  %v3013_v10 = vadd.f32 %v3719_v9, %v6383_v38 }
 0x510   : > { %3207 = vst [vmem:[%s5902_s24 + $0xb0] sm:$0xff] %v3147_v28  ;;  %v3139_v49 = vadd.f32 %v3138_v30, %v2978_v55 }
 0x511   : > { %v3837_v45 = vpop.f32.mrf.mxu1 }
 0x512   : > { %3205 = vst [vmem:[%s5902_s24 + $0xa0] sm:$0xff] %v3139_v49  ;;  %v3150_v46 = vadd.f32 %v3837_v45, %v2989_v3 }
 0x513   : > { %v3141_v29 = vpop.f32.mrf.mxu1 }
 0x514   : > { %3208 = vst [vmem:[%s5902_s24 + $0xb8] sm:$0xff] %v3150_v46  ;;  %v3142_v61 = vadd.f32 %v3141_v29, %v2981_v41 }
 0x515   : > { %v3840_v57 = vpop.f32.mrf.mxu1 }
 0x516   : > { %3206 = vst [vmem:[%s5902_s24 + $0xa8] sm:$0xff] %v3142_v61  ;;  %v3163_v50 = vadd.f32 %v3840_v57, %v3002_v63 }
 0x517   : > { %v3154_v36 = vpop.f32.mrf.mxu1 }
 0x518   : > { %3211 = vst [vmem:[%s5902_s24 + $0xd0] sm:$0xff] %v3163_v50  ;;  %v3155_v35 = vadd.f32 %v3154_v36, %v2994_v40 }
 0x519   : > { %v3841_v47 = vpop.f32.mrf.mxu1 }
 0x51a   : > { %3209 = vst [vmem:[%s5902_s24 + $0xc0] sm:$0xff] %v3155_v35  ;;  %v3166_v14 = vadd.f32 %v3841_v47, %v3005_v17 }
 0x51b   : > { %v3157_v27 = vpop.f32.mrf.mxu1 }
 0x51c   : > { %3212 = vst [vmem:[%s5902_s24 + $0xd8] sm:$0xff] %v3166_v14  ;;  %v3158_v51 = vadd.f32 %v3157_v27, %v2997_v42 }
 0x51d   : > { %v3844_v21 = vpop.f32.mrf.mxu1 }
 0x51e   : > { %3210 = vst [vmem:[%s5902_s24 + $0xc8] sm:$0xff] %v3158_v51  ;;  %v3179_v0 = vadd.f32 %v3844_v21, %v3018_v59 }
 0x51f   : > { %v3170_v39 = vpop.f32.mrf.mxu1 }
 0x520   : > { %3215 = vst [vmem:[%s5902_s24 + $0xf0] sm:$0xff] %v3179_v0  ;;  %v3171_v6 = vadd.f32 %v3170_v39, %v3010_v1 }
 0x521   : > { %v3845_v37 = vpop.f32.mrf.mxu1 }
 0x522   : > { %3213 = vst [vmem:[%s5902_s24 + $0xe0] sm:$0xff] %v3171_v6  ;;  %v3182_v62 = vadd.f32 %v3845_v37, %v3021_v58 }
 0x523   : > { %v3173_v24 = vpop.f32.mrf.mxu1 }
 0x524   : > { %3216 = vst [vmem:[%s5902_s24 + $0xf8] sm:$0xff] %v3182_v62  ;;  %v3174_v16 = vadd.f32 %v3173_v24, %v3013_v10 }
 0x526   : > { %3214 = vst [vmem:[%s5902_s24 + $0xe8] sm:$0xff] %v3174_v16 }
 0x527   : > { %4362 = shalt.err (!%p4359_p5)
}
 0x528   : > { %s4363_s12 = scalar_lea.hbm %s6037_s11, 4096  ;;  %s4367_s27 = scalar_lea.hbm %s6089_s5, 8192 }
 0x529   : > { %p4364_p0 = scmp.ne.s32.totalorder %s6037_s11, %s4363_s12  ;;  %p4368_p10 = scmp.lt.s32.totalorder %s6037_s11, %s6089_s5 }
 0x52a   : > { %p4369_p1 = scmp.lt.s32.totalorder %s4367_s27, %s4363_s12 }
 0x52b   : > { %p4365_p7 = pnand %p4364_p0, %p6384_p8 }
 0x52c   : > { %p4370_p2 = por %p4369_p1, %p4368_p10 }
 0x52d   : > { %p4366_p11 = pneg %p4365_p7 }
 0x52f   : > { %p4371_p4 = pnand %p4370_p2, %p4366_p11 }
 0x531   : > { %4374 = shalt.err (!%p4371_p4)
}
 0x532   : > { %s4438_s26 = smov 128   ;;  %s4439_s9 = smov 8  }
 0x533   : > { %3864 = dma.vmem_to_hbm [thread:$0]  (%p6384_p8), %s6039_s6, 4096, %s6037_s11, %s3218_s22, %s4438_s26, %s4438_s26, %s4439_s9  }
 0x534 PF: > { %s3246_s10 = sand.u32 1, %s4409_s18   ;;  %p6385_p12 = scmp.ne.s32.totalorder %s6113_s25, 0 }
 0x535   : > { %p6386_p6 = scmp.ge.s32.totalorder %s4421_s21, 2  ;;  %s3247_s29 = scalar_lea.sflag [#allocation4], %s3246_s10 }
 0x537   : > { %p3884_p3 = pnand %p6386_p6, %p6385_p12 }
 0x539   : > { %p3885_p9 = pneg %p3884_p3 }
 0x53b   : > { %4404 = dma.done.wait (%p3885_p9), %s3247_s29, 4096  }
 0x53c   : > { %4406 = vsyncadd (%p3885_p9), %s3247_s29, 4294963200  ;;  %p20_p13 = scmp.ge.s32.totalorder %s4558_s14, 4   ;;  %s6387_s18 = smov %s4413_s19 }
 0x53d   : > { %s6388_s19 = smov %s4417_s20  ;;  %s6389_s20 = smov %s4567_s17 }
 0x53e   : > { %s6390_s21 = smov %s4558_s14  ;;  %22 = sbr.rel (!%p20_p13) target bundleno = 7 (0x7), region = 101 }
 0x543   :  { %3252 = vsyncpa [#allocation3], 1 }
 0x544   :  { %3254 = vsyncpa [#allocation3 + $0x1], 1 }
 0x545   :  { %3255 = vsyncpa [#allocation6], 1 }
 0x546   :  { %3256 = vsyncpa [#allocation9], 1 }
 0x547   :  { %3257 = vsyncpa [#allocation4], 1 }
 0x548   :  { %3259 = vsyncpa [#allocation4 + $0x1], 1 }

</bundles_post_ra>
